<compile_context>
chip_gen: v6e
topology: v6e:2x2x1
jax: 0.10.0
libtpu: 0.0.40
codegen_flags: <defaults>
</compile_context>

<pallas_src>
import functools

import jax
import jax.numpy as jnp
from jax.experimental import pallas as pl
from jax.experimental.pallas import tpu as pltpu

LANE = 128  # final logits padded to the 128-lane width (lane-dense store)


# ----------------------------- Pallas kernel -----------------------------

def _fused_forward_kernel(x_ref, xmask_ref, w0_ref, b0_ref, w1_ref, b1_ref,
                          w2_ref, b2_ref, fcw_ref, fcb_ref, out_ref, *, h, w):
    """b_tile images per grid step: stem conv -> basic block -> pool -> fc.

    x_ref    : (bt, h*w, c_in)   f32   flat NHWC input, compact channels
    xmask_ref: ((h+2)*w, 2)      f32   [:,0]: x-1 in-bounds, [:,1]: x+1 in-bounds
    w*_ref   : (9*c, c_mid)      bf16  tap-stacked conv weights, rows (kx,ky,ci)
    b*_ref   : (1, c_mid)        f32
    fcw_ref  : (c_mid, LANE)     bf16  fc weight, classes zero-padded to 128
    fcb_ref  : (1, LANE)         f32
    out_ref  : (bt, 1, LANE)     f32   logits (lane-dense store)
    """
    hw = h * w
    rows = (h + 2) * w
    bt = x_ref.shape[0]

    xm = xmask_ref[...]
    mask_l = xm[:, 0:1]   # reading x-1 is in-bounds
    mask_r = xm[:, 1:2]   # reading x+1 is in-bounds

    def conv3x3(a, w_stack_ref, b_ref):
        # a: (hw, c) f32 -> (hw, c_out) f32.  One tap-stacked MXU dot:
        # patch (hw, 9c) bf16 @ (9c, c_out) bf16, f32 accumulation.
        c = a.shape[-1]
        zero = jnp.zeros((w, c), a.dtype)
        hal = jnp.concatenate([zero, a, zero], axis=0)        # ((h+2)*w, c)
        taps = []
        for dx, msk in ((-1, mask_l), (0, None), (1, mask_r)):
            if dx == 0:
                s = hal
            else:
                # s[r] = hal[r + dx]: XLU sublane rotate + x-boundary mask.
                s = pltpu.roll(hal, shift=(-dx) % rows, axis=0)
                s = s * msk
            for ky in range(3):                               # 8-aligned slices
                taps.append(s[ky * w: ky * w + hw, :])
        patch = jnp.concatenate(taps, axis=-1).astype(jnp.bfloat16)
        return jnp.dot(patch, w_stack_ref[...],
                       preferred_element_type=jnp.float32) + b_ref[...]

    pooled = []
    for i in range(bt):                                       # bt small & static
        x = x_ref[i]                                          # (hw, c_in) f32
        a0 = jnp.maximum(conv3x3(x, w0_ref, b0_ref), 0.0)        # stem
        a1 = jnp.maximum(conv3x3(a0, w1_ref, b1_ref), 0.0)       # block conv1
        a2 = jnp.maximum(conv3x3(a1, w2_ref, b2_ref) + a0, 0.0)  # conv2 + skip
        pooled.append(jnp.mean(a2, axis=0, keepdims=True))       # (1, c_mid)
    pooled = pooled[0] if bt == 1 else jnp.concatenate(pooled, axis=0)

    logits = jnp.dot(pooled.astype(fcw_ref.dtype), fcw_ref[...],
                     preferred_element_type=jnp.float32) + fcb_ref[...]
    out_ref[...] = logits.reshape(out_ref.shape)


# ----------------------------- Pallas wrapper -----------------------------

def fused_forward(x_flat, xmask, params, *, h, w, b_tile=1):
    """x_flat: (N, h*w, c_in) f32 -> (N, 1, LANE) f32 padded logits."""
    n, hw, c_in = x_flat.shape
    assert n % b_tile == 0, "batch must be divisible by b_tile"
    cp = params["fc_w"].shape[1]

    def full(a):  # whole-array block (weights stay resident across the grid)
        return pl.BlockSpec(a.shape, lambda i, nd=a.ndim: (0,) * nd)

    kernel = functools.partial(_fused_forward_kernel, h=h, w=w)
    return pl.pallas_call(
        kernel,
        out_shape=jax.ShapeDtypeStruct((n, 1, cp), jnp.float32),
        grid=(n // b_tile,),
        in_specs=[
            pl.BlockSpec((b_tile, hw, c_in), lambda i: (i, 0, 0)),  # x
            full(xmask),
            full(params["stem_w"]), full(params["stem_b"]),
            full(params["b1_w"]), full(params["b1_b"]),
            full(params["b2_w"]), full(params["b2_b"]),
            full(params["fc_w"]), full(params["fc_b"]),
        ],
        out_specs=pl.BlockSpec((b_tile, 1, cp), lambda i: (i, 0, 0)),
        compiler_params=pltpu.CompilerParams(
            dimension_semantics=("parallel",)),
    )(x_flat, xmask,
      params["stem_w"], params["stem_b"],
      params["b1_w"], params["b1_b"],
      params["b2_w"], params["b2_b"],
      params["fc_w"], params["fc_b"])


# ------------------------------ JAX glue ------------------------------

def init_params(key, c_in=4, c_mid=32, num_classes=10):
    """Kernel-ready params.  Conv weights are tap-stacked along K with rows
    ordered (kx, ky, c_in) to match the in-kernel im2col patch layout; only
    the fc output is padded to the 128-lane width."""
    ks = jax.random.split(key, 4)

    def conv_w(k, cin, cout):
        wt = jax.random.normal(k, (3, 3, cin, cout), jnp.float32)
        wt = wt / jnp.sqrt(9.0 * cin)
        wt = jnp.transpose(wt, (1, 0, 2, 3)).reshape(9 * cin, cout)
        return wt.astype(jnp.bfloat16)

    fc = jax.random.normal(ks[3], (c_mid, num_classes), jnp.float32)
    fc = fc / jnp.sqrt(float(c_mid))
    fc = jnp.pad(fc, ((0, 0), (0, LANE - num_classes)))
    return {
        "stem_w": conv_w(ks[0], c_in, c_mid),
        "stem_b": jnp.zeros((1, c_mid), jnp.float32),
        "b1_w": conv_w(ks[1], c_mid, c_mid),
        "b1_b": jnp.zeros((1, c_mid), jnp.float32),
        "b2_w": conv_w(ks[2], c_mid, c_mid),
        "b2_b": jnp.zeros((1, c_mid), jnp.float32),
        "fc_w": fc.astype(jnp.bfloat16),
        "fc_b": jnp.zeros((1, LANE), jnp.float32),
    }


@functools.partial(jax.jit, static_argnames=("num_classes", "b_tile"))
def torchvision_forward(x_nchw, params, num_classes=10, b_tile=1):
    # NCHW (PyTorch) -> row-flattened NHWC with compact (un-padded) channels.
    n, c, h, w = x_nchw.shape
    x = jnp.transpose(x_nchw, (0, 2, 3, 1)).reshape(n, h * w, c)
    x = x.astype(jnp.float32)
    # Horizontal-boundary validity multipliers for the +/-1 x-shifts, indexed
    # by flat row of the vertically haloed ((h+2)*w, C) activation buffer.
    col = jnp.arange((h + 2) * w, dtype=jnp.int32) % w
    xmask = jnp.stack([col > 0, col < w - 1], axis=-1).astype(jnp.float32)
    logits = fused_forward(x, xmask, params, h=h, w=w, b_tile=b_tile)
    return logits.reshape(n, -1)[:, :num_classes]


if __name__ == "__main__":
    key = jax.random.PRNGKey(0)
    k_param, k_x = jax.random.split(key)
    params = init_params(k_param, c_in=4, c_mid=32, num_classes=10)
    x = jax.random.normal(k_x, (2, 4, 16, 16), jnp.float32)  # NCHW input
    # b_tile=1 keeps grid=(2,) so both v7x TensorCores get a program; raise
    # b_tile for larger batches to amortize per-grid-step overhead.
    out = torchvision_forward(x, params, num_classes=10, b_tile=1)
    jax.block_until_ready(out)
    assert out.shape == (2, 10)
    print("KERNEL_OK")
</pallas_src>

<mosaic_0001>
module attributes {stable_mosaic.version = 11 : i64} {
  func.func @_fused_forward_kernel(%arg0: i32, %arg1: memref<1x256x4xf32, #tpu.memory_space<vmem>>, %arg2: memref<288x2xf32, #tpu.memory_space<vmem>>, %arg3: memref<36x32xbf16, #tpu.memory_space<vmem>>, %arg4: memref<1x32xf32, #tpu.memory_space<vmem>>, %arg5: memref<288x32xbf16, #tpu.memory_space<vmem>>, %arg6: memref<1x32xf32, #tpu.memory_space<vmem>>, %arg7: memref<288x32xbf16, #tpu.memory_space<vmem>>, %arg8: memref<1x32xf32, #tpu.memory_space<vmem>>, %arg9: memref<32x128xbf16, #tpu.memory_space<vmem>>, %arg10: memref<1x128xf32, #tpu.memory_space<vmem>>, %arg11: memref<1x1x128xf32, #tpu.memory_space<vmem>>) attributes {dimension_semantics = [#tpu.dimension_semantics<parallel>], iteration_bounds = array<i64: 2>, scalar_prefetch = 0 : i64, scratch_operands = 0 : i64, tpu.core_type = #tpu.core_type<tc>, window_params = [{transform_indices = @transform_0, window_bounds = array<i64: 1, 256, 4>}, {pipeline_mode = #tpu.pipeline_mode<synchronous>, transform_indices = @transform_1, window_bounds = array<i64: 288, 2>}, {pipeline_mode = #tpu.pipeline_mode<synchronous>, transform_indices = @transform_2, window_bounds = array<i64: 36, 32>}, {pipeline_mode = #tpu.pipeline_mode<synchronous>, transform_indices = @transform_3, window_bounds = array<i64: 1, 32>}, {pipeline_mode = #tpu.pipeline_mode<synchronous>, transform_indices = @transform_4, window_bounds = array<i64: 288, 32>}, {pipeline_mode = #tpu.pipeline_mode<synchronous>, transform_indices = @transform_5, window_bounds = array<i64: 1, 32>}, {pipeline_mode = #tpu.pipeline_mode<synchronous>, transform_indices = @transform_6, window_bounds = array<i64: 288, 32>}, {pipeline_mode = #tpu.pipeline_mode<synchronous>, transform_indices = @transform_7, window_bounds = array<i64: 1, 32>}, {pipeline_mode = #tpu.pipeline_mode<synchronous>, transform_indices = @transform_8, window_bounds = array<i64: 32, 128>}, {pipeline_mode = #tpu.pipeline_mode<synchronous>, transform_indices = @transform_9, window_bounds = array<i64: 1, 128>}, {transform_indices = @transform_10, window_bounds = array<i64: 1, 1, 128>}]} {
    %c0 = arith.constant 0 : index
    %c0_0 = arith.constant 0 : index
    %0 = vector.load %arg2[%c0, %c0_0] : memref<288x2xf32, #tpu.memory_space<vmem>>, vector<288x2xf32>
    %1 = vector.extract_strided_slice %0 {offsets = [0, 0], sizes = [288, 1], strides = [1, 1]} : vector<288x2xf32> to vector<288x1xf32>
    %2 = vector.extract_strided_slice %0 {offsets = [0, 1], sizes = [288, 1], strides = [1, 1]} : vector<288x2xf32> to vector<288x1xf32>
    %c0_1 = arith.constant 0 : index
    %c0_2 = arith.constant 0 : index
    %c0_3 = arith.constant 0 : index
    %3 = vector.load %arg1[%c0_1, %c0_2, %c0_3] : memref<1x256x4xf32, #tpu.memory_space<vmem>>, vector<1x256x4xf32>
    %4 = vector.shape_cast %3 : vector<1x256x4xf32> to vector<256x4xf32>
    %cst = arith.constant 0.000000e+00 : f32
    %5 = vector.broadcast %cst : f32 to vector<16x4xf32>
    %6 = tpu.concatenate %5, %4, %5 in 0 : vector<16x4xf32>, vector<256x4xf32>, vector<16x4xf32> -> vector<288x4xf32>
    %c1_i32 = arith.constant 1 : i32
    %7 = tpu.dynamic_rotate %6 by %c1_i32 dim 0 : vector<288x4xf32>, i32 -> vector<288x4xf32>
    %8 = vector.broadcast %1 : vector<288x1xf32> to vector<288x4xf32>
    %9 = arith.mulf %7, %8 : vector<288x4xf32>
    %10 = vector.extract_strided_slice %9 {offsets = [0, 0], sizes = [256, 4], strides = [1, 1]} : vector<288x4xf32> to vector<256x4xf32>
    %11 = vector.extract_strided_slice %9 {offsets = [16, 0], sizes = [256, 4], strides = [1, 1]} : vector<288x4xf32> to vector<256x4xf32>
    %12 = vector.extract_strided_slice %9 {offsets = [32, 0], sizes = [256, 4], strides = [1, 1]} : vector<288x4xf32> to vector<256x4xf32>
    %13 = vector.extract_strided_slice %6 {offsets = [0, 0], sizes = [256, 4], strides = [1, 1]} : vector<288x4xf32> to vector<256x4xf32>
    %14 = vector.extract_strided_slice %6 {offsets = [16, 0], sizes = [256, 4], strides = [1, 1]} : vector<288x4xf32> to vector<256x4xf32>
    %15 = vector.extract_strided_slice %6 {offsets = [32, 0], sizes = [256, 4], strides = [1, 1]} : vector<288x4xf32> to vector<256x4xf32>
    %c287_i32 = arith.constant 287 : i32
    %16 = tpu.dynamic_rotate %6 by %c287_i32 dim 0 : vector<288x4xf32>, i32 -> vector<288x4xf32>
    %17 = vector.broadcast %2 : vector<288x1xf32> to vector<288x4xf32>
    %18 = arith.mulf %16, %17 : vector<288x4xf32>
    %19 = vector.extract_strided_slice %18 {offsets = [0, 0], sizes = [256, 4], strides = [1, 1]} : vector<288x4xf32> to vector<256x4xf32>
    %20 = vector.extract_strided_slice %18 {offsets = [16, 0], sizes = [256, 4], strides = [1, 1]} : vector<288x4xf32> to vector<256x4xf32>
    %21 = vector.extract_strided_slice %18 {offsets = [32, 0], sizes = [256, 4], strides = [1, 1]} : vector<288x4xf32> to vector<256x4xf32>
    %22 = tpu.concatenate %10, %11, %12, %13, %14, %15, %19, %20, %21 in 1 : vector<256x4xf32>, vector<256x4xf32>, vector<256x4xf32>, vector<256x4xf32>, vector<256x4xf32>, vector<256x4xf32>, vector<256x4xf32>, vector<256x4xf32>, vector<256x4xf32> -> vector<256x36xf32>
    %23 = arith.truncf %22 : vector<256x36xf32> to vector<256x36xbf16>
    %c0_4 = arith.constant 0 : index
    %c0_5 = arith.constant 0 : index
    %24 = vector.load %arg3[%c0_4, %c0_5] : memref<36x32xbf16, #tpu.memory_space<vmem>>, vector<36x32xbf16>
    %cst_6 = arith.constant dense<0.000000e+00> : vector<256x32xf32>
    %25 = tpu.matmul %23, %24, %cst_6 {dimension_numbers = #tpu.dot_dimension_numbers<[1], [0], [0], [1], [0, 0, 1, 1], [], []>} : vector<256x36xbf16>, vector<36x32xbf16>, vector<256x32xf32> -> vector<256x32xf32>
    %c0_7 = arith.constant 0 : index
    %c0_8 = arith.constant 0 : index
    %26 = vector.load %arg4[%c0_7, %c0_8] : memref<1x32xf32, #tpu.memory_space<vmem>>, vector<1x32xf32>
    %27 = vector.broadcast %26 : vector<1x32xf32> to vector<256x32xf32>
    %28 = arith.addf %25, %27 : vector<256x32xf32>
    %cst_9 = arith.constant 0.000000e+00 : f32
    %29 = vector.broadcast %cst_9 : f32 to vector<256x32xf32>
    %30 = arith.maximumf %28, %29 : vector<256x32xf32>
    %cst_10 = arith.constant 0.000000e+00 : f32
    %31 = vector.broadcast %cst_10 : f32 to vector<16x32xf32>
    %32 = tpu.concatenate %31, %30, %31 in 0 : vector<16x32xf32>, vector<256x32xf32>, vector<16x32xf32> -> vector<288x32xf32>
    %c1_i32_11 = arith.constant 1 : i32
    %33 = tpu.dynamic_rotate %32 by %c1_i32_11 dim 0 : vector<288x32xf32>, i32 -> vector<288x32xf32>
    %34 = vector.broadcast %1 : vector<288x1xf32> to vector<288x32xf32>
    %35 = arith.mulf %33, %34 : vector<288x32xf32>
    %36 = vector.extract_strided_slice %35 {offsets = [0, 0], sizes = [256, 32], strides = [1, 1]} : vector<288x32xf32> to vector<256x32xf32>
    %37 = vector.extract_strided_slice %35 {offsets = [16, 0], sizes = [256, 32], strides = [1, 1]} : vector<288x32xf32> to vector<256x32xf32>
    %38 = vector.extract_strided_slice %35 {offsets = [32, 0], sizes = [256, 32], strides = [1, 1]} : vector<288x32xf32> to vector<256x32xf32>
    %39 = vector.extract_strided_slice %32 {offsets = [0, 0], sizes = [256, 32], strides = [1, 1]} : vector<288x32xf32> to vector<256x32xf32>
    %40 = vector.extract_strided_slice %32 {offsets = [16, 0], sizes = [256, 32], strides = [1, 1]} : vector<288x32xf32> to vector<256x32xf32>
    %41 = vector.extract_strided_slice %32 {offsets = [32, 0], sizes = [256, 32], strides = [1, 1]} : vector<288x32xf32> to vector<256x32xf32>
    %c287_i32_12 = arith.constant 287 : i32
    %42 = tpu.dynamic_rotate %32 by %c287_i32_12 dim 0 : vector<288x32xf32>, i32 -> vector<288x32xf32>
    %43 = vector.broadcast %2 : vector<288x1xf32> to vector<288x32xf32>
    %44 = arith.mulf %42, %43 : vector<288x32xf32>
    %45 = vector.extract_strided_slice %44 {offsets = [0, 0], sizes = [256, 32], strides = [1, 1]} : vector<288x32xf32> to vector<256x32xf32>
    %46 = vector.extract_strided_slice %44 {offsets = [16, 0], sizes = [256, 32], strides = [1, 1]} : vector<288x32xf32> to vector<256x32xf32>
    %47 = vector.extract_strided_slice %44 {offsets = [32, 0], sizes = [256, 32], strides = [1, 1]} : vector<288x32xf32> to vector<256x32xf32>
    %48 = tpu.concatenate %36, %37, %38, %39, %40, %41, %45, %46, %47 in 1 : vector<256x32xf32>, vector<256x32xf32>, vector<256x32xf32>, vector<256x32xf32>, vector<256x32xf32>, vector<256x32xf32>, vector<256x32xf32>, vector<256x32xf32>, vector<256x32xf32> -> vector<256x288xf32>
    %49 = arith.truncf %48 : vector<256x288xf32> to vector<256x288xbf16>
    %c0_13 = arith.constant 0 : index
    %c0_14 = arith.constant 0 : index
    %50 = vector.load %arg5[%c0_13, %c0_14] : memref<288x32xbf16, #tpu.memory_space<vmem>>, vector<288x32xbf16>
    %cst_15 = arith.constant dense<0.000000e+00> : vector<256x32xf32>
    %51 = tpu.matmul %49, %50, %cst_15 {dimension_numbers = #tpu.dot_dimension_numbers<[1], [0], [0], [1], [0, 0, 1, 1], [], []>} : vector<256x288xbf16>, vector<288x32xbf16>, vector<256x32xf32> -> vector<256x32xf32>
    %c0_16 = arith.constant 0 : index
    %c0_17 = arith.constant 0 : index
    %52 = vector.load %arg6[%c0_16, %c0_17] : memref<1x32xf32, #tpu.memory_space<vmem>>, vector<1x32xf32>
    %53 = vector.broadcast %52 : vector<1x32xf32> to vector<256x32xf32>
    %54 = arith.addf %51, %53 : vector<256x32xf32>
    %cst_18 = arith.constant 0.000000e+00 : f32
    %55 = vector.broadcast %cst_18 : f32 to vector<256x32xf32>
    %56 = arith.maximumf %54, %55 : vector<256x32xf32>
    %cst_19 = arith.constant 0.000000e+00 : f32
    %57 = vector.broadcast %cst_19 : f32 to vector<16x32xf32>
    %58 = tpu.concatenate %57, %56, %57 in 0 : vector<16x32xf32>, vector<256x32xf32>, vector<16x32xf32> -> vector<288x32xf32>
    %c1_i32_20 = arith.constant 1 : i32
    %59 = tpu.dynamic_rotate %58 by %c1_i32_20 dim 0 : vector<288x32xf32>, i32 -> vector<288x32xf32>
    %60 = vector.broadcast %1 : vector<288x1xf32> to vector<288x32xf32>
    %61 = arith.mulf %59, %60 : vector<288x32xf32>
    %62 = vector.extract_strided_slice %61 {offsets = [0, 0], sizes = [256, 32], strides = [1, 1]} : vector<288x32xf32> to vector<256x32xf32>
    %63 = vector.extract_strided_slice %61 {offsets = [16, 0], sizes = [256, 32], strides = [1, 1]} : vector<288x32xf32> to vector<256x32xf32>
    %64 = vector.extract_strided_slice %61 {offsets = [32, 0], sizes = [256, 32], strides = [1, 1]} : vector<288x32xf32> to vector<256x32xf32>
    %65 = vector.extract_strided_slice %58 {offsets = [0, 0], sizes = [256, 32], strides = [1, 1]} : vector<288x32xf32> to vector<256x32xf32>
    %66 = vector.extract_strided_slice %58 {offsets = [16, 0], sizes = [256, 32], strides = [1, 1]} : vector<288x32xf32> to vector<256x32xf32>
    %67 = vector.extract_strided_slice %58 {offsets = [32, 0], sizes = [256, 32], strides = [1, 1]} : vector<288x32xf32> to vector<256x32xf32>
    %c287_i32_21 = arith.constant 287 : i32
    %68 = tpu.dynamic_rotate %58 by %c287_i32_21 dim 0 : vector<288x32xf32>, i32 -> vector<288x32xf32>
    %69 = vector.broadcast %2 : vector<288x1xf32> to vector<288x32xf32>
    %70 = arith.mulf %68, %69 : vector<288x32xf32>
    %71 = vector.extract_strided_slice %70 {offsets = [0, 0], sizes = [256, 32], strides = [1, 1]} : vector<288x32xf32> to vector<256x32xf32>
    %72 = vector.extract_strided_slice %70 {offsets = [16, 0], sizes = [256, 32], strides = [1, 1]} : vector<288x32xf32> to vector<256x32xf32>
    %73 = vector.extract_strided_slice %70 {offsets = [32, 0], sizes = [256, 32], strides = [1, 1]} : vector<288x32xf32> to vector<256x32xf32>
    %74 = tpu.concatenate %62, %63, %64, %65, %66, %67, %71, %72, %73 in 1 : vector<256x32xf32>, vector<256x32xf32>, vector<256x32xf32>, vector<256x32xf32>, vector<256x32xf32>, vector<256x32xf32>, vector<256x32xf32>, vector<256x32xf32>, vector<256x32xf32> -> vector<256x288xf32>
    %75 = arith.truncf %74 : vector<256x288xf32> to vector<256x288xbf16>
    %c0_22 = arith.constant 0 : index
    %c0_23 = arith.constant 0 : index
    %76 = vector.load %arg7[%c0_22, %c0_23] : memref<288x32xbf16, #tpu.memory_space<vmem>>, vector<288x32xbf16>
    %cst_24 = arith.constant dense<0.000000e+00> : vector<256x32xf32>
    %77 = tpu.matmul %75, %76, %cst_24 {dimension_numbers = #tpu.dot_dimension_numbers<[1], [0], [0], [1], [0, 0, 1, 1], [], []>} : vector<256x288xbf16>, vector<288x32xbf16>, vector<256x32xf32> -> vector<256x32xf32>
    %c0_25 = arith.constant 0 : index
    %c0_26 = arith.constant 0 : index
    %78 = vector.load %arg8[%c0_25, %c0_26] : memref<1x32xf32, #tpu.memory_space<vmem>>, vector<1x32xf32>
    %79 = vector.broadcast %78 : vector<1x32xf32> to vector<256x32xf32>
    %80 = arith.addf %77, %79 : vector<256x32xf32>
    %81 = arith.addf %80, %30 : vector<256x32xf32>
    %cst_27 = arith.constant 0.000000e+00 : f32
    %82 = vector.broadcast %cst_27 : f32 to vector<256x32xf32>
    %83 = arith.maximumf %81, %82 : vector<256x32xf32>
    %cst_28 = arith.constant dense<0.000000e+00> : vector<32xf32>
    %84 = vector.multi_reduction <add>, %83, %cst_28 [0] : vector<256x32xf32> to vector<32xf32>
    %85 = vector.shape_cast %84 : vector<32xf32> to vector<1x32xf32>
    %cst_29 = arith.constant 2.560000e+02 : f32
    %86 = vector.broadcast %cst_29 : f32 to vector<1x32xf32>
    %87 = arith.divf %85, %86 : vector<1x32xf32>
    %88 = arith.truncf %87 : vector<1x32xf32> to vector<1x32xbf16>
    %c0_30 = arith.constant 0 : index
    %c0_31 = arith.constant 0 : index
    %89 = vector.load %arg9[%c0_30, %c0_31] : memref<32x128xbf16, #tpu.memory_space<vmem>>, vector<32x128xbf16>
    %cst_32 = arith.constant dense<0.000000e+00> : vector<1x128xf32>
    %90 = tpu.matmul %88, %89, %cst_32 {dimension_numbers = #tpu.dot_dimension_numbers<[1], [0], [0], [1], [0, 0, 1, 1], [], []>} : vector<1x32xbf16>, vector<32x128xbf16>, vector<1x128xf32> -> vector<1x128xf32>
    %c0_33 = arith.constant 0 : index
    %c0_34 = arith.constant 0 : index
    %91 = vector.load %arg10[%c0_33, %c0_34] : memref<1x128xf32, #tpu.memory_space<vmem>>, vector<1x128xf32>
    %92 = arith.addf %90, %91 : vector<1x128xf32>
    %93 = vector.shape_cast %92 : vector<1x128xf32> to vector<1x1x128xf32>
    %c0_35 = arith.constant 0 : index
    %c0_36 = arith.constant 0 : index
    %c0_37 = arith.constant 0 : index
    %94 = vector.load %arg11[%c0_35, %c0_36, %c0_37] : memref<1x1x128xf32, #tpu.memory_space<vmem>>, vector<1x1x128xf32>
    tpu.vector_store %arg11[%c0_35, %c0_36, %c0_37], %93 {strides = array<i32>} : memref<1x1x128xf32, #tpu.memory_space<vmem>>, vector<1x1x128xf32>,
    return
  }
  func.func @transform_0(%arg0: i32) -> (i32, i32, i32) {
    %c0_i32 = arith.constant 0 : i32
    %c0_i32_0 = arith.constant 0 : i32
    %c0_i32_1 = arith.constant 0 : i32
    return %arg0, %c0_i32, %c0_i32_0 : i32, i32, i32
  }
  func.func @transform_1(%arg0: i32) -> (i32, i32) {
    %c0_i32 = arith.constant 0 : i32
    %c0_i32_0 = arith.constant 0 : i32
    %c0_i32_1 = arith.constant 0 : i32
    return %c0_i32, %c0_i32_0 : i32, i32
  }
  func.func @transform_2(%arg0: i32) -> (i32, i32) {
    %c0_i32 = arith.constant 0 : i32
    %c0_i32_0 = arith.constant 0 : i32
    %c0_i32_1 = arith.constant 0 : i32
    return %c0_i32, %c0_i32_0 : i32, i32
  }
  func.func @transform_3(%arg0: i32) -> (i32, i32) {
    %c0_i32 = arith.constant 0 : i32
    %c0_i32_0 = arith.constant 0 : i32
    %c0_i32_1 = arith.constant 0 : i32
    return %c0_i32, %c0_i32_0 : i32, i32
  }
  func.func @transform_4(%arg0: i32) -> (i32, i32) {
    %c0_i32 = arith.constant 0 : i32
    %c0_i32_0 = arith.constant 0 : i32
    %c0_i32_1 = arith.constant 0 : i32
    return %c0_i32, %c0_i32_0 : i32, i32
  }
  func.func @transform_5(%arg0: i32) -> (i32, i32) {
    %c0_i32 = arith.constant 0 : i32
    %c0_i32_0 = arith.constant 0 : i32
    %c0_i32_1 = arith.constant 0 : i32
    return %c0_i32, %c0_i32_0 : i32, i32
  }
  func.func @transform_6(%arg0: i32) -> (i32, i32) {
    %c0_i32 = arith.constant 0 : i32
    %c0_i32_0 = arith.constant 0 : i32
    %c0_i32_1 = arith.constant 0 : i32
    return %c0_i32, %c0_i32_0 : i32, i32
  }
  func.func @transform_7(%arg0: i32) -> (i32, i32) {
    %c0_i32 = arith.constant 0 : i32
    %c0_i32_0 = arith.constant 0 : i32
    %c0_i32_1 = arith.constant 0 : i32
    return %c0_i32, %c0_i32_0 : i32, i32
  }
  func.func @transform_8(%arg0: i32) -> (i32, i32) {
    %c0_i32 = arith.constant 0 : i32
    %c0_i32_0 = arith.constant 0 : i32
    %c0_i32_1 = arith.constant 0 : i32
    return %c0_i32, %c0_i32_0 : i32, i32
  }
  func.func @transform_9(%arg0: i32) -> (i32, i32) {
    %c0_i32 = arith.constant 0 : i32
    %c0_i32_0 = arith.constant 0 : i32
    %c0_i32_1 = arith.constant 0 : i32
    return %c0_i32, %c0_i32_0 : i32, i32
  }
  func.func @transform_10(%arg0: i32) -> (i32, i32, i32) {
    %c0_i32 = arith.constant 0 : i32
    %c0_i32_0 = arith.constant 0 : i32
    %c0_i32_1 = arith.constant 0 : i32
    return %arg0, %c0_i32, %c0_i32_0 : i32, i32, i32
  }
}

</mosaic_0001>

<bundles_post_ra>
// kernel: torchvision_forward.1
= control target key start
LH: loop header
LB: loop body
LE: loop exit
PB: predicated region body
PF: predicated region fallthrough
CT: control target
= control target key end

     0   :  { %15 = vsyncpa [#allocation3], 0  ;;  %s12588_s0 = inlined_call_operand.vmem [shape: f32[2,256,4], index: 0, kind: input, shape index: {}]   ;;  %s12589_s1 = inlined_call_operand.vmem [shape: f32[288,2], index: 1, kind: input, shape index: {}]   ;;  %s12590_s2 = inlined_call_operand.vmem [shape: bf16[36,32], index: 2, kind: input, shape index: {}]   ;;  %s12591_s3 = inlined_call_operand.vmem [shape: f32[1,32], index: 3, kind: input, shape index: {}]   ;;  %s12592_s4 = inlined_call_operand.vmem [shape: bf16[288,32], index: 4, kind: input, shape index: {}]   ;;  %s12593_s5 = inlined_call_operand.vmem [shape: f32[1,32], index: 5, kind: input, shape index: {}]   ;;  %s12594_s6 = inlined_call_operand.vmem [shape: bf16[288,32], index: 6, kind: input, shape index: {}]   ;;  %s12595_s7 = inlined_call_operand.vmem [shape: f32[1,32], index: 7, kind: input, shape index: {}]   ;;  %s12596_s8 = inlined_call_operand.vmem [shape: bf16[32,128], index: 8, kind: input, shape index: {}]   ;;  %s12597_s9 = inlined_call_operand.vmem [shape: f32[1,128], index: 9, kind: input, shape index: {}]   ;;  %s12598_s10 = inlined_call_operand.hbm [shape: f32[2,1,128], index: 10, kind: output, shape index: {}]  }
   0x1   :  { %17 = vsyncpa [#allocation3 + $0x1], 0  ;;  %s8222_s13 = smov 0   ;;  %s8224_s14 = smov 0  }
   0x2   :  { %s8226_s15 = smov 0   ;;  %s8228_s16 = smov 0  }
   0x3 LB: > { %s8243_s17 = sadd.s32 4294967295, %s8150_s16   ;;  %s5907_s18 = sadd.s32 4294967294, %s8150_s16   ;;  %s8150_s16 = sphi %s8228_s16, %s13351_s16   ;;  %s8146_s15 = sphi %s8226_s15, %s13350_s15   ;;  %s8142_s14 = sphi %s8224_s14, %s13349_s14   ;;  %s8138_s13 = sphi %s8222_s13, %s13348_s13  }
   0x4   : > { %s8247_s19 = sadd.s32 1, %s8150_s16   ;;  %s245_s20 = sadd.s32 1, %s8146_s15 }
   0x5   : > { %s242_s21 = ssub.s32 %s8150_s16, %s8247_s19  ;;  %p255_p0 = scmp.ne.s32.totalorder %s8146_s15, %s8142_s14 }
   0x6   : > { %p243_p1 = scmp.eq.s32.totalorder %s242_s21, 0  ;;  %p256_p2 = scmp.eq.s32.totalorder %s8243_s17, 1 }
   0x7   : > { %p261_p3 = scmp.ne.s32.totalorder %s8142_s14, %s8138_s13  ;;  %p262_p4 = scmp.eq.s32.totalorder %s5907_s18, 1 }
   0x8   : > { %s8258_s22 = scalar_select %p243_p1, %s8146_s15, %s245_s20  }
   0x9   : > { %p8260_p5 = por %p256_p2, %p255_p0  ;;  %p8264_p6 = por %p262_p4, %p261_p3 }
   0xa   : > { %p5910_p7 = scmp.ge.s32.totalorder %s8150_s16, 1  ;;  %p315_p8 = scmp.lt.s32.totalorder %s8150_s16, 3 }
   0xc   : > { %p316_p9 = pnand %p5910_p7, %p315_p8 }
   0xe   : > { %319 = sbr.rel (%p316_p9) target bundleno = 1879 (0x757), region = 60 }
  0x13   : > { %v8273_v0 = vld [vmem:[%s12589_s1 + $0x10] sm:$0xff]  ;;  %v8278_v1 = vld [vmem:[%s12589_s1] sm:$0xff]  ;;  %v8152_v2 = vmov 0   ;;  %v8285_v3 = vld [vmem:[%s12589_s1 + $0x18] sm:$0xff]  ;;  %p352_p10 = scmp.lt.s32.totalorder %s8243_s17, 1  ;;  %v458_v37 = vlaneseq  ;;  %v8153_v40 = vmov 1  }
  0x14   : > { %6469 = vset.pattern.permute.xlu1 %v8152_v2  ;;  %6468 = vset.pattern.permute.xlu0 %v8152_v2  ;;  %v8290_v4 = vld [vmem:[%s12589_s1 + $0x8] sm:$0xff]  ;;  %v8302_v6 = vld [vmem:[%s12589_s1 + $0x20] sm:$0xff]  ;;  %v8309_v7 = vld [vmem:[%s12589_s1 + $0x38] sm:$0xff]  ;;  %s8154_s25 = smov 4   ;;  %s8155_s26 = smov 8   ;;  %vm2177_vm2 = vcmask 1041408  }
  0x15   : > { %506 = vperm.xlu1 %6469, %v8273_v0   ;;  %496 = vperm.xlu0 %6468, %v8278_v1   ;;  %v8297_v5 = vld [vmem:[%s12589_s1 + $0x28] sm:$0xff]  ;;  %v8314_v8 = vld [vmem:[%s12589_s1 + $0x30] sm:$0xff]  ;;  %v8326_v10 = vld [vmem:[%s12589_s1 + $0x40] sm:$0xff]  ;;  %s353_s27 = scalar_select %p352_p10, %s8243_s17, 1  ;;  %v8479_v38 = vshrl.u32 %v458_v37, 7  ;;  %vm1821_vm3 = vcmask 31744  }
  0x16   : > { %v8321_v9 = vld [vmem:[%s12589_s1 + $0x48] sm:$0xff]  ;;  %v8333_v11 = vld [vmem:[%s12589_s1 + $0x58] sm:$0xff]  ;;  %v8338_v12 = vld [vmem:[%s12589_s1 + $0x50] sm:$0xff]  ;;  %s8158_s30 = smov 16   ;;  %s8159_s18 = smov 20   ;;  %vm1854_vm4 = vcmask 64512  }
  0x17   : > { %v8345_v13 = vld [vmem:[%s12589_s1 + $0x68] sm:$0xff]  ;;  %v8350_v14 = vld [vmem:[%s12589_s1 + $0x60] sm:$0xff]  ;;  %v8357_v15 = vld [vmem:[%s12589_s1 + $0x78] sm:$0xff]  ;;  %s6009_s12 = sshll.u32 %s353_s27, 8  ;;  %vm742_vm0 = vcmp.lt.s32.totalorder %v8479_v38, 7  ;;  %vm460_vm1 = vcmp.lt.s32.totalorder %v8479_v38, 1 }
  0x18   : > { %v8362_v16 = vld [vmem:[%s12589_s1 + $0x70] sm:$0xff]  ;;  %v8369_v17 = vld [vmem:[%s12589_s1 + $0x88] sm:$0xff]  ;;  %v8374_v18 = vld [vmem:[%s12589_s1 + $0x80] sm:$0xff]  ;;  %s8484_s21 = scalar_lea.vmem %s12588_s0, %s6009_s12  ;;  %s8157_s27 = smov 12   ;;  %vm1887_vm5 = vcmask 97280   ;;  %vm1920_vm6 = vcmask 130048  }
  0x19   : > { %511 = vperm.xlu1 %6469, %v8285_v3   ;;  %501 = vperm.xlu0 %6468, %v8290_v4   ;;  %v8381_v19 = vld [vmem:[%s12589_s1 + $0x98] sm:$0xff]  ;;  %v8386_v20 = vld [vmem:[%s12589_s1 + $0x90] sm:$0xff]  ;;  %v8393_v21 = vld [vmem:[%s12589_s1 + $0xa8] sm:$0xff]  ;;  %s8160_s28 = smov 24   ;;  %s8161_s29 = smov 28   ;;  %vm1953_vm7 = vcmask 162816  }
  0x1a   : > { %v8398_v22 = vld [vmem:[%s12589_s1 + $0xa0] sm:$0xff]  ;;  %v8405_v23 = vld [vmem:[%s12589_s1 + $0xb8] sm:$0xff]  ;;  %v8410_v24 = vld [vmem:[%s12589_s1 + $0xb0] sm:$0xff]  ;;  %s8162_s11 = smov 32   ;;  %vm1986_vm8 = vcmask 195584   ;;  %vm2019_vm9 = vcmask 228352  }
  0x1b   : > { %v8417_v25 = vld [vmem:[%s12589_s1 + $0xc8] sm:$0xff]  ;;  %v382_v26 = vld [vmem:[%s12589_s1 + $0xc0] sm:$0xff]  ;;  %v8426_v27 = vld [vmem:[%s12589_s1 + $0xd8] sm:$0xff]  ;;  %vm2052_vm10 = vcmask 261120   ;;  %vm2128_vm11 = vcmask 293888   ;;  %s8163_s20 = smov 64  }
  0x1c   : > { %v384_v28 = vld [vmem:[%s12589_s1 + $0xd0] sm:$0xff]  ;;  %v8435_v29 = vld [vmem:[%s12589_s1 + $0xe8] sm:$0xff]  ;;  %v386_v30 = vld [vmem:[%s12589_s1 + $0xe0] sm:$0xff]  ;;  %vm3270_vm12 = vcmask 523264   ;;  %vm3303_vm13 = vcmask 785408   ;;  %vm8165_vm14 = vmmov 0  }
  0x1d   : > { %521 = vperm.xlu1 %6469, %v8297_v5   ;;  %516 = vperm.xlu0 %6468, %v8302_v6   ;;  %v8444_v31 = vld [vmem:[%s12589_s1 + $0xf8] sm:$0xff]  ;;  %v8449_v32 = vld [vmem:[%s12589_s1 + $0xf0] sm:$0xff]  ;;  %v8457_v33 = vld [vmem:[%s12589_s1 + $0x108] sm:$0xff]  ;;  %s6006_s12 = sshll.u32 %s8243_s17, 4  ;;  %s8166_s17 = smov [#allocation2]  }
  0x1e   : > { %v8462_v34 = vld [vmem:[%s12589_s1 + $0x100] sm:$0xff]  ;;  %v8470_v35 = vld [vmem:[%s12589_s1 + $0x118] sm:$0xff]  ;;  %v8475_v36 = vld [vmem:[%s12589_s1 + $0x110] sm:$0xff] }
  0x1f   : > { %v8487_v39 = vld [vmem:[%s8484_s21 + $0x8] sm:$0xff]  ;;  %v8490_v41 = vld [vmem:[%s8484_s21 + $0x10] sm:$0xff]  ;;  %v8538_v49 = vld [vmem:[%s8484_s21 + $0x18] sm:$0xff] }
  0x20   : > { %v12600_v42 = vrot.slane %v8487_v39, 1  ;;  %v12599_v43 = vrot.slane %v8490_v41, 1  ;;  %v8542_v50 = vld [vmem:[%s8484_s21] sm:$0xff]  ;;  %v427_v51 = vrot.slane %v8487_v39, 7  ;;  %v428_v53 = vrot.slane %v8490_v41, 7  ;;  %v8555_v57 = vld [vmem:[%s8484_s21 + $0x28] sm:$0xff] }
  0x21   : > { %531 = vperm.xlu1 %6469, %v8309_v7   ;;  %526 = vperm.xlu0 %6468, %v8314_v8   ;;  %v429_v54 = vrot.slane %v8538_v49, 7  ;;  %v8552_v56 = vld [vmem:[%s8484_s21 + $0x20] sm:$0xff]  ;;  %v8558_v58 = vld [vmem:[%s8484_s21 + $0x30] sm:$0xff]  ;;  %v426_v59 = vrot.slane %v8542_v50, 7  ;;  %v8564_v60 = vld [vmem:[%s8484_s21 + $0x38] sm:$0xff]  ;;  %v431_v62 = vrot.slane %v8555_v57, 7 }
  0x22   : > { %v8503_v44 = vsel %vm742_vm0, %v12600_v42, %v12599_v43  ;;  %v430_v61 = vrot.slane %v8552_v56, 7  ;;  %v8747_v42 = vld [vmem:[%s8484_s21 + $0x90] sm:$0xff] }
  0x23   : > { %v492_v63 = vsel %vm460_vm1, %v426_v59, %v427_v51 }
  0x25   : > { %541 = vperm.xlu1 %6469, %v8321_v9   ;;  %536 = vperm.xlu0 %6468, %v8326_v10  }
  0x29   : > { %551 = vperm.xlu1 %6469, %v8333_v11   ;;  %546 = vperm.xlu0 %6468, %v8338_v12  }
  0x2d   : > { %561 = vperm.xlu1 %6469, %v8345_v13   ;;  %556 = vperm.xlu0 %6468, %v8350_v14  }
  0x31   : > { %571 = vperm.xlu1 %6469, %v8357_v15   ;;  %566 = vperm.xlu0 %6468, %v8362_v16  }
  0x35   : > { %581 = vperm.xlu1 %6469, %v8369_v17   ;;  %576 = vperm.xlu0 %6468, %v8374_v18  }
  0x39   : > { %591 = vperm.xlu1 %6469, %v8381_v19   ;;  %586 = vperm.xlu0 %6468, %v8386_v20  }
  0x3d   : > { %601 = vperm.xlu1 %6469, %v8393_v21   ;;  %596 = vperm.xlu0 %6468, %v8398_v22  }
  0x41   : > { %611 = vperm.xlu1 %6469, %v8405_v23   ;;  %606 = vperm.xlu0 %6468, %v8410_v24  }
  0x45   : > { %621 = vperm.xlu1 %6469, %v8417_v25   ;;  %616 = vperm.xlu0 %6468, %v382_v26  }
  0x49   : > { %631 = vperm.xlu1 %6469, %v8426_v27   ;;  %626 = vperm.xlu0 %6468, %v384_v28  }
  0x4d   : > { %641 = vperm.xlu1 %6469, %v8435_v29   ;;  %636 = vperm.xlu0 %6468, %v386_v30  }
  0x51   : > { %651 = vperm.xlu1 %6469, %v8444_v31   ;;  %646 = vperm.xlu0 %6468, %v8449_v32  }
  0x55   : > { %661 = vperm.xlu1 %6469, %v8457_v33   ;;  %656 = vperm.xlu0 %6468, %v8462_v34  }
  0x59   : > { %671 = vperm.xlu1 %6469, %v8470_v35   ;;  %666 = vperm.xlu0 %6468, %v8475_v36  }
  0x5d   : > { %6471 = vset.pattern.permute.xlu1 %v8153_v40  ;;  %6470 = vset.pattern.permute.xlu0 %v8153_v40 }
  0x5e   : > { %781 = vperm.xlu1 %6471, %v8290_v4   ;;  %777 = vperm.xlu0 %6470, %v8278_v1   ;;  %v491_v1 = vsel %vm460_vm1, %v427_v51, %v428_v53  ;;  %v432_v4 = vrot.slane %v8558_v58, 7 }
  0x62   : > { %785 = vperm.xlu1 %6471, %v8273_v0   ;;  %789 = vperm.xlu0 %6470, %v8285_v3   ;;  %v490_v0 = vsel %vm460_vm1, %v428_v53, %v429_v54 }
  0x66   : > { %793 = vperm.xlu1 %6471, %v8302_v6   ;;  %797 = vperm.xlu0 %6470, %v8297_v5   ;;  %v433_v5 = vrot.slane %v8564_v60, 7  ;;  %v493_v6 = vsel %vm460_vm1, 0.0, %v426_v59  ;;  %v8672_v59 = vld [vmem:[%s8484_s21 + $0x78] sm:$0xff] }
  0x6a   : > { %801 = vperm.xlu1 %6471, %v8314_v8   ;;  %805 = vperm.xlu0 %6470, %v8309_v7   ;;  %v8586_v7 = vld [vmem:[%s8484_s21 + $0x40] sm:$0xff]  ;;  %v8589_v8 = vld [vmem:[%s8484_s21 + $0x48] sm:$0xff] }
  0x6e   : > { %809 = vperm.xlu1 %6471, %v8326_v10   ;;  %813 = vperm.xlu0 %6470, %v8321_v9  }
  0x72   : > { %817 = vperm.xlu1 %6471, %v8338_v12   ;;  %821 = vperm.xlu0 %6470, %v8333_v11   ;;  %v8601_v12 = vld [vmem:[%s8484_s21 + $0x50] sm:$0xff] }
  0x76   : > { %825 = vperm.xlu1 %6471, %v8350_v14   ;;  %829 = vperm.xlu0 %6470, %v8345_v13   ;;  %v8604_v13 = vld [vmem:[%s8484_s21 + $0x58] sm:$0xff]  ;;  %v488_v14 = vsel %vm460_vm1, %v430_v61, %v431_v62 }
  0x7a   : > { %833 = vperm.xlu1 %6471, %v8362_v16   ;;  %837 = vperm.xlu0 %6470, %v8357_v15   ;;  %v489_v15 = vsel %vm460_vm1, %v429_v54, %v430_v61  ;;  %v8669_v54 = vld [vmem:[%s8484_s21 + $0x70] sm:$0xff] }
  0x7e   : > { %841 = vperm.xlu1 %6471, %v8374_v18   ;;  %845 = vperm.xlu0 %6470, %v8369_v17   ;;  %v487_v18 = vsel %vm460_vm1, %v431_v62, %v432_v4 }
  0x82   : > { %849 = vperm.xlu1 %6471, %v8386_v20   ;;  %853 = vperm.xlu0 %6470, %v8381_v19   ;;  %v486_v20 = vsel %vm460_vm1, %v432_v4, %v433_v5 }
  0x86   : > { %857 = vperm.xlu1 %6471, %v8398_v22   ;;  %861 = vperm.xlu0 %6470, %v8393_v21   ;;  %v434_v21 = vrot.slane %v8586_v7, 7  ;;  %v435_v22 = vrot.slane %v8589_v8, 7 }
  0x8a   : > { %865 = vperm.xlu1 %6471, %v8410_v24   ;;  %869 = vperm.xlu0 %6470, %v8405_v23   ;;  %v436_v23 = vrot.slane %v8601_v12, 7  ;;  %v437_v24 = vrot.slane %v8604_v13, 7 }
  0x8c   : > { %v482_v37 = vsel %vm460_vm1, %v436_v23, %v437_v24  ;;  %v483_v40 = vsel %vm460_vm1, %v435_v22, %v436_v23  ;;  %v8716_v23 = vld [vmem:[%s8484_s21 + $0x88] sm:$0xff] }
  0x8e   : > { %873 = vperm.xlu1 %6471, %v382_v26   ;;  %877 = vperm.xlu0 %6470, %v8417_v25  }
  0x90   : > { %v8528_v45 = vpop.permute.xlu1 %506  ;;  %v8530_v46 = vpop.permute.xlu0 %496 }
  0x91   : > { %12866 = vst [vmem:[#allocation5_spill] sm:$0xff] %v8528_v45  ;;  %v8617_v19 = vmul.f32 %v8528_v45, %v493_v6 }
  0x92   : > { %881 = vperm.xlu1 %6471, %v384_v28   ;;  %885 = vperm.xlu0 %6470, %v8426_v27   ;;  %v8634_v27 = vld [vmem:[%s8484_s21 + $0x60] sm:$0xff]  ;;  %v8637_v28 = vld [vmem:[%s8484_s21 + $0x68] sm:$0xff] }
  0x93   : > { %v438_v51 = vrot.slane %v8634_v27, 7  ;;  %v439_v53 = vrot.slane %v8637_v28, 7 }
  0x94   : > { %v8533_v47 = vpop.permute.xlu1 %511  ;;  %v8535_v48 = vpop.permute.xlu0 %501 }
  0x95   : > { %12867 = vst [vmem:[#allocation6_spill] sm:$0xff] %v8533_v47  ;;  %v8592_v9 = vmul.f32 %v8533_v47, %v492_v63 }
  0x96   : > { %889 = vperm.xlu1 %6471, %v386_v30   ;;  %893 = vperm.xlu0 %6470, %v8435_v29  }
  0x97   : > { %v6472_v26 = vpack.i.bf16 %v8592_v9, %v8617_v19 }
  0x98   : > { %v8545_v52 = vpop.permute.xlu1 %521  ;;  %v8549_v55 = vpop.permute.xlu0 %516 }
  0x99   : > { %12868 = vst [vmem:[#allocation7_spill] sm:$0xff] %v8545_v52  ;;  %12869 = vst [vmem:[#allocation8_spill] sm:$0xff] %v8549_v55  ;;  %v8595_v10 = vmul.f32 %v8545_v52, %v490_v0  ;;  %v8598_v11 = vmul.f32 %v8549_v55, %v491_v1 }
  0x9a   : > { %897 = vperm.xlu1 %6471, %v8449_v32   ;;  %901 = vperm.xlu0 %6470, %v8444_v31  }
  0x9b   : > { %12872 = vst [vmem:[#allocation11_spill] sm:$0xff] %v8595_v10  ;;  %12873 = vst [vmem:[#allocation12_spill] sm:$0xff] %v8598_v11  ;;  %v8629_v25 = vpack.i.bf16 %v8595_v10, %v8598_v11 }
  0x9c   : > { %v8575_v2 = vpop.permute.xlu1 %531  ;;  %v8577_v3 = vpop.permute.xlu0 %526 }
  0x9d   : > { %12870 = vst [vmem:[#allocation9_spill] sm:$0xff] %v8575_v2  ;;  %12871 = vst [vmem:[#allocation10_spill] sm:$0xff] %v8577_v3  ;;  %v8640_v29 = vmul.f32 %v8575_v2, %v488_v14  ;;  %v8643_v30 = vmul.f32 %v8577_v3, %v489_v15  ;;  %v480_v14 = vsel %vm460_vm1, %v438_v51, %v439_v53 }
  0x9e   : > { %905 = vperm.xlu1 %6471, %v8462_v34   ;;  %909 = vperm.xlu0 %6470, %v8457_v33   ;;  %v481_v15 = vsel %vm460_vm1, %v437_v24, %v438_v51 }
  0x9f   : > { %v8690_v4 = vpack.i.bf16 %v8640_v29, %v8643_v30 }
  0xa0   : > { %v8610_v16 = vpop.permute.xlu1 %541  ;;  %v8612_v17 = vpop.permute.xlu0 %536 }
  0xa1   : > { %12874 = vst [vmem:[#allocation13_spill] sm:$0xff] %v8610_v16  ;;  %12875 = vst [vmem:[#allocation14_spill] sm:$0xff] %v8612_v17  ;;  %v8646_v31 = vmul.f32 %v8610_v16, %v486_v20  ;;  %v8649_v32 = vmul.f32 %v8612_v17, %v487_v18  ;;  %v440_v18 = vrot.slane %v8669_v54, 7  ;;  %v441_v20 = vrot.slane %v8672_v59, 7 }
  0xa2   : > { %913 = vperm.xlu1 %6471, %v8475_v36   ;;  %917 = vperm.xlu0 %6470, %v8470_v35   ;;  %v484_v35 = vsel %vm460_vm1, %v434_v21, %v435_v22  ;;  %v485_v36 = vsel %vm460_vm1, %v433_v5, %v434_v21  ;;  %v8713_v22 = vld [vmem:[%s8484_s21 + $0x80] sm:$0xff] }
  0xa3   : > { %12876 = vst [vmem:[#allocation15_spill] sm:$0xff] %v8646_v31  ;;  %12877 = vst [vmem:[#allocation16_spill] sm:$0xff] %v8649_v32  ;;  %v8686_v1 = vpack.i.bf16 %v8646_v31, %v8649_v32  ;;  %v479_v51 = vsel %vm460_vm1, %v439_v53, %v440_v18  ;;  %v442_v43 = vrot.slane %v8713_v22, 7 }
  0xa4   : > { %v8651_v33 = vpop.permute.xlu1 %551  ;;  %v8653_v34 = vpop.permute.xlu0 %546 }
  0xa5   : > { %12878 = vst [vmem:[#allocation17_spill] sm:$0xff] %v8651_v33  ;;  %12879 = vst [vmem:[#allocation18_spill] sm:$0xff] %v8653_v34  ;;  %v8675_v61 = vmul.f32 %v8651_v33, %v484_v35  ;;  %v8678_v62 = vmul.f32 %v8653_v34, %v485_v36  ;;  %v477_v34 = vsel %vm460_vm1, %v441_v20, %v442_v43  ;;  %v444_v33 = vrot.slane %v8747_v42, 7 }
  0xa6   : > { %6478 = vrot.lane.b32.xlu0 %v8629_v25, %s8154_s25  ;;  %6473 = vrot.lane.b32.xlu1 %v6472_v26, %s8154_s25 }
  0xa7   : > { %12880 = vst [vmem:[#allocation19_spill] sm:$0xff] %v8675_v61  ;;  %12881 = vst [vmem:[#allocation20_spill] sm:$0xff] %v8678_v62  ;;  %v8724_v24 = vpack.i.bf16 %v8675_v61, %v8678_v62 }
  0xa8   : > { %v8680_v63 = vpop.permute.xlu1 %561  ;;  %v8682_v0 = vpop.permute.xlu0 %556 }
  0xa9   : > { %12882 = vst [vmem:[#allocation21_spill] sm:$0xff] %v8680_v63  ;;  %12883 = vst [vmem:[#allocation22_spill] sm:$0xff] %v8682_v0  ;;  %v8693_v5 = vmul.f32 %v8680_v63, %v482_v37  ;;  %v8696_v6 = vmul.f32 %v8682_v0, %v483_v40  ;;  %v478_v40 = vsel %vm460_vm1, %v440_v18, %v441_v20 }
  0xaa   : > { %6488 = vrot.lane.b32.xlu0 %v8686_v1, %s8154_s25  ;;  %6483 = vrot.lane.b32.xlu1 %v8690_v4, %s8154_s25 }
  0xab   : > { %12884 = vst [vmem:[#allocation23_spill] sm:$0xff] %v8693_v5  ;;  %12885 = vst [vmem:[#allocation24_spill] sm:$0xff] %v8696_v6  ;;  %v8710_v21 = vpack.i.bf16 %v8693_v5, %v8696_v6 }
  0xac   : > { %v8718_v26 = vpop.permute.xlu1 %571  ;;  %v8720_v35 = vpop.permute.xlu0 %566 }
  0xad   : > { %12886 = vst [vmem:[#allocation25_spill] sm:$0xff] %v8718_v26  ;;  %12887 = vst [vmem:[#allocation26_spill] sm:$0xff] %v8720_v35  ;;  %v8727_v36 = vmul.f32 %v8718_v26, %v480_v14  ;;  %v8730_v37 = vmul.f32 %v8720_v35, %v481_v15  ;;  %v443_v14 = vrot.slane %v8716_v23, 7  ;;  %v8750_v35 = vld [vmem:[%s8484_s21 + $0x98] sm:$0xff] }
  0xae   : > { %6498 = vrot.lane.b32.xlu0 %v8710_v21, %s8154_s25  ;;  %6493 = vrot.lane.b32.xlu1 %v8724_v24, %s8154_s25  ;;  %v445_v16 = vrot.slane %v8750_v35, 7 }
  0xaf   : > { %12888 = vst [vmem:[#allocation27_spill] sm:$0xff] %v8727_v36  ;;  %12889 = vst [vmem:[#allocation28_spill] sm:$0xff] %v8730_v37  ;;  %v8744_v15 = vpack.i.bf16 %v8727_v36, %v8730_v37  ;;  %v476_v0 = vsel %vm460_vm1, %v442_v43, %v443_v14  ;;  %v475_v2 = vsel %vm460_vm1, %v443_v14, %v444_v33 }
  0xb0   : > { %v8752_v26 = vpop.permute.xlu1 %581  ;;  %v8754_v63 = vpop.permute.xlu0 %576  ;;  %v474_v3 = vsel %vm460_vm1, %v444_v33, %v445_v16 }
  0xb1   : > { %12890 = vst [vmem:[#allocation29_spill] sm:$0xff] %v8752_v26  ;;  %12891 = vst [vmem:[#allocation30_spill] sm:$0xff] %v8754_v63  ;;  %v8757_v53 = vmul.f32 %v8752_v26, %v478_v40  ;;  %v8760_v18 = vmul.f32 %v8754_v63, %v479_v51  ;;  %v8775_v51 = vld [vmem:[%s8484_s21 + $0xa0] sm:$0xff]  ;;  %v8778_v26 = vld [vmem:[%s8484_s21 + $0xa8] sm:$0xff] }
  0xb2   : > { %6503 = vrot.lane.b32.xlu1 %v8744_v15, %s8154_s25  ;;  %v446_v52 = vrot.slane %v8775_v51, 7  ;;  %v447_v55 = vrot.slane %v8778_v26, 7 }
  0xb3   : > { %12892 = vst [vmem:[#allocation31_spill] sm:$0xff] %v8757_v53  ;;  %12893 = vst [vmem:[#allocation32_spill] sm:$0xff] %v8760_v18  ;;  %v8772_v40 = vpack.i.bf16 %v8757_v53, %v8760_v18 }
  0xb4   : > { %v8780_v63 = vpop.permute.xlu1 %591  ;;  %v8782_v17 = vpop.permute.xlu0 %586  ;;  %v472_v47 = vsel %vm460_vm1, %v446_v52, %v447_v55  ;;  %v473_v53 = vsel %vm460_vm1, %v445_v16, %v446_v52 }
  0xb5   : > { %12894 = vst [vmem:[#allocation33_spill] sm:$0xff] %v8780_v63  ;;  %12895 = vst [vmem:[#allocation34_spill] sm:$0xff] %v8782_v17  ;;  %v8785_v43 = vmul.f32 %v8780_v63, %v476_v0  ;;  %v8788_v20 = vmul.f32 %v8782_v17, %v477_v34  ;;  %6508 = vrot.lane.b32.xlu0 %v8772_v40, %s8154_s25  ;;  %v8803_v34 = vld [vmem:[%s8484_s21 + $0xb0] sm:$0xff]  ;;  %v8806_v63 = vld [vmem:[%s8484_s21 + $0xb8] sm:$0xff] }
  0xb6   : > { %v449_v18 = vrot.slane %v8806_v63, 7 }
  0xb7   : > { %12896 = vst [vmem:[#allocation35_spill] sm:$0xff] %v8785_v43  ;;  %12897 = vst [vmem:[#allocation36_spill] sm:$0xff] %v8788_v20  ;;  %v8800_v0 = vpack.i.bf16 %v8785_v43, %v8788_v20  ;;  %v448_v43 = vrot.slane %v8803_v34, 7 }
  0xb8   : > { %v8808_v17 = vpop.permute.xlu1 %601  ;;  %v8810_v45 = vpop.permute.xlu0 %596 }
  0xb9   : > { %12898 = vst [vmem:[#allocation37_spill] sm:$0xff] %v8808_v17  ;;  %12899 = vst [vmem:[#allocation38_spill] sm:$0xff] %v8810_v45  ;;  %v8813_v33 = vmul.f32 %v8808_v17, %v474_v3  ;;  %v8816_v14 = vmul.f32 %v8810_v45, %v475_v2  ;;  %6513 = vrot.lane.b32.xlu1 %v8800_v0, %s8154_s25  ;;  %v8831_v2 = vld [vmem:[%s8484_s21 + $0xc0] sm:$0xff]  ;;  %v8834_v17 = vld [vmem:[%s8484_s21 + $0xc8] sm:$0xff] }
  0xba   : > { %v450_v5 = vrot.slane %v8831_v2, 7  ;;  %v451_v36 = vrot.slane %v8834_v17, 7 }
  0xbb   : > { %12900 = vst [vmem:[#allocation39_spill] sm:$0xff] %v8813_v33  ;;  %12901 = vst [vmem:[#allocation40_spill] sm:$0xff] %v8816_v14  ;;  %v8828_v3 = vpack.i.bf16 %v8813_v33, %v8816_v14  ;;  %v470_v33 = vsel %vm460_vm1, %v448_v43, %v449_v18  ;;  %v471_v14 = vsel %vm460_vm1, %v447_v55, %v448_v43 }
  0xbc   : > { %v8836_v45 = vpop.permute.xlu1 %611  ;;  %v8838_v20 = vpop.permute.xlu0 %606  ;;  %v468_v43 = vsel %vm460_vm1, %v450_v5, %v451_v36 }
  0xbd   : > { %12902 = vst [vmem:[#allocation41_spill] sm:$0xff] %v8836_v45  ;;  %12903 = vst [vmem:[#allocation42_spill] sm:$0xff] %v8838_v20  ;;  %v8841_v52 = vmul.f32 %v8836_v45, %v472_v47  ;;  %v8844_v16 = vmul.f32 %v8838_v20, %v473_v53  ;;  %6518 = vrot.lane.b32.xlu0 %v8828_v3, %s8154_s25  ;;  %v8859_v53 = vld [vmem:[%s8484_s21 + $0xd0] sm:$0xff]  ;;  %v421_v45 = vld [vmem:[%s8484_s21 + $0xd8] sm:$0xff] }
  0xbe   : > { %v453_v31 = vrot.slane %v421_v45, 7 }
  0xbf   : > { %12904 = vst [vmem:[#allocation43_spill] sm:$0xff] %v8841_v52  ;;  %12905 = vst [vmem:[#allocation44_spill] sm:$0xff] %v8844_v16  ;;  %v8856_v47 = vpack.i.bf16 %v8841_v52, %v8844_v16  ;;  %v469_v52 = vsel %vm460_vm1, %v449_v18, %v450_v5  ;;  %v452_v16 = vrot.slane %v8859_v53, 7 }
  0xc0   : > { %v8862_v20 = vpop.permute.xlu1 %621  ;;  %v8864_v6 = vpop.permute.xlu0 %616 }
  0xc1   : > { %12906 = vst [vmem:[#allocation45_spill] sm:$0xff] %v8862_v20  ;;  %12907 = vst [vmem:[#allocation46_spill] sm:$0xff] %v8864_v6  ;;  %v8867_v37 = vmul.f32 %v8862_v20, %v470_v33  ;;  %v8870_v55 = vmul.f32 %v8864_v6, %v471_v14  ;;  %6523 = vrot.lane.b32.xlu1 %v8856_v47, %s8154_s25  ;;  %v422_v14 = vld [vmem:[%s8484_s21 + $0xe0] sm:$0xff]  ;;  %v423_v20 = vld [vmem:[%s8484_s21 + $0xe8] sm:$0xff]  ;;  %v466_v45 = vsel %vm460_vm1, %v452_v16, %v453_v31 }
  0xc2   : > { %v467_v18 = vsel %vm460_vm1, %v451_v36, %v452_v16 }
  0xc3   : > { %12908 = vst [vmem:[#allocation47_spill] sm:$0xff] %v8867_v37  ;;  %12909 = vst [vmem:[#allocation48_spill] sm:$0xff] %v8870_v55  ;;  %v8881_v33 = vpack.i.bf16 %v8867_v37, %v8870_v55  ;;  %v454_v37 = vrot.slane %v422_v14, 7  ;;  %v455_v55 = vrot.slane %v423_v20, 7 }
  0xc4   : > { %v8885_v6 = vpop.permute.xlu1 %631  ;;  %v8887_v32 = vpop.permute.xlu0 %626 }
  0xc5   : > { %12910 = vst [vmem:[#allocation49_spill] sm:$0xff] %v8885_v6  ;;  %12911 = vst [vmem:[#allocation50_spill] sm:$0xff] %v8887_v32  ;;  %v8890_v62 = vmul.f32 %v8885_v6, %v468_v43  ;;  %v8893_v5 = vmul.f32 %v8887_v32, %v469_v52  ;;  %6528 = vrot.lane.b32.xlu0 %v8881_v33, %s8154_s25  ;;  %v424_v43 = vld [vmem:[%s8484_s21 + $0xf0] sm:$0xff]  ;;  %v8907_v6 = vld [vmem:[%s8484_s21 + $0xf8] sm:$0xff]  ;;  %v464_v36 = vsel %vm460_vm1, %v454_v37, %v455_v55 }
  0xc6   : > { %12914 = vst [vmem:[#allocation53_spill] sm:$0xff] %v8907_v6  ;;  %v465_v20 = vsel %vm460_vm1, %v453_v31, %v454_v37  ;;  %v456_v16 = vrot.slane %v424_v43, 7  ;;  %v12683_v14 = vrot.slane %v8907_v6, 7 }
  0xc7   : > { %12912 = vst [vmem:[#allocation51_spill] sm:$0xff] %v8890_v62  ;;  %12913 = vst [vmem:[#allocation52_spill] sm:$0xff] %v8893_v5  ;;  %v8903_v61 = vpack.i.bf16 %v8890_v62, %v8893_v5 }
  0xc8   : > { %v8909_v52 = vpop.permute.xlu1 %641  ;;  %v8911_v32 = vpop.permute.xlu0 %636  ;;  %v462_v31 = vsel %vm460_vm1, %v456_v16, %v12683_v14  ;;  %v463_v37 = vsel %vm460_vm1, %v455_v55, %v456_v16  ;;  %v12686_v16 = vmov 0.0  }
  0xc9   : > { %12915 = vst [vmem:[#allocation54_spill] sm:$0xff] %v8909_v52  ;;  %12916 = vst [vmem:[#allocation55_spill] sm:$0xff] %v8911_v32  ;;  %v8914_v10 = vmul.f32 %v8909_v52, %v466_v45  ;;  %v8917_v11 = vmul.f32 %v8911_v32, %v467_v18  ;;  %6533 = vrot.lane.b32.xlu1 %v8903_v61, %s8154_s25 }
  0xcb   : > { %12917 = vst [vmem:[#allocation56_spill] sm:$0xff] %v8914_v10  ;;  %12918 = vst [vmem:[#allocation57_spill] sm:$0xff] %v8917_v11  ;;  %v8928_v62 = vpack.i.bf16 %v8914_v10, %v8917_v11 }
  0xcc   : > { %v8930_v45 = vpop.permute.xlu1 %651  ;;  %v8932_v18 = vpop.permute.xlu0 %646 }
  0xcd   : > { %12919 = vst [vmem:[#allocation58_spill] sm:$0xff] %v8928_v62  ;;  %12920 = vst [vmem:[#allocation59_spill] sm:$0xff] %v8930_v45  ;;  %v8935_v52 = vmul.f32 %v8930_v45, %v464_v36  ;;  %v8938_v32 = vmul.f32 %v8932_v18, %v465_v20  ;;  %6538 = vrot.lane.b32.xlu0 %v8928_v62, %s8154_s25 }
  0xce   : > { %12921 = vst [vmem:[#allocation60_spill] sm:$0xff] %v8932_v18 }
  0xcf   : > { %12922 = vst [vmem:[#allocation61_spill] sm:$0xff] %v8935_v52  ;;  %12923 = vst [vmem:[#allocation62_spill] sm:$0xff] %v8938_v32  ;;  %v8950_v43 = vpack.i.bf16 %v8935_v52, %v8938_v32 }
  0xd0   : > { %v8952_v36 = vpop.permute.xlu1 %661  ;;  %v8954_v45 = vpop.permute.xlu0 %656 }
  0xd1   : > { %12924 = vst [vmem:[#allocation63_spill] sm:$0xff] %v8950_v43  ;;  %12925 = vst [vmem:[#allocation64_spill] sm:$0xff] %v8952_v36  ;;  %v707_v20 = vmul.f32 %v8952_v36, %v462_v31  ;;  %v706_v18 = vmul.f32 %v8954_v45, %v463_v37  ;;  %6543 = vrot.lane.b32.xlu1 %v8950_v43, %s8154_s25  ;;  %v6562_v31 = vpack.i.bf16 %v8542_v50, %v12686_v16 }
  0xd2   : > { %12926 = vst [vmem:[#allocation65_spill] sm:$0xff] %v8954_v45  ;;  %v710_v37 = vrot.slane %v8542_v50, 1  ;;  %v12931_v45 = vrot.slane %v8487_v39, 1 }
  0xd3   : > { %v8960_v11 = vpack.i.bf16 %v707_v20, %v706_v18  ;;  %v6567_v20 = vpack.i.bf16 %v8490_v41, %v8487_v39 }
  0xd4   : > { %v8962_v14 = vpop.permute.xlu1 %671  ;;  %v8964_v55 = vpop.permute.xlu0 %666  ;;  %v775_v16 = vsel %vm742_vm0, 0.0, %v710_v37  ;;  %v774_v52 = vsel %vm742_vm0, %v710_v37, %v12931_v45 }
  0xd5   : > { %12927 = vst [vmem:[#allocation66_spill] sm:$0xff] %v8960_v11  ;;  %12928 = vst [vmem:[#allocation67_spill] sm:$0xff] %v8962_v14  ;;  %6548 = vrot.lane.b32.xlu0 %v8960_v11, %s8154_s25  ;;  %6553 = vrot.lane.b32.xlu1 %v8629_v25, %s8155_s26  ;;  %v6572_v25 = vpack.i.bf16 %v8487_v39, %v8542_v50  ;;  %s8164_s25 = smov 96  }
  0xd6   : > { %12929 = vst [vmem:[#allocation68_spill] sm:$0xff] %v8964_v55 }
  0xd9   : > { %v8973_v36 = vpop.permute.xlu1 %781  ;;  %v778_v18 = vpop.permute.xlu0 %777  ;;  %6558 = vrot.lane.b32.xlu0 %v8690_v4, %s8155_s26  ;;  %6563 = vrot.lane.b32.xlu1 %v6562_v31, %s8157_s27  ;;  %v8037_v4 = vld [vmem:[%s12590_s2 + $0x10] ss:$0 sps:$4 sm:$0x33]   ;;  %v6577_v31 = vpack.i.bf16 %v8538_v49, %v8490_v41 }
  0xda   : > { %12930 = vst [vmem:[#allocation69_spill] sm:$0xff] %v8973_v36  ;;  %v8993_v32 = vmul.f32 0.0, %v778_v18  ;;  %v921_v50 = vmul.f32 %v8973_v36, %v775_v16  ;;  %v2179_v39 = vsel %vm2177_vm2, %v8037_v4, 0  ;;  %6414 = vmatprep.subr.msk.bf16.mxu0 %vm2177_vm2, %v8037_v4  ;;  %v8038_v16 = vld [vmem:[%s12590_s2 + $0x8] sm:$0xff]   ;;  %v713_v18 = vrot.slane %v8538_v49, 1 }
  0xdb   : > { %6293 = vmatpush3.bf16.msra.mxu0 %v2179_v39  ;;  %v714_v36 = vrot.slane %v8552_v56, 1  ;;  %v12937_v4 = vrot.slane %v8490_v41, 1 }
  0xdc   : > { %12932 = vst [vmem:[#allocation70_spill] sm:$0xff] %v8993_v32  ;;  %v6592_v11 = vpack.i.bf16 %v921_v50, %v8993_v32  ;;  %6294 = vmatprep.subr.bf16.mxu0 %v8038_v16 }
  0xdd   : > { %v8996_v10 = vpop.permute.xlu1 %785  ;;  %v8998_v5 = vpop.permute.xlu0 %789  ;;  %6568 = vrot.lane.b32.xlu0 %v6567_v20, %s8157_s27  ;;  %6573 = vrot.lane.b32.xlu1 %v6572_v25, %s8158_s30  ;;  %v772_v50 = vsel %vm742_vm0, %v12937_v4, %v713_v18  ;;  %v771_v39 = vsel %vm742_vm0, %v713_v18, %v714_v36 }
  0xde   : > { %12933 = vst [vmem:[#allocation71_spill] sm:$0xff] %v8996_v10  ;;  %12934 = vst [vmem:[#allocation72_spill] sm:$0xff] %v8998_v5  ;;  %v922_v45 = vmul.f32 %v8996_v10, %v774_v52  ;;  %v923_v37 = vmul.f32 %v8998_v5, %v8503_v44  ;;  %v6587_v44 = vpack.i.bf16 %v8555_v57, %v8552_v56  ;;  %v8039_v52 = vld [vmem:[%s12590_s2] sm:$0xff]  }
  0xdf   : > { %6295 = vmatpush3.bf16.msra.mxu0 %v8038_v16 }
  0xe0   : > { %v6597_v20 = vpack.i.bf16 %v923_v37, %v922_v45  ;;  %v715_v45 = vrot.slane %v8555_v57, 1  ;;  %6296 = vmatprep.subr.bf16.mxu0 %v8039_v52 }
  0xe1   : > { %v9011_v25 = vpop.permute.xlu1 %793  ;;  %v9013_v55 = vpop.permute.xlu0 %797  ;;  %6578 = vrot.lane.b32.xlu0 %v6577_v31, %s8158_s30  ;;  %6583 = vrot.lane.b32.xlu1 %v6577_v31, %s8159_s18  ;;  %v716_v31 = vrot.slane %v8558_v58, 1 }
  0xe2   : > { %12935 = vst [vmem:[#allocation73_spill] sm:$0xff] %v9011_v25  ;;  %12936 = vst [vmem:[#allocation74_spill] sm:$0xff] %v9013_v55  ;;  %v924_v41 = vmul.f32 %v9011_v25, %v772_v50  ;;  %v925_v16 = vmul.f32 %v9013_v55, %v771_v39  ;;  %v770_v18 = vsel %vm742_vm0, %v714_v36, %v715_v45 }
  0xe3   : > { %6297 = vmatpush3.bf16.msra.mxu0 %v8039_v52  ;;  %v769_v4 = vsel %vm742_vm0, %v715_v45, %v716_v31 }
  0xe4   : > { %v6607_v52 = vpack.i.bf16 %v925_v16, %v924_v41 }
  0xe5   : > { %v9030_v37 = vpop.permute.xlu1 %801  ;;  %v9032_v5 = vpop.permute.xlu0 %805  ;;  %6588 = vrot.lane.b32.xlu0 %v6587_v44, %s8159_s18  ;;  %6593 = vrot.lane.b32.xlu1 %v6592_v11, %s8160_s28 }
  0xe6   : > { %12938 = vst [vmem:[#allocation75_spill] sm:$0xff] %v9030_v37  ;;  %12939 = vst [vmem:[#allocation76_spill] sm:$0xff] %v9032_v5  ;;  %v926_v11 = vmul.f32 %v9030_v37, %v770_v18  ;;  %v927_v50 = vmul.f32 %v9032_v5, %v769_v4  ;;  %v6637_v18 = vpack.i.bf16 %v8558_v58, %v8555_v57 }
  0xe7   : > { %v6657_v57 = vpack.i.bf16 %v8589_v8, %v8586_v7 }
  0xe8   : > { %v6617_v45 = vpack.i.bf16 %v927_v50, %v926_v11 }
  0xe9   : > { %v9042_v10 = vpop.permute.xlu1 %809  ;;  %v9044_v32 = vpop.permute.xlu0 %813  ;;  %6598 = vrot.lane.b32.xlu0 %v6597_v20, %s8160_s28  ;;  %6603 = vrot.lane.b32.xlu1 %v6597_v20, %s8161_s29  ;;  %v6632_v20 = vpack.i.bf16 %v8552_v56, %v8538_v49  ;;  %v6647_v49 = vpack.i.bf16 %v8564_v60, %v8558_v58  ;;  %v717_v56 = vrot.slane %v8564_v60, 1 }
  0xea   : > { %12940 = vst [vmem:[#allocation77_spill] sm:$0xff] %v9042_v10  ;;  %12941 = vst [vmem:[#allocation78_spill] sm:$0xff] %v9044_v32 }
  0xed   : > { %v9050_v39 = vpop.permute.xlu1 %817  ;;  %v9052_v36 = vpop.permute.xlu0 %821  ;;  %6608 = vrot.lane.b32.xlu0 %v6607_v52, %s8161_s29  ;;  %6613 = vrot.lane.b32.xlu1 %v6607_v52, %s8162_s11 }
  0xee   : > { %12942 = vst [vmem:[#allocation79_spill] sm:$0xff] %v9050_v39  ;;  %12943 = vst [vmem:[#allocation80_spill] sm:$0xff] %v9052_v36 }
  0xf1   : > { %v9056_v55 = vpop.permute.xlu1 %825  ;;  %v9058_v25 = vpop.permute.xlu0 %829  ;;  %6618 = vrot.lane.b32.xlu0 %v6617_v45, %s8162_s11  ;;  %6623 = vrot.lane.b32.xlu1 %v8686_v1, %s8155_s26  ;;  %v718_v1 = vrot.slane %v8586_v7, 1 }
  0xf2   : > { %12944 = vst [vmem:[#allocation81_spill] sm:$0xff] %v9056_v55  ;;  %12945 = vst [vmem:[#allocation82_spill] sm:$0xff] %v9058_v25 }
  0xf3   : > { %v767_v58 = vsel %vm742_vm0, %v717_v56, %v718_v1 }
  0xf4   : > { %v929_v14 = vmul.f32 %v9044_v32, %v767_v58 }
  0xf5   : > { %v9065_v41 = vpop.permute.xlu1 %833  ;;  %v9067_v16 = vpop.permute.xlu0 %837  ;;  %6628 = vrot.lane.b32.xlu0 %v8724_v24, %s8155_s26  ;;  %6633 = vrot.lane.b32.xlu1 %v6632_v20, %s8157_s27  ;;  %v719_v20 = vrot.slane %v8589_v8, 1 }
  0xf6   : > { %12946 = vst [vmem:[#allocation83_spill] sm:$0xff] %v9065_v41  ;;  %12947 = vst [vmem:[#allocation84_spill] sm:$0xff] %v9067_v16 }
  0xf9   : > { %v9074_v4 = vpop.permute.xlu1 %841  ;;  %v9076_v11 = vpop.permute.xlu0 %845  ;;  %6638 = vrot.lane.b32.xlu0 %v6637_v18, %s8157_s27  ;;  %6643 = vrot.lane.b32.xlu1 %v6587_v44, %s8158_s30  ;;  %v768_v44 = vsel %vm742_vm0, %v716_v31, %v717_v56  ;;  %v720_v18 = vrot.slane %v8601_v12, 1  ;;  %v766_v31 = vsel %vm742_vm0, %v718_v1, %v719_v20 }
  0xfa   : > { %12948 = vst [vmem:[#allocation85_spill] sm:$0xff] %v9074_v4  ;;  %12949 = vst [vmem:[#allocation86_spill] sm:$0xff] %v9076_v11 }
  0xfb   : > { %v765_v56 = vsel %vm742_vm0, %v719_v20, %v720_v18 }
  0xfd   : > { %v9084_v24 = vpop.permute.xlu1 %849  ;;  %v9086_v50 = vpop.permute.xlu0 %853  ;;  %6648 = vrot.lane.b32.xlu0 %v6647_v49, %s8158_s30  ;;  %6653 = vrot.lane.b32.xlu1 %v6647_v49, %s8159_s18  ;;  %v928_v49 = vmul.f32 %v9042_v10, %v768_v44  ;;  %v931_v44 = vmul.f32 %v9052_v36, %v765_v56 }
  0xfe   : > { %12950 = vst [vmem:[#allocation87_spill] sm:$0xff] %v9084_v24  ;;  %12951 = vst [vmem:[#allocation88_spill] sm:$0xff] %v9086_v50 }
  0xff   : > { %v6677_v10 = vpack.i.bf16 %v929_v14, %v928_v49  ;;  %v6702_v14 = vpack.i.bf16 %v8586_v7, %v8564_v60  ;;  %v6717_v60 = vpack.i.bf16 %v8604_v13, %v8601_v12  ;;  %v721_v7 = vrot.slane %v8604_v13, 1 }
 0x101   : > { %v9098_v5 = vpop.permute.xlu1 %857  ;;  %v9100_v37 = vpop.permute.xlu0 %861  ;;  %6658 = vrot.lane.b32.xlu0 %v6657_v57, %s8159_s18  ;;  %6663 = vrot.lane.b32.xlu1 %v6607_v52, %s8160_s28  ;;  %v930_v52 = vmul.f32 %v9050_v39, %v766_v31  ;;  %v6707_v31 = vpack.i.bf16 %v8601_v12, %v8589_v8  ;;  %v6727_v8 = vpack.i.bf16 %v8637_v28, %v8634_v27 }
 0x102   : > { %12952 = vst [vmem:[#allocation89_spill] sm:$0xff] %v9098_v5  ;;  %12953 = vst [vmem:[#allocation90_spill] sm:$0xff] %v9100_v37 }
 0x103   : > { %v6687_v1 = vpack.i.bf16 %v931_v44, %v930_v52 }
 0x105   : > { %v9110_v6 = vpop.permute.xlu1 %865  ;;  %v9112_v43 = vpop.permute.xlu0 %869  ;;  %6668 = vrot.lane.b32.xlu0 %v6617_v45, %s8160_s28  ;;  %6673 = vrot.lane.b32.xlu1 %v6617_v45, %s8161_s29 }
 0x106   : > { %12954 = vst [vmem:[#allocation91_spill] sm:$0xff] %v9110_v6  ;;  %12955 = vst [vmem:[#allocation92_spill] sm:$0xff] %v9112_v43 }
 0x109   : > { %v9118_v58 = vpop.permute.xlu1 %873  ;;  %v9120_v32 = vpop.permute.xlu0 %877  ;;  %6678 = vrot.lane.b32.xlu0 %v6677_v10, %s8161_s29  ;;  %6683 = vrot.lane.b32.xlu1 %v6677_v10, %s8162_s11 }
 0x10a   : > { %12956 = vst [vmem:[#allocation93_spill] sm:$0xff] %v9120_v32 }
 0x10d   : > { %v9124_v20 = vpop.permute.xlu1 %881  ;;  %v9126_v62 = vpop.permute.xlu0 %885  ;;  %6688 = vrot.lane.b32.xlu0 %v6687_v1, %s8162_s11  ;;  %6693 = vrot.lane.b32.xlu1 %v8710_v21, %s8155_s26  ;;  %v722_v21 = vrot.slane %v8634_v27, 1 }
 0x10e   : > { %12957 = vst [vmem:[#allocation94_spill] sm:$0xff] %v9124_v20  ;;  %12958 = vst [vmem:[#allocation95_spill] sm:$0xff] %v9126_v62 }
 0x10f   : > { %v763_v12 = vsel %vm742_vm0, %v721_v7, %v722_v21 }
 0x111   : > { %v9133_v45 = vpop.permute.xlu1 %889  ;;  %v9135_v49 = vpop.permute.xlu0 %893  ;;  %6698 = vrot.lane.b32.xlu0 %v8744_v15, %s8155_s26  ;;  %6703 = vrot.lane.b32.xlu1 %v6702_v14, %s8157_s27  ;;  %v723_v14 = vrot.slane %v8637_v28, 1 }
 0x112   : > { %12959 = vst [vmem:[#allocation96_spill] sm:$0xff] %v9133_v45  ;;  %12960 = vst [vmem:[#allocation97_spill] sm:$0xff] %v9135_v49 }
 0x115   : > { %v9142_v56 = vpop.permute.xlu1 %897  ;;  %v9144_v52 = vpop.permute.xlu0 %901  ;;  %6708 = vrot.lane.b32.xlu0 %v6707_v31, %s8157_s27  ;;  %6713 = vrot.lane.b32.xlu1 %v6657_v57, %s8158_s30  ;;  %v764_v57 = vsel %vm742_vm0, %v720_v18, %v721_v7  ;;  %v724_v31 = vrot.slane %v8669_v54, 1  ;;  %v933_v18 = vmul.f32 %v9058_v25, %v763_v12  ;;  %v762_v7 = vsel %vm742_vm0, %v722_v21, %v723_v14 }
 0x116   : > { %12961 = vst [vmem:[#allocation98_spill] sm:$0xff] %v9142_v56  ;;  %12962 = vst [vmem:[#allocation99_spill] sm:$0xff] %v9144_v52 }
 0x117   : > { %v761_v52 = vsel %vm742_vm0, %v723_v14, %v724_v31 }
 0x119   : > { %v9152_v15 = vpop.permute.xlu1 %905  ;;  %v9154_v44 = vpop.permute.xlu0 %909  ;;  %6718 = vrot.lane.b32.xlu0 %v6717_v60, %s8158_s30  ;;  %6723 = vrot.lane.b32.xlu1 %v6717_v60, %s8159_s18 }
 0x11a   : > { %12963 = vst [vmem:[#allocation100_spill] sm:$0xff] %v9152_v15  ;;  %12964 = vst [vmem:[#allocation101_spill] sm:$0xff] %v9154_v44  ;;  %v932_v15 = vmul.f32 %v9056_v55, %v764_v57 }
 0x11c   : > { %v6747_v21 = vpack.i.bf16 %v933_v18, %v932_v15  ;;  %v6777_v15 = vpack.i.bf16 %v8669_v54, %v8637_v28  ;;  %v6797_v28 = vpack.i.bf16 %v8716_v23, %v8713_v22 }
 0x11d   : > { %v914_v36 = vpop.permute.xlu1 %913  ;;  %v918_v39 = vpop.permute.xlu0 %917  ;;  %6728 = vrot.lane.b32.xlu0 %v6727_v8, %s8159_s18  ;;  %6733 = vrot.lane.b32.xlu1 %v6677_v10, %s8160_s28 }
 0x11e   : > { %v9168_v60 = vmul.f32 0.0, %v914_v36  ;;  %v9170_v44 = vmul.f32 0.0, %v918_v39  ;;  %v934_v39 = vmul.f32 %v9065_v41, %v762_v7  ;;  %v935_v36 = vmul.f32 %v9067_v16, %v761_v52 }
 0x11f   : > { %v6772_v52 = vpack.i.bf16 %v8634_v27, %v8604_v13  ;;  %v725_v13 = vrot.slane %v8672_v59, 1  ;;  %v726_v27 = vrot.slane %v8713_v22, 1 }
 0x120   : > { %v9180_v56 = vpack.c.bf16 %v9170_v44, %v9168_v60  ;;  %v6757_v14 = vpack.i.bf16 %v935_v36, %v934_v39  ;;  %v727_v36 = vrot.slane %v8716_v23, 1 }
 0x121   : > { %6738 = vrot.lane.b32.xlu0 %v6687_v1, %s8160_s28  ;;  %6743 = vrot.lane.b32.xlu1 %v6687_v1, %s8161_s29  ;;  %v9184_v10 = vpop.permute.xlu1 %6473  ;;  %v9188_v57 = vpop.permute.xlu0 %6478 }
 0x122   : > { %12965 = vst [vmem:[#allocation102_spill] sm:$0xff] %v9180_v56 }
 0x125   : > { %6748 = vrot.lane.b32.xlu0 %v6747_v21, %s8161_s29  ;;  %6753 = vrot.lane.b32.xlu1 %v6747_v21, %s8162_s11  ;;  %v9192_v12 = vpop.permute.xlu1 %6483  ;;  %v9194_v56 = vpop.permute.xlu0 %6488 }
 0x129   : > { %6758 = vrot.lane.b32.xlu0 %v6757_v14, %s8162_s11  ;;  %6763 = vrot.lane.b32.xlu1 %v8772_v40, %s8155_s26  ;;  %v9199_v1 = vpop.permute.xlu1 %6493  ;;  %v9208_v18 = vpop.permute.xlu0 %6498  ;;  %v6787_v40 = vpack.i.bf16 %v8672_v59, %v8669_v54  ;;  %v759_v54 = vsel %vm742_vm0, %v725_v13, %v726_v27 }
 0x12d   : > { %6768 = vrot.lane.b32.xlu0 %v8800_v0, %s8155_s26  ;;  %6773 = vrot.lane.b32.xlu1 %v6772_v52, %s8157_s27  ;;  %v9210_v7 = vpop.permute.xlu1 %6503  ;;  %v9218_v0 = vpop.permute.xlu0 %6508  ;;  %v728_v52 = vrot.slane %v8747_v42, 1 }
 0x131   : > { %6778 = vrot.lane.b32.xlu0 %v6777_v15, %s8157_s27  ;;  %6783 = vrot.lane.b32.xlu1 %v6727_v8, %s8158_s30  ;;  %v9220_v39 = vpop.permute.xlu1 %6513  ;;  %v760_v8 = vsel %vm742_vm0, %v724_v31, %v725_v13  ;;  %v9236_v16 = vpop.permute.xlu0 %6518  ;;  %v758_v31 = vsel %vm742_vm0, %v726_v27, %v727_v36  ;;  %v757_v13 = vsel %vm742_vm0, %v727_v36, %v728_v52 }
 0x132   : > { %v936_v15 = vmul.f32 %v9074_v4, %v760_v8  ;;  %v939_v8 = vmul.f32 %v9086_v50, %v757_v13  ;;  %v729_v13 = vrot.slane %v8750_v35, 1 }
 0x135   : > { %6788 = vrot.lane.b32.xlu0 %v6787_v40, %s8158_s30  ;;  %6793 = vrot.lane.b32.xlu1 %v6787_v40, %s8159_s18  ;;  %v937_v40 = vmul.f32 %v9076_v11, %v759_v54  ;;  %v9238_v41 = vpop.permute.xlu1 %6523 }
 0x137   : > { %v9248_v4 = vpop.permute.xlu0 %6528  ;;  %v6817_v11 = vpack.i.bf16 %v937_v40, %v936_v15 }
 0x138   : > { %12966 = vst [vmem:[#allocation103_spill] sm:$0xff] %v9248_v4 }
 0x139   : > { %6798 = vrot.lane.b32.xlu0 %v6797_v28, %s8159_s18  ;;  %6803 = vrot.lane.b32.xlu1 %v6747_v21, %s8160_s28  ;;  %v938_v21 = vmul.f32 %v9084_v24, %v758_v31  ;;  %v6847_v31 = vpack.i.bf16 %v8747_v42, %v8716_v23  ;;  %v756_v23 = vsel %vm742_vm0, %v728_v52, %v729_v13 }
 0x13a   : > { %v9311_v52 = vpack.i.bf16 %v8778_v26, %v8775_v51 }
 0x13b   : > { %v9250_v54 = vpop.permute.xlu1 %6533  ;;  %v9258_v25 = vpack.i.bf16 %v939_v8, %v938_v21  ;;  %v730_v21 = vrot.slane %v8775_v51, 1 }
 0x13c   : > { %12967 = vst [vmem:[#allocation104_spill] sm:$0xff] %v9250_v54 }
 0x13d   : > { %6808 = vrot.lane.b32.xlu0 %v6757_v14, %s8160_s28  ;;  %6813 = vrot.lane.b32.xlu1 %v6757_v14, %s8161_s29  ;;  %v6842_v14 = vpack.i.bf16 %v8713_v22, %v8672_v59  ;;  %v12743_v22 = vrot.slane %v8803_v34, 1 }
 0x13f   : > { %v9254_v27 = vpop.permute.xlu0 %6538 }
 0x140   : > { %12968 = vst [vmem:[#allocation105_spill] sm:$0xff] %v9254_v27 }
 0x141   : > { %6818 = vrot.lane.b32.xlu0 %v6817_v11, %s8161_s29  ;;  %6823 = vrot.lane.b32.xlu1 %v6817_v11, %s8162_s11 }
 0x143   : > { %v9256_v36 = vpop.permute.xlu1 %6543 }
 0x144   : > { %12969 = vst [vmem:[#allocation106_spill] sm:$0xff] %v9256_v36 }
 0x145   : > { %6828 = vrot.lane.b32.xlu0 %v9258_v25, %s8162_s11  ;;  %6833 = vrot.lane.b32.xlu1 %v8828_v3, %s8155_s26  ;;  %v731_v3 = vrot.slane %v8778_v26, 1 }
 0x147   : > { %v9266_v15 = vpop.permute.xlu0 %6548  ;;  %v9268_v40 = vpop.permute.xlu1 %6553  ;;  %v754_v50 = vsel %vm742_vm0, %v730_v21, %v731_v3 }
 0x148   : > { %12970 = vst [vmem:[#allocation107_spill] sm:$0xff] %v9266_v15 }
 0x149   : > { %6838 = vrot.lane.b32.xlu0 %v8856_v47, %s8155_s26  ;;  %6843 = vrot.lane.b32.xlu1 %v6842_v14, %s8157_s27  ;;  %v6857_v47 = vpack.i.bf16 %v8750_v35, %v8747_v42  ;;  %v755_v14 = vsel %vm742_vm0, %v729_v13, %v730_v21  ;;  %v753_v42 = vsel %vm742_vm0, %v731_v3, %v12743_v22  ;;  %v6480_v3 = vunpack.i.l.bf16 %v9188_v57 }
 0x14a   : > { %v942_v13 = vmul.f32 %v9110_v6, %v754_v50  ;;  %v943_v21 = vmul.f32 %v9112_v43, %v753_v42  ;;  %v6476_v50 = vunpack.i.h.bf16 %v9184_v10  ;;  %v6555_v42 = vunpack.i.l.bf16 %v9268_v40 }
 0x14b   : > { %v9278_v8 = vpop.permute.xlu0 %6558  ;;  %v9280_v59 = vpop.permute.xlu1 %6563 }
 0x14c   : > { %v6561_v6 = vunpack.i.h.bf16 %v9278_v8  ;;  %v9336_v27 = vpack.i.bf16 %v943_v21, %v942_v13 }
 0x14d   : > { %6848 = vrot.lane.b32.xlu0 %v6847_v31, %s8157_s27  ;;  %6853 = vrot.lane.b32.xlu1 %v6797_v28, %s8158_s30  ;;  %v9298_v31 = vmul.f32 0.0, %v8530_v46  ;;  %v9301_v28 = vmul.f32 0.0, %v8535_v48  ;;  %v940_v46 = vmul.f32 %v9098_v5, %v756_v23  ;;  %v941_v48 = vmul.f32 %v9100_v37, %v755_v14 }
 0x14e   : > { %v6475_v14 = vunpack.i.l.bf16 %v9184_v10  ;;  %v6560_v37 = vunpack.i.l.bf16 %v9278_v8  ;;  %v6556_v23 = vunpack.i.h.bf16 %v9268_v40  ;;  %v6566_v10 = vunpack.i.h.bf16 %v9280_v59 }
 0x14f   : > { %v9293_v24 = vpop.permute.xlu0 %6568  ;;  %v9295_v55 = vpop.permute.xlu1 %6573  ;;  %12971 = vst [vmem:[#allocation108_spill] sm:$0xff] %v9298_v31  ;;  %12972 = vst [vmem:[#allocation109_spill] sm:$0xff] %v9301_v28  ;;  %v9330_v43 = vpack.i.bf16 %v941_v48, %v940_v46  ;;  %v6565_v46 = vunpack.i.l.bf16 %v9280_v59 }
 0x150   : > { %v6570_v48 = vunpack.i.l.bf16 %v9293_v24  ;;  %v6576_v8 = vunpack.i.h.bf16 %v9295_v55  ;;  %v6575_v13 = vunpack.i.l.bf16 %v9295_v55 }
 0x151   : > { %6858 = vrot.lane.b32.xlu0 %v6857_v47, %s8158_s30  ;;  %6863 = vrot.lane.b32.xlu1 %v6857_v47, %s8159_s18  ;;  %v6481_v47 = vunpack.i.h.bf16 %v9188_v57  ;;  %v1824_v57 = vsel %vm1821_vm3, %v8617_v19, %v6480_v3  ;;  %v1822_v19 = vsel %vm1821_vm3, %v9298_v31, %v6475_v14 }
 0x152   : > { %v1857_v40 = vsel %vm1854_vm4, %v1824_v57, %v6560_v37  ;;  %v1855_v59 = vsel %vm1854_vm4, %v1822_v19, %v6555_v42 }
 0x153   : > { %v9318_v22 = vpop.permute.xlu0 %6578  ;;  %v6584_v15 = vpop.permute.xlu1 %6583  ;;  %v1890_v54 = vsel %vm1887_vm5, %v1857_v40, %v6566_v10 }
 0x154   : > { %v6586_v21 = vunpack.i.h.bf16 %v6584_v15  ;;  %v6585_v3 = vunpack.i.l.bf16 %v6584_v15 }
 0x155   : > { %6868 = vrot.lane.b32.xlu0 %v9311_v52, %s8159_s18  ;;  %6873 = vrot.lane.b32.xlu1 %v6817_v11, %s8160_s28  ;;  %v1825_v11 = vsel %vm1821_vm3, %v8592_v9, %v6481_v47  ;;  %v1823_v9 = vsel %vm1821_vm3, %v9301_v28, %v6476_v50 }
 0x156   : > { %v1856_v47 = vsel %vm1854_vm4, %v1823_v9, %v6556_v23  ;;  %v1858_v37 = vsel %vm1854_vm4, %v1825_v11, %v6561_v6  ;;  %v6581_v6 = vunpack.i.h.bf16 %v9318_v22 }
 0x157   : > { %v6589_v5 = vpop.permute.xlu0 %6588  ;;  %v6594_v36 = vpop.permute.xlu1 %6593  ;;  %v1889_v4 = vsel %vm1887_vm5, %v1856_v47, %v6565_v46  ;;  %v1891_v50 = vsel %vm1887_vm5, %v1858_v37, %v6570_v48 }
 0x158   : > { %v6596_v14 = vunpack.i.h.bf16 %v6594_v36  ;;  %v6595_v57 = vunpack.i.l.bf16 %v6594_v36  ;;  %v1922_v15 = vsel %vm1920_vm6, %v1889_v4, %v6576_v8  ;;  %v6580_v36 = vunpack.i.l.bf16 %v9318_v22 }
 0x159   : > { %6878 = vrot.lane.b32.xlu0 %v9258_v25, %s8160_s28  ;;  %6883 = vrot.lane.b32.xlu1 %v9258_v25, %s8161_s29  ;;  %v1888_v25 = vsel %vm1887_vm5, %v1855_v59, %v6565_v46  ;;  %v1955_v10 = vsel %vm1953_vm7, %v1922_v15, %v6586_v21  ;;  %v6591_v46 = vunpack.i.h.bf16 %v6589_v5  ;;  %v6590_v48 = vunpack.i.l.bf16 %v6589_v5 }
 0x15a   : > { %v1921_v42 = vsel %vm1920_vm6, %v1888_v25, %v6575_v13  ;;  %v1988_v8 = vsel %vm1986_vm8, %v1955_v10, %v6596_v14  ;;  %v1923_v21 = vsel %vm1920_vm6, %v1890_v54, %v6580_v36 }
 0x15b   : > { %v6599_v55 = vpop.permute.xlu0 %6598  ;;  %v6604_v31 = vpop.permute.xlu1 %6603  ;;  %v1954_v11 = vsel %vm1953_vm7, %v1921_v42, %v6585_v3  ;;  %v1924_v3 = vsel %vm1920_vm6, %v1891_v50, %v6581_v6 }
 0x15c   : > { %v6606_v23 = vunpack.i.h.bf16 %v6604_v31  ;;  %v6605_v19 = vunpack.i.l.bf16 %v6604_v31  ;;  %v1987_v31 = vsel %vm1986_vm8, %v1954_v11, %v6595_v57  ;;  %v6601_v13 = vunpack.i.h.bf16 %v6599_v55 }
 0x15d   : > { %6888 = vrot.lane.b32.xlu0 %v9330_v43, %s8161_s29  ;;  %6893 = vrot.lane.b32.xlu1 %v9330_v43, %s8162_s11  ;;  %v6600_v9 = vunpack.i.l.bf16 %v6599_v55  ;;  %v1956_v55 = vsel %vm1953_vm7, %v1923_v21, %v6590_v48  ;;  %v1957_v42 = vsel %vm1953_vm7, %v1924_v3, %v6591_v46  ;;  %v12973_v46 = vpack.i.bf16 %v8775_v51, %v8750_v35 }
 0x15e   : > { %v2020_v5 = vsel %vm2019_vm9, %v1987_v31, %v6605_v19  ;;  %v2021_v22 = vsel %vm2019_vm9, %v1988_v8, %v6606_v23  ;;  %v6917_v19 = vpack.i.bf16 %v8803_v34, %v8778_v26  ;;  %v1990_v54 = vsel %vm1986_vm8, %v1957_v42, %v6601_v13 }
 0x15f   : > { %v6609_v40 = vpop.permute.xlu0 %6608  ;;  %v6614_v4 = vpop.permute.xlu1 %6613  ;;  %v1989_v23 = vsel %vm1986_vm8, %v1956_v55, %v6600_v9  ;;  %v733_v26 = vrot.slane %v8806_v63, 1  ;;  %v735_v31 = vrot.slane %v8834_v17, 1  ;;  %v736_v8 = vrot.slane %v8859_v53, 1  ;;  %v12979_v53 = vld [vmem:[#allocation53_spill] sm:$0xff] }
 0x160   : > { %v6616_v59 = vunpack.i.h.bf16 %v6614_v4  ;;  %v6615_v47 = vunpack.i.l.bf16 %v6614_v4  ;;  %v6611_v37 = vunpack.i.h.bf16 %v6609_v40  ;;  %v6610_v25 = vunpack.i.l.bf16 %v6609_v40 }
 0x161   : > { %6898 = vrot.lane.b32.xlu0 %v9336_v27, %s8162_s11  ;;  %6903 = vrot.lane.b32.xlu1 %v8881_v33, %s8155_s26  ;;  %v734_v4 = vrot.slane %v8831_v2, 1  ;;  %v6927_v35 = vpack.i.bf16 %v8806_v63, %v8803_v34  ;;  %v12974_v51 = vrot.slane %v8803_v34, 1  ;;  %v6937_v34 = vpack.i.bf16 %v8834_v17, %v8831_v2 }
 0x162   : > { %v2053_v14 = vsel %vm2052_vm10, %v2020_v5, %v6615_v47  ;;  %v2054_v57 = vsel %vm2052_vm10, %v2021_v22, %v6616_v59  ;;  %v2022_v36 = vsel %vm2019_vm9, %v1989_v23, %v6610_v25  ;;  %v2023_v10 = vsel %vm2019_vm9, %v1990_v54, %v6611_v37 }
 0x163   : > { %v6619_v15 = vpop.permute.xlu0 %6618  ;;  %v9385_v11 = vpop.permute.xlu1 %6623  ;;  %v2085_v33 = vpack.c.bf16 %v2054_v57, %v2053_v14  ;;  %v752_v59 = vsel %vm742_vm0, %v12974_v51, %v733_v26  ;;  %v751_v47 = vsel %vm742_vm0, %v733_v26, %v734_v4  ;;  %v750_v37 = vsel %vm742_vm0, %v734_v4, %v735_v31 }
 0x164   : > { %v6621_v50 = vunpack.i.h.bf16 %v6619_v15  ;;  %v6620_v6 = vunpack.i.l.bf16 %v6619_v15  ;;  %v944_v22 = vmul.f32 %v9118_v58, %v752_v59  ;;  %v945_v21 = vmul.f32 %v9120_v32, %v751_v47 }
 0x165   : > { %6908 = vrot.lane.b32.xlu0 %v8903_v61, %s8155_s26  ;;  %6913 = vrot.lane.b32.xlu1 %v12973_v46, %s8157_s27  ;;  %v946_v3 = vmul.f32 %v9124_v20, %v750_v37  ;;  %v6491_v57 = vunpack.i.h.bf16 %v9194_v56  ;;  %v6490_v55 = vunpack.i.l.bf16 %v9194_v56  ;;  %v6982_v17 = vpack.i.bf16 %v8831_v2, %v8806_v63  ;;  %v9528_v2 = vld [vmem:[%s8484_s21 + $0xf0] sm:$0xff] }
 0x166   : > { %v2055_v48 = vsel %vm2052_vm10, %v2022_v36, %v6620_v6  ;;  %v2056_v40 = vsel %vm2052_vm10, %v2023_v10, %v6621_v50  ;;  %6298 = vmatprep.mubr.msk.bf16.mxu0 %vm2128_vm11, %v2085_v33  ;;  %v6485_v33 = vunpack.i.l.bf16 %v9192_v12  ;;  %v6486_v54 = vunpack.i.h.bf16 %v9192_v12 }
 0x167   : > { %v6629_v61 = vpop.permute.xlu0 %6628  ;;  %v6634_v13 = vpop.permute.xlu1 %6633  ;;  %v2086_v9 = vpack.c.bf16 %v2056_v40, %v2055_v48  ;;  %v9446_v50 = vpack.i.bf16 %v945_v21, %v944_v22  ;;  %v1829_v6 = vsel %vm1821_vm3, %v8640_v29, %v6491_v57  ;;  %v1828_v36 = vsel %vm1821_vm3, %v8643_v30, %v6490_v55  ;;  %v12975_v40 = vld [vmem:[#allocation12_spill] sm:$0xff]  ;;  %v12976_v30 = vld [vmem:[#allocation11_spill] sm:$0xff] }
 0x168   : > { %v6630_v23 = vunpack.i.l.bf16 %v6629_v61  ;;  %v6626_v10 = vunpack.i.h.bf16 %v9385_v11  ;;  %v6631_v46 = vunpack.i.h.bf16 %v6629_v61  ;;  %v6636_v4 = vunpack.i.h.bf16 %v6634_v13 }
 0x169   : > { %6918 = vrot.lane.b32.xlu0 %v6917_v19, %s8157_s27  ;;  %6923 = vrot.lane.b32.xlu1 %v9311_v52, %s8158_s30  ;;  %v749_v52 = vsel %vm742_vm0, %v735_v31, %v736_v8  ;;  %v6625_v19 = vunpack.i.l.bf16 %v9385_v11  ;;  %v6635_v12 = vunpack.i.l.bf16 %v6634_v13  ;;  %v1827_v11 = vsel %vm1821_vm3, %v12976_v30, %v6486_v54 }
 0x16a   : > { %6299 = vmatmul.mubr.msk.bf16.vlgmr.msra.gmra.mxu0 %vm2128_vm11, %v2086_v9  ;;  %v947_v14 = vmul.f32 %v9126_v62, %v749_v52  ;;  %v6571_v61 = vunpack.i.h.bf16 %v9293_v24  ;;  %v1860_v47 = vsel %vm1854_vm4, %v1827_v11, %v6626_v10  ;;  %v1862_v37 = vsel %vm1854_vm4, %v1829_v6, %v6631_v46 }
 0x16b   : > { %v9424_v25 = vpop.permute.xlu0 %6638  ;;  %v6644_v5 = vpop.permute.xlu1 %6643 }
 0x16c   : > { %v9448_v56 = vpack.i.bf16 %v947_v14, %v946_v3  ;;  %v6640_v31 = vunpack.i.l.bf16 %v9424_v25  ;;  %v6646_v29 = vunpack.i.h.bf16 %v6644_v5  ;;  %v6645_v51 = vunpack.i.l.bf16 %v6644_v5 }
 0x16d   : > { %6928 = vrot.lane.b32.xlu0 %v6927_v35, %s8158_s30  ;;  %6933 = vrot.lane.b32.xlu1 %v6927_v35, %s8159_s18  ;;  %v1861_v35 = vsel %vm1854_vm4, %v1828_v36, %v6630_v23  ;;  %v1893_v3 = vsel %vm1887_vm5, %v1860_v47, %v6635_v12 }
 0x16e   : > { %v1894_v21 = vsel %vm1887_vm5, %v1861_v35, %v6636_v4  ;;  %v1926_v57 = vsel %vm1920_vm6, %v1893_v3, %v6646_v29 }
 0x16f   : > { %v9436_v42 = vpop.permute.xlu0 %6648  ;;  %v6654_v15 = vpop.permute.xlu1 %6653 }
 0x170   : > { %v6656_v13 = vunpack.i.h.bf16 %v6654_v15  ;;  %v6655_v59 = vunpack.i.l.bf16 %v6654_v15 }
 0x171   : > { %6938 = vrot.lane.b32.xlu0 %v6937_v34, %s8159_s18  ;;  %6943 = vrot.lane.b32.xlu1 %v9330_v43, %s8160_s28  ;;  %v1826_v43 = vsel %vm1821_vm3, %v12975_v40, %v6485_v33  ;;  %v6651_v33 = vunpack.i.h.bf16 %v9436_v42 }
 0x172   : > { %v1859_v9 = vsel %vm1854_vm4, %v1826_v43, %v6625_v19  ;;  %v6650_v19 = vunpack.i.l.bf16 %v9436_v42  ;;  %v1959_v54 = vsel %vm1953_vm7, %v1926_v57, %v6656_v13 }
 0x173   : > { %v6659_v26 = vpop.permute.xlu0 %6658  ;;  %v6664_v48 = vpop.permute.xlu1 %6663  ;;  %v1892_v14 = vsel %vm1887_vm5, %v1859_v9, %v6571_v61 }
 0x174   : > { %v6666_v52 = vunpack.i.h.bf16 %v6664_v48  ;;  %v6665_v34 = vunpack.i.l.bf16 %v6664_v48  ;;  %v1925_v24 = vsel %vm1920_vm6, %v1892_v14, %v6645_v51  ;;  %v6661_v6 = vunpack.i.h.bf16 %v6659_v26 }
 0x175   : > { %6948 = vrot.lane.b32.xlu0 %v9336_v27, %s8160_s28  ;;  %6953 = vrot.lane.b32.xlu1 %v9336_v27, %s8161_s29  ;;  %v1895_v27 = vsel %vm1887_vm5, %v1862_v37, %v6640_v31  ;;  %v1958_v23 = vsel %vm1953_vm7, %v1925_v24, %v6655_v59  ;;  %v6660_v36 = vunpack.i.l.bf16 %v6659_v26  ;;  %v12977_v26 = vld [vmem:[#allocation58_spill] sm:$0xff]  ;;  %v1927_v51 = vsel %vm1920_vm6, %v1894_v21, %v6650_v19  ;;  %v9513_v19 = vld [vmem:[%s8484_s21 + $0xd8] sm:$0xff] }
 0x176   : > { %v1991_v10 = vsel %vm1986_vm8, %v1958_v23, %v6665_v34  ;;  %v1992_v46 = vsel %vm1986_vm8, %v1959_v54, %v6666_v52  ;;  %v1928_v30 = vsel %vm1920_vm6, %v1895_v27, %v6651_v33  ;;  %v8078_v34 = vld [vmem:[%s8484_s21 + $0xc8] sm:$0xff]  ;;  %v737_v23 = vrot.slane %v9513_v19, 1  ;;  %v9517_v54 = vld [vmem:[%s8484_s21 + $0xe0] sm:$0xff] }
 0x177   : > { %v6669_v5 = vpop.permute.xlu0 %6668  ;;  %v6674_v22 = vpop.permute.xlu1 %6673  ;;  %v1960_v13 = vsel %vm1953_vm7, %v1927_v51, %v6660_v36  ;;  %v1961_v59 = vsel %vm1953_vm7, %v1928_v30, %v6661_v6  ;;  %v738_v6 = vrot.slane %v9517_v54, 1 }
 0x178   : > { %v6676_v55 = vunpack.i.h.bf16 %v6674_v22  ;;  %v6675_v15 = vunpack.i.l.bf16 %v6674_v22  ;;  %v6671_v43 = vunpack.i.h.bf16 %v6669_v5  ;;  %v6670_v4 = vunpack.i.l.bf16 %v6669_v5  ;;  %v8079_v5 = vld [vmem:[%s8484_s21 + $0xd0] sm:$0xff] }
 0x179   : > { %6958 = vrot.lane.b32.xlu0 %v9446_v50, %s8161_s29  ;;  %6963 = vrot.lane.b32.xlu1 %v9446_v50, %s8162_s11  ;;  %v6987_v22 = vpack.i.bf16 %v8079_v5, %v8078_v34 }
 0x17a   : > { %v2024_v9 = vsel %vm2019_vm9, %v1991_v10, %v6675_v15  ;;  %v2025_v42 = vsel %vm2019_vm9, %v1992_v46, %v6676_v55  ;;  %v1993_v21 = vsel %vm1986_vm8, %v1960_v13, %v6670_v4  ;;  %v1994_v3 = vsel %vm1986_vm8, %v1961_v59, %v6671_v43  ;;  %v12978_v55 = vld [vmem:[#allocation63_spill] sm:$0xff]  ;;  %v8080_v15 = vld [vmem:[%s8484_s21 + $0xc0] sm:$0xff]  ;;  %v9524_v46 = vld [vmem:[%s8484_s21 + $0xe8] sm:$0xff] }
 0x17b   : > { %v6679_v48 = vpop.permute.xlu0 %6678  ;;  %v6684_v40 = vpop.permute.xlu1 %6683  ;;  %v6992_v33 = vpack.i.bf16 %v8078_v34, %v8080_v15  ;;  %v739_v63 = vrot.slane %v9524_v46, 1  ;;  %v6997_v4 = vpack.i.bf16 %v9513_v19, %v8079_v5  ;;  %v12982_v59 = vld [vmem:[#allocation99_spill] sm:$0xff]  ;;  %v6500_v34 = vunpack.i.l.bf16 %v9208_v18 }
 0x17c   : > { %v6686_v12 = vunpack.i.h.bf16 %v6684_v40  ;;  %v6685_v31 = vunpack.i.l.bf16 %v6684_v40  ;;  %v6681_v35 = vunpack.i.h.bf16 %v6679_v48  ;;  %v6680_v29 = vunpack.i.l.bf16 %v6679_v48 }
 0x17d   : > { %6968 = vrot.lane.b32.xlu0 %v9448_v56, %s8162_s11  ;;  %6973 = vrot.lane.b32.xlu1 %v12977_v26, %s8155_s26  ;;  %v12980_v26 = vrot.slane %v12979_v53, 7  ;;  %v6496_v15 = vunpack.i.h.bf16 %v9199_v1 }
 0x17e   : > { %v2057_v11 = vsel %vm2052_vm10, %v2024_v9, %v6685_v31  ;;  %v2058_v61 = vsel %vm2052_vm10, %v2025_v42, %v6686_v12  ;;  %v2026_v24 = vsel %vm2019_vm9, %v1993_v21, %v6680_v29  ;;  %v2027_v57 = vsel %vm2019_vm9, %v1994_v3, %v6681_v35  ;;  %v12983_v21 = vld [vmem:[#allocation67_spill] sm:$0xff] }
 0x17f   : > { %v6689_v47 = vpop.permute.xlu0 %6688  ;;  %v9497_v37 = vpop.permute.xlu1 %6693  ;;  %v2087_v52 = vpack.c.bf16 %v2058_v61, %v2057_v11  ;;  %v748_v12 = vsel %vm742_vm0, %v736_v8, %v737_v23  ;;  %v747_v31 = vsel %vm742_vm0, %v737_v23, %v738_v6  ;;  %v746_v9 = vsel %vm742_vm0, %v738_v6, %v739_v63  ;;  %v12981_v61 = vld [vmem:[#allocation98_spill] sm:$0xff]  ;;  %v12986_v6 = vld [vmem:[#allocation19_spill] sm:$0xff] }
 0x180   : > { %v6691_v27 = vunpack.i.h.bf16 %v6689_v47  ;;  %v6690_v14 = vunpack.i.l.bf16 %v6689_v47  ;;  %v461_v8 = vsel %vm460_vm1, %v12980_v26, 0.0  ;;  %v948_v51 = vmul.f32 %v9133_v45, %v748_v12 }
 0x181   : > { %6978 = vrot.lane.b32.xlu0 %v12978_v55, %s8155_s26  ;;  %6983 = vrot.lane.b32.xlu1 %v6982_v17, %s8157_s27  ;;  %v740_v17 = vrot.slane %v9528_v2, 1  ;;  %v949_v30 = vmul.f32 %v9135_v49, %v747_v31  ;;  %v9561_v11 = vpack.i.bf16 %v9524_v46, %v9517_v54  ;;  %v950_v13 = vmul.f32 %v12981_v61, %v746_v9  ;;  %v12988_v31 = vld [vmem:[#allocation16_spill] sm:$0xff] }
 0x182   : > { %v2059_v36 = vsel %vm2052_vm10, %v2026_v24, %v6690_v14  ;;  %v2060_v10 = vsel %vm2052_vm10, %v2027_v57, %v6691_v27  ;;  %6302 = vmatprep.mubr.msk.bf16.mxu0 %vm2128_vm11, %v2087_v52  ;;  %v6501_v52 = vunpack.i.h.bf16 %v9208_v18  ;;  %v9570_v3 = vmul.f32 0.0, %v12983_v21  ;;  %v12985_v27 = vld [vmem:[#allocation68_spill] sm:$0xff] }
 0x183   : > { %v6699_v48 = vpop.permute.xlu0 %6698  ;;  %v9531_v40 = vpop.permute.xlu1 %6703  ;;  %v2088_v43 = vpack.c.bf16 %v2060_v10, %v2059_v36  ;;  %v745_v42 = vsel %vm742_vm0, %v739_v63, %v740_v17  ;;  %v9573_v14 = vmul.f32 %v12985_v27, %v461_v8  ;;  %v6495_v24 = vunpack.i.l.bf16 %v9199_v1  ;;  %v12987_v10 = vld [vmem:[#allocation20_spill] sm:$0xff] }
 0x184   : > { %v951_v47 = vmul.f32 %v12982_v59, %v745_v42  ;;  %12984 = vst [vmem:[#allocation12_spill] sm:$0xff] %v9570_v3  ;;  %v6695_v57 = vunpack.i.l.bf16 %v9497_v37  ;;  %v6700_v55 = vunpack.i.l.bf16 %v6699_v48  ;;  %v9581_v18 = vpack.i.bf16 %v949_v30, %v948_v51 }
 0x185   : > { %6988 = vrot.lane.b32.xlu0 %v6987_v22, %s8157_s27  ;;  %6993 = vrot.lane.b32.xlu1 %v6992_v33, %s8158_s30  ;;  %v7052_v23 = vpack.i.bf16 %v9517_v54, %v9513_v19  ;;  %v1833_v36 = vsel %vm1821_vm3, %v12986_v6, %v6501_v52  ;;  %v1832_v63 = vsel %vm1821_vm3, %v12987_v10, %v6500_v34  ;;  %v6706_v1 = vunpack.i.h.bf16 %v9531_v40 }
 0x186   : > { %6303 = vmatmul.mubr.msk.bf16.gmra.mxu0 %vm2128_vm11, %v2088_v43  ;;  %v9584_v33 = vpack.i.bf16 %v951_v47, %v950_v13  ;;  %v6696_v43 = vunpack.i.h.bf16 %v9497_v37  ;;  %v1830_v9 = vsel %vm1821_vm3, %v12988_v31, %v6495_v24  ;;  %v6705_v42 = vunpack.i.l.bf16 %v9531_v40  ;;  %v12989_v37 = vld [vmem:[#allocation15_spill] sm:$0xff] }
 0x187   : > { %v9549_v35 = vpop.permute.xlu0 %6708  ;;  %v6714_v29 = vpop.permute.xlu1 %6713  ;;  %v1863_v26 = vsel %vm1854_vm4, %v1830_v9, %v6695_v57  ;;  %v1865_v8 = vsel %vm1854_vm4, %v1832_v63, %v6700_v55  ;;  %v6641_v13 = vunpack.i.h.bf16 %v9424_v25 }
 0x188   : > { %v6710_v53 = vunpack.i.l.bf16 %v9549_v35  ;;  %v6716_v51 = vunpack.i.h.bf16 %v6714_v29  ;;  %v6715_v30 = vunpack.i.l.bf16 %v6714_v29  ;;  %v1898_v55 = vsel %vm1887_vm5, %v1865_v8, %v6706_v1 }
 0x189   : > { %6998 = vrot.lane.b32.xlu0 %v6997_v4, %s8158_s30  ;;  %7003 = vrot.lane.b32.xlu1 %v6997_v4, %s8159_s18  ;;  %v6701_v4 = vunpack.i.h.bf16 %v6699_v48  ;;  %v1831_v48 = vsel %vm1821_vm3, %v12989_v37, %v6496_v15  ;;  %v1896_v15 = vsel %vm1887_vm5, %v1863_v26, %v6641_v13 }
 0x18a   : > { %v1864_v52 = vsel %vm1854_vm4, %v1831_v48, %v6696_v43  ;;  %v1929_v25 = vsel %vm1920_vm6, %v1896_v15, %v6715_v30  ;;  %v7047_v15 = vpack.i.bf16 %v9570_v3, %v9573_v14  ;;  %v13067_v3 = vld [vmem:[#allocation25_spill] sm:$0xff] }
 0x18b   : > { %v9567_v5 = vpop.permute.xlu0 %6718  ;;  %v6724_v22 = vpop.permute.xlu1 %6723  ;;  %v1866_v34 = vsel %vm1854_vm4, %v1833_v36, %v6701_v4  ;;  %v1897_v6 = vsel %vm1887_vm5, %v1864_v52, %v6705_v42 }
 0x18c   : > { %v6726_v40 = vunpack.i.h.bf16 %v6724_v22  ;;  %v6725_v47 = vunpack.i.l.bf16 %v6724_v22  ;;  %v1930_v22 = vsel %vm1920_vm6, %v1897_v6, %v6716_v51  ;;  %v6721_v36 = vunpack.i.h.bf16 %v9567_v5 }
 0x18d   : > { %7008 = vrot.lane.b32.xlu0 %v9561_v11, %s8159_s18  ;;  %7013 = vrot.lane.b32.xlu1 %v9446_v50, %s8160_s28  ;;  %v6720_v43 = vunpack.i.l.bf16 %v9567_v5 }
 0x18e   : > { %v1962_v4 = vsel %vm1953_vm7, %v1929_v25, %v6725_v47 }
 0x18f   : > { %v6729_v12 = vpop.permute.xlu0 %6728  ;;  %v6734_v50 = vpop.permute.xlu1 %6733 }
 0x190   : > { %v6736_v21 = vunpack.i.h.bf16 %v6734_v50  ;;  %v6735_v24 = vunpack.i.l.bf16 %v6734_v50  ;;  %v1963_v50 = vsel %vm1953_vm7, %v1930_v22, %v6726_v40  ;;  %v6731_v31 = vunpack.i.h.bf16 %v6729_v12 }
 0x191   : > { %7018 = vrot.lane.b32.xlu0 %v9448_v56, %s8160_s28  ;;  %7023 = vrot.lane.b32.xlu1 %v9448_v56, %s8161_s29  ;;  %v1899_v56 = vsel %vm1887_vm5, %v1866_v34, %v6710_v53  ;;  %v6730_v9 = vunpack.i.l.bf16 %v6729_v12  ;;  %v12990_v12 = vld [vmem:[#allocation66_spill] sm:$0xff]  ;;  %v1931_v40 = vsel %vm1920_vm6, %v1898_v55, %v6720_v43  ;;  %v8085_v43 = vld [vmem:[%s8484_s21 + $0xf8] sm:$0xff] }
 0x192   : > { %v1995_v1 = vsel %vm1986_vm8, %v1962_v4, %v6735_v24  ;;  %v1996_v42 = vsel %vm1986_vm8, %v1963_v50, %v6736_v21  ;;  %v1932_v52 = vsel %vm1920_vm6, %v1899_v56, %v6721_v36  ;;  %v741_v14 = vrot.slane %v8085_v43, 1 }
 0x193   : > { %v6739_v29 = vpop.permute.xlu0 %6738  ;;  %v6744_v57 = vpop.permute.xlu1 %6743  ;;  %v1964_v24 = vsel %vm1953_vm7, %v1931_v40, %v6730_v9  ;;  %v7062_v19 = vpack.i.bf16 %v8085_v43, %v9528_v2  ;;  %v6510_v2 = vunpack.i.l.bf16 %v9218_v0  ;;  %v6506_v40 = vunpack.i.h.bf16 %v9210_v7 }
 0x194   : > { %v6746_v10 = vunpack.i.h.bf16 %v6744_v57  ;;  %v6745_v63 = vunpack.i.l.bf16 %v6744_v57  ;;  %v6741_v8 = vunpack.i.h.bf16 %v6739_v29  ;;  %v6740_v51 = vunpack.i.l.bf16 %v6739_v29 }
 0x195   : > { %7028 = vrot.lane.b32.xlu0 %v9581_v18, %s8161_s29  ;;  %7033 = vrot.lane.b32.xlu1 %v9581_v18, %s8162_s11  ;;  %v1965_v29 = vsel %vm1953_vm7, %v1932_v52, %v6731_v31  ;;  %v744_v54 = vsel %vm742_vm0, %v740_v17, %v741_v14  ;;  %v6505_v17 = vunpack.i.l.bf16 %v9210_v7  ;;  %v12994_v52 = vld [vmem:[#allocation28_spill] sm:$0xff] }
 0x196   : > { %v2028_v48 = vsel %vm2019_vm9, %v1995_v1, %v6745_v63  ;;  %v2029_v5 = vsel %vm2019_vm9, %v1996_v42, %v6746_v10  ;;  %v1997_v55 = vsel %vm1986_vm8, %v1964_v24, %v6740_v51  ;;  %v1998_v56 = vsel %vm1986_vm8, %v1965_v29, %v6741_v8  ;;  %v12992_v8 = vld [vmem:[#allocation101_spill] sm:$0xff] }
 0x197   : > { %v6749_v53 = vpop.permute.xlu0 %6748  ;;  %v6754_v26 = vpop.permute.xlu1 %6753 }
 0x198   : > { %v6756_v30 = vunpack.i.h.bf16 %v6754_v26  ;;  %v6755_v37 = vunpack.i.l.bf16 %v6754_v26  ;;  %v6751_v13 = vunpack.i.h.bf16 %v6749_v53  ;;  %v6750_v47 = vunpack.i.l.bf16 %v6749_v53  ;;  %v12991_v26 = vld [vmem:[#allocation100_spill] sm:$0xff] }
 0x199   : > { %7038 = vrot.lane.b32.xlu0 %v9584_v33, %s8162_s11  ;;  %7043 = vrot.lane.b32.xlu1 %v12990_v12, %s8155_s26  ;;  %v6511_v12 = vunpack.i.h.bf16 %v9218_v0 }
 0x19a   : > { %v2061_v34 = vsel %vm2052_vm10, %v2028_v48, %v6755_v37  ;;  %v2062_v21 = vsel %vm2052_vm10, %v2029_v5, %v6756_v30  ;;  %v2030_v63 = vsel %vm2019_vm9, %v1997_v55, %v6750_v47  ;;  %v2031_v36 = vsel %vm2019_vm9, %v1998_v56, %v6751_v13 }
 0x19b   : > { %v6759_v57 = vpop.permute.xlu0 %6758  ;;  %v9637_v6 = vpop.permute.xlu1 %6763  ;;  %v2089_v25 = vpack.c.bf16 %v2062_v21, %v2061_v34  ;;  %v12993_v5 = vmov 0.0   ;;  %v7097_v47 = vpack.i.bf16 %v9170_v44, %v9168_v60  ;;  %v1836_v34 = vsel %vm1821_vm3, %v12994_v52, %v6510_v2  ;;  %v12995_v21 = vld [vmem:[#allocation24_spill] sm:$0xff] }
 0x19c   : > { %v6761_v22 = vunpack.i.h.bf16 %v6759_v57  ;;  %v6760_v10 = vunpack.i.l.bf16 %v6759_v57  ;;  %v6765_v37 = vunpack.i.l.bf16 %v9637_v6  ;;  %v1834_v24 = vsel %vm1821_vm3, %v12995_v21, %v6505_v17 }
 0x19d   : > { %7048 = vrot.lane.b32.xlu0 %v7047_v15, %s8155_s26  ;;  %7053 = vrot.lane.b32.xlu1 %v7052_v23, %s8157_s27  ;;  %v743_v23 = vsel %vm742_vm0, %v741_v14, 0.0  ;;  %v6766_v29 = vunpack.i.h.bf16 %v9637_v6  ;;  %v12996_v6 = vld [vmem:[#allocation27_spill] sm:$0xff]  ;;  %s350_s26 = sand.u32 1, %s8142_s14  }
 0x19e   : > { %v2063_v4 = vsel %vm2052_vm10, %v2030_v63, %v6760_v10  ;;  %v2064_v50 = vsel %vm2052_vm10, %v2031_v36, %v6761_v22  ;;  %6306 = vmatprep.mubr.msk.bf16.mxu0 %vm2128_vm11, %v2089_v25  ;;  %v953_v51 = vmul.f32 %v12992_v8, %v743_v23  ;;  %v1867_v60 = vsel %vm1854_vm4, %v1834_v24, %v6765_v37 }
 0x19f   : > { %v6769_v31 = vpop.permute.xlu0 %6768  ;;  %v6774_v9 = vpop.permute.xlu1 %6773  ;;  %v2090_v1 = vpack.c.bf16 %v2064_v50, %v2063_v4  ;;  %v1837_v10 = vsel %vm1821_vm3, %v12996_v6, %v6511_v12 }
 0x1a0   : > { %v6770_v48 = vunpack.i.l.bf16 %v6769_v31  ;;  %v6771_v57 = vunpack.i.h.bf16 %v6769_v31  ;;  %v6776_v55 = vunpack.i.h.bf16 %v6774_v9  ;;  %v6775_v56 = vunpack.i.l.bf16 %v6774_v9 }
 0x1a1   : > { %1273 = vrot.lane.b32.xlu0 %v9524_v46, %s8157_s27  ;;  %7058 = vrot.lane.b32.xlu1 %v9561_v11, %s8158_s30  ;;  %v952_v46 = vmul.f32 %v12991_v26, %v744_v54  ;;  %s8094_s27 = sshll.u32 %s8166_s17, 4  ;;  %s8095_s27 = int_to_ptr.vmem [resolvable:$false] %s8094_s27 }
 0x1a2   : > { %6307 = vmatmul.mubr.msk.bf16.gmra.mxu0 %vm2128_vm11, %v2090_v1  ;;  %v1869_v7 = vsel %vm1854_vm4, %v1836_v34, %v6770_v48  ;;  %v1870_v4 = vsel %vm1854_vm4, %v1837_v10, %v6771_v57 }
 0x1a3   : > { %v9666_v42 = vpop.permute.xlu0 %6778  ;;  %v6784_v53 = vpop.permute.xlu1 %6783  ;;  %v7087_v13 = vpack.i.bf16 %v953_v51, %v952_v46 }
 0x1a4   : > { %v6780_v44 = vunpack.i.l.bf16 %v9666_v42  ;;  %v6786_v0 = vunpack.i.h.bf16 %v6784_v53  ;;  %v6785_v22 = vunpack.i.l.bf16 %v6784_v53 }
 0x1a5   : > { %7063 = vrot.lane.b32.xlu0 %v7062_v19, %s8158_s30  ;;  %7068 = vrot.lane.b32.xlu1 %v7062_v19, %s8159_s18  ;;  %v1902_v19 = vsel %vm1887_vm5, %v1869_v7, %v6776_v55  ;;  %s8096_s30 = scalar_lea.vmem %s8095_s27, 32 }
 0x1a6   : > { %v1903_v54 = vsel %vm1887_vm5, %v1870_v4, %v6780_v44 }
 0x1a7   : > { %v9674_v11 = vpop.permute.xlu0 %6788  ;;  %v6794_v30 = vpop.permute.xlu1 %6793 }
 0x1a8   : > { %v6796_v36 = vunpack.i.h.bf16 %v6794_v30  ;;  %v6795_v43 = vunpack.i.l.bf16 %v6794_v30  ;;  %v6791_v17 = vunpack.i.h.bf16 %v9674_v11  ;;  %v6790_v30 = vunpack.i.l.bf16 %v9674_v11 }
 0x1a9   : > { %1464 = vrot.lane.b32.xlu0 %v12993_v5, %s8159_s18  ;;  %7073 = vrot.lane.b32.xlu1 %v9581_v18, %s8160_s28  ;;  %v6711_v18 = vunpack.i.h.bf16 %v9549_v35  ;;  %v12997_v35 = vld [vmem:[#allocation23_spill] sm:$0xff]  ;;  %s351_s18 = scalar_lea.vmem [#allocation2], %s350_s26 }
 0x1aa   : > { %v1835_v63 = vsel %vm1821_vm3, %v12997_v35, %v6506_v40  ;;  %v1936_v44 = vsel %vm1920_vm6, %v1903_v54, %v6791_v17 }
 0x1ab   : > { %v6799_v15 = vpop.permute.xlu0 %6798  ;;  %v6804_v25 = vpop.permute.xlu1 %6803  ;;  %v1868_v14 = vsel %vm1854_vm4, %v1835_v63, %v6766_v29  ;;  %v1900_v23 = vsel %vm1887_vm5, %v1867_v60, %v6711_v18 }
 0x1ac   : > { %v6806_v50 = vunpack.i.h.bf16 %v6804_v25  ;;  %v6805_v31 = vunpack.i.l.bf16 %v6804_v25  ;;  %v1933_v53 = vsel %vm1920_vm6, %v1900_v23, %v6785_v22  ;;  %v6801_v12 = vunpack.i.h.bf16 %v6799_v15 }
 0x1ad   : > { %7078 = vrot.lane.b32.xlu0 %v9584_v33, %s8160_s28  ;;  %7083 = vrot.lane.b32.xlu1 %v9584_v33, %s8161_s29  ;;  %v1901_v33 = vsel %vm1887_vm5, %v1868_v14, %v6775_v56  ;;  %v1966_v37 = vsel %vm1953_vm7, %v1933_v53, %v6795_v43  ;;  %v6800_v40 = vunpack.i.l.bf16 %v6799_v15  ;;  %v1935_v15 = vsel %vm1920_vm6, %v1902_v19, %v6790_v30  ;;  %s12547_s28 = scalar_lea.hbm %s12598_s10, %s6006_s12 }
 0x1ae   : > { %v1934_v46 = vsel %vm1920_vm6, %v1901_v33, %v6786_v0  ;;  %v1999_v52 = vsel %vm1986_vm8, %v1966_v37, %v6805_v31  ;;  %v1969_v22 = vsel %vm1953_vm7, %v1936_v44, %v6801_v12  ;;  %v6520_v23 = vunpack.i.l.bf16 %v9236_v16  ;;  %v13001_v44 = vld [vmem:[#allocation31_spill] sm:$0xff] }
 0x1af   : > { %v6809_v9 = vpop.permute.xlu0 %6808  ;;  %v6814_v1 = vpop.permute.xlu1 %6813  ;;  %v1967_v48 = vsel %vm1953_vm7, %v1934_v46, %v6796_v36  ;;  %v1968_v0 = vsel %vm1953_vm7, %v1935_v15, %v6800_v40  ;;  %v6515_v53 = vunpack.i.l.bf16 %v9220_v39  ;;  %v6521_v30 = vunpack.i.h.bf16 %v9236_v16  ;;  %v12999_v40 = vld [vmem:[#allocation32_spill] sm:$0xff] }
 0x1b0   : > { %v6816_v51 = vunpack.i.h.bf16 %v6814_v1  ;;  %v6815_v2 = vunpack.i.l.bf16 %v6814_v1  ;;  %v2000_v34 = vsel %vm1986_vm8, %v1967_v48, %v6806_v50  ;;  %v6811_v29 = vunpack.i.h.bf16 %v6809_v9  ;;  %v12998_v48 = vld [vmem:[#allocation36_spill] sm:$0xff] }
 0x1b1   : > { %7088 = vrot.lane.b32.xlu0 %v7087_v13, %s8161_s29  ;;  %7093 = vrot.lane.b32.xlu1 %v7087_v13, %s8162_s11  ;;  %v6810_v57 = vunpack.i.l.bf16 %v6809_v9  ;;  %v6516_v37 = vunpack.i.h.bf16 %v9220_v39  ;;  %v1840_v12 = vsel %vm1821_vm3, %v12998_v48, %v6520_v23  ;;  %s5840_s29 = scalar_lea.sflag [#allocation3], %s350_s26 }
 0x1b2   : > { %v2032_v18 = vsel %vm2019_vm9, %v1999_v52, %v6815_v2  ;;  %v2033_v11 = vsel %vm2019_vm9, %v2000_v34, %v6816_v51  ;;  %v2002_v36 = vsel %vm1986_vm8, %v1969_v22, %v6811_v29  ;;  %v1838_v52 = vsel %vm1821_vm3, %v12999_v40, %v6515_v53 }
 0x1b3   : > { %v6819_v21 = vpop.permute.xlu0 %6818  ;;  %v6824_v24 = vpop.permute.xlu1 %6823  ;;  %v2001_v63 = vsel %vm1986_vm8, %v1968_v0, %v6810_v57  ;;  %v6781_v57 = vunpack.i.h.bf16 %v9666_v42 }
 0x1b4   : > { %v6826_v25 = vunpack.i.h.bf16 %v6824_v24  ;;  %v6825_v13 = vunpack.i.l.bf16 %v6824_v24  ;;  %v6821_v55 = vunpack.i.h.bf16 %v6819_v21  ;;  %v6820_v56 = vunpack.i.l.bf16 %v6819_v21 }
 0x1b5   : > { %7098 = vrot.lane.b32.xlu0 %v7097_v47, %s8162_s11 }
 0x1b6   : > { %v2065_v60 = vsel %vm2052_vm10, %v2032_v18, %v6825_v13  ;;  %v2066_v7 = vsel %vm2052_vm10, %v2033_v11, %v6826_v25  ;;  %v2034_v14 = vsel %vm2019_vm9, %v2001_v63, %v6820_v56  ;;  %v2035_v4 = vsel %vm2019_vm9, %v2002_v36, %v6821_v55  ;;  %v13000_v56 = vld [vmem:[#allocation35_spill] sm:$0xff] }
 0x1b7   : > { %v6829_v6 = vpop.permute.xlu0 %6828  ;;  %v6834_v10 = vpop.permute.xlu1 %6833  ;;  %v2091_v35 = vpack.c.bf16 %v2066_v7, %v2065_v60  ;;  %v1841_v15 = vsel %vm1821_vm3, %v13000_v56, %v6521_v30  ;;  %v1839_v60 = vsel %vm1821_vm3, %v13001_v44, %v6516_v37 }
 0x1b8   : > { %v6831_v47 = vunpack.i.h.bf16 %v6829_v6  ;;  %v6830_v43 = vunpack.i.l.bf16 %v6829_v6  ;;  %v6835_v2 = vunpack.i.l.bf16 %v6834_v10  ;;  %v6836_v34 = vunpack.i.h.bf16 %v6834_v10 }
 0x1b9   : > { %6310 = vmatprep.mubr.msk.bf16.mxu0 %vm2128_vm11, %v2091_v35 }
 0x1ba   : > { %v2067_v50 = vsel %vm2052_vm10, %v2034_v14, %v6830_v43  ;;  %v2068_v31 = vsel %vm2052_vm10, %v2035_v4, %v6831_v47  ;;  %v1871_v16 = vsel %vm1854_vm4, %v1838_v52, %v6835_v2  ;;  %v1872_v42 = vsel %vm1854_vm4, %v1839_v60, %v6836_v34 }
 0x1bb   : > { %v6839_v9 = vpop.permute.xlu0 %6838  ;;  %v6844_v1 = vpop.permute.xlu1 %6843  ;;  %v2092_v19 = vpack.c.bf16 %v2068_v31, %v2067_v50  ;;  %v1904_v14 = vsel %vm1887_vm5, %v1871_v16, %v6781_v57  ;;  %v8041_v57 = vld [vmem:[%s12592_s4 + $0x80] sm:$0xff]  }
 0x1bc   : > { %v6840_v17 = vunpack.i.l.bf16 %v6839_v9  ;;  %v6841_v21 = vunpack.i.h.bf16 %v6839_v9  ;;  %v6846_v25 = vunpack.i.h.bf16 %v6844_v1  ;;  %v6845_v13 = vunpack.i.l.bf16 %v6844_v1 }
 0x1bd   : > { %6311 = vmatmul.mubr.msk.bf16.gmra.mxu0 %vm2128_vm11, %v2092_v19 }
 0x1be   : > { %v1873_v39 = vsel %vm1854_vm4, %v1840_v12, %v6840_v17  ;;  %v1874_v22 = vsel %vm1854_vm4, %v1841_v15, %v6841_v21  ;;  %v1905_v47 = vsel %vm1887_vm5, %v1872_v42, %v6845_v13 }
 0x1bf   : > { %v9735_v33 = vpop.permute.xlu0 %6848  ;;  %v6854_v54 = vpop.permute.xlu1 %6853  ;;  %v1906_v36 = vsel %vm1887_vm5, %v1873_v39, %v6846_v25 }
 0x1c0   : > { %v6850_v18 = vunpack.i.l.bf16 %v9735_v33  ;;  %v6856_v11 = vunpack.i.h.bf16 %v6854_v54  ;;  %v6855_v55 = vunpack.i.l.bf16 %v6854_v54 }
 0x1c2   : > { %v1907_v43 = vsel %vm1887_vm5, %v1874_v22, %v6850_v18  ;;  %v1937_v4 = vsel %vm1920_vm6, %v1904_v14, %v6855_v55  ;;  %v1938_v50 = vsel %vm1920_vm6, %v1905_v47, %v6856_v11  ;;  %v6525_v14 = vunpack.i.l.bf16 %v9238_v41 }
 0x1c3   : > { %v6859_v46 = vpop.permute.xlu0 %6858  ;;  %v6864_v51 = vpop.permute.xlu1 %6863 }
 0x1c4   : > { %v6866_v7 = vunpack.i.h.bf16 %v6864_v51  ;;  %v6865_v0 = vunpack.i.l.bf16 %v6864_v51  ;;  %v6861_v1 = vunpack.i.h.bf16 %v6859_v46  ;;  %v6860_v19 = vunpack.i.l.bf16 %v6859_v46 }
 0x1c6   : > { %v1970_v54 = vsel %vm1953_vm7, %v1937_v4, %v6865_v0  ;;  %v1971_v23 = vsel %vm1953_vm7, %v1938_v50, %v6866_v7  ;;  %v1939_v25 = vsel %vm1920_vm6, %v1906_v36, %v6860_v19  ;;  %v1940_v13 = vsel %vm1920_vm6, %v1907_v43, %v6861_v1  ;;  %v13002_v4 = vld [vmem:[#allocation103_spill] sm:$0xff] }
 0x1c7   : > { %v6869_v24 = vpop.permute.xlu0 %6868  ;;  %v6874_v29 = vpop.permute.xlu1 %6873  ;;  %v6530_v50 = vunpack.i.l.bf16 %v13002_v4 }
 0x1c8   : > { %v6876_v6 = vunpack.i.h.bf16 %v6874_v29  ;;  %v6875_v10 = vunpack.i.l.bf16 %v6874_v29  ;;  %v6871_v53 = vunpack.i.h.bf16 %v6869_v24  ;;  %v6870_v51 = vunpack.i.l.bf16 %v6869_v24  ;;  %v9770_v24 = vld [vmem:[%s12592_s4 + $0x88] sm:$0xff]  }
 0x1c9   : > { %6330 = vmatprep.subr.bf16.mxu0 %v9770_v24 }
 0x1ca   : > { %v2003_v2 = vsel %vm1986_vm8, %v1970_v54, %v6875_v10  ;;  %v2004_v17 = vsel %vm1986_vm8, %v1971_v23, %v6876_v6  ;;  %v1972_v39 = vsel %vm1953_vm7, %v1939_v25, %v6870_v51  ;;  %v1973_v11 = vsel %vm1953_vm7, %v1940_v13, %v6871_v53  ;;  %6331 = vmatpush3.bf16.msra.mxu0 %v9770_v24  ;;  %v13003_v53 = vld [vmem:[#allocation40_spill] sm:$0xff]  ;;  %v13005_v25 = vld [vmem:[#allocation39_spill] sm:$0xff] }
 0x1cb   : > { %v6879_v35 = vpop.permute.xlu0 %6878  ;;  %v6884_v63 = vpop.permute.xlu1 %6883  ;;  %6332 = vmatprep.subr.bf16.mxu0 %v8041_v57  ;;  %v6526_v54 = vunpack.i.h.bf16 %v9238_v41  ;;  %v6531_v23 = vunpack.i.h.bf16 %v13002_v4  ;;  %v1842_v51 = vsel %vm1821_vm3, %v13003_v53, %v6525_v14 }
 0x1cc   : > { %v6886_v31 = vunpack.i.h.bf16 %v6884_v63  ;;  %v6885_v9 = vunpack.i.l.bf16 %v6884_v63  ;;  %v6881_v48 = vunpack.i.h.bf16 %v6879_v35  ;;  %v6880_v12 = vunpack.i.l.bf16 %v6879_v35 }
 0x1cd   : > { %v1843_v13 = vsel %vm1821_vm3, %v13005_v25, %v6526_v54 }
 0x1ce   : > { %v2036_v34 = vsel %vm2019_vm9, %v2003_v2, %v6885_v9  ;;  %v2037_v46 = vsel %vm2019_vm9, %v2004_v17, %v6886_v31  ;;  %v2005_v44 = vsel %vm1986_vm8, %v1972_v39, %v6880_v12  ;;  %v2006_v60 = vsel %vm1986_vm8, %v1973_v11, %v6881_v48  ;;  %6333 = vmatpush3.bf16.msra.mxu0 %v8041_v57  ;;  %v13004_v2 = vld [vmem:[#allocation44_spill] sm:$0xff] }
 0x1cf   : > { %v6889_v30 = vpop.permute.xlu0 %6888  ;;  %v6894_v37 = vpop.permute.xlu1 %6893  ;;  %v1844_v17 = vsel %vm1821_vm3, %v13004_v2, %v6530_v50 }
 0x1d0   : > { %v6896_v40 = vunpack.i.h.bf16 %v6894_v37  ;;  %v6895_v52 = vunpack.i.l.bf16 %v6894_v37  ;;  %v6891_v21 = vunpack.i.h.bf16 %v6889_v30  ;;  %v6890_v29 = vunpack.i.l.bf16 %v6889_v30 }
 0x1d2   : > { %v2069_v18 = vsel %vm2052_vm10, %v2036_v34, %v6895_v52  ;;  %v2070_v16 = vsel %vm2052_vm10, %v2037_v46, %v6896_v40  ;;  %v2038_v42 = vsel %vm2019_vm9, %v2005_v44, %v6890_v29  ;;  %v2039_v22 = vsel %vm2019_vm9, %v2006_v60, %v6891_v21 }
 0x1d3   : > { %v6899_v55 = vpop.permute.xlu0 %6898  ;;  %v6904_v56 = vpop.permute.xlu1 %6903  ;;  %v2093_v15 = vpack.c.bf16 %v2070_v16, %v2069_v18  ;;  %v6851_v40 = vunpack.i.h.bf16 %v9735_v33  ;;  %v13006_v18 = vld [vmem:[#allocation43_spill] sm:$0xff] }
 0x1d4   : > { %v6901_v7 = vunpack.i.h.bf16 %v6899_v55  ;;  %v6900_v0 = vunpack.i.l.bf16 %v6899_v55  ;;  %v6905_v1 = vunpack.i.l.bf16 %v6904_v56  ;;  %v6906_v30 = vunpack.i.h.bf16 %v6904_v56 }
 0x1d5   : > { %6314 = vmatprep.mubr.msk.bf16.mxu0 %vm2128_vm11, %v2093_v15  ;;  %v1845_v16 = vsel %vm1821_vm3, %v13006_v18, %v6531_v23 }
 0x1d6   : > { %v2071_v6 = vsel %vm2052_vm10, %v2038_v42, %v6900_v0  ;;  %v2072_v10 = vsel %vm2052_vm10, %v2039_v22, %v6901_v7  ;;  %v1875_v41 = vsel %vm1854_vm4, %v1842_v51, %v6905_v1  ;;  %v1876_v33 = vsel %vm1854_vm4, %v1843_v13, %v6906_v30 }
 0x1d7   : > { %v6909_v35 = vpop.permute.xlu0 %6908  ;;  %v6914_v63 = vpop.permute.xlu1 %6913  ;;  %v2094_v36 = vpack.c.bf16 %v2072_v10, %v2071_v6  ;;  %v1908_v22 = vsel %vm1887_vm5, %v1875_v41, %v6851_v40 }
 0x1d8   : > { %v6910_v19 = vunpack.i.l.bf16 %v6909_v35  ;;  %v6911_v37 = vunpack.i.h.bf16 %v6909_v35  ;;  %v6916_v52 = vunpack.i.h.bf16 %v6914_v63  ;;  %v6915_v34 = vunpack.i.l.bf16 %v6914_v63 }
 0x1d9   : > { %6315 = vmatmul.mubr.msk.bf16.gmra.mxu0 %vm2128_vm11, %v2094_v36 }
 0x1da   : > { %v1877_v21 = vsel %vm1854_vm4, %v1844_v17, %v6910_v19  ;;  %v1878_v55 = vsel %vm1854_vm4, %v1845_v16, %v6911_v37  ;;  %v1909_v0 = vsel %vm1887_vm5, %v1876_v33, %v6915_v34 }
 0x1db   : > { %v9791_v47 = vpop.permute.xlu0 %6918  ;;  %v6924_v43 = vpop.permute.xlu1 %6923  ;;  %v1910_v7 = vsel %vm1887_vm5, %v1877_v21, %v6916_v52 }
 0x1dc   : > { %v6920_v46 = vunpack.i.l.bf16 %v9791_v47  ;;  %v6926_v29 = vunpack.i.h.bf16 %v6924_v43  ;;  %v6925_v57 = vunpack.i.l.bf16 %v6924_v43 }
 0x1de   : > { %v1911_v42 = vsel %vm1887_vm5, %v1878_v55, %v6920_v46  ;;  %v1941_v6 = vsel %vm1920_vm6, %v1908_v22, %v6925_v57  ;;  %v1942_v10 = vsel %vm1920_vm6, %v1909_v0, %v6926_v29  ;;  %v13007_v0 = vld [vmem:[#allocation104_spill] sm:$0xff]  ;;  %v13008_v22 = vld [vmem:[#allocation105_spill] sm:$0xff] }
 0x1df   : > { %v6929_v31 = vpop.permute.xlu0 %6928  ;;  %v6934_v9 = vpop.permute.xlu1 %6933 }
 0x1e0   : > { %v6936_v39 = vunpack.i.h.bf16 %v6934_v9  ;;  %v6935_v11 = vunpack.i.l.bf16 %v6934_v9  ;;  %v6931_v36 = vunpack.i.h.bf16 %v6929_v31  ;;  %v6930_v43 = vunpack.i.l.bf16 %v6929_v31 }
 0x1e2   : > { %v1974_v14 = vsel %vm1953_vm7, %v1941_v6, %v6935_v11  ;;  %v1975_v4 = vsel %vm1953_vm7, %v1942_v10, %v6936_v39  ;;  %v1943_v40 = vsel %vm1920_vm6, %v1910_v7, %v6930_v43  ;;  %v6540_v6 = vunpack.i.l.bf16 %v13008_v22 }
 0x1e3   : > { %v6939_v48 = vpop.permute.xlu0 %6938  ;;  %v6944_v12 = vpop.permute.xlu1 %6943  ;;  %v6536_v43 = vunpack.i.h.bf16 %v13007_v0 }
 0x1e4   : > { %v6946_v56 = vunpack.i.h.bf16 %v6944_v12  ;;  %v6945_v15 = vunpack.i.l.bf16 %v6944_v12  ;;  %v6941_v50 = vunpack.i.h.bf16 %v6939_v48  ;;  %v6940_v9 = vunpack.i.l.bf16 %v6939_v48 }
 0x1e5   : > { %v1944_v48 = vsel %vm1920_vm6, %v1911_v42, %v6931_v36  ;;  %v6535_v42 = vunpack.i.l.bf16 %v13007_v0 }
 0x1e6   : > { %v2007_v1 = vsel %vm1986_vm8, %v1974_v14, %v6945_v15  ;;  %v2008_v19 = vsel %vm1986_vm8, %v1975_v4, %v6946_v56  ;;  %v1976_v46 = vsel %vm1953_vm7, %v1943_v40, %v6940_v9  ;;  %v1977_v41 = vsel %vm1953_vm7, %v1944_v48, %v6941_v50  ;;  %v13009_v4 = vld [vmem:[#allocation48_spill] sm:$0xff]  ;;  %v13011_v48 = vld [vmem:[#allocation47_spill] sm:$0xff] }
 0x1e7   : > { %v6949_v44 = vpop.permute.xlu0 %6948  ;;  %v6954_v60 = vpop.permute.xlu1 %6953  ;;  %v6541_v14 = vunpack.i.h.bf16 %v13008_v22  ;;  %v1846_v50 = vsel %vm1821_vm3, %v13009_v4, %v6535_v42  ;;  %v13010_v9 = vld [vmem:[#allocation52_spill] sm:$0xff] }
 0x1e8   : > { %v6956_v35 = vunpack.i.h.bf16 %v6954_v60  ;;  %v6955_v63 = vunpack.i.l.bf16 %v6954_v60  ;;  %v6951_v53 = vunpack.i.h.bf16 %v6949_v44  ;;  %v6950_v51 = vunpack.i.l.bf16 %v6949_v44 }
 0x1ea   : > { %v2040_v30 = vsel %vm2019_vm9, %v2007_v1, %v6955_v63  ;;  %v2041_v31 = vsel %vm2019_vm9, %v2008_v19, %v6956_v35  ;;  %v2009_v25 = vsel %vm1986_vm8, %v1976_v46, %v6950_v51  ;;  %v2010_v13 = vsel %vm1986_vm8, %v1977_v41, %v6951_v53 }
 0x1eb   : > { %v6959_v54 = vpop.permute.xlu0 %6958  ;;  %v6964_v23 = vpop.permute.xlu1 %6963  ;;  %v1848_v1 = vsel %vm1821_vm3, %v13010_v9, %v6540_v6  ;;  %v6921_v51 = vunpack.i.h.bf16 %v9791_v47 }
 0x1ec   : > { %v6966_v2 = vunpack.i.h.bf16 %v6964_v23  ;;  %v6965_v17 = vunpack.i.l.bf16 %v6964_v23  ;;  %v6961_v37 = vunpack.i.h.bf16 %v6959_v54  ;;  %v6960_v12 = vunpack.i.l.bf16 %v6959_v54 }
 0x1ee   : > { %v2073_v52 = vsel %vm2052_vm10, %v2040_v30, %v6965_v17  ;;  %v2074_v34 = vsel %vm2052_vm10, %v2041_v31, %v6966_v2  ;;  %v2042_v39 = vsel %vm2019_vm9, %v2009_v25, %v6960_v12  ;;  %v2043_v11 = vsel %vm2019_vm9, %v2010_v13, %v6961_v37 }
 0x1ef   : > { %v6969_v21 = vpop.permute.xlu0 %6968  ;;  %v6974_v29 = vpop.permute.xlu1 %6973  ;;  %v2095_v57 = vpack.c.bf16 %v2074_v34, %v2073_v52  ;;  %v1847_v52 = vsel %vm1821_vm3, %v13011_v48, %v6536_v43  ;;  %v13012_v34 = vld [vmem:[#allocation51_spill] sm:$0xff] }
 0x1f0   : > { %v6971_v18 = vunpack.i.h.bf16 %v6969_v21  ;;  %v6970_v16 = vunpack.i.l.bf16 %v6969_v21  ;;  %v6975_v63 = vunpack.i.l.bf16 %v6974_v29  ;;  %v6976_v19 = vunpack.i.h.bf16 %v6974_v29 }
 0x1f1   : > { %6318 = vmatprep.mubr.msk.bf16.mxu0 %vm2128_vm11, %v2095_v57  ;;  %v1849_v46 = vsel %vm1821_vm3, %v13012_v34, %v6541_v14 }
 0x1f2   : > { %v2075_v33 = vsel %vm2052_vm10, %v2042_v39, %v6970_v16  ;;  %v2076_v55 = vsel %vm2052_vm10, %v2043_v11, %v6971_v18  ;;  %v1879_v31 = vsel %vm1854_vm4, %v1846_v50, %v6975_v63  ;;  %v1880_v47 = vsel %vm1854_vm4, %v1847_v52, %v6976_v19 }
 0x1f3   : > { %v6979_v56 = vpop.permute.xlu0 %6978  ;;  %v6984_v15 = vpop.permute.xlu1 %6983  ;;  %v2096_v44 = vpack.c.bf16 %v2076_v55, %v2075_v33  ;;  %v1912_v33 = vsel %vm1887_vm5, %v1879_v31, %v6921_v51 }
 0x1f4   : > { %v6980_v36 = vunpack.i.l.bf16 %v6979_v56  ;;  %v6981_v54 = vunpack.i.h.bf16 %v6979_v56  ;;  %v6986_v2 = vunpack.i.h.bf16 %v6984_v15  ;;  %v6985_v17 = vunpack.i.l.bf16 %v6984_v15 }
 0x1f5   : > { %6319 = vmatmul.mubr.msk.bf16.gmra.mxu0 %vm2128_vm11, %v2096_v44 }
 0x1f6   : > { %v1881_v37 = vsel %vm1854_vm4, %v1848_v1, %v6980_v36  ;;  %v1882_v29 = vsel %vm1854_vm4, %v1849_v46, %v6981_v54  ;;  %v1913_v39 = vsel %vm1887_vm5, %v1880_v47, %v6985_v17 }
 0x1f7   : > { %v9837_v60 = vpop.permute.xlu0 %6988  ;;  %v6994_v7 = vpop.permute.xlu1 %6993  ;;  %v1914_v16 = vsel %vm1887_vm5, %v1881_v37, %v6986_v2 }
 0x1f8   : > { %v6990_v30 = vunpack.i.l.bf16 %v9837_v60  ;;  %v6996_v12 = vunpack.i.h.bf16 %v6994_v7  ;;  %v6995_v40 = vunpack.i.l.bf16 %v6994_v7 }
 0x1fa   : > { %v1915_v11 = vsel %vm1887_vm5, %v1882_v29, %v6990_v30  ;;  %v1945_v55 = vsel %vm1920_vm6, %v1912_v33, %v6995_v40  ;;  %v1946_v56 = vsel %vm1920_vm6, %v1913_v39, %v6996_v12  ;;  %v13013_v39 = vld [vmem:[#allocation106_spill] sm:$0xff] }
 0x1fb   : > { %v6999_v10 = vpop.permute.xlu0 %6998  ;;  %v7004_v35 = vpop.permute.xlu1 %7003  ;;  %v6545_v33 = vunpack.i.l.bf16 %v13013_v39 }
 0x1fc   : > { %v7006_v41 = vunpack.i.h.bf16 %v7004_v35  ;;  %v7005_v21 = vunpack.i.l.bf16 %v7004_v35  ;;  %v7001_v7 = vunpack.i.h.bf16 %v6999_v10  ;;  %v7000_v0 = vunpack.i.l.bf16 %v6999_v10 }
 0x1fe   : > { %v1978_v42 = vsel %vm1953_vm7, %v1945_v55, %v7005_v21  ;;  %v1979_v22 = vsel %vm1953_vm7, %v1946_v56, %v7006_v41  ;;  %v1947_v51 = vsel %vm1920_vm6, %v1914_v16, %v7000_v0  ;;  %v13014_v55 = vld [vmem:[#allocation107_spill] sm:$0xff] }
 0x1ff   : > { %v7009_v23 = vpop.permute.xlu0 %7008  ;;  %v7014_v53 = vpop.permute.xlu1 %7013  ;;  %v6550_v56 = vunpack.i.l.bf16 %v13014_v55 }
 0x200   : > { %v7016_v57 = vunpack.i.h.bf16 %v7014_v53  ;;  %v7015_v25 = vunpack.i.l.bf16 %v7014_v53  ;;  %v7011_v6 = vunpack.i.h.bf16 %v7009_v23  ;;  %v7010_v35 = vunpack.i.l.bf16 %v7009_v23 }
 0x201   : > { %v1948_v23 = vsel %vm1920_vm6, %v1915_v11, %v7001_v7  ;;  %v6546_v11 = vunpack.i.h.bf16 %v13013_v39  ;;  %v6551_v7 = vunpack.i.h.bf16 %v13014_v55 }
 0x202   : > { %v2011_v63 = vsel %vm1986_vm8, %v1978_v42, %v7015_v25  ;;  %v2012_v36 = vsel %vm1986_vm8, %v1979_v22, %v7016_v57  ;;  %v1980_v30 = vsel %vm1953_vm7, %v1947_v51, %v7010_v35  ;;  %v1981_v31 = vsel %vm1953_vm7, %v1948_v23, %v7011_v6  ;;  %v13015_v35 = vld [vmem:[#allocation56_spill] sm:$0xff] }
 0x203   : > { %v7019_v13 = vpop.permute.xlu0 %7018  ;;  %v7024_v18 = vpop.permute.xlu1 %7023  ;;  %v8042_v51 = vld [vmem:[%s12592_s4 + $0x78] sm:$0xff]  }
 0x204   : > { %v7026_v15 = vunpack.i.h.bf16 %v7024_v18  ;;  %v7025_v44 = vunpack.i.l.bf16 %v7024_v18  ;;  %v7021_v4 = vunpack.i.h.bf16 %v7019_v13  ;;  %v7020_v50 = vunpack.i.l.bf16 %v7019_v13  ;;  %6029 = vmatprep.subr.bf16.mxu1 %v8042_v51 }
 0x206   : > { %v2044_v19 = vsel %vm2019_vm9, %v2011_v63, %v7025_v44  ;;  %v2045_v10 = vsel %vm2019_vm9, %v2012_v36, %v7026_v15  ;;  %v2013_v48 = vsel %vm1986_vm8, %v1980_v30, %v7020_v50  ;;  %v2014_v52 = vsel %vm1986_vm8, %v1981_v31, %v7021_v4  ;;  %v13016_v36 = vld [vmem:[#allocation57_spill] sm:$0xff] }
 0x207   : > { %v7029_v43 = vpop.permute.xlu0 %7028  ;;  %v7034_v14 = vpop.permute.xlu1 %7033  ;;  %v1851_v63 = vsel %vm1821_vm3, %v13015_v35, %v6546_v11 }
 0x208   : > { %v7036_v9 = vunpack.i.h.bf16 %v7034_v14  ;;  %v7035_v1 = vunpack.i.l.bf16 %v7034_v14  ;;  %v7031_v54 = vunpack.i.h.bf16 %v7029_v43  ;;  %v7030_v53 = vunpack.i.l.bf16 %v7029_v43  ;;  %v13017_v14 = vld [vmem:[#allocation62_spill] sm:$0xff] }
 0x209   : > { %v1850_v43 = vsel %vm1821_vm3, %v13016_v36, %v6545_v33  ;;  %v1852_v4 = vsel %vm1821_vm3, %v13017_v14, %v6550_v56  ;;  %v8047_v14 = vld [vmem:[%s12592_s4 + $0x28] sm:$0xff]  }
 0x20a   : > { %v2077_v2 = vsel %vm2052_vm10, %v2044_v19, %v7035_v1  ;;  %v2078_v17 = vsel %vm2052_vm10, %v2045_v10, %v7036_v9  ;;  %v2046_v41 = vsel %vm2019_vm9, %v2013_v48, %v7030_v53  ;;  %v2047_v21 = vsel %vm2019_vm9, %v2014_v52, %v7031_v54  ;;  %v13018_v54 = vld [vmem:[#allocation61_spill] sm:$0xff] }
 0x20b   : > { %v7039_v37 = vpop.permute.xlu0 %7038  ;;  %v7044_v12 = vpop.permute.xlu1 %7043  ;;  %v2097_v40 = vpack.c.bf16 %v2078_v17, %v2077_v2  ;;  %v6991_v1 = vunpack.i.h.bf16 %v9837_v60  ;;  %v1853_v53 = vsel %vm1821_vm3, %v13018_v54, %v6551_v7 }
 0x20c   : > { %v7041_v34 = vunpack.i.h.bf16 %v7039_v37  ;;  %v7040_v46 = vunpack.i.l.bf16 %v7039_v37  ;;  %v7045_v0 = vunpack.i.l.bf16 %v7044_v12  ;;  %v7046_v42 = vunpack.i.h.bf16 %v7044_v12 }
 0x20d   : > { %6322 = vmatprep.mubr.msk.bf16.mxu0 %vm2128_vm11, %v2097_v40  ;;  %v8043_v40 = vld [vmem:[%s12592_s4 + $0x38] sm:$0xff]  }
 0x20e   : > { %v2079_v47 = vsel %vm2052_vm10, %v2046_v41, %v7040_v46  ;;  %v2080_v29 = vsel %vm2052_vm10, %v2047_v21, %v7041_v34  ;;  %v1883_v19 = vsel %vm1854_vm4, %v1850_v43, %v7045_v0  ;;  %v1884_v23 = vsel %vm1854_vm4, %v1851_v63, %v7046_v42  ;;  %6030 = vmatpush3.bf16.msra.mxu1 %v8043_v40  ;;  %v8049_v40 = vld [vmem:[%s12592_s4 + $0x20] sm:$0xff]  }
 0x20f   : > { %v7049_v57 = vpop.permute.xlu0 %7048  ;;  %v7054_v25 = vpop.permute.xlu1 %7053  ;;  %v2098_v13 = vpack.c.bf16 %v2080_v29, %v2079_v47  ;;  %v1916_v29 = vsel %vm1887_vm5, %v1883_v19, %v6991_v1 }
 0x210   : > { %v7051_v22 = vunpack.i.h.bf16 %v7049_v57  ;;  %v7050_v6 = vunpack.i.l.bf16 %v7049_v57  ;;  %v7055_v10 = vunpack.i.l.bf16 %v7054_v25  ;;  %v7056_v2 = vunpack.i.h.bf16 %v7054_v25  ;;  %v8044_v57 = vld [vmem:[%s12592_s4 + $0x70] sm:$0xff]  }
 0x211   : > { %6323 = vmatmul.mubr.msk.bf16.gmra.mxu0 %vm2128_vm11, %v2098_v13  ;;  %6031 = vmatprep.subr.bf16.mxu1 %v8044_v57  ;;  %v8051_v57 = vld [vmem:[%s12592_s4 + $0x18] sm:$0xff]  }
 0x212   : > { %v1885_v31 = vsel %vm1854_vm4, %v1852_v4, %v7050_v6  ;;  %v1886_v37 = vsel %vm1854_vm4, %v1853_v53, %v7051_v22  ;;  %v1917_v47 = vsel %vm1887_vm5, %v1884_v23, %v7055_v10  ;;  %v8048_v10 = vld [vmem:[%s12592_s4 + $0x60] sm:$0xff]  }
 0x213   : > { %v1274_v18 = vpop.permute.xlu0 %1273  ;;  %v7059_v16 = vpop.permute.xlu1 %7058  ;;  %v1918_v56 = vsel %vm1887_vm5, %v1885_v31, %v7056_v2 }
 0x214   : > { %v7061_v17 = vunpack.i.h.bf16 %v7059_v16  ;;  %v7060_v30 = vunpack.i.l.bf16 %v7059_v16  ;;  %v1919_v11 = vsel %vm1887_vm5, %v1886_v37, %v1274_v18 }
 0x216   : > { %v1949_v25 = vsel %vm1920_vm6, %v1916_v29, %v7060_v30  ;;  %v1950_v13 = vsel %vm1920_vm6, %v1917_v47, %v7061_v17 }
 0x217   : > { %v7064_v15 = vpop.permute.xlu0 %7063  ;;  %v7069_v44 = vpop.permute.xlu1 %7068 }
 0x218   : > { %v7071_v60 = vunpack.i.h.bf16 %v7069_v44  ;;  %v7070_v12 = vunpack.i.l.bf16 %v7069_v44  ;;  %v7066_v48 = vunpack.i.h.bf16 %v7064_v15  ;;  %v7065_v52 = vunpack.i.l.bf16 %v7064_v15  ;;  %v8045_v15 = vld [vmem:[%s12592_s4 + $0x30] sm:$0xff]   ;;  %v8046_v44 = vld [vmem:[%s12592_s4 + $0x68] sm:$0xff]  }
 0x219   : > { %6032 = vmatpush3.bf16.msra.mxu1 %v8045_v15 }
 0x21a   : > { %v1982_v33 = vsel %vm1953_vm7, %v1949_v25, %v7070_v12  ;;  %v1983_v55 = vsel %vm1953_vm7, %v1950_v13, %v7071_v60  ;;  %v1951_v7 = vsel %vm1920_vm6, %v1918_v56, %v7065_v52  ;;  %v1952_v0 = vsel %vm1920_vm6, %v1919_v11, %v7066_v48  ;;  %6033 = vmatprep.subr.bf16.mxu1 %v8046_v44  ;;  %v9944_v12 = vld [vmem:[%s12591_s3] ss:$0 sm:$0xff]  ;;  %v8050_v52 = vld [vmem:[%s12592_s4 + $0x58] sm:$0xff]   ;;  %v8052_v13 = vld [vmem:[%s12592_s4 + $0x50] sm:$0xff]  }
 0x21b   : > { %v1465_v50 = vpop.permute.xlu0 %1464  ;;  %v7074_v9 = vpop.permute.xlu1 %7073  ;;  %v8053_v56 = vld [vmem:[%s12592_s4 + $0x10] sm:$0xff]  }
 0x21c   : > { %v7076_v34 = vunpack.i.h.bf16 %v7074_v9  ;;  %v7075_v46 = vunpack.i.l.bf16 %v7074_v9  ;;  %v1984_v51 = vsel %vm1953_vm7, %v1951_v7, %v1465_v50  ;;  %v1985_v23 = vsel %vm1953_vm7, %v1952_v0, %v1465_v50 }
 0x21d   : > { %6034 = vmatpush3.bf16.msra.mxu1 %v8047_v14  ;;  %v8055_v14 = vld [vmem:[%s12592_s4 + $0x8] sm:$0xff]  }
 0x21e   : > { %v2015_v18 = vsel %vm1986_vm8, %v1982_v33, %v7075_v46  ;;  %v2016_v42 = vsel %vm1986_vm8, %v1983_v55, %v7076_v34  ;;  %6035 = vmatprep.subr.bf16.mxu1 %v8048_v10 }
 0x21f   : > { %v7079_v41 = vpop.permute.xlu0 %7078  ;;  %v7084_v21 = vpop.permute.xlu1 %7083 }
 0x220   : > { %v7086_v16 = vunpack.i.h.bf16 %v7084_v21  ;;  %v7085_v39 = vunpack.i.l.bf16 %v7084_v21  ;;  %v7081_v35 = vunpack.i.h.bf16 %v7079_v41  ;;  %v7080_v63 = vunpack.i.l.bf16 %v7079_v41 }
 0x221   : > { %6036 = vmatpush3.bf16.msra.mxu1 %v8049_v40 }
 0x222   : > { %v2048_v4 = vsel %vm2019_vm9, %v2015_v18, %v7085_v39  ;;  %v2049_v9 = vsel %vm2019_vm9, %v2016_v42, %v7086_v16  ;;  %v2017_v30 = vsel %vm1986_vm8, %v1984_v51, %v7080_v63  ;;  %v2018_v31 = vsel %vm1986_vm8, %v1985_v23, %v7081_v35  ;;  %6037 = vmatprep.subr.bf16.mxu1 %v8050_v52  ;;  %v8054_v63 = vld [vmem:[%s12592_s4 + $0x48] sm:$0xff]  }
 0x223   : > { %v7089_v22 = vpop.permute.xlu0 %7088  ;;  %v7094_v6 = vpop.permute.xlu1 %7093  ;;  %v13028_v52 = vld [vmem:[#allocation6_spill] sm:$0xff] }
 0x224   : > { %v7096_v36 = vunpack.i.h.bf16 %v7094_v6  ;;  %v7095_v43 = vunpack.i.l.bf16 %v7094_v6  ;;  %v7091_v1 = vunpack.i.h.bf16 %v7089_v22  ;;  %v7090_v19 = vunpack.i.l.bf16 %v7089_v22 }
 0x225   : > { %6038 = vmatpush3.bf16.msra.mxu1 %v8051_v57  ;;  %v8057_v57 = vld [vmem:[%s12592_s4] sm:$0xff]  }
 0x226   : > { %v2081_v54 = vsel %vm2052_vm10, %v2048_v4, %v7095_v43  ;;  %v2082_v53 = vsel %vm2052_vm10, %v2049_v9, %v7096_v36  ;;  %v2050_v50 = vsel %vm2019_vm9, %v2017_v30, %v7090_v19  ;;  %v2051_v48 = vsel %vm2019_vm9, %v2018_v31, %v7091_v1  ;;  %6039 = vmatprep.subr.bf16.mxu1 %v8052_v13  ;;  %v13023_v36 = vld [vmem:[#allocation69_spill] sm:$0xff]  ;;  %v13024_v19 = vld [vmem:[#allocation70_spill] sm:$0xff] }
 0x227   : > { %v7099_v2 = vpop.permute.xlu0 %7098  ;;  %v2099_v17 = vpack.c.bf16 %v2082_v53, %v2081_v54  ;;  %v13025_v54 = vld [vmem:[#allocation73_spill] sm:$0xff] }
 0x228   : > { %v7101_v37 = vunpack.i.h.bf16 %v7099_v2  ;;  %v7100_v60 = vunpack.i.l.bf16 %v7099_v2 }
 0x229   : > { %6326 = vmatprep.mubr.msk.bf16.mxu0 %vm2128_vm11, %v2099_v17  ;;  %6040 = vmatpush3.bf16.msra.mxu1 %v8053_v56 }
 0x22a   : > { %v2083_v34 = vsel %vm2052_vm10, %v2050_v50, %v7100_v60  ;;  %v2084_v46 = vsel %vm2052_vm10, %v2051_v48, %v7101_v37  ;;  %v6300_v41 = vpop.f32.mrf.mxu0  ;;  %6041 = vmatprep.subr.bf16.mxu1 %v8054_v63  ;;  %v13026_v60 = vld [vmem:[#allocation71_spill] sm:$0xff]  ;;  %v13027_v50 = vld [vmem:[#allocation72_spill] sm:$0xff] }
 0x22b   : > { %v2224_v21 = vadd.f32 %v6300_v41, %v9944_v12  ;;  %v2100_v47 = vpack.c.bf16 %v2084_v46, %v2083_v34  ;;  %v8056_v46 = vld [vmem:[%s12592_s4 + $0x40] sm:$0xff]  }
 0x22c   : > { %v2215_v29 = vpop.f32.mrf.mxu0 }
 0x22d   : > { %v2216_v25 = vadd.f32 %v9944_v12, %v2215_v29  ;;  %6327 = vmatmul.mubr.msk.bf16.gmra.mxu0 %vm2128_vm11, %v2100_v47  ;;  %v9966_v16 = vmax.f32 %v2224_v21, 0.0  ;;  %6042 = vmatpush3.bf16.msra.mxu1 %v8055_v14  ;;  %v13029_v47 = vld [vmem:[#allocation5_spill] sm:$0xff] }
 0x22e   : > { %v6301_v39 = vpop.f32.mrf.mxu0  ;;  %6043 = vmatprep.subr.bf16.mxu1 %v8056_v46 }
 0x22f   : > { %13019 = vst [vmem:[#allocation11_spill] sm:$0xff] %v9966_v16  ;;  %v9968_v11 = vmax.f32 %v2216_v25, 0.0  ;;  %v2227_v33 = vadd.f32 %v6301_v39, %v9944_v12  ;;  %v2474_v0 = vrot.slane %v9966_v16, 1  ;;  %v2376_v23 = vrot.slane %v9966_v16, 7  ;;  %v13030_v39 = vld [vmem:[#allocation8_spill] sm:$0xff] }
 0x230   : > { %v2218_v55 = vpop.f32.mrf.mxu0 }
 0x231   : > { %13020 = vst [vmem:[#allocation58_spill] sm:$0xff] %v9968_v11  ;;  %v9974_v15 = vmax.f32 %v2227_v33, 0.0  ;;  %v2219_v44 = vadd.f32 %v9944_v12, %v2218_v55  ;;  %v2472_v7 = vrot.slane %v9968_v11, 1  ;;  %v2374_v18 = vrot.slane %v9968_v11, 7  ;;  %6044 = vmatpush3.bf16.msra.mxu1 %v8057_v57  ;;  %v13031_v55 = vld [vmem:[#allocation7_spill] sm:$0xff] }
 0x232   : > { %6410 = vmatprep.subr.bf16.mxu1 %v9770_v24 }
 0x233   : > { %13021 = vst [vmem:[#allocation63_spill] sm:$0xff] %v9974_v15  ;;  %v9980_v42 = vmax.f32 %v2219_v44, 0.0  ;;  %v7102_v22 = vpack.i.bf16 %v9974_v15, %v9966_v16  ;;  %v2536_v6 = vsel %vm742_vm0, 0.0, %v2472_v7  ;;  %v2475_v35 = vrot.slane %v9974_v15, 1 }
 0x234   : > { %v2537_v43 = vmul.f32 %v2536_v6, %v13023_v36  ;;  %v2438_v51 = vsel %vm460_vm1, 0.0, %v2374_v18  ;;  %v2377_v31 = vrot.slane %v9974_v15, 7 }
 0x235   : > { %13022 = vst [vmem:[#allocation53_spill] sm:$0xff] %v9980_v42  ;;  %v2375_v4 = vrot.slane %v9980_v42, 7  ;;  %v2473_v9 = vrot.slane %v9980_v42, 1  ;;  %7103 = vrot.lane.b32.xlu1 %v7102_v22, %s8162_s11  ;;  %v2533_v1 = vsel %vm742_vm0, %v2474_v0, %v2475_v35  ;;  %v10028_v29 = vmul.f32 %v2438_v51, %v13029_v47 }
 0x236   : > { %v7107_v10 = vpack.i.bf16 %v2537_v43, %v13024_v19  ;;  %v10001_v53 = vmul.f32 %v2533_v1, %v13025_v54  ;;  %v2435_v25 = vsel %vm460_vm1, %v2376_v23, %v2377_v31 }
 0x237   : > { %v2534_v2 = vsel %vm742_vm0, %v2473_v9, %v2474_v0  ;;  %v2535_v17 = vsel %vm742_vm0, %v2472_v7, %v2473_v9  ;;  %v2437_v30 = vsel %vm460_vm1, %v2374_v18, %v2375_v4  ;;  %v2436_v41 = vsel %vm460_vm1, %v2375_v4, %v2376_v23 }
 0x238   : > { %v7112_v37 = vpack.i.bf16 %v10001_v53, %v12993_v5  ;;  %v2538_v40 = vmul.f32 %v2535_v17, %v13026_v60  ;;  %v2539_v48 = vmul.f32 %v2534_v2, %v13027_v50  ;;  %v10018_v34 = vmul.f32 %v2437_v30, %v13028_v52  ;;  %v13036_v30 = vld [vmem:[#allocation74_spill] sm:$0xff]  ;;  %v13052_v50 = vld [vmem:[#allocation17_spill] sm:$0xff] }
 0x239   : > { %7108 = vrot.lane.b32.xlu1 %v7107_v10, %s8163_s20  ;;  %v10038_v33 = vmul.f32 %v2436_v41, %v13030_v39  ;;  %v10044_v56 = vmul.f32 %v2435_v25, %v13031_v55  ;;  %v13064_v52 = vld [vmem:[#allocation85_spill] sm:$0xff] }
 0x23a   : > { %7113 = vrot.lane.b32.xlu0 %v7112_v37, %s8164_s25  ;;  %v7127_v21 = vpack.i.bf16 %v2539_v48, %v2538_v40  ;;  %v7117_v13 = vpack.i.bf16 %v10018_v34, %v10028_v29  ;;  %v13084_v5 = vld [vmem:[#allocation33_spill] sm:$0xff] }
 0x23b   : > { %v7122_v44 = vpack.i.bf16 %v10044_v56, %v10038_v33 }
 0x23d   : > { %7128 = vrot.lane.b32.xlu1 %v7127_v21, %s8164_s25 }
 0x23e   : > { %7118 = vrot.lane.b32.xlu0 %v7117_v13, %s8162_s11 }
 0x241   : > { %7138 = vrot.lane.b32.xlu1 %v7127_v21, %s8163_s20  ;;  %v13037_v21 = vld [vmem:[#allocation77_spill] sm:$0xff] }
 0x242   : > { %7123 = vrot.lane.b32.xlu0 %v7122_v44, %s8163_s20 }
 0x246   : > { %v6304_v7 = vpop.f32.mrf.mxu0  ;;  %7133 = vrot.lane.b32.xlu0 %v7122_v44, %s8162_s11 }
 0x247   : > { %v2240_v0 = vadd.f32 %v6304_v7, %v9944_v12 }
 0x248   : > { %v2231_v18 = vpop.f32.mrf.mxu0 }
 0x249   : > { %v2232_v24 = vadd.f32 %v9944_v12, %v2231_v18  ;;  %v10053_v22 = vmax.f32 %v2240_v0, 0.0  ;;  %v13038_v18 = vld [vmem:[#allocation75_spill] sm:$0xff] }
 0x24a   : > { %v6305_v6 = vpop.f32.mrf.mxu0 }
 0x24b   : > { %13032 = vst [vmem:[#allocation67_spill] sm:$0xff] %v10053_v22  ;;  %v10055_v63 = vmax.f32 %v2232_v24, 0.0  ;;  %v2243_v43 = vadd.f32 %v6305_v6, %v9944_v12  ;;  %v2478_v19 = vrot.slane %v10053_v22, 1 }
 0x24c   : > { %v2234_v14 = vpop.f32.mrf.mxu0 }
 0x24d   : > { %13033 = vst [vmem:[#allocation19_spill] sm:$0xff] %v10055_v63  ;;  %v10058_v4 = vmax.f32 %v2243_v43, 0.0  ;;  %v2235_v9 = vadd.f32 %v9944_v12, %v2234_v14  ;;  %v2476_v1 = vrot.slane %v10055_v63, 1  ;;  %v2378_v10 = vrot.slane %v10055_v63, 7  ;;  %v13040_v43 = vld [vmem:[#allocation9_spill] sm:$0xff] }
 0x24f   : > { %13034 = vst [vmem:[#allocation20_spill] sm:$0xff] %v10058_v4  ;;  %v10064_v51 = vmax.f32 %v2235_v9, 0.0  ;;  %v7142_v23 = vpack.i.bf16 %v10058_v4, %v10053_v22  ;;  %v2532_v2 = vsel %vm742_vm0, %v2475_v35, %v2476_v1  ;;  %v2479_v17 = vrot.slane %v10058_v4, 1 }
 0x250   : > { %v2541_v37 = vmul.f32 %v2532_v2, %v13036_v30  ;;  %v2434_v35 = vsel %vm460_vm1, %v2377_v31, %v2378_v10  ;;  %v13039_v31 = vld [vmem:[#allocation76_spill] sm:$0xff] }
 0x251   : > { %13035 = vst [vmem:[#allocation16_spill] sm:$0xff] %v10064_v51  ;;  %v2477_v40 = vrot.slane %v10064_v51, 1  ;;  %7143 = vrot.lane.b32.xlu1 %v7142_v23, %s8162_s11  ;;  %v2529_v48 = vsel %vm742_vm0, %v2478_v19, %v2479_v17  ;;  %v2379_v46 = vrot.slane %v10064_v51, 7  ;;  %v7147_v13 = vpack.i.bf16 %v10064_v51, %v10055_v63 }
 0x252   : > { %v3434_v41 = vpack.c.bf16 %v2541_v37, %v10001_v53  ;;  %v10079_v57 = vmul.f32 %v2529_v48, %v13037_v21  ;;  %v7157_v2 = vpack.i.bf16 %v2541_v37, %v10001_v53  ;;  %v2381_v48 = vrot.slane %v10058_v4, 7  ;;  %v13048_v21 = vld [vmem:[#allocation78_spill] sm:$0xff] }
 0x253   : > { %v2531_v25 = vsel %vm742_vm0, %v2476_v1, %v2477_v40  ;;  %v2530_v44 = vsel %vm742_vm0, %v2477_v40, %v2478_v19  ;;  %v2433_v7 = vsel %vm460_vm1, %v2378_v10, %v2379_v46  ;;  %v13041_v1 = vld [vmem:[#allocation10_spill] sm:$0xff]  ;;  %v7152_v10 = vpack.i.bf16 %v9968_v11, %v2541_v37 }
 0x254   : > { %6334 = vmatprep.mubr.msk.bf16.mxu0 %vm2052_vm10, %v3434_v41  ;;  %v7162_v0 = vpack.i.bf16 %v10079_v57, %v9974_v15  ;;  %v2542_v24 = vmul.f32 %v2531_v25, %v13038_v18  ;;  %v2543_v6 = vmul.f32 %v2530_v44, %v13039_v31  ;;  %v10097_v14 = vmul.f32 %v2433_v7, %v13040_v43  ;;  %v13042_v44 = vld [vmem:[#allocation14_spill] sm:$0xff]  ;;  %v13043_v7 = vld [vmem:[#allocation13_spill] sm:$0xff] }
 0x255   : > { %7148 = vrot.lane.b32.xlu1 %v7147_v13, %s8162_s11  ;;  %v10102_v19 = vmul.f32 %v2434_v35, %v13041_v1  ;;  %v2380_v40 = vrot.slane %v10053_v22, 7 }
 0x256   : > { %7163 = vrot.lane.b32.xlu0 %v7162_v0, %s8164_s25  ;;  %v3437_v9 = vpack.c.bf16 %v2543_v6, %v2542_v24  ;;  %v7172_v41 = vpack.i.bf16 %v2542_v24, %v9980_v42  ;;  %v7187_v25 = vpack.i.bf16 %v9966_v16, %v2543_v6 }
 0x257   : > { %v7167_v23 = vpack.i.bf16 %v10097_v14, %v10102_v19  ;;  %v2432_v35 = vsel %vm460_vm1, %v2379_v46, %v2380_v40  ;;  %v2431_v13 = vsel %vm460_vm1, %v2380_v40, %v2381_v48 }
 0x258   : > { %6335 = vmatmul.mubr.msk.bf16.vlgmr.msra.gmra.mxu0 %vm2052_vm10, %v3437_v9  ;;  %v10122_v53 = vmul.f32 %v2432_v35, %v13042_v44  ;;  %v10127_v0 = vmul.f32 %v2431_v13, %v13043_v7  ;;  %v7197_v9 = vpack.i.bf16 %v2543_v6, %v2542_v24  ;;  %v13049_v44 = vld [vmem:[#allocation81_spill] sm:$0xff] }
 0x259   : > { %7153 = vrot.lane.b32.xlu1 %v7152_v10, %s8164_s25 }
 0x25a   : > { %7168 = vrot.lane.b32.xlu0 %v7167_v23, %s8163_s20 }
 0x25d   : > { %7158 = vrot.lane.b32.xlu1 %v7157_v2, %s8163_s20  ;;  %v7182_v2 = vpack.i.bf16 %v10127_v0, %v10122_v53 }
 0x25e   : > { %7173 = vrot.lane.b32.xlu0 %v7172_v41, %s8164_s25 }
 0x261   : > { %7188 = vrot.lane.b32.xlu1 %v7187_v25, %s8164_s25 }
 0x262   : > { %v6308_v37 = vpop.f32.mrf.mxu0  ;;  %7178 = vrot.lane.b32.xlu0 %v7167_v23, %s8162_s11 }
 0x263   : > { %v2256_v46 = vadd.f32 %v6308_v37, %v9944_v12 }
 0x264   : > { %v2247_v10 = vpop.f32.mrf.mxu0 }
 0x265   : > { %v2248_v40 = vadd.f32 %v9944_v12, %v2247_v10  ;;  %7198 = vrot.lane.b32.xlu1 %v7197_v9, %s8163_s20  ;;  %v10134_v41 = vmax.f32 %v2256_v46, 0.0 }
 0x266   : > { %v6309_v35 = vpop.f32.mrf.mxu0  ;;  %7183 = vrot.lane.b32.xlu0 %v7182_v2, %s8163_s20 }
 0x267   : > { %13044 = vst [vmem:[#allocation15_spill] sm:$0xff] %v10134_v41  ;;  %v10137_v23 = vmax.f32 %v2248_v40, 0.0  ;;  %v2259_v25 = vadd.f32 %v6309_v35, %v9944_v12  ;;  %v2482_v9 = vrot.slane %v10134_v41, 1 }
 0x268   : > { %v2250_v13 = vpop.f32.mrf.mxu0 }
 0x269   : > { %13045 = vst [vmem:[#allocation66_spill] sm:$0xff] %v10137_v23  ;;  %v10140_v37 = vmax.f32 %v2259_v25, 0.0  ;;  %v2251_v24 = vadd.f32 %v9944_v12, %v2250_v13  ;;  %v2480_v6 = vrot.slane %v10137_v23, 1  ;;  %v2382_v46 = vrot.slane %v10137_v23, 7 }
 0x26a   : > { %7193 = vrot.lane.b32.xlu0 %v7182_v2, %s8162_s11 }
 0x26b   : > { %13046 = vst [vmem:[#allocation28_spill] sm:$0xff] %v10140_v37  ;;  %v10147_v10 = vmax.f32 %v2251_v24, 0.0  ;;  %v7202_v40 = vpack.i.bf16 %v10140_v37, %v10134_v41  ;;  %v2528_v35 = vsel %vm742_vm0, %v2479_v17, %v2480_v6  ;;  %v2483_v25 = vrot.slane %v10140_v37, 1 }
 0x26c   : > { %v2545_v13 = vmul.f32 %v2528_v35, %v13048_v21  ;;  %v2430_v17 = vsel %vm460_vm1, %v2381_v48, %v2382_v46  ;;  %v13051_v48 = vld [vmem:[#allocation80_spill] sm:$0xff] }
 0x26d   : > { %13047 = vst [vmem:[#allocation24_spill] sm:$0xff] %v10147_v10  ;;  %7203 = vrot.lane.b32.xlu1 %v7202_v40, %s8162_s11  ;;  %v2525_v2 = vsel %vm742_vm0, %v2482_v9, %v2483_v25  ;;  %v2481_v7 = vrot.slane %v10147_v10, 1  ;;  %v2383_v24 = vrot.slane %v10147_v10, 7  ;;  %v7207_v35 = vpack.i.bf16 %v10147_v10, %v10137_v23 }
 0x26e   : > { %v3440_v31 = vpack.c.bf16 %v2545_v13, %v10079_v57  ;;  %v10162_v18 = vmul.f32 %v2525_v2, %v13049_v44  ;;  %v13050_v44 = vld [vmem:[#allocation79_spill] sm:$0xff] }
 0x26f   : > { %v2526_v40 = vsel %vm742_vm0, %v2481_v7, %v2482_v9  ;;  %v2527_v21 = vsel %vm742_vm0, %v2480_v6, %v2481_v7  ;;  %v2429_v43 = vsel %vm460_vm1, %v2382_v46, %v2383_v24  ;;  %v13053_v6 = vld [vmem:[#allocation18_spill] sm:$0xff]  ;;  %v2384_v46 = vrot.slane %v10134_v41, 7 }
 0x270   : > { %6338 = vmatprep.mubr.msk.bf16.mxu0 %vm2052_vm10, %v3440_v31  ;;  %v7222_v2 = vpack.i.bf16 %v10162_v18, %v10058_v4  ;;  %v2546_v1 = vmul.f32 %v2527_v21, %v13050_v44  ;;  %v2547_v30 = vmul.f32 %v2526_v40, %v13051_v48  ;;  %v10180_v55 = vmul.f32 %v2429_v43, %v13052_v50 }
 0x271   : > { %7208 = vrot.lane.b32.xlu1 %v7207_v35, %s8162_s11  ;;  %v10185_v9 = vmul.f32 %v2430_v17, %v13053_v6  ;;  %v7212_v31 = vpack.i.bf16 %v10055_v63, %v2545_v13  ;;  %v7217_v43 = vpack.i.bf16 %v2545_v13, %v10079_v57  ;;  %v2385_v35 = vrot.slane %v10140_v37, 7 }
 0x272   : > { %7223 = vrot.lane.b32.xlu0 %v7222_v2, %s8164_s25  ;;  %v3443_v7 = vpack.c.bf16 %v2547_v30, %v2546_v1  ;;  %v7232_v17 = vpack.i.bf16 %v2546_v1, %v10064_v51  ;;  %v2428_v40 = vsel %vm460_vm1, %v2383_v24, %v2384_v46  ;;  %v7247_v2 = vpack.i.bf16 %v10053_v22, %v2547_v30 }
 0x273   : > { %13054 = vst [vmem:[#allocation27_spill] sm:$0xff] %v10185_v9  ;;  %v7227_v21 = vpack.i.bf16 %v10180_v55, %v10185_v9 }
 0x274   : > { %6339 = vmatmul.mubr.msk.bf16.gmra.mxu0 %vm2052_vm10, %v3443_v7  ;;  %v2427_v7 = vsel %vm460_vm1, %v2384_v46, %v2385_v35 }
 0x275   : > { %7213 = vrot.lane.b32.xlu1 %v7212_v31, %s8164_s25  ;;  %v13055_v31 = vld [vmem:[#allocation22_spill] sm:$0xff] }
 0x276   : > { %7228 = vrot.lane.b32.xlu0 %v7227_v21, %s8163_s20  ;;  %v10205_v57 = vmul.f32 %v2428_v40, %v13055_v31 }
 0x278   : > { %13056 = vst [vmem:[#allocation23_spill] sm:$0xff] %v10205_v57 }
 0x279   : > { %7218 = vrot.lane.b32.xlu1 %v7217_v43, %s8163_s20  ;;  %v13057_v43 = vld [vmem:[#allocation21_spill] sm:$0xff] }
 0x27a   : > { %7233 = vrot.lane.b32.xlu0 %v7232_v17, %s8164_s25  ;;  %v10211_v48 = vmul.f32 %v2427_v7, %v13057_v43  ;;  %v7257_v17 = vpack.i.bf16 %v2547_v30, %v2546_v1 }
 0x27c   : > { %13058 = vst [vmem:[#allocation36_spill] sm:$0xff] %v10211_v48  ;;  %v7242_v46 = vpack.i.bf16 %v10211_v48, %v10205_v57  ;;  %v13082_v48 = vld [vmem:[#allocation34_spill] sm:$0xff] }
 0x27d   : > { %7248 = vrot.lane.b32.xlu1 %v7247_v2, %s8164_s25  ;;  %v6312_v13 = vpop.f32.mrf.mxu0 }
 0x27e   : > { %v2272_v44 = vadd.f32 %v6312_v13, %v9944_v12  ;;  %7238 = vrot.lane.b32.xlu0 %v7227_v21, %s8162_s11 }
 0x27f   : > { %v2263_v24 = vpop.f32.mrf.mxu0 }
 0x280   : > { %v2264_v50 = vadd.f32 %v9944_v12, %v2263_v24  ;;  %v10216_v6 = vmax.f32 %v2272_v44, 0.0 }
 0x281   : > { %7258 = vrot.lane.b32.xlu1 %v7257_v17, %s8163_s20  ;;  %v6313_v40 = vpop.f32.mrf.mxu0 }
 0x282   : > { %13059 = vst [vmem:[#allocation32_spill] sm:$0xff] %v10216_v6  ;;  %v10219_v2 = vmax.f32 %v2264_v50, 0.0  ;;  %v2275_v13 = vadd.f32 %v6313_v40, %v9944_v12  ;;  %7243 = vrot.lane.b32.xlu0 %v7242_v46, %s8163_s20  ;;  %v2486_v24 = vrot.slane %v10216_v6, 1 }
 0x283   : > { %v2266_v21 = vpop.f32.mrf.mxu0 }
 0x284   : > { %13060 = vst [vmem:[#allocation35_spill] sm:$0xff] %v10219_v2  ;;  %v10223_v7 = vmax.f32 %v2275_v13, 0.0  ;;  %v2267_v30 = vadd.f32 %v9944_v12, %v2266_v21  ;;  %v2484_v1 = vrot.slane %v10219_v2, 1  ;;  %v2386_v44 = vrot.slane %v10219_v2, 7  ;;  %v13063_v13 = vld [vmem:[#allocation82_spill] sm:$0xff] }
 0x286   : > { %13061 = vst [vmem:[#allocation31_spill] sm:$0xff] %v10223_v7  ;;  %v10229_v43 = vmax.f32 %v2267_v30, 0.0  ;;  %7253 = vrot.lane.b32.xlu0 %v7242_v46, %s8162_s11  ;;  %v7262_v50 = vpack.i.bf16 %v10223_v7, %v10216_v6  ;;  %v2524_v17 = vsel %vm742_vm0, %v2483_v25, %v2484_v1  ;;  %v2487_v40 = vrot.slane %v10223_v7, 1 }
 0x287   : > { %v2549_v21 = vmul.f32 %v2524_v17, %v13063_v13  ;;  %v2426_v25 = vsel %vm460_vm1, %v2385_v35, %v2386_v44  ;;  %v13066_v35 = vld [vmem:[#allocation84_spill] sm:$0xff] }
 0x288   : > { %13062 = vst [vmem:[#allocation103_spill] sm:$0xff] %v10229_v43  ;;  %7263 = vrot.lane.b32.xlu1 %v7262_v50, %s8162_s11  ;;  %v2521_v31 = vsel %vm742_vm0, %v2486_v24, %v2487_v40  ;;  %v2485_v30 = vrot.slane %v10229_v43, 1  ;;  %v2387_v54 = vrot.slane %v10229_v43, 7  ;;  %v7267_v17 = vpack.i.bf16 %v10229_v43, %v10219_v2 }
 0x289   : > { %v3446_v46 = vpack.c.bf16 %v2549_v21, %v10162_v18  ;;  %v10245_v36 = vmul.f32 %v2521_v31, %v13064_v52  ;;  %v13065_v52 = vld [vmem:[#allocation83_spill] sm:$0xff] }
 0x28a   : > { %v2522_v50 = vsel %vm742_vm0, %v2485_v30, %v2486_v24  ;;  %v2523_v13 = vsel %vm742_vm0, %v2484_v1, %v2485_v30  ;;  %v2425_v39 = vsel %vm460_vm1, %v2386_v44, %v2387_v54  ;;  %v13069_v24 = vld [vmem:[#allocation26_spill] sm:$0xff]  ;;  %v7272_v44 = vpack.i.bf16 %v10137_v23, %v2549_v21 }
 0x28b   : > { %6342 = vmatprep.mubr.msk.bf16.mxu0 %vm2052_vm10, %v3446_v46  ;;  %v7282_v31 = vpack.i.bf16 %v10245_v36, %v10140_v37  ;;  %v2550_v47 = vmul.f32 %v2523_v13, %v13065_v52  ;;  %v2551_v60 = vmul.f32 %v2522_v50, %v13066_v35  ;;  %v10263_v57 = vmul.f32 %v2425_v39, %v13067_v3  ;;  %v13073_v35 = vld [vmem:[#allocation29_spill] sm:$0xff] }
 0x28c   : > { %7268 = vrot.lane.b32.xlu1 %v7267_v17, %s8162_s11  ;;  %v10268_v30 = vmul.f32 %v2426_v25, %v13069_v24  ;;  %v7277_v39 = vpack.i.bf16 %v2549_v21, %v10162_v18  ;;  %v2388_v46 = vrot.slane %v10216_v6, 7  ;;  %v2389_v17 = vrot.slane %v10223_v7, 7 }
 0x28d   : > { %13068 = vst [vmem:[#allocation40_spill] sm:$0xff] %v10263_v57  ;;  %7283 = vrot.lane.b32.xlu0 %v7282_v31, %s8164_s25  ;;  %v3449_v1 = vpack.c.bf16 %v2551_v60, %v2550_v47  ;;  %v7292_v25 = vpack.i.bf16 %v2550_v47, %v10147_v10  ;;  %v7307_v31 = vpack.i.bf16 %v10134_v41, %v2551_v60 }
 0x28e   : > { %13070 = vst [vmem:[#allocation44_spill] sm:$0xff] %v10268_v30  ;;  %v7287_v13 = vpack.i.bf16 %v10263_v57, %v10268_v30  ;;  %v2424_v50 = vsel %vm460_vm1, %v2387_v54, %v2388_v46  ;;  %v7317_v52 = vpack.i.bf16 %v2551_v60, %v2550_v47  ;;  %v13080_v57 = vld [vmem:[#allocation87_spill] sm:$0xff]  ;;  %v13081_v30 = vld [vmem:[#allocation88_spill] sm:$0xff] }
 0x28f   : > { %6343 = vmatmul.mubr.msk.bf16.gmra.mxu0 %vm2052_vm10, %v3449_v1  ;;  %v2423_v1 = vsel %vm460_vm1, %v2388_v46, %v2389_v17 }
 0x290   : > { %7273 = vrot.lane.b32.xlu1 %v7272_v44, %s8164_s25  ;;  %v13071_v44 = vld [vmem:[#allocation30_spill] sm:$0xff] }
 0x291   : > { %7288 = vrot.lane.b32.xlu0 %v7287_v13, %s8163_s20  ;;  %v10288_v18 = vmul.f32 %v2424_v50, %v13071_v44 }
 0x293   : > { %13072 = vst [vmem:[#allocation39_spill] sm:$0xff] %v10288_v18 }
 0x294   : > { %7278 = vrot.lane.b32.xlu1 %v7277_v39, %s8163_s20  ;;  %v10293_v39 = vmul.f32 %v2423_v1, %v13073_v35 }
 0x295   : > { %7293 = vrot.lane.b32.xlu0 %v7292_v25, %s8164_s25 }
 0x296   : > { %13074 = vst [vmem:[#allocation43_spill] sm:$0xff] %v10293_v39  ;;  %v7302_v3 = vpack.i.bf16 %v10293_v39, %v10288_v18 }
 0x298   : > { %7308 = vrot.lane.b32.xlu1 %v7307_v31, %s8164_s25 }
 0x299   : > { %v6316_v21 = vpop.f32.mrf.mxu0  ;;  %7298 = vrot.lane.b32.xlu0 %v7287_v13, %s8162_s11 }
 0x29a   : > { %v2288_v54 = vadd.f32 %v6316_v21, %v9944_v12 }
 0x29b   : > { %v2279_v25 = vpop.f32.mrf.mxu0 }
 0x29c   : > { %v2280_v46 = vadd.f32 %v9944_v12, %v2279_v25  ;;  %7318 = vrot.lane.b32.xlu1 %v7317_v52, %s8163_s20  ;;  %v10303_v13 = vmax.f32 %v2288_v54, 0.0 }
 0x29d   : > { %v6317_v50 = vpop.f32.mrf.mxu0  ;;  %7303 = vrot.lane.b32.xlu0 %v7302_v3, %s8163_s20 }
 0x29e   : > { %v10301_v31 = vmax.f32 %v2280_v46, 0.0  ;;  %13076 = vst [vmem:[#allocation105_spill] sm:$0xff] %v10303_v13  ;;  %v2291_v25 = vadd.f32 %v6317_v50, %v9944_v12  ;;  %v13078_v46 = vld [vmem:[#allocation86_spill] sm:$0xff]  ;;  %v2490_v54 = vrot.slane %v10303_v13, 1 }
 0x29f   : > { %v2282_v1 = vpop.f32.mrf.mxu0 }
 0x2a0   : > { %13075 = vst [vmem:[#allocation104_spill] sm:$0xff] %v10301_v31  ;;  %v2283_v60 = vadd.f32 %v9944_v12, %v2282_v1  ;;  %v2488_v47 = vrot.slane %v10301_v31, 1  ;;  %v2390_v21 = vrot.slane %v10301_v31, 7 }
 0x2a1   : > { %7313 = vrot.lane.b32.xlu0 %v7302_v3, %s8162_s11 }
 0x2a2   : > { %v10310_v35 = vmax.f32 %v2283_v60, 0.0  ;;  %v2520_v52 = vsel %vm742_vm0, %v2487_v40, %v2488_v47  ;;  %v2422_v3 = vsel %vm460_vm1, %v2389_v17, %v2390_v21  ;;  %v10323_v60 = vmax.f32 %v2291_v25, 0.0 }
 0x2a3   : > { %v2553_v44 = vmul.f32 %v2520_v52, %v13078_v46 }
 0x2a4   : > { %13077 = vst [vmem:[#allocation48_spill] sm:$0xff] %v10310_v35  ;;  %v7322_v1 = vpack.i.bf16 %v10310_v35, %v10301_v31  ;;  %v2489_v24 = vrot.slane %v10310_v35, 1  ;;  %v2391_v39 = vrot.slane %v10310_v35, 7  ;;  %13079 = vst [vmem:[#allocation52_spill] sm:$0xff] %v10323_v60 }
 0x2a5   : > { %v3452_v50 = vpack.c.bf16 %v2553_v44, %v10245_v36 }
 0x2a6   : > { %7323 = vrot.lane.b32.xlu1 %v7322_v1, %s8162_s11  ;;  %v2518_v40 = vsel %vm742_vm0, %v2489_v24, %v2490_v54  ;;  %v2519_v52 = vsel %vm742_vm0, %v2488_v47, %v2489_v24  ;;  %v2421_v46 = vsel %vm460_vm1, %v2390_v21, %v2391_v39  ;;  %v10340_v1 = vmul.f32 %v2422_v3, %v13082_v48  ;;  %v13088_v48 = vld [vmem:[#allocation38_spill] sm:$0xff] }
 0x2a7   : > { %v7104_v18 = vpop.permute.xlu1 %7103  ;;  %6346 = vmatprep.mubr.msk.bf16.mxu0 %vm2052_vm10, %v3452_v50  ;;  %v10334_v17 = vmul.f32 %v2519_v52, %v13080_v57  ;;  %v10337_v25 = vmul.f32 %v2518_v40, %v13081_v30  ;;  %v10343_v27 = vmul.f32 %v2421_v46, %v13084_v5  ;;  %v7327_v24 = vpack.i.bf16 %v10219_v2, %v2553_v44 }
 0x2a8   : > { %13083 = vst [vmem:[#allocation47_spill] sm:$0xff] %v10340_v1  ;;  %v2392_v50 = vrot.slane %v10303_v13, 7  ;;  %v7106_v3 = vunpack.i.h.bf16 %v7104_v18  ;;  %v7105_v52 = vunpack.i.l.bf16 %v7104_v18  ;;  %v7342_v57 = vpack.i.bf16 %v10323_v60, %v10303_v13 }
 0x2a9   : > { %13085 = vst [vmem:[#allocation51_spill] sm:$0xff] %v10343_v27  ;;  %v3455_v47 = vpack.c.bf16 %v10337_v25, %v10334_v17  ;;  %v7332_v21 = vpack.i.bf16 %v10343_v27, %v10340_v1  ;;  %v7352_v46 = vpack.i.bf16 %v2553_v44, %v10245_v36 }
 0x2aa   : > { %7328 = vrot.lane.b32.xlu1 %v7327_v24, %s8164_s25  ;;  %v2420_v24 = vsel %vm460_vm1, %v2391_v39, %v2392_v50  ;;  %v13087_v39 = vrot.slane %v10323_v60, 7 }
 0x2ab   : > { %v10352_v40 = vpop.permute.xlu1 %7108  ;;  %6347 = vmatmul.mubr.msk.bf16.gmra.mxu0 %vm2052_vm10, %v3455_v47  ;;  %7333 = vrot.lane.b32.xlu0 %v7332_v21, %s8163_s20  ;;  %v7337_v47 = vpack.i.bf16 %v10334_v17, %v10229_v43  ;;  %v10376_v2 = vmul.f32 %v2420_v24, %v13088_v48 }
 0x2ac   : > { %13086 = vst [vmem:[#allocation106_spill] sm:$0xff] %v10352_v40  ;;  %v10357_v30 = vpop.permute.xlu0 %7113  ;;  %v7111_v5 = vunpack.i.h.bf16 %v10352_v40  ;;  %v2419_v1 = vsel %vm460_vm1, %v2392_v50, %v13087_v39  ;;  %v13090_v36 = vunpack.i.l.bf16 %v10352_v40  ;;  %v13091_v50 = vrot.slane %v10323_v60, 1 }
 0x2ad   : > { %13089 = vst [vmem:[#allocation107_spill] sm:$0xff] %v10376_v2 }
 0x2ae   : > { %7343 = vrot.lane.b32.xlu1 %v7342_v57, %s8162_s11  ;;  %v3336_v57 = vsel %vm2052_vm10, %v9968_v11, %v7105_v52  ;;  %v2517_v24 = vsel %vm742_vm0, %v2490_v54, %v13091_v50 }
 0x2af   : > { %v7129_v18 = vpop.permute.xlu1 %7128  ;;  %7338 = vrot.lane.b32.xlu0 %v7337_v47, %s8164_s25  ;;  %v3337_v47 = vsel %vm2052_vm10, %v9980_v42, %v7106_v3  ;;  %v3368_v44 = vsel %vm3270_vm12, %v3336_v57, %v13090_v36  ;;  %v13092_v42 = vld [vmem:[#allocation37_spill] sm:$0xff] }
 0x2b0   : > { %v7131_v43 = vunpack.i.h.bf16 %v7129_v18  ;;  %v7130_v8 = vunpack.i.l.bf16 %v7129_v18  ;;  %v7119_v27 = vpop.permute.xlu0 %7118  ;;  %v3369_v26 = vsel %vm3270_vm12, %v3337_v47, %v7111_v5  ;;  %v10395_v57 = vmul.f32 %v2419_v1, %v13092_v42 }
 0x2b1   : > { %v7121_v39 = vunpack.i.h.bf16 %v7119_v27  ;;  %v7120_v18 = vunpack.i.l.bf16 %v7119_v27  ;;  %v7362_v47 = vpack.i.bf16 %v10216_v6, %v10337_v25 }
 0x2b2   : > { %7353 = vrot.lane.b32.xlu1 %v7352_v46, %s8163_s20  ;;  %v3400_v52 = vsel %vm3303_vm13, %v3368_v44, %v7130_v8  ;;  %v3401_v11 = vsel %vm3303_vm13, %v3369_v26, %v7131_v43  ;;  %13093 = vst [vmem:[#allocation56_spill] sm:$0xff] %v10395_v57  ;;  %v7357_v46 = vpack.i.bf16 %v10395_v57, %v10376_v2  ;;  %v13094_v8 = vld [vmem:[#allocation89_spill] sm:$0xff]  ;;  %v10405_v26 = vunpack.i.l.bf16 %v10357_v30  ;;  %v13096_v43 = vld [vmem:[#allocation108_spill] sm:$0xff] }
 0x2b3   : > { %7348 = vrot.lane.b32.xlu0 %v7332_v21, %s8162_s11  ;;  %v3433_v3 = vpack.c.bf16 %v3401_v11, %v3400_v52  ;;  %v10402_v44 = vmul.f32 %v2517_v24, %v13094_v8  ;;  %v3239_v11 = vsel %vm2052_vm10, %v9301_v28, %v7121_v39  ;;  %v3238_v1 = vsel %vm2052_vm10, %v13096_v43, %v7120_v18  ;;  %v13108_v2 = vld [vmem:[#allocation41_spill] sm:$0xff] }
 0x2b4   : > { %v7124_v5 = vpop.permute.xlu0 %7123  ;;  %13095 = vst [vmem:[#allocation57_spill] sm:$0xff] %v10405_v26 }
 0x2b5   : > { %v7126_v36 = vunpack.i.h.bf16 %v7124_v5  ;;  %v7125_v54 = vunpack.i.l.bf16 %v7124_v5  ;;  %3711 = vmatprep.mubr.bf16.mxu1 %v3433_v3  ;;  %v6320_v27 = vpop.f32.mrf.mxu0 }
 0x2b6   : > { %7363 = vrot.lane.b32.xlu1 %v7362_v47, %s8164_s25  ;;  %v2304_v21 = vadd.f32 %v6320_v27, %v9944_v12  ;;  %v7367_v47 = vpack.i.bf16 %v10402_v44, %v10223_v7 }
 0x2b7   : > { %v2295_v50 = vpop.f32.mrf.mxu0  ;;  %7358 = vrot.lane.b32.xlu0 %v7357_v46, %s8163_s20  ;;  %v3271_v52 = vsel %vm3270_vm12, %v3238_v1, %v7125_v54  ;;  %v3272_v24 = vsel %vm3270_vm12, %v3239_v11, %v7126_v36 }
 0x2b8   : > { %v2296_v3 = vadd.f32 %v9944_v12, %v2295_v50  ;;  %v3304_v5 = vsel %vm3303_vm13, %v3271_v52, %v10405_v26  ;;  %v3305_v39 = vsel %vm3303_vm13, %v3272_v24, %v10405_v26  ;;  %v10425_v40 = vmax.f32 %v2304_v21, 0.0  ;;  %v8086_v50 = vld [vmem:[%s12592_s4 + $0x88] sm:$0xff]   ;;  %v8087_v21 = vld [vmem:[%s12592_s4 + $0x80] sm:$0xff]  }
 0x2b9   : > { %v6321_v18 = vpop.f32.mrf.mxu0  ;;  %v3432_v28 = vpack.c.bf16 %v3305_v39, %v3304_v5  ;;  %v13100_v24 = vrot.slane %v10323_v60, 1  ;;  %v7139_v5 = vpop.permute.xlu1 %7138  ;;  %v13101_v39 = vld [vmem:[#allocation90_spill] sm:$0xff]  ;;  %v13102_v26 = vrot.slane %v10323_v60, 7 }
 0x2ba   : > { %v10423_v27 = vmax.f32 %v2296_v3, 0.0  ;;  %13098 = vst [vmem:[#allocation61_spill] sm:$0xff] %v10425_v40 }
 0x2bb   : > { %3712 = vmatmul.mubr.bf16.vlgmr.msra.gmra.mxu1 %v3432_v28  ;;  %v2298_v54 = vpop.f32.mrf.mxu0  ;;  %7368 = vrot.lane.b32.xlu0 %v7367_v47, %s8164_s25  ;;  %v2307_v28 = vadd.f32 %v6321_v18, %v9944_v12 }
 0x2bc   : > { %13097 = vst [vmem:[#allocation62_spill] sm:$0xff] %v10423_v27  ;;  %v2299_v36 = vadd.f32 %v9944_v12, %v2298_v54  ;;  %v2492_v11 = vrot.slane %v10423_v27, 1  ;;  %v2394_v1 = vrot.slane %v10423_v27, 7  ;;  %6412 = vmatpush3.bf16.msra.mxu1 %v8086_v50  ;;  %v2494_v54 = vrot.slane %v10425_v40, 1 }
 0x2bd   : > { %6411 = vmatprep.subr.bf16.mxu1 %v8087_v21 }
 0x2be   : > { %v10438_v52 = vmax.f32 %v2299_v36, 0.0  ;;  %v2516_v3 = vsel %vm742_vm0, %v13100_v24, %v2492_v11  ;;  %v2418_v24 = vsel %vm460_vm1, %v13102_v26, %v2394_v1  ;;  %v13104_v26 = vld [vmem:[#allocation91_spill] sm:$0xff] }
 0x2bf   : > { %7378 = vrot.lane.b32.xlu0 %v7357_v46, %s8162_s11  ;;  %v10446_v47 = vmul.f32 %v2516_v3, %v13101_v39  ;;  %v10459_v3 = vmax.f32 %v2307_v28, 0.0  ;;  %v13105_v28 = vld [vmem:[#allocation92_spill] sm:$0xff] }
 0x2c0   : > { %13099 = vst [vmem:[#allocation70_spill] sm:$0xff] %v10438_v52  ;;  %v7372_v50 = vpack.i.bf16 %v10438_v52, %v10423_v27  ;;  %v2493_v18 = vrot.slane %v10438_v52, 1  ;;  %v2395_v36 = vrot.slane %v10438_v52, 7  ;;  %6413 = vmatpush3.bf16.msra.mxu1 %v8087_v21 }
 0x2c1   : > { %v3458_v46 = vpack.c.bf16 %v10446_v47, %v10402_v44  ;;  %13103 = vst [vmem:[#allocation110_spill] sm:$0xff] %v10459_v3 }
 0x2c2   : > { %7373 = vrot.lane.b32.xlu1 %v7372_v50, %s8162_s11  ;;  %v2514_v39 = vsel %vm742_vm0, %v2493_v18, %v2494_v54  ;;  %v2515_v43 = vsel %vm742_vm0, %v2492_v11, %v2493_v18  ;;  %v2417_v8 = vsel %vm460_vm1, %v2394_v1, %v2395_v36  ;;  %v13106_v50 = vld [vmem:[#allocation42_spill] sm:$0xff]  ;;  %v7134_v11 = vpop.permute.xlu0 %7133  ;;  %v7382_v1 = vpack.i.bf16 %v10337_v25, %v10334_v17 }
 0x2c3   : > { %v10468_v42 = vpop.permute.xlu1 %7143  ;;  %6350 = vmatprep.mubr.msk.bf16.mxu0 %vm2052_vm10, %v3458_v46  ;;  %v10472_v21 = vmul.f32 %v2515_v43, %v13104_v26  ;;  %v10475_v48 = vmul.f32 %v2514_v39, %v13105_v28  ;;  %v10478_v57 = vmul.f32 %v2418_v24, %v13106_v50  ;;  %v10481_v6 = vmul.f32 %v2417_v8, %v13108_v2 }
 0x2c4   : > { %v7136_v39 = vunpack.i.h.bf16 %v7134_v11  ;;  %v2396_v8 = vrot.slane %v10425_v40, 7  ;;  %v7392_v26 = vpack.i.bf16 %v10301_v31, %v10446_v47  ;;  %v7140_v2 = vunpack.i.l.bf16 %v7139_v5 }
 0x2c5   : > { %13107 = vst [vmem:[#allocation111_spill] sm:$0xff] %v10478_v57  ;;  %13109 = vst [vmem:[#allocation112_spill] sm:$0xff] %v10481_v6  ;;  %v3461_v18 = vpack.c.bf16 %v10475_v48, %v10472_v21  ;;  %v7387_v43 = vpack.i.bf16 %v10481_v6, %v10478_v57  ;;  %v7116_v6 = vunpack.i.h.bf16 %v10357_v30  ;;  %v7141_v57 = vunpack.i.h.bf16 %v7139_v5 }
 0x2c6   : > { %7383 = vrot.lane.b32.xlu1 %v7382_v1, %s8163_s20  ;;  %v7397_v1 = vpack.i.bf16 %v10472_v21, %v10310_v35  ;;  %v3241_v31 = vsel %vm2052_vm10, %v10018_v34, %v7136_v39  ;;  %v7135_v35 = vunpack.i.l.bf16 %v7134_v11  ;;  %v13110_v30 = vrot.slane %v10459_v3, 7 }
 0x2c7   : > { %v7149_v46 = vpop.permute.xlu1 %7148  ;;  %6351 = vmatmul.mubr.msk.bf16.gmra.mxu0 %vm2052_vm10, %v3461_v18  ;;  %7388 = vrot.lane.b32.xlu0 %v7387_v43, %s8163_s20  ;;  %v2416_v18 = vsel %vm460_vm1, %v2395_v36, %v2396_v8 }
 0x2c8   : > { %v7151_v28 = vunpack.i.h.bf16 %v7149_v46  ;;  %v7150_v17 = vunpack.i.l.bf16 %v7149_v46  ;;  %v10494_v25 = vpop.permute.xlu0 %7163  ;;  %v2415_v5 = vsel %vm460_vm1, %v2396_v8, %v13110_v30 }
 0x2ca   : > { %v3339_v46 = vsel %vm2052_vm10, %v9974_v15, %v7151_v28  ;;  %v3338_v24 = vsel %vm2052_vm10, %v9966_v16, %v7150_v17  ;;  %7393 = vrot.lane.b32.xlu1 %v7392_v26, %s8164_s25  ;;  %v7145_v28 = vunpack.i.l.bf16 %v10468_v42  ;;  %v7402_v26 = vpack.i.bf16 %v10459_v3, %v10425_v40  ;;  %v13111_v15 = vld [vmem:[#allocation46_spill] sm:$0xff]  ;;  %v13113_v16 = vld [vmem:[#allocation45_spill] sm:$0xff] }
 0x2cb   : > { %v7154_v7 = vpop.permute.xlu1 %7153  ;;  %7398 = vrot.lane.b32.xlu0 %v7397_v1, %s8164_s25  ;;  %v3370_v36 = vsel %vm3270_vm12, %v3338_v24, %v7140_v2  ;;  %v10521_v34 = vmul.f32 %v2416_v18, %v13111_v15  ;;  %v3371_v39 = vsel %vm3270_vm12, %v3339_v46, %v7141_v57  ;;  %v13112_v2 = vrot.slane %v10459_v3, 1 }
 0x2cc   : > { %v7155_v50 = vunpack.i.l.bf16 %v7154_v7  ;;  %v7169_v17 = vpop.permute.xlu0 %7168  ;;  %v3402_v8 = vsel %vm3303_vm13, %v3370_v36, %v7116_v6  ;;  %v10532_v9 = vmul.f32 %v2415_v5, %v13113_v16  ;;  %v3240_v18 = vsel %vm2052_vm10, %v10028_v29, %v7135_v35 }
 0x2cd   : > { %v7170_v11 = vunpack.i.l.bf16 %v7169_v17  ;;  %v2513_v24 = vsel %vm742_vm0, %v2494_v54, %v13112_v2  ;;  %v7171_v1 = vunpack.i.h.bf16 %v7169_v17  ;;  %v7146_v57 = vunpack.i.h.bf16 %v10468_v42 }
 0x2ce   : > { %7403 = vrot.lane.b32.xlu1 %v7402_v26, %s8162_s11  ;;  %v3403_v30 = vsel %vm3303_vm13, %v3371_v39, %v7155_v50  ;;  %v7412_v54 = vpack.i.bf16 %v10446_v47, %v10402_v44  ;;  %v3340_v6 = vsel %vm2052_vm10, %v10055_v63, %v7145_v28  ;;  %v7417_v5 = vpack.i.bf16 %v10532_v9, %v10521_v34 }
 0x2cf   : > { %v7159_v46 = vpop.permute.xlu1 %7158  ;;  %7408 = vrot.lane.b32.xlu0 %v7387_v43, %s8162_s11  ;;  %v3436_v15 = vpack.c.bf16 %v3403_v30, %v3402_v8  ;;  %v10545_v17 = vmul.f32 %v2513_v24, %v9118_v58  ;;  %v3273_v26 = vsel %vm3270_vm12, %v3240_v18, %v7170_v11  ;;  %v7156_v39 = vunpack.i.h.bf16 %v7154_v7 }
 0x2d0   : > { %v7160_v36 = vunpack.i.l.bf16 %v7159_v46  ;;  %v7174_v50 = vpop.permute.xlu0 %7173  ;;  %v7161_v29 = vunpack.i.h.bf16 %v7159_v46  ;;  %v3274_v44 = vsel %vm3270_vm12, %v3241_v31, %v7171_v1  ;;  %v3341_v28 = vsel %vm2052_vm10, %v10064_v51, %v7146_v57 }
 0x2d1   : > { %v7176_v42 = vunpack.i.h.bf16 %v7174_v50  ;;  %v7175_v35 = vunpack.i.l.bf16 %v7174_v50  ;;  %3719 = vmatprep.mubr.bf16.mxu1 %v3436_v15  ;;  %v6324_v43 = vpop.f32.mrf.mxu0  ;;  %v7422_v15 = vpack.i.bf16 %v10303_v13, %v10475_v48  ;;  %v3306_v31 = vsel %vm3303_vm13, %v3273_v26, %v7156_v39 }
 0x2d2   : > { %7413 = vrot.lane.b32.xlu1 %v7412_v54, %s8163_s20  ;;  %v3372_v47 = vsel %vm3270_vm12, %v3340_v6, %v7160_v36  ;;  %v7427_v1 = vpack.i.bf16 %v10545_v17, %v10323_v60  ;;  %v2320_v18 = vadd.f32 %v6324_v43, %v9944_v12  ;;  %v3373_v54 = vsel %vm3270_vm12, %v3341_v28, %v7161_v29 }
 0x2d3   : > { %v7189_v2 = vpop.permute.xlu1 %7188  ;;  %v2311_v24 = vpop.f32.mrf.mxu0  ;;  %7418 = vrot.lane.b32.xlu0 %v7417_v5, %s8163_s20  ;;  %v3307_v8 = vsel %vm3303_vm13, %v3274_v44, %v7175_v35  ;;  %v3404_v6 = vsel %vm3303_vm13, %v3372_v47, %v7176_v42  ;;  %v7165_v43 = vunpack.i.l.bf16 %v10494_v25 }
 0x2d4   : > { %v7190_v11 = vunpack.i.l.bf16 %v7189_v2  ;;  %v2312_v7 = vadd.f32 %v9944_v12, %v2311_v24  ;;  %v7179_v30 = vpop.permute.xlu0 %7178  ;;  %v3435_v46 = vpack.c.bf16 %v3307_v8, %v3306_v31  ;;  %v10571_v28 = vmax.f32 %v2320_v18, 0.0 }
 0x2d5   : > { %v6325_v57 = vpop.f32.mrf.mxu0  ;;  %v7181_v50 = vunpack.i.h.bf16 %v7179_v30  ;;  %v7180_v35 = vunpack.i.l.bf16 %v7179_v30  ;;  %v13117_v18 = vrot.slane %v10459_v3, 1 }
 0x2d6   : > { %v10564_v36 = vmax.f32 %v2312_v7, 0.0  ;;  %7423 = vrot.lane.b32.xlu1 %v7422_v15, %s8164_s25  ;;  %v3405_v44 = vsel %vm3303_vm13, %v3373_v54, %v7190_v11  ;;  %3720 = vmatmul.mubr.bf16.gmra.mxu1 %v3435_v46  ;;  %13115 = vst [vmem:[#allocation113_spill] sm:$0xff] %v10571_v28  ;;  %v7191_v15 = vunpack.i.h.bf16 %v7189_v2 }
 0x2d7   : > { %v2314_v26 = vpop.f32.mrf.mxu0  ;;  %7428 = vrot.lane.b32.xlu0 %v7427_v1, %s8164_s25  ;;  %v3439_v39 = vpack.c.bf16 %v3405_v44, %v3404_v6  ;;  %v3243_v11 = vsel %vm2052_vm10, %v10044_v56, %v7181_v50  ;;  %v3242_v7 = vsel %vm2052_vm10, %v10038_v33, %v7180_v35  ;;  %v10580_v31 = vpop.permute.xlu1 %7198  ;;  %v12794_v35 = vrot.slane %v10571_v28, 1  ;;  %v10602_v44 = vld [vmem:[%s12591_s3] ss:$0 sm:$0xff] }
 0x2d8   : > { %13114 = vst [vmem:[#allocation45_spill] sm:$0xff] %v10564_v36  ;;  %v2315_v24 = vadd.f32 %v9944_v12, %v2314_v26  ;;  %v7184_v29 = vpop.permute.xlu0 %7183  ;;  %v2496_v8 = vrot.slane %v10564_v36, 1  ;;  %v2398_v56 = vrot.slane %v10564_v36, 7  ;;  %v2323_v26 = vadd.f32 %v10602_v44, %v6325_v57 }
 0x2d9   : > { %v7186_v42 = vunpack.i.h.bf16 %v7184_v29  ;;  %v7185_v47 = vunpack.i.l.bf16 %v7184_v29  ;;  %3727 = vmatprep.mubr.bf16.mxu1 %v3439_v39  ;;  %v13118_v57 = vrot.slane %v10459_v3, 7 }
 0x2da   : > { %v10578_v30 = vmax.f32 %v2315_v24, 0.0  ;;  %v2512_v2 = vsel %vm742_vm0, %v13117_v18, %v2496_v8 }
 0x2db   : > { %7438 = vrot.lane.b32.xlu0 %v7417_v5, %s8162_s11  ;;  %v3275_v12 = vsel %vm3270_vm12, %v3242_v7, %v7185_v47  ;;  %v3276_v1 = vsel %vm3270_vm12, %v3243_v11, %v7186_v42  ;;  %v10595_v5 = vmul.f32 %v2512_v2, %v9120_v32  ;;  %v2414_v47 = vsel %vm460_vm1, %v13118_v57, %v2398_v56  ;;  %v13120_v2 = vld [vmem:[#allocation50_spill] sm:$0xff] }
 0x2dc   : > { %13116 = vst [vmem:[#allocation114_spill] sm:$0xff] %v10578_v30  ;;  %v7432_v33 = vpack.i.bf16 %v10578_v30, %v10564_v36  ;;  %v3308_v46 = vsel %vm3303_vm13, %v3275_v12, %v7191_v15  ;;  %v3309_v54 = vsel %vm3303_vm13, %v3276_v1, %v7165_v43  ;;  %v2497_v50 = vrot.slane %v10578_v30, 1  ;;  %v7194_v15 = vpop.permute.xlu0 %7193 }
 0x2dd   : > { %v3438_v6 = vpack.c.bf16 %v3309_v54, %v3308_v46  ;;  %v3464_v39 = vpack.c.bf16 %v10595_v5, %v10545_v17  ;;  %v2399_v43 = vrot.slane %v10578_v30, 7  ;;  %v7442_v11 = vpack.i.bf16 %v10475_v48, %v10472_v21  ;;  %v13121_v48 = vld [vmem:[#allocation49_spill] sm:$0xff] }
 0x2de   : > { %7433 = vrot.lane.b32.xlu1 %v7432_v33, %s8162_s11  ;;  %v2510_v29 = vsel %vm742_vm0, %v2497_v50, %v12794_v35  ;;  %v2511_v42 = vsel %vm742_vm0, %v2496_v8, %v2497_v50  ;;  %v10632_v1 = vmax.f32 %v2323_v26, 0.0  ;;  %v10638_v33 = vmul.f32 %v2414_v47, %v13120_v2 }
 0x2df   : > { %v10609_v24 = vpop.permute.xlu1 %7203  ;;  %3728 = vmatmul.mubr.bf16.gmra.mxu1 %v3438_v6  ;;  %6354 = vmatprep.mubr.msk.bf16.mxu0 %vm2052_vm10, %v3464_v39  ;;  %v10625_v7 = vmul.f32 %v2511_v42, %v9124_v20  ;;  %v10628_v12 = vmul.f32 %v2510_v29, %v9126_v62  ;;  %v2413_v8 = vsel %vm460_vm1, %v2398_v56, %v2399_v43  ;;  %v7166_v39 = vunpack.i.h.bf16 %v10494_v25  ;;  %v13194_v62 = vld [vmem:[#allocation17_spill] sm:$0xff] }
 0x2e0   : > { %13119 = vst [vmem:[#allocation115_spill] sm:$0xff] %v10632_v1  ;;  %v10641_v21 = vmul.f32 %v2413_v8, %v13121_v48  ;;  %v7452_v26 = vpack.i.bf16 %v10423_v27, %v10595_v5  ;;  %v7200_v29 = vunpack.i.l.bf16 %v10580_v31  ;;  %v2400_v42 = vrot.slane %v10571_v28, 7 }
 0x2e1   : > { %v3467_v18 = vpack.c.bf16 %v10628_v12, %v10625_v7  ;;  %v7201_v57 = vunpack.i.h.bf16 %v10580_v31  ;;  %v7195_v25 = vunpack.i.l.bf16 %v7194_v15  ;;  %v7462_v35 = vpack.i.bf16 %v10632_v1, %v10571_v28 }
 0x2e2   : > { %7443 = vrot.lane.b32.xlu1 %v7442_v11, %s8163_s20  ;;  %v7447_v56 = vpack.i.bf16 %v10641_v21, %v10638_v33  ;;  %v7205_v8 = vunpack.i.l.bf16 %v10609_v24  ;;  %v13122_v48 = vrot.slane %v10632_v1, 7 }
 0x2e3   : > { %v7209_v46 = vpop.permute.xlu1 %7208  ;;  %6355 = vmatmul.mubr.msk.bf16.gmra.mxu0 %vm2052_vm10, %v3467_v18  ;;  %v7196_v18 = vunpack.i.h.bf16 %v7194_v15 }
 0x2e4   : > { %v7211_v54 = vunpack.i.h.bf16 %v7209_v46  ;;  %v7210_v6 = vunpack.i.l.bf16 %v7209_v46  ;;  %v10646_v50 = vpop.permute.xlu0 %7223  ;;  %7448 = vrot.lane.b32.xlu0 %v7447_v56, %s8163_s20 }
 0x2e6   : > { %v3343_v47 = vsel %vm2052_vm10, %v10058_v4, %v7211_v54  ;;  %v3342_v11 = vsel %vm2052_vm10, %v10053_v22, %v7210_v6  ;;  %7453 = vrot.lane.b32.xlu1 %v7452_v26, %s8164_s25  ;;  %v7457_v54 = vpack.i.bf16 %v10625_v7, %v10438_v52  ;;  %v2412_v6 = vsel %vm460_vm1, %v2399_v43, %v2400_v42 }
 0x2e7   : > { %v7214_v46 = vpop.permute.xlu1 %7213  ;;  %v3374_v31 = vsel %vm3270_vm12, %v3342_v11, %v7200_v29  ;;  %v3375_v15 = vsel %vm3270_vm12, %v3343_v47, %v7201_v57  ;;  %v2411_v43 = vsel %vm460_vm1, %v2400_v42, %v13122_v48  ;;  %v3245_v26 = vsel %vm2052_vm10, %v10097_v14, %v7196_v18 }
 0x2e8   : > { %v7215_v51 = vunpack.i.l.bf16 %v7214_v46  ;;  %v7229_v4 = vpop.permute.xlu0 %7228  ;;  %7458 = vrot.lane.b32.xlu0 %v7457_v54, %s8164_s25  ;;  %v3406_v29 = vsel %vm3303_vm13, %v3374_v31, %v7166_v39  ;;  %v3244_v57 = vsel %vm2052_vm10, %v10102_v19, %v7195_v25  ;;  %v13124_v31 = vrot.slane %v10632_v1, 1  ;;  %v13126_v25 = vld [vmem:[#allocation54_spill] sm:$0xff] }
 0x2e9   : > { %v7230_v22 = vunpack.i.l.bf16 %v7229_v4  ;;  %v7231_v63 = vunpack.i.h.bf16 %v7229_v4  ;;  %v13123_v4 = vld [vmem:[#allocation55_spill] sm:$0xff]  ;;  %v13125_v48 = vrot.slane %v10571_v28, 1 }
 0x2ea   : > { %7463 = vrot.lane.b32.xlu1 %v7462_v35, %s8162_s11  ;;  %v3407_v11 = vsel %vm3303_vm13, %v3375_v15, %v7215_v51  ;;  %v10684_v20 = vmul.f32 %v2412_v6, %v13123_v4  ;;  %v7206_v35 = vunpack.i.h.bf16 %v10609_v24  ;;  %v7472_v51 = vpack.i.bf16 %v10595_v5, %v10545_v17 }
 0x2eb   : > { %v7219_v47 = vpop.permute.xlu1 %7218  ;;  %v3442_v54 = vpack.c.bf16 %v3407_v11, %v3406_v29  ;;  %v2509_v14 = vsel %vm742_vm0, %v13125_v48, %v13124_v31  ;;  %v10696_v6 = vmul.f32 %v2411_v43, %v13126_v25  ;;  %v3277_v24 = vsel %vm3270_vm12, %v3244_v57, %v7230_v22 }
 0x2ec   : > { %v7234_v39 = vpop.permute.xlu0 %7233  ;;  %v7220_v42 = vunpack.i.l.bf16 %v7219_v47  ;;  %v3344_v15 = vsel %vm2052_vm10, %v10137_v23, %v7205_v8  ;;  %v7216_v17 = vunpack.i.h.bf16 %v7214_v46  ;;  %v7221_v5 = vunpack.i.h.bf16 %v7219_v47  ;;  %7468 = vrot.lane.b32.xlu0 %v7447_v56, %s8162_s11 }
 0x2ed   : > { %v7235_v19 = vunpack.i.l.bf16 %v7234_v39  ;;  %3735 = vmatprep.mubr.bf16.mxu1 %v3442_v54  ;;  %v6328_v18 = vpop.f32.mrf.mxu0  ;;  %v3278_v29 = vsel %vm3270_vm12, %v3245_v26, %v7231_v63  ;;  %v7477_v54 = vpack.i.bf16 %v10696_v6, %v10684_v20  ;;  %v7482_v22 = vpack.i.bf16 %v10425_v40, %v10628_v12 }
 0x2ee   : > { %7473 = vrot.lane.b32.xlu1 %v7472_v51, %s8163_s20  ;;  %v10710_v8 = vmul.f32 %v2509_v14, %v9133_v45  ;;  %v7236_v46 = vunpack.i.h.bf16 %v7234_v39  ;;  %v3310_v63 = vsel %vm3303_vm13, %v3277_v24, %v7216_v17  ;;  %v3345_v26 = vsel %vm2052_vm10, %v10147_v10, %v7206_v35 }
 0x2ef   : > { %v7249_v11 = vpop.permute.xlu1 %7248  ;;  %v2327_v31 = vpop.f32.mrf.mxu0  ;;  %v3311_v43 = vsel %vm3303_vm13, %v3278_v29, %v7235_v19  ;;  %v3376_v19 = vsel %vm3270_vm12, %v3344_v15, %v7220_v42  ;;  %v3377_v39 = vsel %vm3270_vm12, %v3345_v26, %v7221_v5  ;;  %v2336_v15 = vadd.f32 %v10602_v44, %v6328_v18 }
 0x2f0   : > { %v7250_v57 = vunpack.i.l.bf16 %v7249_v11  ;;  %v2328_v56 = vadd.f32 %v10602_v44, %v2327_v31  ;;  %v7239_v47 = vpop.permute.xlu0 %7238  ;;  %v3441_v48 = vpack.c.bf16 %v3311_v43, %v3310_v63  ;;  %7478 = vrot.lane.b32.xlu0 %v7477_v54, %s8163_s20  ;;  %v7225_v31 = vunpack.i.l.bf16 %v10646_v50 }
 0x2f1   : > { %v6329_v51 = vpop.f32.mrf.mxu0  ;;  %v7241_v14 = vunpack.i.h.bf16 %v7239_v47  ;;  %v7240_v23 = vunpack.i.l.bf16 %v7239_v47  ;;  %v7487_v17 = vpack.i.bf16 %v10710_v8, %v10459_v3  ;;  %v7251_v43 = vunpack.i.h.bf16 %v7249_v11 }
 0x2f2   : > { %v10717_v29 = vmax.f32 %v2328_v56, 0.0  ;;  %7483 = vrot.lane.b32.xlu1 %v7482_v22, %s8164_s25  ;;  %v2339_v24 = vadd.f32 %v10602_v44, %v6329_v51  ;;  %3736 = vmatmul.mubr.bf16.gmra.mxu1 %v3441_v48  ;;  %v3409_v42 = vsel %vm3303_vm13, %v3377_v39, %v7250_v57  ;;  %v3408_v22 = vsel %vm3303_vm13, %v3376_v19, %v7236_v46 }
 0x2f3   : > { %v2330_v35 = vpop.f32.mrf.mxu0  ;;  %v3445_v26 = vpack.c.bf16 %v3409_v42, %v3408_v22  ;;  %v3247_v48 = vsel %vm2052_vm10, %v10127_v0, %v7241_v14  ;;  %v3246_v10 = vsel %vm2052_vm10, %v10122_v53, %v7240_v23  ;;  %v10735_v57 = vpop.permute.xlu1 %7258  ;;  %v10750_v39 = vmax.f32 %v2336_v15, 0.0  ;;  %v13133_v22 = vld [vmem:[#allocation60_spill] sm:$0xff] }
 0x2f4   : > { %13127 = vst [vmem:[#allocation116_spill] sm:$0xff] %v10717_v29  ;;  %v2331_v56 = vadd.f32 %v10602_v44, %v2330_v35  ;;  %v7244_v47 = vpop.permute.xlu0 %7243  ;;  %v2402_v51 = vrot.slane %v10717_v29, 7  ;;  %7488 = vrot.lane.b32.xlu0 %v7487_v17, %s8164_s25  ;;  %v2500_v44 = vrot.slane %v10717_v29, 1  ;;  %v10741_v11 = vmax.f32 %v2339_v24, 0.0 }
 0x2f5   : > { %v7246_v5 = vunpack.i.h.bf16 %v7244_v47  ;;  %v7245_v63 = vunpack.i.l.bf16 %v7244_v47  ;;  %3743 = vmatprep.mubr.bf16.mxu1 %v3445_v26  ;;  %13130 = vst [vmem:[#allocation119_spill] sm:$0xff] %v10750_v39  ;;  %v13131_v24 = vrot.slane %v10632_v1, 7 }
 0x2f6   : > { %v10737_v18 = vmax.f32 %v2331_v56, 0.0  ;;  %13129 = vst [vmem:[#allocation118_spill] sm:$0xff] %v10741_v11  ;;  %v12803_v56 = vrot.slane %v10741_v11, 7 }
 0x2f7   : > { %v3279_v46 = vsel %vm3270_vm12, %v3246_v10, %v7245_v63  ;;  %v3280_v19 = vsel %vm3270_vm12, %v3247_v48, %v7246_v5  ;;  %v2410_v17 = vsel %vm460_vm1, %v13131_v24, %v2402_v51  ;;  %v13134_v63 = vld [vmem:[#allocation59_spill] sm:$0xff] }
 0x2f8   : > { %13128 = vst [vmem:[#allocation117_spill] sm:$0xff] %v10737_v18  ;;  %v7492_v0 = vpack.i.bf16 %v10737_v18, %v10717_v29  ;;  %v3312_v53 = vsel %vm3303_vm13, %v3279_v46, %v7251_v43  ;;  %v3313_v23 = vsel %vm3303_vm13, %v3280_v19, %v7225_v31  ;;  %v2403_v14 = vrot.slane %v10737_v18, 7  ;;  %7498 = vrot.lane.b32.xlu0 %v7477_v54, %s8162_s11  ;;  %v7254_v47 = vpop.permute.xlu0 %7253 }
 0x2f9   : > { %v3444_v35 = vpack.c.bf16 %v3313_v23, %v3312_v53  ;;  %v13132_v31 = vrot.slane %v10632_v1, 1  ;;  %v2501_v43 = vrot.slane %v10737_v18, 1  ;;  %v7502_v54 = vpack.i.bf16 %v10628_v12, %v10625_v7 }
 0x2fa   : > { %7493 = vrot.lane.b32.xlu1 %v7492_v0, %s8162_s11  ;;  %v10758_v10 = vpop.permute.xlu1 %7263  ;;  %v2409_v42 = vsel %vm460_vm1, %v2402_v51, %v2403_v14  ;;  %v10771_v5 = vmul.f32 %v2410_v17, %v13133_v22  ;;  %v7226_v46 = vunpack.i.h.bf16 %v10646_v50  ;;  %v2404_v19 = vrot.slane %v10750_v39, 7 }
 0x2fb   : > { %v2508_v15 = vsel %vm742_vm0, %v13132_v31, %v2500_v44  ;;  %3744 = vmatmul.mubr.bf16.gmra.mxu1 %v3444_v35  ;;  %v10774_v26 = vmul.f32 %v2409_v42, %v13134_v63  ;;  %v2507_v48 = vsel %vm742_vm0, %v2500_v44, %v2501_v43  ;;  %v2502_v0 = vrot.slane %v10750_v39, 1 }
 0x2fc   : > { %v10777_v51 = vmul.f32 %v2508_v15, %v9135_v49  ;;  %v2503_v7 = vrot.slane %v10741_v11, 1  ;;  %v7256_v12 = vunpack.i.h.bf16 %v7254_v47  ;;  %v7255_v53 = vunpack.i.l.bf16 %v7254_v47 }
 0x2fd   : > { %v7507_v35 = vpack.i.bf16 %v10774_v26, %v10771_v5  ;;  %v10789_v24 = vmul.f32 %v2507_v48, %v12981_v61  ;;  %v7261_v44 = vunpack.i.h.bf16 %v10735_v57  ;;  %v7260_v50 = vunpack.i.l.bf16 %v10735_v57  ;;  %v13135_v61 = vld [vmem:[#allocation27_spill] sm:$0xff] }
 0x2fe   : > { %7503 = vrot.lane.b32.xlu1 %v7502_v54, %s8163_s20  ;;  %v7269_v23 = vpop.permute.xlu1 %7268  ;;  %v7512_v15 = vpack.i.bf16 %v10564_v36, %v10777_v51  ;;  %v7522_v47 = vpack.i.bf16 %v10741_v11, %v10750_v39  ;;  %v2407_v54 = vsel %vm460_vm1, %v2404_v19, %v12803_v56  ;;  %v2506_v57 = vsel %vm742_vm0, %v2501_v43, %v2502_v0 }
 0x2ff   : > { %v7271_v17 = vunpack.i.h.bf16 %v7269_v23  ;;  %v7270_v42 = vunpack.i.l.bf16 %v7269_v23  ;;  %v10793_v31 = vpop.permute.xlu0 %7283  ;;  %7508 = vrot.lane.b32.xlu0 %v7507_v35, %s8163_s20  ;;  %v10811_v22 = vmul.f32 %v2506_v57, %v12982_v59  ;;  %v2505_v63 = vsel %vm742_vm0, %v2502_v0, %v2503_v7 }
 0x300   : > { %v3249_v4 = vsel %vm2052_vm10, %v10180_v55, %v7256_v12  ;;  %v3248_v56 = vsel %vm2052_vm10, %v13135_v61, %v7255_v53  ;;  %v7266_v57 = vunpack.i.h.bf16 %v10758_v10  ;;  %v2408_v55 = vsel %vm460_vm1, %v2403_v14, %v2404_v19 }
 0x301   : > { %v3347_v48 = vsel %vm2052_vm10, %v10140_v37, %v7271_v17  ;;  %v3346_v23 = vsel %vm2052_vm10, %v10134_v41, %v7270_v42  ;;  %v7517_v17 = vpack.i.bf16 %v10789_v24, %v10578_v30  ;;  %v7265_v37 = vunpack.i.l.bf16 %v10758_v10 }
 0x302   : > { %7513 = vrot.lane.b32.xlu1 %v7512_v15, %s8164_s25  ;;  %v7274_v43 = vpop.permute.xlu1 %7273  ;;  %v3378_v42 = vsel %vm3270_vm12, %v3346_v23, %v7260_v50  ;;  %v3379_v12 = vsel %vm3270_vm12, %v3347_v48, %v7261_v44  ;;  %v13136_v15 = vld [vmem:[#allocation100_spill] sm:$0xff]  ;;  %v2504_v49 = vsel %vm742_vm0, %v2503_v7, 0.0  ;;  %v7532_v44 = vpack.i.bf16 %v10777_v51, %v10710_v8  ;;  %v13137_v48 = vld [vmem:[#allocation65_spill] sm:$0xff] }
 0x303   : > { %v7275_v41 = vunpack.i.l.bf16 %v7274_v43  ;;  %v7289_v0 = vpop.permute.xlu0 %7288  ;;  %7518 = vrot.lane.b32.xlu0 %v7517_v17, %s8164_s25  ;;  %v10832_v59 = vmul.f32 %v2505_v63, %v13136_v15  ;;  %v3410_v23 = vsel %vm3303_vm13, %v3378_v42, %v7226_v46  ;;  %v2469_v17 = vmul.f32 %v2408_v55, %v13137_v48  ;;  %v13138_v15 = vld [vmem:[#allocation64_spill] sm:$0xff]  ;;  %v13140_v55 = vld [vmem:[#allocation35_spill] sm:$0xff] }
 0x304   : > { %v7290_v61 = vunpack.i.l.bf16 %v7289_v0  ;;  %v7291_v50 = vunpack.i.h.bf16 %v7289_v0  ;;  %v10843_v0 = vmul.f32 %v2407_v54, %v13138_v15  ;;  %v7276_v7 = vunpack.i.h.bf16 %v7274_v43 }
 0x305   : > { %v3411_v10 = vsel %vm3303_vm13, %v3379_v12, %v7275_v41  ;;  %v13139_v41 = vld [vmem:[#allocation101_spill] sm:$0xff] }
 0x306   : > { %7523 = vrot.lane.b32.xlu1 %v7522_v47, %s8162_s11  ;;  %v7279_v14 = vpop.permute.xlu1 %7278  ;;  %v3448_v19 = vpack.c.bf16 %v3411_v10, %v3410_v23  ;;  %v3281_v46 = vsel %vm3270_vm12, %v3248_v56, %v7290_v61  ;;  %v10847_v42 = vmul.f32 %v2504_v49, %v13139_v41  ;;  %v3348_v10 = vsel %vm2052_vm10, %v13140_v55, %v7265_v37 }
 0x307   : > { %v7280_v53 = vunpack.i.l.bf16 %v7279_v14  ;;  %v7294_v63 = vpop.permute.xlu0 %7293  ;;  %v7281_v12 = vunpack.i.h.bf16 %v7279_v14  ;;  %7528 = vrot.lane.b32.xlu0 %v7507_v35, %s8162_s11  ;;  %v3282_v54 = vsel %vm3270_vm12, %v3249_v4, %v7291_v50  ;;  %v7537_v43 = vpack.i.bf16 %v10843_v0, %v2469_v17 }
 0x308   : > { %v7295_v47 = vunpack.i.l.bf16 %v7294_v63  ;;  %3751 = vmatprep.mubr.bf16.mxu1 %v3448_v19  ;;  %v7296_v48 = vunpack.i.h.bf16 %v7294_v63  ;;  %v3314_v35 = vsel %vm3303_vm13, %v3281_v46, %v7276_v7  ;;  %v13141_v19 = vld [vmem:[#allocation103_spill] sm:$0xff]  ;;  %v13142_v50 = vrot.slane %v10741_v11, 7 }
 0x309   : > { %v3380_v14 = vsel %vm3270_vm12, %v3348_v10, %v7280_v53  ;;  %v3349_v37 = vsel %vm2052_vm10, %v13141_v19, %v7266_v57  ;;  %v7542_v46 = vpack.i.bf16 %v10571_v28, %v10811_v22 }
 0x30a   : > { %7533 = vrot.lane.b32.xlu1 %v7532_v44, %s8163_s20  ;;  %v7309_v49 = vpop.permute.xlu1 %7308  ;;  %v3315_v61 = vsel %vm3303_vm13, %v3282_v54, %v7295_v47  ;;  %v2406_v44 = vsel %vm460_vm1, %v13142_v50, 0.0  ;;  %v3381_v7 = vsel %vm3270_vm12, %v3349_v37, %v7281_v12  ;;  %v3412_v57 = vsel %vm3303_vm13, %v3380_v14, %v7296_v48 }
 0x30b   : > { %v7310_v63 = vunpack.i.l.bf16 %v7309_v49  ;;  %v7299_v23 = vpop.permute.xlu0 %7298  ;;  %v3447_v4 = vpack.c.bf16 %v3315_v61, %v3314_v35  ;;  %7538 = vrot.lane.b32.xlu0 %v7537_v43, %s8163_s20  ;;  %v7547_v54 = vpack.i.bf16 %v10832_v59, %v10632_v1  ;;  %v13143_v61 = vld [vmem:[#allocation68_spill] sm:$0xff]  ;;  %v7285_v48 = vunpack.i.l.bf16 %v10793_v31 }
 0x30c   : > { %v7301_v47 = vunpack.i.h.bf16 %v7299_v23  ;;  %v7300_v53 = vunpack.i.l.bf16 %v7299_v23  ;;  %v2471_v43 = vmul.f32 %v2406_v44, %v13143_v61  ;;  %v13144_v23 = vmov 0.0   ;;  %v13147_v44 = vld [vmem:[#allocation12_spill] sm:$0xff] }
 0x30d   : > { %3752 = vmatmul.mubr.bf16.gmra.mxu1 %v3447_v4  ;;  %v3413_v10 = vsel %vm3303_vm13, %v3381_v7, %v7310_v63  ;;  %v7552_v37 = vpack.i.bf16 %v2469_v17, %v13144_v23  ;;  %v7311_v14 = vunpack.i.h.bf16 %v7309_v49  ;;  %v13145_v63 = vld [vmem:[#allocation36_spill] sm:$0xff]  ;;  %v7557_v49 = vpack.i.bf16 %v10811_v22, %v10789_v24 }
 0x30e   : > { %7543 = vrot.lane.b32.xlu1 %v7542_v46, %s8164_s25  ;;  %v3451_v35 = vpack.c.bf16 %v3413_v10, %v3412_v57  ;;  %v3251_v4 = vsel %vm2052_vm10, %v13145_v63, %v7301_v47  ;;  %v13146_v46 = vld [vmem:[#allocation23_spill] sm:$0xff]  ;;  %v7562_v57 = vpack.i.bf16 %v13147_v44, %v2471_v43  ;;  %v7567_v43 = vpack.i.bf16 %v10717_v29, %v10847_v42 }
 0x30f   : > { %v7304_v50 = vpop.permute.xlu0 %7303  ;;  %7548 = vrot.lane.b32.xlu0 %v7547_v54, %s8164_s25  ;;  %v3250_v7 = vsel %vm2052_vm10, %v13146_v46, %v7300_v53 }
 0x310   : > { %v7306_v56 = vunpack.i.h.bf16 %v7304_v50  ;;  %v7305_v12 = vunpack.i.l.bf16 %v7304_v50  ;;  %3759 = vmatprep.mubr.bf16.mxu1 %v3451_v35  ;;  %v7319_v50 = vpop.permute.xlu1 %7318 }
 0x312   : > { %7553 = vrot.lane.b32.xlu1 %v7552_v37, %s8162_s11  ;;  %v3283_v10 = vsel %vm3270_vm12, %v3250_v7, %v7305_v12  ;;  %v3284_v54 = vsel %vm3270_vm12, %v3251_v4, %v7306_v56  ;;  %v13149_v4 = vld [vmem:[#allocation32_spill] sm:$0xff]  ;;  %v7321_v7 = vunpack.i.h.bf16 %v7319_v50 }
 0x313   : > { %v3316_v35 = vsel %vm3303_vm13, %v3283_v10, %v7311_v14  ;;  %v3317_v17 = vsel %vm3303_vm13, %v3284_v54, %v7285_v48  ;;  %7563 = vrot.lane.b32.xlu0 %v7562_v57, %s8163_s20  ;;  %v7314_v12 = vpop.permute.xlu0 %7313  ;;  %v7320_v14 = vunpack.i.l.bf16 %v7319_v50  ;;  %v13148_v48 = vld [vmem:[#allocation31_spill] sm:$0xff]  ;;  %v7286_v54 = vunpack.i.h.bf16 %v10793_v31  ;;  %v13151_v31 = vld [vmem:[#allocation40_spill] sm:$0xff] }
 0x314   : > { %v3450_v47 = vpack.c.bf16 %v3317_v17, %v3316_v35  ;;  %v7315_v44 = vunpack.i.l.bf16 %v7314_v12 }
 0x316   : > { %7558 = vrot.lane.b32.xlu1 %v7557_v49, %s8163_s20  ;;  %3760 = vmatmul.mubr.bf16.gmra.mxu1 %v3450_v47  ;;  %v7316_v49 = vunpack.i.h.bf16 %v7314_v12 }
 0x318   : > { %v7324_v53 = vpop.permute.xlu1 %7323 }
 0x319   : > { %v7326_v56 = vunpack.i.h.bf16 %v7324_v53  ;;  %v7325_v37 = vunpack.i.l.bf16 %v7324_v53 }
 0x31a   : > { %7568 = vrot.lane.b32.xlu1 %v7567_v43, %s8164_s25 }
 0x31b   : > { %v3351_v63 = vsel %vm2052_vm10, %v13148_v48, %v7326_v56  ;;  %v3350_v46 = vsel %vm2052_vm10, %v13149_v4, %v7325_v37  ;;  %v13150_v48 = vld [vmem:[#allocation44_spill] sm:$0xff] }
 0x31c   : > { %v7329_v57 = vpop.permute.xlu1 %7328  ;;  %v3382_v10 = vsel %vm3270_vm12, %v3350_v46, %v7320_v14  ;;  %v3383_v53 = vsel %vm3270_vm12, %v3351_v63, %v7321_v7  ;;  %v3252_v50 = vsel %vm2052_vm10, %v13150_v48, %v7315_v44  ;;  %v3253_v46 = vsel %vm2052_vm10, %v13151_v31, %v7316_v49 }
 0x31d   : > { %v7330_v35 = vunpack.i.l.bf16 %v7329_v57  ;;  %v7334_v17 = vpop.permute.xlu0 %7333  ;;  %v3414_v19 = vsel %vm3303_vm13, %v3382_v10, %v7286_v54  ;;  %v7331_v12 = vunpack.i.h.bf16 %v7329_v57 }
 0x31e   : > { %v7335_v47 = vunpack.i.l.bf16 %v7334_v17  ;;  %v7336_v43 = vunpack.i.h.bf16 %v7334_v17 }
 0x31f   : > { %v3415_v56 = vsel %vm3303_vm13, %v3383_v53, %v7330_v35 }
 0x320   : > { %v7344_v37 = vpop.permute.xlu1 %7343  ;;  %v3454_v4 = vpack.c.bf16 %v3415_v56, %v3414_v19  ;;  %v3285_v14 = vsel %vm3270_vm12, %v3252_v50, %v7335_v47  ;;  %v3286_v7 = vsel %vm3270_vm12, %v3253_v46, %v7336_v43  ;;  %v13152_v47 = vld [vmem:[#allocation104_spill] sm:$0xff] }
 0x321   : > { %v7339_v55 = vpop.permute.xlu0 %7338  ;;  %v7345_v63 = vunpack.i.l.bf16 %v7344_v37  ;;  %v3318_v54 = vsel %vm3303_vm13, %v3285_v14, %v7331_v12  ;;  %v7346_v48 = vunpack.i.h.bf16 %v7344_v37  ;;  %v13153_v50 = vld [vmem:[#allocation48_spill] sm:$0xff] }
 0x322   : > { %v7340_v61 = vunpack.i.l.bf16 %v7339_v55  ;;  %3767 = vmatprep.mubr.bf16.mxu1 %v3454_v4  ;;  %v7341_v31 = vunpack.i.h.bf16 %v7339_v55 }
 0x323   : > { %v3352_v56 = vsel %vm2052_vm10, %v13152_v47, %v7345_v63  ;;  %v3353_v43 = vsel %vm2052_vm10, %v13153_v50, %v7346_v48  ;;  %v13155_v48 = vld [vmem:[#allocation43_spill] sm:$0xff] }
 0x324   : > { %v7354_v10 = vpop.permute.xlu1 %7353  ;;  %v3319_v35 = vsel %vm3303_vm13, %v3286_v7, %v7340_v61 }
 0x325   : > { %v7355_v44 = vunpack.i.l.bf16 %v7354_v10  ;;  %v7349_v19 = vpop.permute.xlu0 %7348  ;;  %v3453_v17 = vpack.c.bf16 %v3319_v35, %v3318_v54  ;;  %v7356_v53 = vunpack.i.h.bf16 %v7354_v10  ;;  %v13154_v54 = vld [vmem:[#allocation39_spill] sm:$0xff] }
 0x326   : > { %v7350_v57 = vunpack.i.l.bf16 %v7349_v19  ;;  %v7351_v61 = vunpack.i.h.bf16 %v7349_v19 }
 0x327   : > { %3768 = vmatmul.mubr.bf16.gmra.mxu1 %v3453_v17  ;;  %v3384_v4 = vsel %vm3270_vm12, %v3352_v56, %v7355_v44  ;;  %v3385_v12 = vsel %vm3270_vm12, %v3353_v43, %v7356_v53 }
 0x328   : > { %v7364_v49 = vpop.permute.xlu1 %7363  ;;  %v3416_v10 = vsel %vm3303_vm13, %v3384_v4, %v7341_v31  ;;  %v3254_v35 = vsel %vm2052_vm10, %v13154_v54, %v7350_v57  ;;  %v3255_v55 = vsel %vm2052_vm10, %v13155_v48, %v7351_v61 }
 0x329   : > { %v7365_v14 = vunpack.i.l.bf16 %v7364_v49  ;;  %v7359_v46 = vpop.permute.xlu0 %7358  ;;  %v7366_v50 = vunpack.i.h.bf16 %v7364_v49 }
 0x32a   : > { %v7360_v37 = vunpack.i.l.bf16 %v7359_v46  ;;  %v7361_v7 = vunpack.i.h.bf16 %v7359_v46 }
 0x32b   : > { %v3417_v63 = vsel %vm3303_vm13, %v3385_v12, %v7365_v14 }
 0x32c   : > { %v3457_v17 = vpack.c.bf16 %v3417_v63, %v3416_v10  ;;  %v3287_v56 = vsel %vm3270_vm12, %v3254_v35, %v7360_v37  ;;  %v3288_v53 = vsel %vm3270_vm12, %v3255_v55, %v7361_v7  ;;  %v13156_v55 = vld [vmem:[#allocation47_spill] sm:$0xff] }
 0x32d   : > { %v7369_v44 = vpop.permute.xlu0 %7368  ;;  %v3320_v43 = vsel %vm3303_vm13, %v3287_v56, %v7366_v50 }
 0x32e   : > { %v7370_v19 = vunpack.i.l.bf16 %v7369_v44  ;;  %3775 = vmatprep.mubr.bf16.mxu1 %v3457_v17  ;;  %v7371_v50 = vunpack.i.h.bf16 %v7369_v44 }
 0x330   : > { %v3321_v4 = vsel %vm3303_vm13, %v3288_v53, %v7370_v19 }
 0x331   : > { %v3456_v31 = vpack.c.bf16 %v3321_v4, %v3320_v43  ;;  %v7379_v57 = vpop.permute.xlu0 %7378 }
 0x332   : > { %v7380_v10 = vunpack.i.l.bf16 %v7379_v57  ;;  %v7381_v61 = vunpack.i.h.bf16 %v7379_v57 }
 0x333   : > { %3776 = vmatmul.mubr.bf16.gmra.mxu1 %v3456_v31 }
 0x334   : > { %v7374_v14 = vpop.permute.xlu1 %7373  ;;  %v3256_v19 = vsel %vm2052_vm10, %v13156_v55, %v7380_v10 }
 0x335   : > { %v7375_v46 = vunpack.i.l.bf16 %v7374_v14  ;;  %v7376_v37 = vunpack.i.h.bf16 %v7374_v14  ;;  %v13157_v14 = vld [vmem:[#allocation51_spill] sm:$0xff] }
 0x336   : > { %v3257_v57 = vsel %vm2052_vm10, %v13157_v14, %v7381_v61 }
 0x337   : > { %v3354_v7 = vsel %vm2052_vm10, %v10303_v13, %v7375_v46  ;;  %v3355_v53 = vsel %vm2052_vm10, %v10323_v60, %v7376_v37 }
 0x338   : > { %v7384_v12 = vpop.permute.xlu1 %7383 }
 0x339   : > { %v7385_v63 = vunpack.i.l.bf16 %v7384_v12  ;;  %v7389_v54 = vpop.permute.xlu0 %7388  ;;  %v7386_v49 = vunpack.i.h.bf16 %v7384_v12 }
 0x33a   : > { %v7390_v35 = vunpack.i.l.bf16 %v7389_v54  ;;  %v7391_v17 = vunpack.i.h.bf16 %v7389_v54 }
 0x33b   : > { %v3386_v48 = vsel %vm3270_vm12, %v3354_v7, %v7385_v63  ;;  %v3387_v46 = vsel %vm3270_vm12, %v3355_v53, %v7386_v49 }
 0x33c   : > { %v7394_v56 = vpop.permute.xlu1 %7393  ;;  %v3289_v44 = vsel %vm3270_vm12, %v3256_v19, %v7390_v35  ;;  %v3418_v54 = vsel %vm3303_vm13, %v3386_v48, %v7371_v50  ;;  %v3290_v10 = vsel %vm3270_vm12, %v3257_v57, %v7391_v17 }
 0x33d   : > { %v7396_v43 = vunpack.i.h.bf16 %v7394_v56  ;;  %v7395_v4 = vunpack.i.l.bf16 %v7394_v56  ;;  %v7399_v31 = vpop.permute.xlu0 %7398 }
 0x33e   : > { %v7400_v12 = vunpack.i.l.bf16 %v7399_v31  ;;  %v7401_v57 = vunpack.i.h.bf16 %v7399_v31 }
 0x33f   : > { %v3419_v63 = vsel %vm3303_vm13, %v3387_v46, %v7395_v4  ;;  %v3322_v7 = vsel %vm3303_vm13, %v3289_v44, %v7396_v43 }
 0x340   : > { %v7404_v37 = vpop.permute.xlu1 %7403  ;;  %v3460_v55 = vpack.c.bf16 %v3419_v63, %v3418_v54  ;;  %v3323_v56 = vsel %vm3303_vm13, %v3290_v10, %v7400_v12 }
 0x341   : > { %v7409_v60 = vpop.permute.xlu0 %7408  ;;  %v3459_v13 = vpack.c.bf16 %v3323_v56, %v3322_v7  ;;  %v7405_v61 = vunpack.i.l.bf16 %v7404_v37  ;;  %v7406_v53 = vunpack.i.h.bf16 %v7404_v37 }
 0x342   : > { %3783 = vmatprep.mubr.bf16.mxu1 %v3460_v55  ;;  %v7410_v35 = vunpack.i.l.bf16 %v7409_v60  ;;  %v7411_v48 = vunpack.i.h.bf16 %v7409_v60  ;;  %v13159_v60 = vld [vmem:[#allocation56_spill] sm:$0xff] }
 0x343   : > { %3784 = vmatmul.mubr.bf16.gmra.mxu1 %v3459_v13  ;;  %v3356_v17 = vsel %vm2052_vm10, %v10423_v27, %v7405_v61  ;;  %v3357_v44 = vsel %vm2052_vm10, %v10438_v52, %v7406_v53  ;;  %v13158_v13 = vld [vmem:[#allocation107_spill] sm:$0xff] }
 0x344   : > { %v7414_v49 = vpop.permute.xlu1 %7413  ;;  %v3258_v54 = vsel %vm2052_vm10, %v13158_v13, %v7410_v35  ;;  %v3259_v37 = vsel %vm2052_vm10, %v13159_v60, %v7411_v48 }
 0x345   : > { %v7415_v19 = vunpack.i.l.bf16 %v7414_v49  ;;  %v7419_v50 = vpop.permute.xlu0 %7418  ;;  %v7416_v4 = vunpack.i.h.bf16 %v7414_v49 }
 0x346   : > { %v7420_v14 = vunpack.i.l.bf16 %v7419_v50  ;;  %v7421_v43 = vunpack.i.h.bf16 %v7419_v50 }
 0x347   : > { %v3388_v12 = vsel %vm3270_vm12, %v3356_v17, %v7415_v19  ;;  %v3389_v56 = vsel %vm3270_vm12, %v3357_v44, %v7416_v4 }
 0x348   : > { %v7424_v46 = vpop.permute.xlu1 %7423  ;;  %v3291_v31 = vsel %vm3270_vm12, %v3258_v54, %v7420_v14  ;;  %v3420_v61 = vsel %vm3303_vm13, %v3388_v12, %v7401_v57  ;;  %v3292_v53 = vsel %vm3270_vm12, %v3259_v37, %v7421_v43 }
 0x349   : > { %v7426_v63 = vunpack.i.h.bf16 %v7424_v46  ;;  %v7425_v10 = vunpack.i.l.bf16 %v7424_v46  ;;  %v7429_v7 = vpop.permute.xlu0 %7428 }
 0x34a   : > { %v7430_v55 = vunpack.i.l.bf16 %v7429_v7  ;;  %v7431_v43 = vunpack.i.h.bf16 %v7429_v7 }
 0x34b   : > { %v3421_v49 = vsel %vm3303_vm13, %v3389_v56, %v7425_v10  ;;  %v3324_v19 = vsel %vm3303_vm13, %v3291_v31, %v7426_v63 }
 0x34c   : > { %v3463_v35 = vpack.c.bf16 %v3421_v49, %v3420_v61  ;;  %v3325_v50 = vsel %vm3303_vm13, %v3292_v53, %v7430_v55 }
 0x34d   : > { %v3462_v17 = vpack.c.bf16 %v3325_v50, %v3324_v19  ;;  %v7439_v13 = vpop.permute.xlu0 %7438  ;;  %v13160_v19 = vld [vmem:[#allocation111_spill] sm:$0xff] }
 0x34e   : > { %3791 = vmatprep.mubr.bf16.mxu1 %v3463_v35  ;;  %v7440_v57 = vunpack.i.l.bf16 %v7439_v13  ;;  %v7441_v10 = vunpack.i.h.bf16 %v7439_v13 }
 0x34f   : > { %3792 = vmatmul.mubr.bf16.gmra.mxu1 %v3462_v17 }
 0x350   : > { %v7434_v48 = vpop.permute.xlu1 %7433  ;;  %v3260_v35 = vsel %vm2052_vm10, %v13160_v19, %v7440_v57 }
 0x351   : > { %v7435_v46 = vunpack.i.l.bf16 %v7434_v48  ;;  %v7436_v44 = vunpack.i.h.bf16 %v7434_v48 }
 0x353   : > { %v3358_v12 = vsel %vm2052_vm10, %v10425_v40, %v7435_v46  ;;  %v3359_v55 = vsel %vm2052_vm10, %v10459_v3, %v7436_v44  ;;  %v13184_v40 = vld [vmem:[#allocation76_spill] sm:$0xff] }
 0x354   : > { %v7444_v4 = vpop.permute.xlu1 %7443 }
 0x355   : > { %v7445_v14 = vunpack.i.l.bf16 %v7444_v4  ;;  %v7446_v54 = vunpack.i.h.bf16 %v7444_v4  ;;  %v13161_v4 = vld [vmem:[#allocation112_spill] sm:$0xff] }
 0x356   : > { %v7449_v63 = vpop.permute.xlu0 %7448  ;;  %v3261_v44 = vsel %vm2052_vm10, %v13161_v4, %v7441_v10 }
 0x357   : > { %v3390_v37 = vsel %vm3270_vm12, %v3358_v12, %v7445_v14  ;;  %v7450_v56 = vunpack.i.l.bf16 %v7449_v63  ;;  %v7451_v49 = vunpack.i.h.bf16 %v7449_v63  ;;  %v3391_v53 = vsel %vm3270_vm12, %v3359_v55, %v7446_v54 }
 0x358   : > { %v7454_v60 = vpop.permute.xlu1 %7453  ;;  %v3422_v50 = vsel %vm3303_vm13, %v3390_v37, %v7431_v43 }
 0x359   : > { %v7456_v31 = vunpack.i.h.bf16 %v7454_v60  ;;  %v7455_v61 = vunpack.i.l.bf16 %v7454_v60  ;;  %v3293_v13 = vsel %vm3270_vm12, %v3260_v35, %v7450_v56  ;;  %v3294_v54 = vsel %vm3270_vm12, %v3261_v44, %v7451_v49 }
 0x35a   : > { %v7459_v17 = vpop.permute.xlu0 %7458 }
 0x35b   : > { %v3423_v7 = vsel %vm3303_vm13, %v3391_v53, %v7455_v61  ;;  %v7460_v14 = vunpack.i.l.bf16 %v7459_v17  ;;  %v3326_v12 = vsel %vm3303_vm13, %v3293_v13, %v7456_v31  ;;  %v7461_v19 = vunpack.i.h.bf16 %v7459_v17 }
 0x35c   : > { %v7464_v48 = vpop.permute.xlu1 %7463  ;;  %v3466_v46 = vpack.c.bf16 %v3423_v7, %v3422_v50 }
 0x35d   : > { %v7465_v63 = vunpack.i.l.bf16 %v7464_v48  ;;  %v3327_v57 = vsel %vm3303_vm13, %v3294_v54, %v7460_v14  ;;  %v7466_v43 = vunpack.i.h.bf16 %v7464_v48 }
 0x35e   : > { %3799 = vmatprep.mubr.bf16.mxu1 %v3466_v46  ;;  %v7469_v60 = vpop.permute.xlu0 %7468  ;;  %v3465_v37 = vpack.c.bf16 %v3327_v57, %v3326_v12 }
 0x35f   : > { %v3360_v56 = vsel %vm2052_vm10, %v10564_v36, %v7465_v63  ;;  %v7470_v10 = vunpack.i.l.bf16 %v7469_v60  ;;  %v3361_v31 = vsel %vm2052_vm10, %v10578_v30, %v7466_v43  ;;  %v7471_v7 = vunpack.i.h.bf16 %v7469_v60 }
 0x360   : > { %v7474_v55 = vpop.permute.xlu1 %7473  ;;  %3800 = vmatmul.mubr.bf16.gmra.mxu1 %v3465_v37 }
 0x361   : > { %v7475_v61 = vunpack.i.l.bf16 %v7474_v55  ;;  %v7476_v53 = vunpack.i.h.bf16 %v7474_v55  ;;  %v3262_v14 = vsel %vm2052_vm10, %v10521_v34, %v7470_v10  ;;  %v3263_v43 = vsel %vm2052_vm10, %v10532_v9, %v7471_v7 }
 0x362   : > { %v7479_v35 = vpop.permute.xlu0 %7478 }
 0x363   : > { %v3392_v50 = vsel %vm3270_vm12, %v3360_v56, %v7475_v61  ;;  %v7480_v48 = vunpack.i.l.bf16 %v7479_v35  ;;  %v7481_v4 = vunpack.i.h.bf16 %v7479_v35  ;;  %v3393_v44 = vsel %vm3270_vm12, %v3361_v31, %v7476_v53 }
 0x364   : > { %v7484_v49 = vpop.permute.xlu1 %7483  ;;  %v3424_v12 = vsel %vm3303_vm13, %v3392_v50, %v7461_v19 }
 0x365   : > { %v7486_v46 = vunpack.i.h.bf16 %v7484_v49  ;;  %v7485_v13 = vunpack.i.l.bf16 %v7484_v49  ;;  %v3295_v57 = vsel %vm3270_vm12, %v3262_v14, %v7480_v48  ;;  %v3296_v55 = vsel %vm3270_vm12, %v3263_v43, %v7481_v4 }
 0x366   : > { %v7489_v54 = vpop.permute.xlu0 %7488 }
 0x367   : > { %v3425_v17 = vsel %vm3303_vm13, %v3393_v44, %v7485_v13  ;;  %v7490_v60 = vunpack.i.l.bf16 %v7489_v54  ;;  %v3328_v37 = vsel %vm3303_vm13, %v3295_v57, %v7486_v46  ;;  %v7491_v13 = vunpack.i.h.bf16 %v7489_v54 }
 0x368   : > { %v3469_v63 = vpack.c.bf16 %v3425_v17, %v3424_v12 }
 0x369   : > { %v3329_v61 = vsel %vm3303_vm13, %v3296_v55, %v7490_v60 }
 0x36a   : > { %3807 = vmatprep.mubr.bf16.mxu1 %v3469_v63  ;;  %v3468_v34 = vpack.c.bf16 %v3329_v61, %v3328_v37  ;;  %v7499_v56 = vpop.permute.xlu0 %7498 }
 0x36b   : > { %v7500_v31 = vunpack.i.l.bf16 %v7499_v56  ;;  %v7501_v50 = vunpack.i.h.bf16 %v7499_v56 }
 0x36c   : > { %v7494_v53 = vpop.permute.xlu1 %7493  ;;  %3808 = vmatmul.mubr.bf16.gmra.mxu1 %v3468_v34 }
 0x36d   : > { %v7495_v10 = vunpack.i.l.bf16 %v7494_v53  ;;  %v7496_v35 = vunpack.i.h.bf16 %v7494_v53  ;;  %v3264_v12 = vsel %vm2052_vm10, %v10638_v33, %v7500_v31  ;;  %v3265_v43 = vsel %vm2052_vm10, %v10641_v21, %v7501_v50 }
 0x36f   : > { %v3362_v7 = vsel %vm2052_vm10, %v10571_v28, %v7495_v10  ;;  %v3363_v17 = vsel %vm2052_vm10, %v10632_v1, %v7496_v35  ;;  %v13178_v28 = vld [vmem:[#allocation9_spill] sm:$0xff] }
 0x370   : > { %v7504_v19 = vpop.permute.xlu1 %7503 }
 0x371   : > { %v7505_v49 = vunpack.i.l.bf16 %v7504_v19  ;;  %v7506_v48 = vunpack.i.h.bf16 %v7504_v19  ;;  %v7509_v9 = vpop.permute.xlu0 %7508 }
 0x372   : > { %v7510_v46 = vunpack.i.l.bf16 %v7509_v9  ;;  %v7511_v4 = vunpack.i.h.bf16 %v7509_v9 }
 0x373   : > { %v3394_v14 = vsel %vm3270_vm12, %v3362_v7, %v7505_v49  ;;  %v3395_v37 = vsel %vm3270_vm12, %v3363_v17, %v7506_v48 }
 0x374   : > { %v7514_v44 = vpop.permute.xlu1 %7513  ;;  %v3297_v54 = vsel %vm3270_vm12, %v3264_v12, %v7510_v46  ;;  %v3426_v61 = vsel %vm3303_vm13, %v3394_v14, %v7491_v13  ;;  %v3298_v10 = vsel %vm3270_vm12, %v3265_v43, %v7511_v4 }
 0x375   : > { %v7516_v63 = vunpack.i.h.bf16 %v7514_v44  ;;  %v7515_v57 = vunpack.i.l.bf16 %v7514_v44  ;;  %v7519_v60 = vpop.permute.xlu0 %7518 }
 0x376   : > { %v7520_v55 = vunpack.i.l.bf16 %v7519_v60  ;;  %v7521_v17 = vunpack.i.h.bf16 %v7519_v60 }
 0x377   : > { %v3427_v34 = vsel %vm3303_vm13, %v3395_v37, %v7515_v57  ;;  %v3330_v33 = vsel %vm3303_vm13, %v3297_v54, %v7516_v63 }
 0x378   : > { %v7524_v53 = vpop.permute.xlu1 %7523  ;;  %v3472_v56 = vpack.c.bf16 %v3427_v34, %v3426_v61  ;;  %v3331_v19 = vsel %vm3303_vm13, %v3298_v10, %v7520_v55 }
 0x379   : > { %v7529_v31 = vpop.permute.xlu0 %7528  ;;  %v3471_v21 = vpack.c.bf16 %v3331_v19, %v3330_v33  ;;  %v7525_v35 = vunpack.i.l.bf16 %v7524_v53  ;;  %v7526_v48 = vunpack.i.h.bf16 %v7524_v53 }
 0x37a   : > { %3815 = vmatprep.mubr.bf16.mxu1 %v3472_v56  ;;  %v7530_v9 = vunpack.i.l.bf16 %v7529_v31  ;;  %v7531_v46 = vunpack.i.h.bf16 %v7529_v31 }
 0x37b   : > { %v6045_v49 = vpop.f32.mrf.mxu1  ;;  %3816 = vmatmul.mubr.bf16.gmra.mxu1 %v3471_v21  ;;  %v3364_v14 = vsel %vm2052_vm10, %v10717_v29, %v7525_v35  ;;  %v3365_v37 = vsel %vm2052_vm10, %v10737_v18, %v7526_v48  ;;  %v6336_v48 = vpop.f32.mrf.mxu0 }
 0x37c   : > { %v7534_v50 = vpop.permute.xlu1 %7533  ;;  %v3266_v54 = vsel %vm2052_vm10, %v10684_v20, %v7530_v9  ;;  %v3267_v34 = vsel %vm2052_vm10, %v10696_v6, %v7531_v46 }
 0x37d   : > { %v7535_v7 = vunpack.i.l.bf16 %v7534_v50  ;;  %v7536_v13 = vunpack.i.h.bf16 %v7534_v50  ;;  %v7539_v44 = vpop.permute.xlu0 %7538  ;;  %v6046_v12 = vpop.f32.mrf.mxu1 }
 0x37e   : > { %v7540_v4 = vunpack.i.l.bf16 %v7539_v44  ;;  %v7541_v63 = vunpack.i.h.bf16 %v7539_v44  ;;  %v3874_v44 = vpop.f32.mrf.mxu0 }
 0x37f   : > { %v3396_v43 = vsel %vm3270_vm12, %v3364_v14, %v7535_v7  ;;  %v3397_v53 = vsel %vm3270_vm12, %v3365_v37, %v7536_v13  ;;  %v6048_v56 = vpop.f32.mrf.mxu1 }
 0x380   : > { %v7544_v57 = vpop.permute.xlu1 %7543  ;;  %v3299_v60 = vsel %vm3270_vm12, %v3266_v54, %v7540_v4  ;;  %v3428_v19 = vsel %vm3303_vm13, %v3396_v43, %v7521_v17  ;;  %v3300_v50 = vsel %vm3270_vm12, %v3267_v34, %v7541_v63  ;;  %v6047_v63 = vadd.f32 %v6046_v12, %v6045_v49  ;;  %v8058_v54 = vld [vmem:[%s12594_s6 + $0x78] sm:$0xff]  }
 0x381   : > { %v7546_v55 = vunpack.i.h.bf16 %v7544_v57  ;;  %v7545_v61 = vunpack.i.l.bf16 %v7544_v57  ;;  %v7549_v33 = vpop.permute.xlu0 %7548  ;;  %v6049_v7 = vpop.f32.mrf.mxu1  ;;  %6159 = vmatprep.subr.bf16.mxu0 %v8058_v54 }
 0x382   : > { %v7550_v10 = vunpack.i.l.bf16 %v7549_v33  ;;  %v6050_v4 = vadd.f32 %v6049_v7, %v6048_v56  ;;  %v7551_v34 = vunpack.i.h.bf16 %v7549_v33  ;;  %v8059_v33 = vld [vmem:[%s12594_s6 + $0x38] sm:$0xff]  }
 0x383   : > { %v3429_v31 = vsel %vm3303_vm13, %v3397_v53, %v7545_v61  ;;  %v3332_v21 = vsel %vm3303_vm13, %v3299_v60, %v7546_v55  ;;  %v6337_v55 = vpop.f32.mrf.mxu0  ;;  %v11044_v61 = vld [vmem:[%s12593_s5] ss:$0 sm:$0xff]  ;;  %6160 = vmatpush3.bf16.msra.mxu0 %v8059_v33 }
 0x384   : > { %v11025_v35 = vpop.permute.xlu1 %7553  ;;  %v3475_v20 = vpack.c.bf16 %v3429_v31, %v3428_v19  ;;  %v3333_v6 = vsel %vm3303_vm13, %v3300_v50, %v7550_v10  ;;  %v3717_v12 = vadd.f32 %v6050_v4, %v11044_v61  ;;  %v3714_v19 = vadd.f32 %v6047_v63, %v11044_v61 }
 0x385   : > { %v3474_v9 = vpack.c.bf16 %v3333_v6, %v3332_v21  ;;  %v11030_v46 = vunpack.i.l.bf16 %v11025_v35  ;;  %v8060_v21 = vld [vmem:[%s12594_s6 + $0x70] sm:$0xff]  }
 0x386   : > { %3823 = vmatprep.mubr.bf16.mxu1 %v3475_v20  ;;  %v3877_v20 = vpop.f32.mrf.mxu0  ;;  %v8061_v6 = vld [vmem:[%s12594_s6 + $0x30] sm:$0xff]   ;;  %6161 = vmatprep.subr.bf16.mxu0 %v8060_v21  ;;  %v3875_v7 = vadd.f32 %v3874_v44, %v3714_v19  ;;  %v8067_v21 = vld [vmem:[%s12594_s6 + $0x18] sm:$0xff]  }
 0x387   : > { %13162 = vst [vmem:[#allocation27_spill] sm:$0xff] %v11030_v46  ;;  %3824 = vmatmul.mubr.bf16.gmra.mxu1 %v3474_v9  ;;  %v3366_v57 = vsel %vm2052_vm10, %v10750_v39, %v11030_v46  ;;  %v3367_v53 = vsel %vm2052_vm10, %v10741_v11, %v11030_v46  ;;  %v3878_v50 = vadd.f32 %v3877_v20, %v3717_v12  ;;  %v8062_v9 = vld [vmem:[%s12594_s6 + $0x68] sm:$0xff]   ;;  %v8066_v12 = vld [vmem:[%s12594_s6 + $0x58] sm:$0xff]  }
 0x388   : > { %v7559_v13 = vpop.permute.xlu1 %7558  ;;  %6162 = vmatpush3.bf16.msra.mxu0 %v8061_v6  ;;  %v11069_v4 = vmax.f32 %v3875_v7, 0.0  ;;  %v13167_v11 = vld [vmem:[#allocation69_spill] sm:$0xff] }
 0x389   : > { %v7560_v14 = vunpack.i.l.bf16 %v7559_v13  ;;  %v7561_v17 = vunpack.i.h.bf16 %v7559_v13  ;;  %v11067_v13 = vmax.f32 %v3878_v50, 0.0  ;;  %6163 = vmatprep.subr.bf16.mxu0 %v8062_v9  ;;  %v8068_v50 = vld [vmem:[%s12594_s6 + $0x50] sm:$0xff]  }
 0x38b   : > { %v3398_v43 = vsel %vm3270_vm12, %v3366_v57, %v7560_v14  ;;  %v3399_v60 = vsel %vm3270_vm12, %v3367_v53, %v7561_v17  ;;  %v8063_v17 = vld [vmem:[%s12594_s6 + $0x28] sm:$0xff]   ;;  %v8064_v57 = vld [vmem:[%s12594_s6 + $0x60] sm:$0xff]   ;;  %v4034_v7 = vrot.slane %v11067_v13, 7 }
 0x38c   : > { %v11036_v37 = vpop.permute.xlu1 %7568  ;;  %v3430_v56 = vsel %vm3303_vm13, %v3398_v43, %v7551_v34  ;;  %v12810_v43 = vrot.slane %v11067_v13, 1  ;;  %6164 = vmatpush3.bf16.msra.mxu0 %v8063_v17  ;;  %v4131_v34 = vrot.slane %v11069_v4, 1  ;;  %v13163_v17 = vld [vmem:[#allocation71_spill] sm:$0xff] }
 0x38d   : > { %v7570_v49 = vunpack.i.l.bf16 %v11036_v37  ;;  %6165 = vmatprep.subr.bf16.mxu0 %v8064_v57 }
 0x38e   : > { %v4194_v33 = vsel %vm742_vm0, %v4131_v34, %v12810_v43 }
 0x38f   : > { %v3431_v10 = vsel %vm3303_vm13, %v3399_v60, %v7570_v49  ;;  %v8065_v49 = vld [vmem:[%s12594_s6 + $0x20] sm:$0xff]   ;;  %v11086_v60 = vpop.f32.mrf.mxu0  ;;  %v4197_v57 = vmul.f32 %v4194_v33, %v13163_v17 }
 0x390   : > { %v3478_v31 = vpack.c.bf16 %v3431_v10, %v3430_v56  ;;  %v4033_v10 = vrot.slane %v11069_v4, 7  ;;  %6166 = vmatpush3.bf16.msra.mxu0 %v8065_v49  ;;  %v13164_v33 = vld [vmem:[#allocation5_spill] sm:$0xff] }
 0x391   : > { %6167 = vmatprep.subr.bf16.mxu0 %v8066_v12  ;;  %v3890_v9 = vpop.f32.mrf.mxu0  ;;  %v8069_v12 = vld [vmem:[%s12594_s6 + $0x10] sm:$0xff]  }
 0x392   : > { %3831 = vmatprep.mubr.bf16.mxu1 %v3478_v31 }
 0x394   : > { %6168 = vmatpush3.bf16.msra.mxu0 %v8067_v21 }
 0x395   : > { %6169 = vmatprep.subr.bf16.mxu0 %v8068_v50  ;;  %v7577_v50 = vpack.i.bf16 %v4197_v57, %v10737_v18 }
 0x396   : > { %v6051_v14 = vpop.f32.mrf.mxu1 }
 0x398   : > { %v6052_v63 = vpop.f32.mrf.mxu1  ;;  %6170 = vmatpush3.bf16.msra.mxu0 %v8069_v12 }
 0x399   : > { %v6053_v54 = vadd.f32 %v6052_v63, %v6051_v14  ;;  %v4097_v63 = vsel %vm460_vm1, 0.0, %v4033_v10 }
 0x39a   : > { %v6054_v44 = vpop.f32.mrf.mxu1  ;;  %v11122_v21 = vmul.f32 %v4097_v63, %v13164_v33 }
 0x39b   : > { %v3722_v53 = vadd.f32 %v6053_v54, %v11044_v61 }
 0x39c   : > { %v6055_v56 = vpop.f32.mrf.mxu1 }
 0x39d   : > { %v3883_v19 = vadd.f32 %v6336_v48, %v3722_v53  ;;  %v6056_v31 = vadd.f32 %v6055_v56, %v6054_v44 }
 0x39f   : > { %v6057_v20 = vpop.f32.mrf.mxu1  ;;  %v11099_v6 = vmax.f32 %v3883_v19, 0.0  ;;  %v3725_v48 = vadd.f32 %v6056_v31, %v11044_v61  ;;  %v4195_v19 = vsel %vm742_vm0, 0.0, %v4131_v34 }
 0x3a0   : > { %v4196_v39 = vmul.f32 %v4195_v19, %v13167_v11 }
 0x3a1   : > { %v6058_v14 = vpop.f32.mrf.mxu1  ;;  %v3886_v54 = vadd.f32 %v6337_v55, %v3725_v48  ;;  %v7572_v53 = vpack.i.bf16 %v11099_v6, %v10843_v0  ;;  %v4035_v49 = vrot.slane %v11099_v6, 7  ;;  %v8070_v55 = vld [vmem:[%s12594_s6 + $0x48] sm:$0xff]   ;;  %v11126_v48 = vpop.f32.mrf.mxu0 }
 0x3a2   : > { %v6059_v44 = vadd.f32 %v6058_v14, %v6057_v20  ;;  %v13165_v14 = vld [vmem:[#allocation8_spill] sm:$0xff]  ;;  %6171 = vmatprep.subr.bf16.mxu0 %v8070_v55 }
 0x3a3   : > { %v6060_v56 = vpop.f32.mrf.mxu1  ;;  %v11117_v31 = vmax.f32 %v3886_v54, 0.0  ;;  %7573 = vrot.lane.b32.xlu0 %v7572_v53, %s8162_s11  ;;  %v4095_v20 = vsel %vm460_vm1, %v4034_v7, %v4035_v49  ;;  %v4096_v54 = vsel %vm460_vm1, %v4033_v10, %v4034_v7  ;;  %v13168_v10 = vld [vmem:[#allocation6_spill] sm:$0xff]  ;;  %v3893_v12 = vpop.f32.mrf.mxu0 }
 0x3a4   : > { %v3730_v0 = vadd.f32 %v6059_v44, %v11044_v61  ;;  %v11130_v17 = vmul.f32 %v4095_v20, %v13165_v14  ;;  %v4133_v44 = vrot.slane %v11099_v6, 1 }
 0x3a5   : > { %v6061_v34 = vpop.f32.mrf.mxu1  ;;  %v7582_v63 = vpack.i.bf16 %v11122_v21, %v11117_v31  ;;  %v4134_v33 = vrot.slane %v11117_v31, 1  ;;  %v4036_v18 = vrot.slane %v11117_v31, 7 }
 0x3a6   : > { %13166 = vst [vmem:[#allocation36_spill] sm:$0xff] %v11130_v17  ;;  %v3891_v53 = vadd.f32 %v3890_v9, %v3730_v0  ;;  %v6062_v43 = vadd.f32 %v6061_v34, %v6060_v56  ;;  %v11146_v9 = vmul.f32 %v4096_v54, %v13168_v10  ;;  %v7587_v11 = vpack.i.bf16 %v11130_v17, %v4196_v39  ;;  %v13170_v34 = vld [vmem:[#allocation73_spill] sm:$0xff]  ;;  %v13171_v54 = vld [vmem:[#allocation7_spill] sm:$0xff] }
 0x3a7   : > { %7578 = vrot.lane.b32.xlu0 %v7577_v50, %s8164_s25  ;;  %7583 = vrot.lane.b32.xlu1 %v7582_v63, %s8162_s11  ;;  %v4192_v7 = vsel %vm742_vm0, %v4133_v44, %v4134_v33  ;;  %v13169_v56 = vrot.slane %v11067_v13, 1 }
 0x3a8   : > { %v11140_v20 = vmax.f32 %v3891_v53, 0.0  ;;  %v3733_v14 = vadd.f32 %v6062_v43, %v11044_v61  ;;  %v4094_v43 = vsel %vm460_vm1, %v4035_v49, %v4036_v18  ;;  %v11160_v50 = vmul.f32 %v4192_v7, %v13170_v34  ;;  %v8072_v49 = vld [vmem:[%s12594_s6 + $0x40] sm:$0xff]   ;;  %v13174_v34 = vld [vmem:[#allocation74_spill] sm:$0xff] }
 0x3a9   : > { %v4193_v19 = vsel %vm742_vm0, %v13169_v56, %v4133_v44  ;;  %v11163_v53 = vmul.f32 %v4094_v43, %v13171_v54  ;;  %v8071_v44 = vld [vmem:[%s12594_s6 + $0x8] sm:$0xff]  }
 0x3aa   : > { %v3894_v55 = vadd.f32 %v3893_v12, %v3733_v14  ;;  %v7592_v0 = vpack.i.bf16 %v11140_v20, %v11146_v9  ;;  %v4037_v39 = vrot.slane %v11140_v20, 7  ;;  %v4135_v63 = vrot.slane %v11140_v20, 1  ;;  %v13173_v14 = vld [vmem:[#allocation72_spill] sm:$0xff]  ;;  %6172 = vmatpush3.bf16.msra.mxu0 %v8071_v44 }
 0x3ab   : > { %13172 = vst [vmem:[#allocation23_spill] sm:$0xff] %v11163_v53  ;;  %7588 = vrot.lane.b32.xlu1 %v7587_v11, %s8163_s20  ;;  %v4198_v10 = vmul.f32 %v4193_v19, %v13173_v14  ;;  %v7597_v43 = vpack.i.bf16 %v4197_v57, %v11163_v53  ;;  %6173 = vmatprep.subr.bf16.mxu0 %v8072_v49  ;;  %v8073_v19 = vld [vmem:[%s12594_s6] sm:$0xff]   ;;  %v11195_v57 = vld [vmem:[%s12594_s6 + $0x88] sm:$0xff]  }
 0x3ac   : > { %7593 = vrot.lane.b32.xlu0 %v7592_v0, %s8162_s11  ;;  %v4191_v7 = vsel %vm742_vm0, %v4134_v33, %v4135_v63  ;;  %v11178_v12 = vmax.f32 %v3894_v55, 0.0  ;;  %v4093_v11 = vsel %vm460_vm1, %v4036_v18, %v4037_v39  ;;  %v13175_v55 = vld [vmem:[#allocation10_spill] sm:$0xff]  ;;  %6366 = vmatprep.subr.bf16.mxu1 %v11195_v57 }
 0x3ad   : > { %v7602_v56 = vpack.i.bf16 %v11160_v50, %v4198_v10  ;;  %v11183_v54 = vmul.f32 %v4191_v7, %v13174_v34  ;;  %v11202_v0 = vmul.f32 %v4093_v11, %v13175_v55 }
 0x3ae   : > { %6174 = vmatpush3.bf16.msra.mxu0 %v8073_v19  ;;  %v7607_v18 = vpack.i.bf16 %v11130_v17, %v11178_v12  ;;  %v11210_v19 = vpop.f32.mrf.mxu0  ;;  %v4136_v55 = vrot.slane %v11178_v12, 1 }
 0x3af   : > { %7603 = vrot.lane.b32.xlu1 %v7602_v56, %s8164_s25  ;;  %13176 = vst [vmem:[#allocation12_spill] sm:$0xff] %v11202_v0  ;;  %v7612_v7 = vpack.i.bf16 %v11202_v0, %v4198_v10  ;;  %v4038_v56 = vrot.slane %v11178_v12, 7 }
 0x3b0   : > { %7598 = vrot.lane.b32.xlu0 %v7597_v43, %s8163_s20 }
 0x3b1   : > { %v4092_v10 = vsel %vm460_vm1, %v4037_v39, %v4038_v56 }
 0x3b2   : > { %v6063_v44 = vpop.f32.mrf.mxu1  ;;  %v11223_v30 = vmul.f32 %v4092_v10, %v13178_v28  ;;  %v13181_v10 = vld [vmem:[#allocation75_spill] sm:$0xff] }
 0x3b4   : > { %7608 = vrot.lane.b32.xlu0 %v7607_v18, %s8162_s11  ;;  %v6064_v49 = vpop.f32.mrf.mxu1  ;;  %v7617_v18 = vpack.i.bf16 %v11069_v4, %v11183_v54  ;;  %13179 = vst [vmem:[#allocation40_spill] sm:$0xff] %v11223_v30 }
 0x3b5   : > { %v6065_v14 = vadd.f32 %v6064_v49, %v6063_v44 }
 0x3b6   : > { %v6066_v43 = vpop.f32.mrf.mxu1 }
 0x3b7   : > { %v3738_v34 = vadd.f32 %v6065_v14, %v11044_v61 }
 0x3b8   : > { %7613 = vrot.lane.b32.xlu0 %v7612_v7, %s8163_s20  ;;  %v6067_v11 = vpop.f32.mrf.mxu1  ;;  %v3906_v7 = vpop.f32.mrf.mxu0 }
 0x3b9   : > { %v3899_v33 = vadd.f32 %v11086_v60, %v3738_v34  ;;  %v6068_v29 = vadd.f32 %v6067_v11, %v6066_v43  ;;  %v4190_v60 = vsel %vm742_vm0, %v4135_v63, %v4136_v55 }
 0x3ba   : > { %v11238_v63 = vpop.f32.mrf.mxu0 }
 0x3bb   : > { %v6069_v44 = vpop.f32.mrf.mxu1  ;;  %v11218_v49 = vmax.f32 %v3899_v33, 0.0  ;;  %v3741_v14 = vadd.f32 %v6068_v29, %v11044_v61 }
 0x3bc   : > { %7618 = vrot.lane.b32.xlu0 %v7617_v18, %s8164_s25 }
 0x3bd   : > { %13177 = vst [vmem:[#allocation44_spill] sm:$0xff] %v11218_v49  ;;  %v6070_v1 = vpop.f32.mrf.mxu1  ;;  %v3902_v43 = vadd.f32 %v11126_v48, %v3741_v14  ;;  %v7622_v39 = vpack.i.bf16 %v11218_v49, %v11163_v53  ;;  %v4039_v33 = vrot.slane %v11218_v49, 7  ;;  %v4137_v29 = vrot.slane %v11218_v49, 1  ;;  %v13182_v14 = vld [vmem:[#allocation14_spill] sm:$0xff] }
 0x3be   : > { %v6071_v34 = vadd.f32 %v6070_v1, %v6069_v44  ;;  %v7627_v48 = vpack.i.bf16 %v11160_v50, %v11223_v30  ;;  %v11243_v44 = vmul.f32 %v4190_v60, %v13181_v10 }
 0x3bf   : > { %v6072_v11 = vpop.f32.mrf.mxu1  ;;  %v11232_v18 = vmax.f32 %v3902_v43, 0.0  ;;  %7623 = vrot.lane.b32.xlu1 %v7622_v39, %s8162_s11  ;;  %v4091_v28 = vsel %vm460_vm1, %v4038_v56, %v4039_v33  ;;  %v4189_v43 = vsel %vm742_vm0, %v4136_v55, %v4137_v29 }
 0x3c0   : > { %v3746_v36 = vadd.f32 %v6071_v34, %v11044_v61  ;;  %v11246_v3 = vmul.f32 %v4091_v28, %v13182_v14  ;;  %v11253_v52 = vmul.f32 %v4189_v43, %v13184_v40  ;;  %v7632_v40 = vpack.i.bf16 %v11243_v44, %v11067_v13 }
 0x3c1   : > { %13180 = vst [vmem:[#allocation39_spill] sm:$0xff] %v11232_v18  ;;  %v6073_v1 = vpop.f32.mrf.mxu1  ;;  %v7637_v56 = vpack.i.bf16 %v11202_v0, %v11232_v18  ;;  %v4040_v27 = vrot.slane %v11232_v18, 7  ;;  %v4138_v55 = vrot.slane %v11232_v18, 1 }
 0x3c2   : > { %13183 = vst [vmem:[#allocation43_spill] sm:$0xff] %v11246_v3  ;;  %v3907_v34 = vadd.f32 %v3906_v7, %v3746_v36  ;;  %v6074_v39 = vadd.f32 %v6073_v1, %v6072_v11  ;;  %v3909_v7 = vpop.f32.mrf.mxu0  ;;  %v7642_v28 = vpack.i.bf16 %v11246_v3, %v11183_v54  ;;  %v7647_v43 = vpack.i.bf16 %v11099_v6, %v11253_v52 }
 0x3c3   : > { %7628 = vrot.lane.b32.xlu1 %v7627_v48, %s8163_s20  ;;  %7638 = vrot.lane.b32.xlu0 %v7637_v56, %s8162_s11  ;;  %v4090_v1 = vsel %vm460_vm1, %v4039_v33, %v4040_v27  ;;  %v4188_v14 = vsel %vm742_vm0, %v4137_v29, %v4138_v55  ;;  %v13187_v56 = vld [vmem:[#allocation13_spill] sm:$0xff] }
 0x3c4   : > { %v11256_v47 = vmax.f32 %v3907_v34, 0.0  ;;  %v3749_v60 = vadd.f32 %v6074_v39, %v11044_v61 }
 0x3c6   : > { %13185 = vst [vmem:[#allocation47_spill] sm:$0xff] %v11256_v47  ;;  %v3910_v11 = vadd.f32 %v3909_v7, %v3749_v60  ;;  %v4041_v48 = vrot.slane %v11256_v47, 7  ;;  %v4139_v10 = vrot.slane %v11256_v47, 1  ;;  %v7652_v33 = vpack.i.bf16 %v11256_v47, %v11223_v30  ;;  %v13189_v7 = vld [vmem:[#allocation78_spill] sm:$0xff] }
 0x3c7   : > { %7633 = vrot.lane.b32.xlu1 %v7632_v40, %s8164_s25  ;;  %7643 = vrot.lane.b32.xlu0 %v7642_v28, %s8163_s20  ;;  %v11285_v60 = vmul.f32 %v4090_v1, %v13187_v56  ;;  %v13190_v28 = vld [vmem:[#allocation77_spill] sm:$0xff]  ;;  %v13191_v56 = vld [vmem:[#allocation18_spill] sm:$0xff] }
 0x3c8   : > { %v4187_v34 = vsel %vm742_vm0, %v4138_v55, %v4139_v10  ;;  %v11280_v39 = vmax.f32 %v3910_v11, 0.0  ;;  %v11291_v36 = vmul.f32 %v4188_v14, %v13190_v28  ;;  %v4089_v29 = vsel %vm460_vm1, %v4040_v27, %v4041_v48 }
 0x3c9   : > { %13188 = vst [vmem:[#allocation107_spill] sm:$0xff] %v11285_v60  ;;  %v11288_v40 = vmul.f32 %v4187_v34, %v13189_v7  ;;  %v7657_v1 = vpack.i.bf16 %v11243_v44, %v11285_v60  ;;  %v11304_v14 = vmul.f32 %v4089_v29, %v13191_v56  ;;  %v11314_v29 = vpop.f32.mrf.mxu0 }
 0x3ca   : > { %13186 = vst [vmem:[#allocation51_spill] sm:$0xff] %v11280_v39  ;;  %v7667_v34 = vpack.i.bf16 %v11246_v3, %v11280_v39  ;;  %v7662_v11 = vpack.i.bf16 %v11291_v36, %v11117_v31  ;;  %v13209_v3 = vld [vmem:[#allocation82_spill] sm:$0xff] }
 0x3cb   : > { %7653 = vrot.lane.b32.xlu1 %v7652_v33, %s8162_s11  ;;  %7648 = vrot.lane.b32.xlu0 %v7647_v43, %s8164_s25  ;;  %13192 = vst [vmem:[#allocation56_spill] sm:$0xff] %v11304_v14  ;;  %v4042_v43 = vrot.slane %v11280_v39, 7  ;;  %v7672_v46 = vpack.i.bf16 %v11304_v14, %v11253_v52  ;;  %v7677_v25 = vpack.i.bf16 %v11140_v20, %v11288_v40 }
 0x3cd   : > { %v6075_v55 = vpop.f32.mrf.mxu1 }
 0x3cf   : > { %v6076_v7 = vpop.f32.mrf.mxu1  ;;  %7658 = vrot.lane.b32.xlu1 %v7657_v1, %s8163_s20  ;;  %7668 = vrot.lane.b32.xlu0 %v7667_v34, %s8162_s11  ;;  %v4088_v1 = vsel %vm460_vm1, %v4041_v48, %v4042_v43  ;;  %v4140_v34 = vrot.slane %v11280_v39, 1 }
 0x3d0   : > { %v6077_v27 = vadd.f32 %v6076_v7, %v6075_v55 }
 0x3d1   : > { %v6078_v33 = vpop.f32.mrf.mxu1 }
 0x3d2   : > { %v3754_v28 = vadd.f32 %v6077_v27, %v11044_v61 }
 0x3d3   : > { %v6079_v15 = vpop.f32.mrf.mxu1  ;;  %7663 = vrot.lane.b32.xlu1 %v7662_v11, %s8164_s25  ;;  %7673 = vrot.lane.b32.xlu0 %v7672_v46, %s8163_s20  ;;  %v3922_v11 = vpop.f32.mrf.mxu0 }
 0x3d4   : > { %v3915_v56 = vadd.f32 %v11210_v19, %v3754_v28  ;;  %v6080_v55 = vadd.f32 %v6079_v15, %v6078_v33  ;;  %v11328_v19 = vmul.f32 %v4088_v1, %v13194_v62 }
 0x3d6   : > { %v11322_v7 = vmax.f32 %v3915_v56, 0.0  ;;  %v3757_v27 = vadd.f32 %v6080_v55, %v11044_v61  ;;  %v6081_v41 = vpop.f32.mrf.mxu1  ;;  %13195 = vst [vmem:[#allocation112_spill] sm:$0xff] %v11328_v19  ;;  %v4186_v55 = vsel %vm742_vm0, %v4139_v10, %v4140_v34  ;;  %v7687_v10 = vpack.i.bf16 %v11291_v36, %v11328_v19 }
 0x3d7   : > { %7678 = vrot.lane.b32.xlu0 %v7677_v25, %s8164_s25 }
 0x3d8   : > { %13193 = vst [vmem:[#allocation111_spill] sm:$0xff] %v11322_v7  ;;  %v3918_v46 = vadd.f32 %v11238_v63, %v3757_v27  ;;  %v6082_v15 = vpop.f32.mrf.mxu1  ;;  %v7682_v48 = vpack.i.bf16 %v11322_v7, %v11285_v60  ;;  %v4043_v33 = vrot.slane %v11322_v7, 7  ;;  %v4141_v28 = vrot.slane %v11322_v7, 1  ;;  %v13197_v27 = vld [vmem:[#allocation80_spill] sm:$0xff] }
 0x3d9   : > { %v6083_v56 = vadd.f32 %v6082_v15, %v6081_v41  ;;  %v11349_v41 = vpop.f32.mrf.mxu0 }
 0x3da   : > { %v11338_v45 = vmax.f32 %v3918_v46, 0.0  ;;  %v6084_v62 = vpop.f32.mrf.mxu1  ;;  %7683 = vrot.lane.b32.xlu1 %v7682_v48, %s8162_s11  ;;  %v4087_v25 = vsel %vm460_vm1, %v4042_v43, %v4043_v33  ;;  %v4185_v63 = vsel %vm742_vm0, %v4140_v34, %v4141_v28  ;;  %v13199_v48 = vld [vmem:[#allocation79_spill] sm:$0xff]  ;;  %v13201_v43 = vld [vmem:[#allocation22_spill] sm:$0xff] }
 0x3db   : > { %v3762_v1 = vadd.f32 %v6083_v56, %v11044_v61  ;;  %v11347_v2 = vmul.f32 %v4185_v63, %v13197_v27  ;;  %v11356_v32 = vmul.f32 %v4186_v55, %v13199_v48  ;;  %v11359_v60 = vmul.f32 %v4087_v25, %v13201_v43  ;;  %v3925_v48 = vpop.f32.mrf.mxu0 }
 0x3dc   : > { %13196 = vst [vmem:[#allocation71_spill] sm:$0xff] %v11338_v45  ;;  %v6085_v15 = vpop.f32.mrf.mxu1  ;;  %v7697_v46 = vpack.i.bf16 %v11304_v14, %v11338_v45  ;;  %v4044_v63 = vrot.slane %v11338_v45, 7  ;;  %v4142_v27 = vrot.slane %v11338_v45, 1 }
 0x3dd   : > { %13198 = vst [vmem:[#allocation5_spill] sm:$0xff] %v11347_v2  ;;  %13200 = vst [vmem:[#allocation8_spill] sm:$0xff] %v11356_v32  ;;  %v3923_v34 = vadd.f32 %v3922_v11, %v3762_v1  ;;  %v6086_v56 = vadd.f32 %v6085_v15, %v6084_v62  ;;  %v7692_v11 = vpack.i.bf16 %v11356_v32, %v11178_v12  ;;  %v11431_v0 = vpop.f32.mrf.mxu0 }
 0x3de   : > { %13202 = vst [vmem:[#allocation69_spill] sm:$0xff] %v11359_v60  ;;  %7688 = vrot.lane.b32.xlu1 %v7687_v10, %s8163_s20  ;;  %7698 = vrot.lane.b32.xlu0 %v7697_v46, %s8162_s11  ;;  %v7702_v62 = vpack.i.bf16 %v11359_v60, %v11288_v40  ;;  %v4086_v1 = vsel %vm460_vm1, %v4043_v33, %v4044_v63  ;;  %v13205_v33 = vld [vmem:[#allocation21_spill] sm:$0xff] }
 0x3df   : > { %v11367_v14 = vmax.f32 %v3923_v34, 0.0  ;;  %v3765_v55 = vadd.f32 %v6086_v56, %v11044_v61  ;;  %v4184_v15 = vsel %vm742_vm0, %v4141_v28, %v4142_v27  ;;  %v7707_v43 = vpack.i.bf16 %v11218_v49, %v11347_v2 }
 0x3e1   : > { %13203 = vst [vmem:[#allocation6_spill] sm:$0xff] %v11367_v14  ;;  %v3926_v25 = vadd.f32 %v3925_v48, %v3765_v55  ;;  %v4045_v10 = vrot.slane %v11367_v14, 7  ;;  %v4143_v46 = vrot.slane %v11367_v14, 1  ;;  %v7712_v56 = vpack.i.bf16 %v11367_v14, %v11328_v19 }
 0x3e2   : > { %7693 = vrot.lane.b32.xlu1 %v7692_v11, %s8164_s25  ;;  %7703 = vrot.lane.b32.xlu0 %v7702_v62, %s8163_s20  ;;  %v11389_v55 = vmul.f32 %v4086_v1, %v13205_v33  ;;  %v13207_v11 = vld [vmem:[#allocation81_spill] sm:$0xff]  ;;  %v13211_v33 = vld [vmem:[#allocation26_spill] sm:$0xff] }
 0x3e3   : > { %v11384_v34 = vmax.f32 %v3926_v25, 0.0  ;;  %v4183_v48 = vsel %vm742_vm0, %v4142_v27, %v4143_v46  ;;  %v11394_v28 = vmul.f32 %v4184_v15, %v13207_v11  ;;  %v4085_v62 = vsel %vm460_vm1, %v4044_v63, %v4045_v10 }
 0x3e4   : > { %13206 = vst [vmem:[#allocation7_spill] sm:$0xff] %v11389_v55  ;;  %v11399_v30 = vmul.f32 %v4183_v48, %v13209_v3  ;;  %v7717_v27 = vpack.i.bf16 %v11356_v32, %v11389_v55  ;;  %v11410_v11 = vmul.f32 %v4085_v62, %v13211_v33 }
 0x3e5   : > { %13204 = vst [vmem:[#allocation73_spill] sm:$0xff] %v11384_v34  ;;  %13208 = vst [vmem:[#allocation72_spill] sm:$0xff] %v11394_v28  ;;  %v7727_v15 = vpack.i.bf16 %v11359_v60, %v11384_v34  ;;  %v7722_v1 = vpack.i.bf16 %v11394_v28, %v11232_v18  ;;  %v4144_v62 = vrot.slane %v11384_v34, 1  ;;  %v13213_v18 = vld [vmem:[#allocation25_spill] sm:$0xff] }
 0x3e6   : > { %13210 = vst [vmem:[#allocation74_spill] sm:$0xff] %v11399_v30  ;;  %7713 = vrot.lane.b32.xlu1 %v7712_v56, %s8162_s11  ;;  %7708 = vrot.lane.b32.xlu0 %v7707_v43, %s8164_s25  ;;  %13212 = vst [vmem:[#allocation10_spill] sm:$0xff] %v11410_v11  ;;  %v4046_v43 = vrot.slane %v11384_v34, 7  ;;  %v7732_v60 = vpack.i.bf16 %v11410_v11, %v11347_v2 }
 0x3e7   : > { %v6087_v25 = vpop.f32.mrf.mxu1 }
 0x3e9   : > { %v6088_v63 = vpop.f32.mrf.mxu1 }
 0x3ea   : > { %v6089_v3 = vadd.f32 %v6088_v63, %v6087_v25  ;;  %7718 = vrot.lane.b32.xlu1 %v7717_v27, %s8163_s20  ;;  %7728 = vrot.lane.b32.xlu0 %v7727_v15, %s8162_s11  ;;  %v4084_v27 = vsel %vm460_vm1, %v4045_v10, %v4046_v43 }
 0x3eb   : > { %v6090_v56 = vpop.f32.mrf.mxu1  ;;  %v11434_v49 = vmul.f32 %v4084_v27, %v13213_v18 }
 0x3ec   : > { %v3770_v48 = vadd.f32 %v6089_v3, %v11044_v61  ;;  %v7737_v3 = vpack.i.bf16 %v11256_v47, %v11399_v30  ;;  %v13219_v47 = vld [vmem:[#allocation30_spill] sm:$0xff] }
 0x3ed   : > { %v6091_v19 = vpop.f32.mrf.mxu1  ;;  %13214 = vst [vmem:[#allocation9_spill] sm:$0xff] %v11434_v49 }
 0x3ee   : > { %v3931_v25 = vadd.f32 %v11314_v29, %v3770_v48  ;;  %v6092_v33 = vadd.f32 %v6091_v19, %v6090_v56  ;;  %7723 = vrot.lane.b32.xlu1 %v7722_v1, %s8164_s25  ;;  %7733 = vrot.lane.b32.xlu0 %v7732_v60, %s8163_s20  ;;  %v4182_v29 = vsel %vm742_vm0, %v4143_v46, %v4144_v62  ;;  %v3938_v46 = vpop.f32.mrf.mxu0 }
 0x3f0   : > { %v11426_v15 = vmax.f32 %v3931_v25, 0.0  ;;  %v3773_v63 = vadd.f32 %v6092_v33, %v11044_v61  ;;  %v13215_v33 = vld [vmem:[#allocation83_spill] sm:$0xff] }
 0x3f1   : > { %v11452_v27 = vmul.f32 %v4182_v29, %v13215_v33 }
 0x3f2   : > { %v3934_v60 = vadd.f32 %v11349_v41, %v3773_v63  ;;  %7738 = vrot.lane.b32.xlu0 %v7737_v3, %s8164_s25  ;;  %v7742_v19 = vpack.i.bf16 %v11426_v15, %v11389_v55  ;;  %v4047_v10 = vrot.slane %v11426_v15, 7  ;;  %v4145_v1 = vrot.slane %v11426_v15, 1  ;;  %v13217_v63 = vld [vmem:[#allocation84_spill] sm:$0xff] }
 0x3f3   : > { %v6093_v56 = vpop.f32.mrf.mxu1  ;;  %13216 = vst [vmem:[#allocation75_spill] sm:$0xff] %v11452_v27 }
 0x3f4   : > { %v11444_v48 = vmax.f32 %v3934_v60, 0.0  ;;  %7743 = vrot.lane.b32.xlu1 %v7742_v19, %s8162_s11  ;;  %v4083_v18 = vsel %vm460_vm1, %v4046_v43, %v4047_v10  ;;  %v4181_v41 = vsel %vm742_vm0, %v4144_v62, %v4145_v1  ;;  %v7747_v60 = vpack.i.bf16 %v11394_v28, %v11434_v49 }
 0x3f5   : > { %v6094_v25 = vpop.f32.mrf.mxu1  ;;  %v11455_v3 = vmul.f32 %v4181_v41, %v13217_v63  ;;  %v11462_v43 = vmul.f32 %v4083_v18, %v13219_v47  ;;  %v7752_v47 = vpack.i.bf16 %v11452_v27, %v11280_v39 }
 0x3f6   : > { %v6095_v55 = vadd.f32 %v6094_v25, %v6093_v56  ;;  %v7757_v19 = vpack.i.bf16 %v11410_v11, %v11444_v48  ;;  %v4048_v62 = vrot.slane %v11444_v48, 7  ;;  %v6353_v56 = vpop.f32.mrf.mxu0  ;;  %v4146_v25 = vrot.slane %v11444_v48, 1 }
 0x3f7   : > { %13218 = vst [vmem:[#allocation14_spill] sm:$0xff] %v11455_v3  ;;  %13220 = vst [vmem:[#allocation76_spill] sm:$0xff] %v11462_v43  ;;  %v6096_v53 = vpop.f32.mrf.mxu1  ;;  %v7762_v18 = vpack.i.bf16 %v11462_v43, %v11399_v30 }
 0x3f8   : > { %v3778_v33 = vadd.f32 %v6095_v55, %v11044_v61  ;;  %7748 = vrot.lane.b32.xlu1 %v7747_v60, %s8163_s20  ;;  %7758 = vrot.lane.b32.xlu0 %v7757_v19, %s8162_s11  ;;  %v4082_v29 = vsel %vm460_vm1, %v4047_v10, %v4048_v62  ;;  %v3941_v19 = vpop.f32.mrf.mxu0  ;;  %v13221_v10 = vld [vmem:[#allocation29_spill] sm:$0xff] }
 0x3f9   : > { %v6097_v41 = vpop.f32.mrf.mxu1 }
 0x3fa   : > { %v3939_v63 = vadd.f32 %v3938_v46, %v3778_v33  ;;  %v6098_v11 = vadd.f32 %v6097_v41, %v6096_v53  ;;  %v7767_v53 = vpack.i.bf16 %v11322_v7, %v11455_v3  ;;  %v4180_v46 = vsel %vm742_vm0, %v4145_v1, %v4146_v25 }
 0x3fc   : > { %v11477_v55 = vmax.f32 %v3939_v63, 0.0  ;;  %v3781_v60 = vadd.f32 %v6098_v11, %v11044_v61  ;;  %7753 = vrot.lane.b32.xlu1 %v7752_v47, %s8164_s25  ;;  %7763 = vrot.lane.b32.xlu0 %v7762_v18, %s8163_s20  ;;  %v11489_v63 = vmul.f32 %v4082_v29, %v13221_v10  ;;  %v13223_v18 = vld [vmem:[#allocation85_spill] sm:$0xff]  ;;  %v13225_v10 = vld [vmem:[#allocation34_spill] sm:$0xff] }
 0x3fe   : > { %v3942_v33 = vadd.f32 %v3941_v19, %v3781_v60  ;;  %v7772_v41 = vpack.i.bf16 %v11477_v55, %v11434_v49  ;;  %13222 = vst [vmem:[#allocation13_spill] sm:$0xff] %v11489_v63  ;;  %v4049_v11 = vrot.slane %v11477_v55, 7  ;;  %v4147_v47 = vrot.slane %v11477_v55, 1 }
 0x3ff   : > { %v11500_v60 = vmul.f32 %v4180_v46, %v13223_v18  ;;  %v7777_v29 = vpack.i.bf16 %v11452_v27, %v11489_v63 }
 0x400   : > { %v11493_v39 = vmax.f32 %v3942_v33, 0.0  ;;  %7773 = vrot.lane.b32.xlu1 %v7772_v41, %s8162_s11  ;;  %7768 = vrot.lane.b32.xlu0 %v7767_v53, %s8164_s25  ;;  %v4081_v1 = vsel %vm460_vm1, %v4048_v62, %v4049_v11  ;;  %v4179_v41 = vsel %vm742_vm0, %v4146_v25, %v4147_v47 }
 0x401   : > { %13224 = vst [vmem:[#allocation78_spill] sm:$0xff] %v11500_v60  ;;  %v11507_v49 = vmul.f32 %v4081_v1, %v13225_v10  ;;  %v7782_v53 = vpack.i.bf16 %v11500_v60, %v11338_v45 }
 0x402   : > { %v7787_v19 = vpack.i.bf16 %v11462_v43, %v11493_v39  ;;  %v13227_v43 = vld [vmem:[#allocation86_spill] sm:$0xff]  ;;  %v4050_v1 = vrot.slane %v11493_v39, 7 }
 0x403   : > { %13226 = vst [vmem:[#allocation77_spill] sm:$0xff] %v11507_v49  ;;  %v6099_v33 = vpop.f32.mrf.mxu1  ;;  %v7792_v18 = vpack.i.bf16 %v11507_v49, %v11455_v3  ;;  %v11518_v7 = vmul.f32 %v4179_v41, %v13227_v43  ;;  %v13233_v3 = vld [vmem:[#allocation38_spill] sm:$0xff] }
 0x404   : > { %7778 = vrot.lane.b32.xlu1 %v7777_v29, %s8163_s20  ;;  %7788 = vrot.lane.b32.xlu0 %v7787_v19, %s8162_s11  ;;  %v4148_v19 = vrot.slane %v11493_v39, 1  ;;  %v4080_v43 = vsel %vm460_vm1, %v4049_v11, %v4050_v1 }
 0x405   : > { %v6100_v62 = vpop.f32.mrf.mxu1  ;;  %13228 = vst [vmem:[#allocation18_spill] sm:$0xff] %v11518_v7  ;;  %v7797_v45 = vpack.i.bf16 %v11367_v14, %v11518_v7 }
 0x406   : > { %v6101_v46 = vadd.f32 %v6100_v62, %v6099_v33 }
 0x407   : > { %v6102_v10 = vpop.f32.mrf.mxu1 }
 0x408   : > { %v3786_v25 = vadd.f32 %v6101_v46, %v11044_v61  ;;  %7783 = vrot.lane.b32.xlu1 %v7782_v53, %s8164_s25  ;;  %7793 = vrot.lane.b32.xlu0 %v7792_v18, %s8163_s20  ;;  %v11534_v53 = vpop.f32.mrf.mxu0  ;;  %v13229_v18 = vld [vmem:[#allocation33_spill] sm:$0xff] }
 0x409   : > { %v6103_v29 = vpop.f32.mrf.mxu1  ;;  %v11537_v27 = vmul.f32 %v4080_v43, %v13229_v18 }
 0x40a   : > { %v3947_v33 = vadd.f32 %v11431_v0, %v3786_v25  ;;  %v6104_v62 = vadd.f32 %v6103_v29, %v6102_v10  ;;  %v4178_v0 = vsel %vm742_vm0, %v4147_v47, %v4148_v19  ;;  %v3954_v43 = vpop.f32.mrf.mxu0  ;;  %v13231_v47 = vld [vmem:[#allocation87_spill] sm:$0xff] }
 0x40b   : > { %13230 = vst [vmem:[#allocation17_spill] sm:$0xff] %v11537_v27 }
 0x40c   : > { %v11530_v41 = vmax.f32 %v3947_v33, 0.0  ;;  %v3789_v46 = vadd.f32 %v6104_v62, %v11044_v61  ;;  %7798 = vrot.lane.b32.xlu0 %v7797_v45, %s8164_s25 }
 0x40e   : > { %v3950_v10 = vadd.f32 %v6353_v56, %v3789_v46  ;;  %v7802_v25 = vpack.i.bf16 %v11530_v41, %v11489_v63  ;;  %v4051_v11 = vrot.slane %v11530_v41, 7  ;;  %v4149_v29 = vrot.slane %v11530_v41, 1  ;;  %v11555_v63 = vpop.permute.xlu0 %7563 }
 0x40f   : > { %v6105_v33 = vpop.f32.mrf.mxu1  ;;  %v7807_v56 = vpack.i.bf16 %v11500_v60, %v11537_v27  ;;  %v11553_v46 = vmul.f32 %v4178_v0, %v13231_v47  ;;  %13232 = vst [vmem:[#allocation80_spill] sm:$0xff] %v11555_v63  ;;  %v13235_v47 = vld [vmem:[#allocation88_spill] sm:$0xff] }
 0x410   : > { %v11545_v62 = vmax.f32 %v3950_v10, 0.0  ;;  %7803 = vrot.lane.b32.xlu1 %v7802_v25, %s8162_s11  ;;  %v4079_v45 = vsel %vm460_vm1, %v4050_v1, %v4051_v11  ;;  %v4177_v1 = vsel %vm742_vm0, %v4148_v19, %v4149_v29  ;;  %v7556_v25 = vunpack.i.h.bf16 %v11025_v35 }
 0x411   : > { %v6106_v18 = vpop.f32.mrf.mxu1  ;;  %v11560_v17 = vmul.f32 %v4079_v45, %v13233_v3  ;;  %v11572_v3 = vmul.f32 %v4177_v1, %v13235_v47  ;;  %v7812_v30 = vpack.i.bf16 %v11553_v46, %v11384_v34  ;;  %v7565_v47 = vunpack.i.l.bf16 %v11555_v63 }
 0x412   : > { %v6107_v14 = vadd.f32 %v6106_v18, %v6105_v33  ;;  %v7817_v10 = vpack.i.bf16 %v11507_v49, %v11545_v62  ;;  %v4052_v60 = vrot.slane %v11545_v62, 7  ;;  %v11569_v33 = vpop.f32.mrf.mxu0  ;;  %v4150_v45 = vrot.slane %v11545_v62, 1 }
 0x413   : > { %13234 = vst [vmem:[#allocation79_spill] sm:$0xff] %v11560_v17  ;;  %v6108_v28 = vpop.f32.mrf.mxu1 }
 0x414   : > { %v3794_v0 = vadd.f32 %v6107_v14, %v11044_v61  ;;  %7808 = vrot.lane.b32.xlu1 %v7807_v56, %s8163_s20  ;;  %7818 = vrot.lane.b32.xlu0 %v7817_v10, %s8162_s11  ;;  %v7822_v14 = vpack.i.bf16 %v11560_v17, %v11518_v7  ;;  %v3268_v56 = vsel %vm2052_vm10, %v10771_v5, %v7556_v25 }
 0x415   : > { %v6109_v18 = vpop.f32.mrf.mxu1  ;;  %v7574_v49 = vpop.permute.xlu0 %7573  ;;  %v4078_v32 = vsel %vm460_vm1, %v4051_v11, %v4052_v60  ;;  %v7827_v11 = vpack.i.bf16 %v11426_v15, %v11572_v3  ;;  %v4176_v25 = vsel %vm742_vm0, %v4149_v29, %v4150_v45  ;;  %v13237_v29 = vunpack.i.h.bf16 %v11555_v63 }
 0x416   : > { %v3955_v19 = vadd.f32 %v3954_v43, %v3794_v0  ;;  %v6110_v35 = vadd.f32 %v6109_v18, %v6108_v28  ;;  %v7575_v10 = vunpack.i.l.bf16 %v7574_v49  ;;  %v7571_v0 = vunpack.i.h.bf16 %v11036_v37  ;;  %v3957_v18 = vpop.f32.mrf.mxu0 }
 0x417   : > { %v7576_v7 = vunpack.i.h.bf16 %v7574_v49 }
 0x418   : > { %v11585_v43 = vmax.f32 %v3955_v19, 0.0  ;;  %v3797_v28 = vadd.f32 %v6110_v35, %v11044_v61  ;;  %7813 = vrot.lane.b32.xlu1 %v7812_v30, %s8164_s25  ;;  %7823 = vrot.lane.b32.xlu0 %v7822_v14, %s8163_s20  ;;  %v3269_v5 = vsel %vm2052_vm10, %v10774_v26, %v7575_v10  ;;  %v13236_v35 = vld [vmem:[#allocation37_spill] sm:$0xff]  ;;  %v3301_v26 = vsel %vm3270_vm12, %v3268_v56, %v7565_v47 }
 0x419   : > { %v7579_v1 = vpop.permute.xlu0 %7578  ;;  %v7584_v34 = vpop.permute.xlu1 %7583  ;;  %v11600_v14 = vmul.f32 %v4078_v32, %v13236_v35  ;;  %v3334_v49 = vsel %vm3303_vm13, %v3301_v26, %v7571_v0  ;;  %v13238_v56 = vld [vmem:[#allocation89_spill] sm:$0xff]  ;;  %v4981_v0 = vsel %vm2052_vm10, %v11069_v4, %v7576_v7  ;;  %v13241_v7 = vld [vmem:[#allocation108_spill] sm:$0xff] }
 0x41a   : > { %v3958_v19 = vadd.f32 %v3957_v18, %v3797_v28  ;;  %v7832_v30 = vpack.i.bf16 %v11585_v43, %v11537_v27  ;;  %v12861_v37 = vrot.slane %v11585_v43, 7  ;;  %v7580_v2 = vunpack.i.l.bf16 %v7579_v1 }
 0x41b   : > { %v3302_v28 = vsel %vm3270_vm12, %v3269_v5, %v13237_v29  ;;  %v11618_v47 = vmul.f32 %v4176_v25, %v13238_v56  ;;  %v7837_v5 = vpack.i.bf16 %v11553_v46, %v11600_v14  ;;  %v7585_v26 = vunpack.i.l.bf16 %v7584_v34  ;;  %v13239_v25 = vld [vmem:[#allocation42_spill] sm:$0xff] }
 0x41c   : > { %v11604_v10 = vmax.f32 %v3958_v19, 0.0  ;;  %7833 = vrot.lane.b32.xlu1 %v7832_v30, %s8162_s11  ;;  %7828 = vrot.lane.b32.xlu0 %v7827_v11, %s8164_s25  ;;  %v4077_v32 = vsel %vm460_vm1, %v4052_v60, %v12861_v37  ;;  %v3335_v18 = vsel %vm3303_vm13, %v3302_v28, %v7580_v2  ;;  %v12860_v19 = vrot.slane %v11585_v43, 1 }
 0x41d   : > { %v7586_v30 = vunpack.i.h.bf16 %v7584_v34  ;;  %v7589_v11 = vpop.permute.xlu1 %7588  ;;  %v3477_v63 = vpack.c.bf16 %v3335_v18, %v3334_v49  ;;  %v7581_v2 = vunpack.i.h.bf16 %v7579_v1  ;;  %v11630_v29 = vmul.f32 %v4077_v32, %v13239_v25 }
 0x41e   : > { %v11621_v35 = vpop.permute.xlu0 %7593  ;;  %v7847_v60 = vpack.i.bf16 %v11560_v17, %v11604_v10  ;;  %v7591_v28 = vunpack.i.h.bf16 %v7589_v11  ;;  %v7590_v56 = vunpack.i.l.bf16 %v7589_v11  ;;  %v13240_v18 = vpack.c.bf16 %v10777_v51, %v10710_v8  ;;  %v13242_v11 = vld [vmem:[#allocation106_spill] sm:$0xff] }
 0x41f   : > { %3832 = vmatmul.mubr.bf16.gmra.mxu1 %v3477_v63  ;;  %v7595_v49 = vunpack.i.l.bf16 %v11621_v35  ;;  %v4175_v4 = vsel %vm742_vm0, %v4150_v45, %v12860_v19  ;;  %v4885_v34 = vsel %vm2052_vm10, %v13241_v7, %v7586_v30  ;;  %v7842_v63 = vpack.i.bf16 %v11618_v47, %v11444_v48 }
 0x420   : > { %7838 = vrot.lane.b32.xlu1 %v7837_v5, %s8163_s20  ;;  %6358 = vmatprep.mubr.msk.bf16.mxu1 %vm2052_vm10, %v13240_v18  ;;  %v6111_v1 = vpop.f32.mrf.mxu1  ;;  %v13243_v8 = vunpack.i.l.bf16 %v13242_v11  ;;  %v4982_v5 = vsel %vm2052_vm10, %v11067_v13, %v7585_v26  ;;  %v7852_v30 = vpack.i.bf16 %v11630_v29, %v11572_v3  ;;  %v13245_v13 = vld [vmem:[#allocation109_spill] sm:$0xff]  ;;  %v4054_v27 = vrot.slane %v11604_v10, 7 }
 0x421   : > { %v11644_v32 = vpop.permute.xlu1 %7603  ;;  %7848 = vrot.lane.b32.xlu0 %v7847_v60, %s8162_s11  ;;  %v4917_v60 = vsel %vm3270_vm12, %v4885_v34, %v7591_v28  ;;  %v5014_v7 = vsel %vm3270_vm12, %v4982_v5, %v7590_v56  ;;  %v4886_v26 = vsel %vm2052_vm10, %v13245_v13, %v7595_v49  ;;  %v13246_v34 = vld [vmem:[#allocation57_spill] sm:$0xff]  ;;  %v13247_v5 = vpack.c.bf16 %v10811_v22, %v10789_v24 }
 0x422   : > { %v5013_v51 = vsel %vm3270_vm12, %v4981_v0, %v13243_v8  ;;  %v7605_v45 = vunpack.i.l.bf16 %v11644_v32  ;;  %v7599_v25 = vpop.permute.xlu0 %7598  ;;  %v6112_v19 = vpop.f32.mrf.mxu1  ;;  %v13244_v0 = vld [vmem:[#allocation90_spill] sm:$0xff]  ;;  %v13249_v22 = vrot.slane %v11585_v43, 7 }
 0x423   : > { %v5045_v18 = vsel %vm3303_vm13, %v5013_v51, %v7581_v2  ;;  %v7600_v37 = vunpack.i.l.bf16 %v7599_v25  ;;  %v11662_v11 = vmul.f32 %v4175_v4, %v13244_v0  ;;  %v6113_v8 = vadd.f32 %v6112_v19, %v6111_v1  ;;  %v8075_v19 = vld [vmem:[%s12594_s6 + $0x80] sm:$0xff]  }
 0x424   : > { %7843 = vrot.lane.b32.xlu1 %v7842_v63, %s8164_s25  ;;  %v5046_v17 = vsel %vm3303_vm13, %v5014_v7, %v7605_v45  ;;  %v6114_v28 = vpop.f32.mrf.mxu1  ;;  %v4949_v63 = vsel %vm3303_vm13, %v4917_v60, %v13246_v34  ;;  %v4152_v45 = vrot.slane %v11604_v10, 1  ;;  %v13248_v60 = vpack.c.bf16 %v10847_v42, %v10832_v59 }
 0x425   : > { %v4918_v2 = vsel %vm3270_vm12, %v4886_v26, %v7600_v37  ;;  %7853 = vrot.lane.b32.xlu0 %v7852_v30, %s8163_s20  ;;  %v5078_v56 = vpack.c.bf16 %v5046_v17, %v5045_v18  ;;  %v3802_v4 = vadd.f32 %v6113_v8, %v11044_v61  ;;  %v7857_v17 = vpack.i.bf16 %v11477_v55, %v11662_v11 }
 0x426   : > { %v4950_v51 = vsel %vm3303_vm13, %v4918_v2, %v13246_v34  ;;  %v11675_v49 = vpop.permute.xlu0 %7608  ;;  %v6115_v37 = vpop.f32.mrf.mxu1  ;;  %v4076_v24 = vsel %vm460_vm1, %v13249_v22, %v4054_v27  ;;  %v7596_v7 = vunpack.i.h.bf16 %v11621_v35  ;;  %v13251_v8 = vrot.slane %v11585_v43, 1 }
 0x427   : > { %v5077_v1 = vpack.c.bf16 %v4950_v51, %v4949_v63  ;;  %6359 = vmatmul.mubr.msk.bf16.vlgmr.msra.gmra.mxu1 %vm2052_vm10, %v13247_v5  ;;  %5352 = vmatprep.mubr.bf16.mxu0 %v5078_v56  ;;  %v3963_v30 = vadd.f32 %v11534_v53, %v3802_v4  ;;  %v6116_v18 = vadd.f32 %v6115_v37, %v6114_v28  ;;  %v7601_v53 = vunpack.i.h.bf16 %v7599_v25  ;;  %v13252_v37 = vld [vmem:[#allocation102_spill] sm:$0xff]  ;;  %v13253_v5 = vld [vmem:[#allocation91_spill] sm:$0xff] }
 0x428   : > { %6362 = vmatprep.mubr.msk.bf16.mxu1 %vm2052_vm10, %v13248_v60  ;;  %6367 = vmatpush3.bf16.msra.mxu1 %v11195_v57  ;;  %v7610_v42 = vunpack.i.l.bf16 %v11675_v49  ;;  %v13250_v57 = vld [vmem:[#allocation41_spill] sm:$0xff]  ;;  %v4174_v35 = vsel %vm742_vm0, %v13251_v8, %v4152_v45  ;;  %v4983_v56 = vsel %vm2052_vm10, %v11099_v6, %v7596_v7  ;;  %v7606_v63 = vunpack.i.h.bf16 %v11644_v32 }
 0x429   : > { %7858 = vrot.lane.b32.xlu0 %v7857_v17, %s8164_s25  ;;  %5353 = vmatmul.mubr.bf16.vlgmr.msra.gmra.mxu0 %v5077_v1  ;;  %v11699_v0 = vmax.f32 %v3963_v30, 0.0  ;;  %v3805_v13 = vadd.f32 %v6116_v18, %v11044_v61  ;;  %v11706_v26 = vmul.f32 %v4076_v24, %v13250_v57  ;;  %v5015_v4 = vsel %vm3270_vm12, %v4983_v56, %v7601_v53 }
 0x42a   : > { %v11702_v59 = vpop.permute.xlu0 %7613  ;;  %6368 = vmatprep.subr.bf16.mxu1 %v8075_v19  ;;  %v4984_v1 = vsel %vm2052_vm10, %v11117_v31, %v7610_v42  ;;  %v11735_v17 = vmul.f32 %v4174_v35, %v13253_v5  ;;  %v13254_v18 = vpack.c.bf16 %v11183_v54, %v11160_v50  ;;  %v5047_v7 = vsel %vm3303_vm13, %v5015_v4, %v7606_v63  ;;  %v13256_v35 = vld [vmem:[#allocation92_spill] sm:$0xff] }
 0x42b   : > { %v3966_v2 = vadd.f32 %v11569_v33, %v3805_v13  ;;  %v7615_v28 = vunpack.i.l.bf16 %v11702_v59  ;;  %v7862_v61 = vpack.i.bf16 %v11699_v0, %v11600_v14  ;;  %v4055_v25 = vrot.slane %v11699_v0, 7 }
 0x42c   : > { %6369 = vmatpush3.bf16.msra.mxu1 %v8075_v19  ;;  %v4153_v34 = vrot.slane %v11699_v0, 1  ;;  %v7867_v32 = vpack.i.bf16 %v11618_v47, %v11706_v26  ;;  %v7872_v57 = vpack.i.bf16 %v11735_v17, %v11493_v39 }
 0x42d   : > { %6402 = vmatprep.subr.bf16.mxu1 %v13144_v23  ;;  %v11723_v33 = vmax.f32 %v3966_v2, 0.0  ;;  %7863 = vrot.lane.b32.xlu1 %v7862_v61, %s8162_s11  ;;  %v4075_v19 = vsel %vm460_vm1, %v4054_v27, %v4055_v25  ;;  %v5016_v30 = vsel %vm3270_vm12, %v4984_v1, %v7615_v28  ;;  %v13255_v27 = vld [vmem:[#allocation46_spill] sm:$0xff]  ;;  %v7611_v28 = vunpack.i.h.bf16 %v11675_v49 }
 0x42e   : > { %v7619_v51 = vpop.permute.xlu0 %7618  ;;  %v11745_v60 = vmul.f32 %v4075_v19, %v13255_v27  ;;  %v4173_v13 = vsel %vm742_vm0, %v4152_v45, %v4153_v34  ;;  %v13257_v19 = vpack.c.bf16 %v11253_v52, %v11243_v44  ;;  %v13258_v1 = vpack.c.bf16 %v11288_v40, %v11291_v36 }
 0x42f   : > { %v7620_v6 = vunpack.i.l.bf16 %v7619_v51  ;;  %6363 = vmatmul.mubr.msk.bf16.gmra.mxu1 %vm2052_vm10, %v13252_v37  ;;  %v7877_v31 = vpack.i.bf16 %v11630_v29, %v11723_v33  ;;  %v4056_v22 = vrot.slane %v11723_v33, 7  ;;  %v4154_v50 = vrot.slane %v11723_v33, 1 }
 0x430   : > { %6370 = vmatprep.mubr.msk.bf16.mxu1 %vm2052_vm10, %v13254_v18  ;;  %v7882_v8 = vpack.i.bf16 %v11745_v60, %v11662_v11  ;;  %v11767_v2 = vmul.f32 %v4173_v13, %v13256_v35  ;;  %v7621_v49 = vunpack.i.h.bf16 %v7619_v51  ;;  %v4887_v52 = vsel %vm2052_vm10, %v11122_v21, %v7611_v28  ;;  %v13259_v28 = vld [vmem:[#allocation5_spill] sm:$0xff] }
 0x431   : > { %v7624_v24 = vpop.permute.xlu1 %7623  ;;  %v5048_v53 = vsel %vm3303_vm13, %v5016_v30, %v7620_v6  ;;  %7868 = vrot.lane.b32.xlu1 %v7867_v32, %s8163_s20  ;;  %7878 = vrot.lane.b32.xlu0 %v7877_v31, %s8162_s11  ;;  %v4074_v42 = vsel %vm460_vm1, %v4055_v25, %v4056_v22  ;;  %v4172_v25 = vsel %vm742_vm0, %v4153_v34, %v4154_v50 }
 0x432   : > { %v5081_v54 = vpack.c.bf16 %v5048_v53, %v5047_v7  ;;  %v11764_v45 = vmul.f32 %v4074_v42, %v13113_v16  ;;  %v7625_v63 = vunpack.i.l.bf16 %v7624_v24  ;;  %v7616_v16 = vunpack.i.h.bf16 %v11702_v59 }
 0x433   : > { %v7887_v6 = vpack.i.bf16 %v11530_v41, %v11767_v2  ;;  %v11790_v59 = vmul.f32 %v4172_v25, %v9118_v58  ;;  %v7626_v51 = vunpack.i.h.bf16 %v7624_v24 }
 0x434   : > { %5360 = vmatprep.mubr.bf16.mxu0 %v5081_v54  ;;  %v7892_v34 = vpack.i.bf16 %v11735_v17, %v11764_v45  ;;  %v4888_v36 = vsel %vm2052_vm10, %v11146_v9, %v7625_v63  ;;  %v4919_v30 = vsel %vm3270_vm12, %v4887_v52, %v7616_v16  ;;  %v13262_v63 = vld [vmem:[#allocation74_spill] sm:$0xff]  ;;  %v13263_v16 = vld [vmem:[#allocation72_spill] sm:$0xff] }
 0x435   : > { %v7629_v61 = vpop.permute.xlu1 %7628  ;;  %v7639_v56 = vpop.permute.xlu0 %7638  ;;  %7873 = vrot.lane.b32.xlu1 %v7872_v57, %s8164_s25  ;;  %7883 = vrot.lane.b32.xlu0 %v7882_v8, %s8163_s20  ;;  %v7897_v21 = vpack.i.bf16 %v11790_v59, %v11545_v62  ;;  %v4951_v24 = vsel %vm3303_vm13, %v4919_v30, %v7621_v49  ;;  %v4985_v54 = vsel %vm2052_vm10, %v11140_v20, %v7626_v51 }
 0x436   : > { %v7630_v4 = vunpack.i.l.bf16 %v7629_v61  ;;  %v7640_v40 = vunpack.i.l.bf16 %v7639_v56  ;;  %v7631_v18 = vunpack.i.h.bf16 %v7629_v61  ;;  %v13260_v61 = vld [vmem:[#allocation8_spill] sm:$0xff] }
 0x437   : > { %6371 = vmatmul.mubr.msk.bf16.vlgmr.msra.gmra.mxu1 %vm2052_vm10, %v13257_v19  ;;  %v13261_v25 = vpack.c.bf16 %v13259_v28, %v13260_v61  ;;  %v7641_v19 = vunpack.i.h.bf16 %v7639_v56 }
 0x438   : > { %6374 = vmatprep.mubr.msk.bf16.mxu1 %vm2052_vm10, %v13258_v1  ;;  %v4920_v58 = vsel %vm3270_vm12, %v4888_v36, %v7630_v4  ;;  %v4986_v42 = vsel %vm2052_vm10, %v11178_v12, %v7640_v40  ;;  %v5017_v8 = vsel %vm3270_vm12, %v4985_v54, %v7631_v18  ;;  %v13264_v4 = vpack.c.bf16 %v13262_v63, %v13263_v16  ;;  %v13265_v36 = vld [vmem:[#allocation36_spill] sm:$0xff]  ;;  %v13266_v18 = vld [vmem:[#allocation78_spill] sm:$0xff] }
 0x439   : > { %v7634_v44 = vpop.permute.xlu1 %7633  ;;  %v7644_v32 = vpop.permute.xlu0 %7643  ;;  %7893 = vrot.lane.b32.xlu1 %v7892_v34, %s8163_s20  ;;  %7888 = vrot.lane.b32.xlu0 %v7887_v6, %s8164_s25  ;;  %v4889_v40 = vsel %vm2052_vm10, %v13265_v36, %v7641_v19  ;;  %v13272_v63 = vld [vmem:[#allocation44_spill] sm:$0xff]  ;;  %v5103_v36 = vpack.c.bf16 %v11662_v11, %v11618_v47 }
 0x43a   : > { %v7635_v5 = vunpack.i.l.bf16 %v7634_v44  ;;  %v7645_v31 = vunpack.i.l.bf16 %v7644_v32  ;;  %v7636_v27 = vunpack.i.h.bf16 %v7634_v44  ;;  %v7646_v52 = vunpack.i.h.bf16 %v7644_v32  ;;  %v13275_v11 = vld [vmem:[#allocation40_spill] sm:$0xff] }
 0x43c   : > { %v4952_v9 = vsel %vm3303_vm13, %v4920_v58, %v7635_v5  ;;  %v5018_v35 = vsel %vm3270_vm12, %v4986_v42, %v7645_v31  ;;  %v5049_v20 = vsel %vm3303_vm13, %v5017_v8, %v7636_v27  ;;  %v13267_v58 = vld [vmem:[#allocation18_spill] sm:$0xff] }
 0x43d   : > { %v7654_v7 = vpop.permute.xlu1 %7653  ;;  %v7649_v53 = vpop.permute.xlu0 %7648  ;;  %v5080_v13 = vpack.c.bf16 %v4952_v9, %v4951_v24  ;;  %7898 = vrot.lane.b32.xlu1 %v7897_v21, %s8164_s25  ;;  %v5097_v31 = vpack.c.bf16 %v13267_v58, %v13266_v18  ;;  %v13268_v21 = vld [vmem:[#allocation23_spill] sm:$0xff]  ;;  %v13269_v42 = vld [vmem:[#allocation14_spill] sm:$0xff] }
 0x43e   : > { %v7650_v57 = vunpack.i.l.bf16 %v7649_v53  ;;  %v7655_v6 = vunpack.i.l.bf16 %v7654_v7  ;;  %v7651_v51 = vunpack.i.h.bf16 %v7649_v53  ;;  %v7656_v27 = vunpack.i.h.bf16 %v7654_v7 }
 0x43f   : > { %5361 = vmatmul.mubr.bf16.gmra.mxu0 %v5080_v13  ;;  %6375 = vmatmul.mubr.msk.bf16.gmra.mxu1 %vm2052_vm10, %v13261_v25  ;;  %v4921_v13 = vsel %vm3270_vm12, %v4889_v40, %v7646_v52 }
 0x440   : > { %6378 = vmatprep.mubr.msk.bf16.mxu1 %vm2052_vm10, %v13264_v4  ;;  %v5050_v12 = vsel %vm3303_vm13, %v5018_v35, %v7650_v57  ;;  %v4890_v56 = vsel %vm2052_vm10, %v13268_v21, %v7655_v6  ;;  %v13270_v57 = vld [vmem:[#allocation75_spill] sm:$0xff]  ;;  %v4953_v7 = vsel %vm3303_vm13, %v4921_v13, %v7651_v51  ;;  %v4987_v16 = vsel %vm2052_vm10, %v13272_v63, %v7656_v27 }
 0x441   : > { %v7659_v49 = vpop.permute.xlu1 %7658  ;;  %v7669_v1 = vpop.permute.xlu0 %7668  ;;  %v5084_v34 = vpack.c.bf16 %v5050_v12, %v5049_v20  ;;  %v13271_v8 = vpack.c.bf16 %v13269_v42, %v13270_v57  ;;  %v13273_v4 = vld [vmem:[#allocation39_spill] sm:$0xff]  ;;  %v5100_v51 = vpack.c.bf16 %v11572_v3, %v11553_v46  ;;  %v5106_v3 = vpack.c.bf16 %v11767_v2, %v11735_v17 }
 0x442   : > { %v7660_v44 = vunpack.i.l.bf16 %v7659_v49  ;;  %v7670_v24 = vunpack.i.l.bf16 %v7669_v1  ;;  %v7661_v32 = vunpack.i.h.bf16 %v7659_v49  ;;  %v7671_v40 = vunpack.i.h.bf16 %v7669_v1  ;;  %v13277_v63 = vld [vmem:[#allocation51_spill] sm:$0xff] }
 0x443   : > { %5368 = vmatprep.mubr.bf16.mxu0 %v5084_v34 }
 0x444   : > { %v4922_v54 = vsel %vm3270_vm12, %v4890_v56, %v7660_v44  ;;  %v4988_v20 = vsel %vm2052_vm10, %v13273_v4, %v7670_v24  ;;  %v5019_v19 = vsel %vm3270_vm12, %v4987_v16, %v7661_v32  ;;  %v13274_v56 = vld [vmem:[#allocation12_spill] sm:$0xff] }
 0x445   : > { %v7664_v5 = vpop.permute.xlu1 %7663  ;;  %v7674_v30 = vpop.permute.xlu0 %7673  ;;  %v4891_v24 = vsel %vm2052_vm10, %v13274_v56, %v7671_v40 }
 0x446   : > { %v7665_v9 = vunpack.i.l.bf16 %v7664_v5  ;;  %v7675_v53 = vunpack.i.l.bf16 %v7674_v30  ;;  %v7666_v35 = vunpack.i.h.bf16 %v7664_v5 }
 0x447   : > { %6379 = vmatmul.mubr.msk.bf16.gmra.mxu1 %vm2052_vm10, %v13271_v8 }
 0x448   : > { %6382 = vmatprep.mubr.msk.bf16.mxu1 %vm2052_vm10, %v5097_v31  ;;  %v4954_v28 = vsel %vm3303_vm13, %v4922_v54, %v7665_v9  ;;  %v5020_v49 = vsel %vm3270_vm12, %v4988_v20, %v7675_v53  ;;  %v5051_v6 = vsel %vm3303_vm13, %v5019_v19, %v7666_v35  ;;  %v7676_v31 = vunpack.i.h.bf16 %v7674_v30 }
 0x449   : > { %v7679_v61 = vpop.permute.xlu0 %7678  ;;  %v5083_v25 = vpack.c.bf16 %v4954_v28, %v4953_v7 }
 0x44a   : > { %v7680_v12 = vunpack.i.l.bf16 %v7679_v61  ;;  %v7681_v21 = vunpack.i.h.bf16 %v7679_v61  ;;  %v4923_v54 = vsel %vm3270_vm12, %v4891_v24, %v7676_v31  ;;  %v13276_v61 = vld [vmem:[#allocation47_spill] sm:$0xff] }
 0x44b   : > { %5369 = vmatmul.mubr.bf16.gmra.mxu0 %v5083_v25  ;;  %v13279_v24 = vld [vmem:[#allocation107_spill] sm:$0xff] }
 0x44c   : > { %v7684_v34 = vpop.permute.xlu1 %7683  ;;  %v5052_v52 = vsel %vm3303_vm13, %v5020_v49, %v7680_v12  ;;  %v4955_v8 = vsel %vm3303_vm13, %v4923_v54, %v7681_v21 }
 0x44d   : > { %v5087_v44 = vpack.c.bf16 %v5052_v52, %v5051_v6  ;;  %v7685_v58 = vunpack.i.l.bf16 %v7684_v34  ;;  %v7686_v47 = vunpack.i.h.bf16 %v7684_v34 }
 0x44f   : > { %5376 = vmatprep.mubr.bf16.mxu0 %v5087_v44  ;;  %6383 = vmatmul.mubr.msk.bf16.gmra.mxu1 %vm2052_vm10, %v5100_v51  ;;  %v4892_v1 = vsel %vm2052_vm10, %v13275_v11, %v7685_v58  ;;  %v4989_v25 = vsel %vm2052_vm10, %v13276_v61, %v7686_v47  ;;  %v13278_v58 = vld [vmem:[#allocation43_spill] sm:$0xff] }
 0x450   : > { %v7689_v5 = vpop.permute.xlu1 %7688  ;;  %v7699_v18 = vpop.permute.xlu0 %7698  ;;  %6386 = vmatprep.mubr.msk.bf16.mxu1 %vm2052_vm10, %v5103_v36 }
 0x451   : > { %v7690_v27 = vunpack.i.l.bf16 %v7689_v5  ;;  %v7700_v13 = vunpack.i.l.bf16 %v7699_v18  ;;  %v7691_v53 = vunpack.i.h.bf16 %v7689_v5  ;;  %v7701_v34 = vunpack.i.h.bf16 %v7699_v18 }
 0x453   : > { %v4924_v30 = vsel %vm3270_vm12, %v4892_v1, %v7690_v27  ;;  %v4990_v16 = vsel %vm2052_vm10, %v13277_v63, %v7700_v13  ;;  %v5021_v20 = vsel %vm3270_vm12, %v4989_v25, %v7691_v53  ;;  %v4893_v31 = vsel %vm2052_vm10, %v13278_v58, %v7701_v34  ;;  %v13283_v58 = vld [vmem:[#allocation112_spill] sm:$0xff] }
 0x454   : > { %v7694_v9 = vpop.permute.xlu1 %7693  ;;  %v7704_v46 = vpop.permute.xlu0 %7703 }
 0x455   : > { %v7695_v32 = vunpack.i.l.bf16 %v7694_v9  ;;  %v7705_v42 = vunpack.i.l.bf16 %v7704_v46  ;;  %v7696_v57 = vunpack.i.h.bf16 %v7694_v9  ;;  %v7706_v36 = vunpack.i.h.bf16 %v7704_v46 }
 0x457   : > { %v4956_v35 = vsel %vm3303_vm13, %v4924_v30, %v7695_v32  ;;  %6387 = vmatmul.mubr.msk.bf16.gmra.mxu1 %vm2052_vm10, %v5106_v3  ;;  %v5022_v12 = vsel %vm3270_vm12, %v4990_v16, %v7705_v42  ;;  %v5053_v19 = vsel %vm3303_vm13, %v5021_v20, %v7696_v57  ;;  %v4925_v18 = vsel %vm3270_vm12, %v4893_v31, %v7706_v36  ;;  %v13280_v42 = vld [vmem:[#allocation111_spill] sm:$0xff] }
 0x458   : > { %v7714_v17 = vpop.permute.xlu1 %7713  ;;  %v7709_v7 = vpop.permute.xlu0 %7708  ;;  %v5086_v28 = vpack.c.bf16 %v4956_v35, %v4955_v8  ;;  %v13281_v8 = vld [vmem:[#allocation71_spill] sm:$0xff] }
 0x459   : > { %v7710_v4 = vunpack.i.l.bf16 %v7709_v7  ;;  %v7715_v51 = vunpack.i.l.bf16 %v7714_v17  ;;  %v7711_v5 = vunpack.i.h.bf16 %v7709_v7  ;;  %v7716_v56 = vunpack.i.h.bf16 %v7714_v17 }
 0x45a   : > { %5377 = vmatmul.mubr.bf16.gmra.mxu0 %v5086_v28 }
 0x45b   : > { %v5054_v49 = vsel %vm3303_vm13, %v5022_v12, %v7710_v4  ;;  %v4894_v9 = vsel %vm2052_vm10, %v13279_v24, %v7715_v51  ;;  %v4957_v32 = vsel %vm3303_vm13, %v4925_v18, %v7711_v5  ;;  %v4991_v57 = vsel %vm2052_vm10, %v13280_v42, %v7716_v56 }
 0x45c   : > { %v7719_v6 = vpop.permute.xlu1 %7718  ;;  %v7729_v52 = vpop.permute.xlu0 %7728  ;;  %v5090_v44 = vpack.c.bf16 %v5054_v49, %v5053_v19 }
 0x45d   : > { %v7720_v40 = vunpack.i.l.bf16 %v7719_v6  ;;  %v7730_v3 = vunpack.i.l.bf16 %v7729_v52  ;;  %v7721_v11 = vunpack.i.h.bf16 %v7719_v6  ;;  %v7731_v4 = vunpack.i.h.bf16 %v7729_v52 }
 0x45e   : > { %5384 = vmatprep.mubr.bf16.mxu0 %v5090_v44  ;;  %v13282_v44 = vld [vmem:[#allocation56_spill] sm:$0xff] }
 0x45f   : > { %v4926_v1 = vsel %vm3270_vm12, %v4894_v9, %v7720_v40  ;;  %v4992_v35 = vsel %vm2052_vm10, %v13281_v8, %v7730_v3  ;;  %v5023_v7 = vsel %vm3270_vm12, %v4991_v57, %v7721_v11  ;;  %v4895_v51 = vsel %vm2052_vm10, %v13282_v44, %v7731_v4  ;;  %v13287_v44 = vld [vmem:[#allocation7_spill] sm:$0xff] }
 0x460   : > { %v7724_v27 = vpop.permute.xlu1 %7723  ;;  %v7734_v21 = vpop.permute.xlu0 %7733 }
 0x461   : > { %v7725_v47 = vunpack.i.l.bf16 %v7724_v27  ;;  %v7735_v46 = vunpack.i.l.bf16 %v7734_v21  ;;  %v7726_v13 = vunpack.i.h.bf16 %v7724_v27  ;;  %v7736_v49 = vunpack.i.h.bf16 %v7734_v21 }
 0x463   : > { %v4958_v54 = vsel %vm3303_vm13, %v4926_v1, %v7725_v47  ;;  %v5024_v28 = vsel %vm3270_vm12, %v4992_v35, %v7735_v46  ;;  %v5055_v25 = vsel %vm3303_vm13, %v5023_v7, %v7726_v13  ;;  %v4927_v52 = vsel %vm3270_vm12, %v4895_v51, %v7736_v49  ;;  %v13284_v13 = vld [vmem:[#allocation6_spill] sm:$0xff] }
 0x464   : > { %v7739_v53 = vpop.permute.xlu0 %7738  ;;  %v5089_v30 = vpack.c.bf16 %v4958_v54, %v4957_v32  ;;  %v13285_v54 = vld [vmem:[#allocation73_spill] sm:$0xff] }
 0x465   : > { %v7740_v17 = vunpack.i.l.bf16 %v7739_v53  ;;  %v7741_v6 = vunpack.i.h.bf16 %v7739_v53 }
 0x466   : > { %v7744_v61 = vpop.permute.xlu1 %7743  ;;  %5385 = vmatmul.mubr.bf16.gmra.mxu0 %v5089_v30 }
 0x467   : > { %v5056_v63 = vsel %vm3303_vm13, %v5024_v28, %v7740_v17  ;;  %v7745_v19 = vunpack.i.l.bf16 %v7744_v61  ;;  %v7746_v5 = vunpack.i.h.bf16 %v7744_v61  ;;  %v4959_v47 = vsel %vm3303_vm13, %v4927_v52, %v7741_v6 }
 0x468   : > { %v5093_v16 = vpack.c.bf16 %v5056_v63, %v5055_v25 }
 0x469   : > { %v4896_v31 = vsel %vm2052_vm10, %v13283_v58, %v7745_v19  ;;  %v4993_v32 = vsel %vm2052_vm10, %v13284_v13, %v7746_v5 }
 0x46a   : > { %v7749_v20 = vpop.permute.xlu1 %7748  ;;  %v7759_v12 = vpop.permute.xlu0 %7758  ;;  %5392 = vmatprep.mubr.bf16.mxu0 %v5093_v16 }
 0x46b   : > { %v7750_v34 = vunpack.i.l.bf16 %v7749_v20  ;;  %v7760_v27 = vunpack.i.l.bf16 %v7759_v12  ;;  %v7751_v24 = vunpack.i.h.bf16 %v7749_v20  ;;  %v7761_v17 = vunpack.i.h.bf16 %v7759_v12  ;;  %v13286_v20 = vld [vmem:[#allocation69_spill] sm:$0xff] }
 0x46d   : > { %v4928_v9 = vsel %vm3270_vm12, %v4896_v31, %v7750_v34  ;;  %v4994_v53 = vsel %vm2052_vm10, %v13285_v54, %v7760_v27  ;;  %v5025_v42 = vsel %vm3270_vm12, %v4993_v32, %v7751_v24  ;;  %v4897_v19 = vsel %vm2052_vm10, %v13286_v20, %v7761_v17 }
 0x46e   : > { %v7754_v36 = vpop.permute.xlu1 %7753  ;;  %v7764_v40 = vpop.permute.xlu0 %7763 }
 0x46f   : > { %v7755_v56 = vunpack.i.l.bf16 %v7754_v36  ;;  %v7765_v3 = vunpack.i.l.bf16 %v7764_v40  ;;  %v7756_v21 = vunpack.i.h.bf16 %v7754_v36  ;;  %v7766_v63 = vunpack.i.h.bf16 %v7764_v40 }
 0x471   : > { %v4960_v18 = vsel %vm3303_vm13, %v4928_v9, %v7755_v56  ;;  %v5026_v57 = vsel %vm3270_vm12, %v4994_v53, %v7765_v3  ;;  %v5057_v8 = vsel %vm3303_vm13, %v5025_v42, %v7756_v21  ;;  %v4929_v12 = vsel %vm3270_vm12, %v4897_v19, %v7766_v63 }
 0x472   : > { %v7774_v11 = vpop.permute.xlu1 %7773  ;;  %v7769_v1 = vpop.permute.xlu0 %7768  ;;  %v5092_v46 = vpack.c.bf16 %v4960_v18, %v4959_v47 }
 0x473   : > { %v7770_v30 = vunpack.i.l.bf16 %v7769_v1  ;;  %v7775_v25 = vunpack.i.l.bf16 %v7774_v11  ;;  %v7771_v4 = vunpack.i.h.bf16 %v7769_v1  ;;  %v7776_v6 = vunpack.i.h.bf16 %v7774_v11 }
 0x474   : > { %5393 = vmatmul.mubr.bf16.gmra.mxu0 %v5092_v46 }
 0x475   : > { %v5058_v35 = vsel %vm3303_vm13, %v5026_v57, %v7770_v30  ;;  %v4898_v51 = vsel %vm2052_vm10, %v13287_v44, %v7775_v25  ;;  %v4961_v56 = vsel %vm3303_vm13, %v4929_v12, %v7771_v4  ;;  %v4995_v3 = vsel %vm2052_vm10, %v11426_v15, %v7776_v6  ;;  %v13289_v25 = vld [vmem:[#allocation9_spill] sm:$0xff] }
 0x476   : > { %v7779_v7 = vpop.permute.xlu1 %7778  ;;  %v7789_v28 = vpop.permute.xlu0 %7788  ;;  %v5096_v61 = vpack.c.bf16 %v5058_v35, %v5057_v8  ;;  %v13288_v8 = vld [vmem:[#allocation10_spill] sm:$0xff] }
 0x477   : > { %v7780_v16 = vunpack.i.l.bf16 %v7779_v7  ;;  %v7790_v36 = vunpack.i.l.bf16 %v7789_v28  ;;  %v7781_v58 = vunpack.i.h.bf16 %v7779_v7  ;;  %v7791_v54 = vunpack.i.h.bf16 %v7789_v28 }
 0x478   : > { %5400 = vmatprep.mubr.bf16.mxu0 %v5096_v61 }
 0x479   : > { %v4930_v31 = vsel %vm3270_vm12, %v4898_v51, %v7780_v16  ;;  %v4996_v21 = vsel %vm2052_vm10, %v11444_v48, %v7790_v36  ;;  %v5027_v18 = vsel %vm3270_vm12, %v4995_v3, %v7781_v58  ;;  %v4899_v35 = vsel %vm2052_vm10, %v13288_v8, %v7791_v54 }
 0x47a   : > { %v7784_v49 = vpop.permute.xlu1 %7783  ;;  %v7794_v34 = vpop.permute.xlu0 %7793 }
 0x47b   : > { %v7785_v5 = vunpack.i.l.bf16 %v7784_v49  ;;  %v7795_v40 = vunpack.i.l.bf16 %v7794_v34  ;;  %v7786_v27 = vunpack.i.h.bf16 %v7784_v49  ;;  %v7796_v42 = vunpack.i.h.bf16 %v7794_v34 }
 0x47d   : > { %v4962_v52 = vsel %vm3303_vm13, %v4930_v31, %v7785_v5  ;;  %v5028_v11 = vsel %vm3270_vm12, %v4996_v21, %v7795_v40  ;;  %v5059_v1 = vsel %vm3303_vm13, %v5027_v18, %v7786_v27  ;;  %v4931_v20 = vsel %vm3270_vm12, %v4899_v35, %v7796_v42 }
 0x47e   : > { %v7799_v24 = vpop.permute.xlu0 %7798  ;;  %v5095_v9 = vpack.c.bf16 %v4962_v52, %v4961_v56 }
 0x47f   : > { %v7800_v47 = vunpack.i.l.bf16 %v7799_v24  ;;  %v7801_v48 = vunpack.i.h.bf16 %v7799_v24 }
 0x480   : > { %5401 = vmatmul.mubr.bf16.gmra.mxu0 %v5095_v9 }
 0x481   : > { %v5060_v46 = vsel %vm3303_vm13, %v5028_v11, %v7800_v47  ;;  %v4963_v6 = vsel %vm3303_vm13, %v4931_v20, %v7801_v48 }
 0x482   : > { %v7804_v13 = vpop.permute.xlu1 %7803  ;;  %v5099_v32 = vpack.c.bf16 %v5060_v46, %v5059_v1  ;;  %v13290_v1 = vld [vmem:[#allocation76_spill] sm:$0xff] }
 0x483   : > { %v7805_v15 = vunpack.i.l.bf16 %v7804_v13  ;;  %v7806_v61 = vunpack.i.h.bf16 %v7804_v13  ;;  %v13291_v13 = vld [vmem:[#allocation13_spill] sm:$0xff] }
 0x484   : > { %5408 = vmatprep.mubr.bf16.mxu0 %v5099_v32 }
 0x485   : > { %v4900_v63 = vsel %vm2052_vm10, %v13289_v25, %v7805_v15  ;;  %v4997_v12 = vsel %vm2052_vm10, %v11477_v55, %v7806_v61 }
 0x486   : > { %v7809_v53 = vpop.permute.xlu1 %7808  ;;  %v7819_v30 = vpop.permute.xlu0 %7818 }
 0x487   : > { %v7810_v57 = vunpack.i.l.bf16 %v7809_v53  ;;  %v7820_v16 = vunpack.i.l.bf16 %v7819_v30  ;;  %v7811_v28 = vunpack.i.h.bf16 %v7809_v53  ;;  %v7821_v3 = vunpack.i.h.bf16 %v7819_v30 }
 0x489   : > { %v4932_v19 = vsel %vm3270_vm12, %v4900_v63, %v7810_v57  ;;  %v4998_v58 = vsel %vm2052_vm10, %v11493_v39, %v7820_v16  ;;  %v5029_v40 = vsel %vm3270_vm12, %v4997_v12, %v7811_v28  ;;  %v4901_v46 = vsel %vm2052_vm10, %v13290_v1, %v7821_v3 }
 0x48a   : > { %v7814_v17 = vpop.permute.xlu1 %7813  ;;  %v7824_v7 = vpop.permute.xlu0 %7823 }
 0x48b   : > { %v7815_v4 = vunpack.i.l.bf16 %v7814_v17  ;;  %v7825_v49 = vunpack.i.l.bf16 %v7824_v7  ;;  %v7816_v34 = vunpack.i.h.bf16 %v7814_v17  ;;  %v7826_v47 = vunpack.i.h.bf16 %v7824_v7 }
 0x48d   : > { %v4964_v44 = vsel %vm3303_vm13, %v4932_v19, %v7815_v4  ;;  %v5030_v27 = vsel %vm3270_vm12, %v4998_v58, %v7825_v49  ;;  %v5061_v56 = vsel %vm3303_vm13, %v5029_v40, %v7816_v34  ;;  %v4933_v53 = vsel %vm3270_vm12, %v4901_v46, %v7826_v47 }
 0x48e   : > { %v7834_v51 = vpop.permute.xlu1 %7833  ;;  %v7829_v36 = vpop.permute.xlu0 %7828  ;;  %v5098_v5 = vpack.c.bf16 %v4964_v44, %v4963_v6 }
 0x48f   : > { %v7830_v31 = vunpack.i.l.bf16 %v7829_v36  ;;  %v7835_v21 = vunpack.i.l.bf16 %v7834_v51  ;;  %v7831_v11 = vunpack.i.h.bf16 %v7829_v36  ;;  %v7836_v30 = vunpack.i.h.bf16 %v7834_v51 }
 0x490   : > { %5409 = vmatmul.mubr.bf16.gmra.mxu0 %v5098_v5 }
 0x491   : > { %v5062_v52 = vsel %vm3303_vm13, %v5030_v27, %v7830_v31  ;;  %v4902_v32 = vsel %vm2052_vm10, %v13291_v13, %v7835_v21  ;;  %v4965_v48 = vsel %vm3303_vm13, %v4933_v53, %v7831_v11  ;;  %v4999_v63 = vsel %vm2052_vm10, %v11530_v41, %v7836_v30 }
 0x492   : > { %v7839_v24 = vpop.permute.xlu1 %7838  ;;  %v5102_v9 = vpack.c.bf16 %v5062_v52, %v5061_v56 }
 0x493   : > { %v7840_v18 = vunpack.i.l.bf16 %v7839_v24  ;;  %v7849_v55 = vpop.permute.xlu0 %7848  ;;  %v7841_v35 = vunpack.i.h.bf16 %v7839_v24 }
 0x494   : > { %5416 = vmatprep.mubr.bf16.mxu0 %v5102_v9  ;;  %v7850_v57 = vunpack.i.l.bf16 %v7849_v55  ;;  %v7851_v44 = vunpack.i.h.bf16 %v7849_v55  ;;  %v13293_v9 = vld [vmem:[#allocation17_spill] sm:$0xff] }
 0x495   : > { %v4934_v15 = vsel %vm3270_vm12, %v4902_v32, %v7840_v18  ;;  %v5031_v20 = vsel %vm3270_vm12, %v4999_v63, %v7841_v35 }
 0x496   : > { %v7844_v39 = vpop.permute.xlu1 %7843  ;;  %v5000_v16 = vsel %vm2052_vm10, %v11545_v62, %v7850_v57  ;;  %v13292_v62 = vld [vmem:[#allocation77_spill] sm:$0xff] }
 0x497   : > { %v7845_v54 = vunpack.i.l.bf16 %v7844_v39  ;;  %v7854_v42 = vpop.permute.xlu0 %7853  ;;  %v7846_v61 = vunpack.i.h.bf16 %v7844_v39  ;;  %v4903_v31 = vsel %vm2052_vm10, %v13292_v62, %v7851_v44  ;;  %v13294_v39 = vld [vmem:[#allocation79_spill] sm:$0xff] }
 0x498   : > { %v7855_v17 = vunpack.i.l.bf16 %v7854_v42  ;;  %v7856_v51 = vunpack.i.h.bf16 %v7854_v42 }
 0x499   : > { %v4966_v8 = vsel %vm3303_vm13, %v4934_v15, %v7845_v54  ;;  %v5063_v19 = vsel %vm3303_vm13, %v5031_v20, %v7846_v61 }
 0x49a   : > { %v5101_v7 = vpack.c.bf16 %v4966_v8, %v4965_v48  ;;  %v5032_v28 = vsel %vm3270_vm12, %v5000_v16, %v7855_v17  ;;  %v4935_v27 = vsel %vm3270_vm12, %v4903_v31, %v7856_v51 }
 0x49b   : > { %v7859_v25 = vpop.permute.xlu0 %7858 }
 0x49c   : > { %5417 = vmatmul.mubr.bf16.gmra.mxu0 %v5101_v7  ;;  %v7860_v4 = vunpack.i.l.bf16 %v7859_v25  ;;  %v7861_v40 = vunpack.i.h.bf16 %v7859_v25  ;;  %v6117_v25 = vpop.f32.mrf.mxu1 }
 0x49e   : > { %v5064_v49 = vsel %vm3303_vm13, %v5032_v28, %v7860_v4  ;;  %v4967_v54 = vsel %vm3303_vm13, %v4935_v27, %v7861_v40  ;;  %v6118_v63 = vpop.f32.mrf.mxu1  ;;  %v8089_v40 = vld [vmem:[%s12593_s5] ss:$0 sm:$0xff] }
 0x49f   : > { %v5105_v34 = vpack.c.bf16 %v5064_v49, %v5063_v19  ;;  %v7864_v6 = vpop.permute.xlu1 %7863 }
 0x4a0   : > { %v7865_v41 = vunpack.i.l.bf16 %v7864_v6  ;;  %v7866_v56 = vunpack.i.h.bf16 %v7864_v6  ;;  %v6120_v16 = vpop.f32.mrf.mxu1 }
 0x4a1   : > { %5424 = vmatprep.mubr.bf16.mxu0 %v5105_v34 }
 0x4a2   : > { %v4904_v3 = vsel %vm2052_vm10, %v13293_v9, %v7865_v41  ;;  %v5001_v30 = vsel %vm2052_vm10, %v11585_v43, %v7866_v56  ;;  %v6121_v4 = vpop.f32.mrf.mxu1 }
 0x4a3   : > { %v7869_v36 = vpop.permute.xlu1 %7868  ;;  %v7879_v5 = vpop.permute.xlu0 %7878 }
 0x4a4   : > { %v7870_v12 = vunpack.i.l.bf16 %v7869_v36  ;;  %v7881_v58 = vunpack.i.h.bf16 %v7879_v5  ;;  %v7880_v21 = vunpack.i.l.bf16 %v7879_v5  ;;  %v7871_v55 = vunpack.i.h.bf16 %v7869_v36  ;;  %v6123_v20 = vpop.f32.mrf.mxu1 }
 0x4a6   : > { %v4936_v11 = vsel %vm3270_vm12, %v4904_v3, %v7870_v12  ;;  %v4905_v1 = vsel %vm2052_vm10, %v13294_v39, %v7881_v58  ;;  %v5002_v57 = vsel %vm2052_vm10, %v11604_v10, %v7880_v21  ;;  %v5033_v8 = vsel %vm3270_vm12, %v5001_v30, %v7871_v55  ;;  %v6124_v28 = vpop.f32.mrf.mxu1 }
 0x4a7   : > { %v7874_v52 = vpop.permute.xlu1 %7873  ;;  %v7884_v24 = vpop.permute.xlu0 %7883  ;;  %v6125_v41 = vadd.f32 %v6124_v28, %v6123_v20  ;;  %v6119_v58 = vadd.f32 %v6118_v63, %v6117_v25 }
 0x4a8   : > { %v7875_v47 = vunpack.i.l.bf16 %v7874_v52  ;;  %v7886_v18 = vunpack.i.h.bf16 %v7884_v24  ;;  %v7885_v46 = vunpack.i.l.bf16 %v7884_v24  ;;  %v7876_v13 = vunpack.i.h.bf16 %v7874_v52  ;;  %v6126_v19 = vpop.f32.mrf.mxu1 }
 0x4a9   : > { %v3818_v27 = vadd.f32 %v8089_v40, %v6125_v41  ;;  %v6122_v52 = vadd.f32 %v6121_v4, %v6120_v16  ;;  %v3810_v9 = vadd.f32 %v8089_v40, %v6119_v58 }
 0x4aa   : > { %v11958_v32 = vsel %vm3270_vm12, %v4905_v1, %v7886_v18  ;;  %v4968_v53 = vsel %vm3303_vm13, %v4936_v11, %v7875_v47  ;;  %v5034_v35 = vsel %vm3270_vm12, %v5002_v57, %v7885_v46  ;;  %v5065_v17 = vsel %vm3303_vm13, %v5033_v8, %v7876_v13  ;;  %v6127_v49 = vpop.f32.mrf.mxu1 }
 0x4ab   : > { %v11962_v15 = vpop.permute.xlu0 %7888  ;;  %v5104_v42 = vpack.c.bf16 %v4968_v53, %v4967_v54  ;;  %v6128_v31 = vadd.f32 %v6127_v49, %v6126_v19 }
 0x4ac   : > { %v7890_v48 = vunpack.i.l.bf16 %v11962_v15  ;;  %v6129_v34 = vpop.f32.mrf.mxu1 }
 0x4ad   : > { %5425 = vmatmul.mubr.bf16.gmra.mxu0 %v5104_v42  ;;  %v3821_v55 = vadd.f32 %v8089_v40, %v6128_v31  ;;  %v3813_v42 = vadd.f32 %v8089_v40, %v6122_v52  ;;  %v13295_v31 = vld [vmem:[#allocation93_spill] sm:$0xff] }
 0x4ae   : > { %v5066_v7 = vsel %vm3303_vm13, %v5034_v35, %v7890_v48  ;;  %v6130_v6 = vpop.f32.mrf.mxu1 }
 0x4af   : > { %v5108_v61 = vpack.c.bf16 %v5066_v7, %v5065_v17  ;;  %v6131_v11 = vadd.f32 %v6130_v6, %v6129_v34 }
 0x4b0   : > { %v6132_v44 = vpop.f32.mrf.mxu1 }
 0x4b1   : > { %5432 = vmatprep.mubr.bf16.mxu0 %v5108_v61  ;;  %v3826_v16 = vadd.f32 %v8089_v40, %v6131_v11 }
 0x4b2   : > { %v6133_v51 = vpop.f32.mrf.mxu1 }
 0x4b3   : > { %v6134_v13 = vadd.f32 %v6133_v51, %v6132_v44 }
 0x4b5   : > { %v3829_v19 = vadd.f32 %v8089_v40, %v6134_v13 }
 0x4df   : > { %v6135_v36 = vpop.f32.mrf.mxu1 }
 0x4e1   : > { %v6136_v5 = vpop.f32.mrf.mxu1 }
 0x4e2   : > { %v6137_v39 = vadd.f32 %v6136_v5, %v6135_v36 }
 0x4e3   : > { %v6138_v12 = vpop.f32.mrf.mxu1 }
 0x4e4   : > { %v3834_v25 = vadd.f32 %v8089_v40, %v6137_v39 }
 0x4e5   : > { %v6139_v62 = vpop.f32.mrf.mxu1 }
 0x4e6   : > { %v6140_v30 = vadd.f32 %v6139_v62, %v6138_v12 }
 0x4e7   : > { %v6360_v56 = vpop.f32.mrf.mxu1 }
 0x4e8   : > { %v3979_v24 = vadd.f32 %v6360_v56, %v3818_v27  ;;  %v3837_v12 = vadd.f32 %v8089_v40, %v6140_v30  ;;  %v13296_v56 = vld [vmem:[#allocation50_spill] sm:$0xff] }
 0x4e9   : > { %v3970_v3 = vpop.f32.mrf.mxu1  ;;  %v6175_v21 = vpop.f32.mrf.mxu0 }
 0x4ea   : > { %v11976_v47 = vmax.f32 %v3979_v24, 0.0  ;;  %v3971_v18 = vadd.f32 %v3970_v3, %v3810_v9 }
 0x4eb   : > { %v6361_v1 = vpop.f32.mrf.mxu1  ;;  %v6176_v46 = vpop.f32.mrf.mxu0 }
 0x4ec   : > { %v11978_v54 = vmax.f32 %v3971_v18, 0.0  ;;  %v3982_v53 = vadd.f32 %v6361_v1, %v3821_v55  ;;  %v11980_v57 = vadd.f32 %v6176_v46, %v6175_v21  ;;  %v7902_v8 = vpack.i.bf16 %v11976_v47, %v11764_v45  ;;  %v13297_v55 = vld [vmem:[#allocation96_spill] sm:$0xff] }
 0x4ed   : > { %v3973_v48 = vpop.f32.mrf.mxu1  ;;  %v4157_v4 = vrot.slane %v11976_v47, 1  ;;  %v4059_v52 = vrot.slane %v11976_v47, 7 }
 0x4ee   : > { %v4057_v35 = vrot.slane %v11978_v54, 7  ;;  %v4155_v17 = vrot.slane %v11978_v54, 1  ;;  %v11986_v7 = vmax.f32 %v3982_v53, 0.0  ;;  %v3974_v61 = vadd.f32 %v3973_v48, %v3813_v42  ;;  %7903 = vrot.lane.b32.xlu1 %v7902_v8, %s8162_s11  ;;  %v13298_v48 = vld [vmem:[#allocation95_spill] sm:$0xff] }
 0x4ef   : > { %v6364_v63 = vpop.f32.mrf.mxu1  ;;  %v7907_v6 = vpack.i.bf16 %v11978_v54, %v11706_v26 }
 0x4f0   : > { %v4158_v20 = vrot.slane %v11986_v7, 1  ;;  %v11991_v28 = vmax.f32 %v3974_v61, 0.0  ;;  %v3995_v49 = vadd.f32 %v6364_v63, %v3834_v25  ;;  %v4171_v44 = vsel %vm742_vm0, %v4154_v50, %v4155_v17  ;;  %v13299_v63 = vld [vmem:[#allocation94_spill] sm:$0xff] }
 0x4f1   : > { %v3986_v34 = vpop.f32.mrf.mxu1  ;;  %v4073_v51 = vsel %vm460_vm1, %v4056_v22, %v4057_v35  ;;  %v4060_v36 = vrot.slane %v11986_v7, 7  ;;  %v12009_v27 = vmul.f32 %v4171_v44, %v13295_v31 }
 0x4f2   : > { %v4156_v5 = vrot.slane %v11991_v28, 1  ;;  %v3987_v41 = vadd.f32 %v3986_v34, %v3826_v16  ;;  %7908 = vrot.lane.b32.xlu1 %v7907_v6, %s8162_s11  ;;  %v7912_v62 = vpack.i.bf16 %v11745_v60, %v11991_v28  ;;  %v4168_v50 = vsel %vm742_vm0, %v4157_v4, %v4158_v20 }
 0x4f3   : > { %v6365_v58 = vpop.f32.mrf.mxu1  ;;  %v12014_v22 = vmul.f32 %v4073_v51, %v13296_v56  ;;  %v4058_v24 = vrot.slane %v11991_v28, 7  ;;  %v12020_v3 = vmax.f32 %v3995_v49, 0.0  ;;  %v5109_v18 = vpack.c.bf16 %v12009_v27, %v11790_v59 }
 0x4f4   : > { %v12018_v40 = vmax.f32 %v3987_v41, 0.0  ;;  %v3998_v9 = vadd.f32 %v6365_v58, %v3837_v12  ;;  %7913 = vrot.lane.b32.xlu0 %v7912_v62, %s8162_s11  ;;  %v12026_v11 = vmul.f32 %v4168_v50, %v13297_v55  ;;  %v4169_v39 = vsel %vm742_vm0, %v4156_v5, %v4157_v4  ;;  %v13300_v4 = vld [vmem:[#allocation54_spill] sm:$0xff]  ;;  %v13301_v41 = vld [vmem:[#allocation97_spill] sm:$0xff] }
 0x4f5   : > { %v3989_v21 = vpop.f32.mrf.mxu1  ;;  %v7917_v53 = vpack.i.bf16 %v12014_v22, %v11767_v2  ;;  %6390 = vmatprep.mubr.msk.bf16.mxu1 %vm2052_vm10, %v5109_v18  ;;  %v4170_v30 = vsel %vm742_vm0, %v4155_v17, %v4156_v5  ;;  %v12041_v8 = vmul.f32 %v4169_v39, %v13298_v48  ;;  %v4070_v61 = vsel %vm460_vm1, %v4059_v52, %v4060_v36  ;;  %v13302_v58 = vld [vmem:[#allocation49_spill] sm:$0xff]  ;;  %v13304_v55 = vld [vmem:[#allocation98_spill] sm:$0xff] }
 0x4f6   : > { %v4159_v1 = vrot.slane %v12018_v40, 1  ;;  %v12031_v46 = vmax.f32 %v3998_v9, 0.0  ;;  %v3990_v13 = vadd.f32 %v3989_v21, %v3829_v19  ;;  %v7932_v42 = vpack.i.bf16 %v12026_v11, %v11723_v33 }
 0x4f7   : > { %v4221_v2 = vmul.f32 %v4170_v30, %v13299_v63  ;;  %v12054_v17 = vmul.f32 %v4070_v61, %v13300_v4  ;;  %v4161_v19 = vrot.slane %v12020_v3, 1  ;;  %v7922_v44 = vpack.i.bf16 %v11585_v43, %v12009_v27  ;;  %v13307_v61 = vld [vmem:[#allocation55_spill] sm:$0xff] }
 0x4f8   : > { %v12047_v25 = vmax.f32 %v3990_v13, 0.0  ;;  %v4162_v16 = vrot.slane %v12031_v46, 1  ;;  %7933 = vrot.lane.b32.xlu1 %v7932_v42, %s8164_s25  ;;  %7918 = vrot.lane.b32.xlu0 %v7917_v53, %s8163_s20  ;;  %v4167_v51 = vsel %vm742_vm0, %v4158_v20, %v4159_v1  ;;  %v4072_v5 = vsel %vm460_vm1, %v4057_v35, %v4058_v24  ;;  %v13303_v20 = vld [vmem:[#allocation99_spill] sm:$0xff]  ;;  %v13306_v53 = vld [vmem:[#allocation101_spill] sm:$0xff] }
 0x4f9   : > { %v5112_v34 = vpack.c.bf16 %v12041_v8, %v4221_v2  ;;  %v7937_v6 = vpack.i.bf16 %v12020_v3, %v12054_v17  ;;  %v12069_v12 = vmul.f32 %v4167_v51, %v13301_v41  ;;  %v12072_v62 = vmul.f32 %v4072_v5, %v13302_v58  ;;  %v13309_v5 = vld [vmem:[#allocation60_spill] sm:$0xff] }
 0x4fa   : > { %v4160_v49 = vrot.slane %v12047_v25, 1  ;;  %v4163_v50 = vsel %vm742_vm0, %v4162_v16, 0.0  ;;  %v4164_v56 = vsel %vm742_vm0, %v4161_v19, %v4162_v16  ;;  %v7927_v21 = vpack.i.bf16 %v12014_v22, %v11986_v7 }
 0x4fb   : > { %6391 = vmatmul.mubr.msk.bf16.gmra.mxu1 %vm2052_vm10, %v5112_v34  ;;  %v5115_v9 = vpack.c.bf16 %v12069_v12, %v12026_v11  ;;  %v7942_v18 = vpack.i.bf16 %v11790_v59, %v12072_v62  ;;  %v4228_v42 = vmul.f32 %v4163_v50, %v13306_v53  ;;  %v4071_v30 = vsel %vm460_vm1, %v4058_v24, %v4059_v52 }
 0x4fc   : > { %v4165_v31 = vsel %vm742_vm0, %v4160_v49, %v4161_v19  ;;  %7938 = vrot.lane.b32.xlu1 %v7937_v6, %s8162_s11  ;;  %7923 = vrot.lane.b32.xlu0 %v7922_v44, %s8164_s25  ;;  %v4166_v43 = vsel %vm742_vm0, %v4159_v1, %v4160_v49  ;;  %v13305_v1 = vld [vmem:[#allocation100_spill] sm:$0xff]  ;;  %v12105_v59 = vmul.f32 %v4071_v30, %v13307_v61  ;;  %v4062_v4 = vrot.slane %v12047_v25, 7  ;;  %v13308_v6 = vld [vmem:[#allocation59_spill] sm:$0xff] }
 0x4fd   : > { %v12081_v35 = vmul.f32 %v4165_v31, %v13303_v20  ;;  %v4225_v39 = vmul.f32 %v4166_v43, %v13304_v55  ;;  %v12095_v13 = vmul.f32 %v4164_v56, %v13305_v1  ;;  %6394 = vmatprep.mubr.msk.bf16.mxu1 %vm2052_vm10, %v5115_v9  ;;  %v7947_v16 = vpack.i.bf16 %v4221_v2, %v11604_v10  ;;  %v13310_v20 = vld [vmem:[#allocation65_spill] sm:$0xff] }
 0x4fe   : > { %v7957_v52 = vpack.i.bf16 %v12105_v59, %v12009_v27  ;;  %v4061_v24 = vrot.slane %v12018_v40, 7  ;;  %v7952_v19 = vpack.i.bf16 %v12018_v40, %v12072_v62  ;;  %v7967_v10 = vpack.i.bf16 %v11699_v0, %v12041_v8 }
 0x4ff   : > { %v5118_v48 = vpack.c.bf16 %v12081_v35, %v4225_v39  ;;  %v5121_v63 = vpack.c.bf16 %v4228_v42, %v12095_v13  ;;  %v7962_v34 = vpack.i.bf16 %v4221_v2, %v12054_v17  ;;  %v7972_v51 = vpack.i.bf16 %v12105_v59, %v12047_v25 }
 0x500   : > { %7943 = vrot.lane.b32.xlu1 %v7942_v18, %s8163_s20  ;;  %7928 = vrot.lane.b32.xlu0 %v7927_v21, %s8162_s11  ;;  %v4068_v49 = vsel %vm460_vm1, %v4061_v24, %v4062_v4  ;;  %v4069_v27 = vsel %vm460_vm1, %v4060_v36, %v4061_v24  ;;  %v4063_v36 = vrot.slane %v12020_v3, 7  ;;  %v4064_v31 = vrot.slane %v12031_v46, 7  ;;  %v13311_v21 = vld [vmem:[#allocation64_spill] sm:$0xff] }
 0x501   : > { %v12131_v44 = vmul.f32 %v4068_v49, %v13308_v6  ;;  %v12138_v41 = vmul.f32 %v4069_v27, %v13309_v5  ;;  %v7997_v43 = vpack.i.bf16 %v4225_v39, %v11991_v28  ;;  %v7982_v56 = vpack.i.bf16 %v11978_v54, %v12069_v12 }
 0x502   : > { %v4065_v53 = vsel %vm460_vm1, %v4064_v31, 0.0  ;;  %v8017_v30 = vpack.i.bf16 %v11976_v47, %v12081_v35  ;;  %v8032_v38 = vpack.i.bf16 %v12047_v25, %v12018_v40  ;;  %v7891_v24 = vunpack.i.h.bf16 %v11962_v15 }
 0x503   : > { %6395 = vmatmul.mubr.msk.bf16.gmra.mxu1 %vm2052_vm10, %v5118_v48  ;;  %v7992_v2 = vpack.i.bf16 %v12026_v11, %v12131_v44  ;;  %v7977_v58 = vpack.i.bf16 %v12138_v41, %v12041_v8  ;;  %v4066_v11 = vsel %vm460_vm1, %v4063_v36, %v4064_v31  ;;  %v7987_v9 = vpack.i.bf16 %v12138_v41, %v12031_v46  ;;  %v13312_v48 = vld [vmem:[#allocation68_spill] sm:$0xff] }
 0x504   : > { %6398 = vmatprep.mubr.msk.bf16.mxu1 %vm2052_vm10, %v5121_v63  ;;  %7948 = vrot.lane.b32.xlu1 %v7947_v16, %s8164_s25  ;;  %v4129_v18 = vmul.f32 %v4066_v11, %v13311_v21  ;;  %v4130_v61 = vmul.f32 %v4065_v53, %v13312_v48  ;;  %v7894_v63 = vpop.permute.xlu1 %7893 }
 0x505   : > { %7958 = vrot.lane.b32.xlu0 %v7957_v52, %s8163_s20 }
 0x506   : > { %v8012_v55 = vpack.i.bf16 %v4225_v39, %v4129_v18  ;;  %v8022_v39 = vpack.i.bf16 %v4130_v61, %v12081_v35 }
 0x508   : > { %7953 = vrot.lane.b32.xlu1 %v7952_v19, %s8162_s11  ;;  %v7899_v16 = vpop.permute.xlu1 %7898  ;;  %v7895_v19 = vunpack.i.l.bf16 %v7894_v63 }
 0x509   : > { %7968 = vrot.lane.b32.xlu0 %v7967_v10, %s8164_s25  ;;  %v7900_v49 = vunpack.i.l.bf16 %v7899_v16 }
 0x50b   : > { %6399 = vmatmul.mubr.msk.bf16.gmra.mxu1 %vm2052_vm10, %v13252_v37  ;;  %v4067_v37 = vsel %vm460_vm1, %v4062_v4, %v4063_v36 }
 0x50c   : > { %7963 = vrot.lane.b32.xlu1 %v7962_v34, %s8163_s20  ;;  %v4128_v50 = vmul.f32 %v4067_v37, %v13310_v20  ;;  %v7901_v20 = vunpack.i.h.bf16 %v7899_v16  ;;  %6406 = vmatprep.mubr.msk.bf16.mxu1 %vm8165_vm14, %v13144_v23 }
 0x50d   : > { %7973 = vrot.lane.b32.xlu0 %v7972_v51, %s8162_s11 }
 0x50e   : > { %v8002_v8 = vpack.i.bf16 %v4128_v50, %v12131_v44  ;;  %v8007_v1 = vpack.i.bf16 %v4128_v50, %v12069_v12  ;;  %v8027_v12 = vpack.i.bf16 %v4228_v42, %v12095_v13  ;;  %v4969_v42 = vsel %vm3303_vm13, %v11958_v32, %v7891_v24 }
 0x510   : > { %7993 = vrot.lane.b32.xlu1 %v7992_v2, %s8163_s20 }
 0x511   : > { %7978 = vrot.lane.b32.xlu0 %v7977_v58, %s8163_s20  ;;  %v7896_v58 = vunpack.i.h.bf16 %v7894_v63 }
 0x514   : > { %7998 = vrot.lane.b32.xlu1 %v7997_v43, %s8164_s25 }
 0x515   : > { %7983 = vrot.lane.b32.xlu0 %v7982_v56, %s8164_s25 }
 0x518   : > { %8003 = vrot.lane.b32.xlu1 %v8002_v8, %s8162_s11 }
 0x519   : > { %7988 = vrot.lane.b32.xlu0 %v7987_v9, %s8162_s11 }
 0x51c   : > { %8013 = vrot.lane.b32.xlu1 %v8012_v55, %s8163_s20 }
 0x51d   : > { %8008 = vrot.lane.b32.xlu0 %v8007_v1, %s8163_s20 }
 0x520   : > { %4535 = vrot.lane.b32.xlu1 %v11986_v7, %s8164_s25 }
 0x521   : > { %8018 = vrot.lane.b32.xlu0 %v8017_v30, %s8164_s25 }
 0x524   : > { %8023 = vrot.lane.b32.xlu1 %v8022_v39, %s8163_s20 }
 0x525   : > { %4323 = vrot.lane.b32.xlu0 %v4129_v18, %s8162_s11  ;;  %s5852_s11 = sshll.u32 %s351_s18, 4  ;;  %s12549_s11 = int_to_ptr.vmem [resolvable:$true] %s5852_s11 }
 0x526   : > { %s8090_s21 = scalar_lea.vmem %s12549_s11, 16  ;;  %p8097_p0 = scmp.lt.s32.totalorder %s12549_s11, %s8095_s27 }
 0x527   : > { %p8091_p11 = scmp.ne.s32.totalorder %s12549_s11, %s8090_s21  ;;  %p8098_p1 = scmp.lt.s32.totalorder %s8096_s30, %s8090_s21 }
 0x528   : > { %8033 = vrot.lane.b32.xlu1 %v8032_v38, %s8164_s25 }
 0x529   : > { %8028 = vrot.lane.b32.xlu0 %v8027_v12, %s8164_s25  ;;  %p8092_p12 = pnand %p8091_p11, %p8260_p5  ;;  %p8099_p2 = por %p8098_p1, %p8097_p0 }
 0x52b   : > { %p8093_p13 = pneg %p8092_p12 }
 0x52d   : > { %p8100_p3 = pnand %p8099_p2, %p8093_p13 }
 0x560   : > { %v7904_v4 = vpop.permute.xlu1 %7903 }
 0x561   : > { %v7905_v18 = vunpack.i.l.bf16 %v7904_v4  ;;  %v7906_v61 = vunpack.i.h.bf16 %v7904_v4 }
 0x564   : > { %v7909_v52 = vpop.permute.xlu1 %7908 }
 0x565   : > { %v7910_v35 = vunpack.i.l.bf16 %v7909_v52  ;;  %v7911_v27 = vunpack.i.h.bf16 %v7909_v52 }
 0x566   : > { %v7914_v10 = vpop.permute.xlu0 %7913 }
 0x567   : > { %v4906_v34 = vsel %vm2052_vm10, %v11600_v14, %v7910_v35  ;;  %v5003_v15 = vsel %vm2052_vm10, %v11699_v0, %v7911_v27  ;;  %v7915_v2 = vunpack.i.l.bf16 %v7914_v10  ;;  %v7916_v55 = vunpack.i.h.bf16 %v7914_v10 }
 0x568   : > { %v4938_v13 = vsel %vm3270_vm12, %v4906_v34, %v7895_v19  ;;  %v5035_v43 = vsel %vm3270_vm12, %v5003_v15, %v7896_v58 }
 0x569   : > { %v4970_v6 = vsel %vm3303_vm13, %v4938_v13, %v7900_v49  ;;  %v5004_v32 = vsel %vm2052_vm10, %v11723_v33, %v7915_v2  ;;  %v5067_v11 = vsel %vm3303_vm13, %v5035_v43, %v7901_v20  ;;  %v4908_v33 = vsel %vm2052_vm10, %v11706_v26, %v7905_v18 }
 0x56a   : > { %v12192_v51 = vpop.permute.xlu1 %7933  ;;  %v7919_v5 = vpop.permute.xlu0 %7918  ;;  %v5107_v36 = vpack.c.bf16 %v4970_v6, %v4969_v42  ;;  %v4907_v12 = vsel %vm2052_vm10, %v11630_v29, %v7916_v55  ;;  %v5005_v26 = vsel %vm2052_vm10, %v11978_v54, %v7906_v61 }
 0x56b   : > { %v7920_v37 = vunpack.i.l.bf16 %v7919_v5  ;;  %v7921_v53 = vunpack.i.h.bf16 %v7919_v5 }
 0x56c   : > { %5433 = vmatmul.mubr.bf16.gmra.mxu0 %v5107_v36 }
 0x56d   : > { %v5036_v56 = vsel %vm3270_vm12, %v5004_v32, %v7920_v37  ;;  %v4939_v52 = vsel %vm3270_vm12, %v4907_v12, %v7921_v53  ;;  %v7935_v32 = vunpack.i.l.bf16 %v12192_v51 }
 0x56e   : > { %v12196_v31 = vpop.permute.xlu1 %7938  ;;  %v7924_v14 = vpop.permute.xlu0 %7923 }
 0x56f   : > { %v7925_v50 = vunpack.i.l.bf16 %v7924_v14  ;;  %v7926_v30 = vunpack.i.h.bf16 %v7924_v14  ;;  %v7940_v18 = vunpack.i.l.bf16 %v12196_v31 }
 0x571   : > { %v5068_v0 = vsel %vm3303_vm13, %v5036_v56, %v7925_v50  ;;  %v4971_v4 = vsel %vm3303_vm13, %v4939_v52, %v7926_v30  ;;  %v4912_v12 = vsel %vm2052_vm10, %v12072_v62, %v7940_v18 }
 0x572   : > { %v7944_v8 = vpop.permute.xlu1 %7943  ;;  %v7929_v9 = vpop.permute.xlu0 %7928  ;;  %v5111_v21 = vpack.c.bf16 %v5068_v0, %v5067_v11 }
 0x573   : > { %v7945_v1 = vunpack.i.l.bf16 %v7944_v8  ;;  %v7930_v16 = vunpack.i.l.bf16 %v7929_v9  ;;  %v7946_v24 = vunpack.i.h.bf16 %v7944_v8  ;;  %v7931_v13 = vunpack.i.h.bf16 %v7929_v9 }
 0x574   : > { %5440 = vmatprep.mubr.bf16.mxu0 %v5111_v21 }
 0x575   : > { %v4940_v63 = vsel %vm3270_vm12, %v4908_v33, %v7945_v1  ;;  %v5006_v29 = vsel %vm2052_vm10, %v11991_v28, %v7930_v16  ;;  %v5037_v5 = vsel %vm3270_vm12, %v5005_v26, %v7946_v24  ;;  %v4909_v28 = vsel %vm2052_vm10, %v11745_v60, %v7931_v13 }
 0x576   : > { %v7949_v48 = vpop.permute.xlu1 %7948  ;;  %v7936_v33 = vunpack.i.h.bf16 %v12192_v51 }
 0x577   : > { %v7950_v39 = vunpack.i.l.bf16 %v7949_v48  ;;  %v7959_v38 = vpop.permute.xlu0 %7958  ;;  %v7951_v10 = vunpack.i.h.bf16 %v7949_v48 }
 0x578   : > { %v7960_v35 = vunpack.i.l.bf16 %v7959_v38  ;;  %v7961_v36 = vunpack.i.h.bf16 %v7959_v38 }
 0x579   : > { %v4972_v19 = vsel %vm3303_vm13, %v4940_v63, %v7950_v39  ;;  %v5069_v37 = vsel %vm3303_vm13, %v5037_v5, %v7951_v10 }
 0x57a   : > { %v7954_v49 = vpop.permute.xlu1 %7953  ;;  %v5110_v34 = vpack.c.bf16 %v4972_v19, %v4971_v4  ;;  %v5038_v15 = vsel %vm3270_vm12, %v5006_v29, %v7960_v35  ;;  %v4941_v56 = vsel %vm3270_vm12, %v4909_v28, %v7961_v36 }
 0x57b   : > { %v7969_v27 = vpop.permute.xlu0 %7968  ;;  %v7955_v42 = vunpack.i.l.bf16 %v7954_v49  ;;  %v7956_v0 = vunpack.i.h.bf16 %v7954_v49 }
 0x57c   : > { %v7970_v6 = vunpack.i.l.bf16 %v7969_v27  ;;  %5441 = vmatmul.mubr.bf16.gmra.mxu0 %v5110_v34  ;;  %v7971_v2 = vunpack.i.h.bf16 %v7969_v27 }
 0x57d   : > { %v4910_v50 = vsel %vm2052_vm10, %v11764_v45, %v7955_v42  ;;  %v5007_v39 = vsel %vm2052_vm10, %v11976_v47, %v7956_v0 }
 0x57e   : > { %v7964_v58 = vpop.permute.xlu1 %7963  ;;  %v5070_v54 = vsel %vm3303_vm13, %v5038_v15, %v7970_v6  ;;  %v4973_v9 = vsel %vm3303_vm13, %v4941_v56, %v7971_v2  ;;  %v7941_v6 = vunpack.i.h.bf16 %v12196_v31 }
 0x57f   : > { %v7965_v14 = vunpack.i.l.bf16 %v7964_v58  ;;  %v7974_v43 = vpop.permute.xlu0 %7973  ;;  %v5114_v20 = vpack.c.bf16 %v5070_v54, %v5069_v37  ;;  %v7966_v55 = vunpack.i.h.bf16 %v7964_v58 }
 0x580   : > { %v7976_v1 = vunpack.i.h.bf16 %v7974_v43  ;;  %v7975_v30 = vunpack.i.l.bf16 %v7974_v43 }
 0x581   : > { %v4942_v11 = vsel %vm3270_vm12, %v4910_v50, %v7965_v14  ;;  %5448 = vmatprep.mubr.bf16.mxu0 %v5114_v20  ;;  %v5039_v63 = vsel %vm3270_vm12, %v5007_v39, %v7966_v55 }
 0x582   : > { %v7994_v8 = vpop.permute.xlu1 %7993  ;;  %v4974_v21 = vsel %vm3303_vm13, %v4942_v11, %v7935_v32  ;;  %v4911_v16 = vsel %vm2052_vm10, %v12014_v22, %v7976_v1  ;;  %v5008_v35 = vsel %vm2052_vm10, %v11986_v7, %v7975_v30  ;;  %v5071_v26 = vsel %vm3303_vm13, %v5039_v63, %v7936_v33  ;;  %v13313_v33 = vld [vmem:[#allocation27_spill] sm:$0xff] }
 0x583   : > { %v7979_v53 = vpop.permute.xlu0 %7978  ;;  %v5113_v60 = vpack.c.bf16 %v4974_v21, %v4973_v9  ;;  %v7995_v48 = vunpack.i.l.bf16 %v7994_v8  ;;  %v7996_v58 = vunpack.i.h.bf16 %v7994_v8  ;;  %v5009_v32 = vsel %vm2052_vm10, %v12018_v40, %v7941_v6 }
 0x584   : > { %v7981_v45 = vunpack.i.h.bf16 %v7979_v53  ;;  %v7980_v61 = vunpack.i.l.bf16 %v7979_v53  ;;  %v5011_v39 = vsel %vm2052_vm10, %v12020_v3, %v13313_v33  ;;  %v5012_v63 = vsel %vm2052_vm10, %v12031_v46, %v13313_v33 }
 0x585   : > { %5449 = vmatmul.mubr.bf16.gmra.mxu0 %v5113_v60  ;;  %v4944_v19 = vsel %vm3270_vm12, %v4912_v12, %v7995_v48  ;;  %v5041_v8 = vsel %vm3270_vm12, %v5009_v32, %v7996_v58  ;;  %v8076_v58 = vld [vmem:[%s12596_s8 + $0x8] sm:$0xff]  }
 0x586   : > { %v7999_v38 = vpop.permute.xlu1 %7998  ;;  %v4943_v47 = vsel %vm3270_vm12, %v4911_v16, %v7981_v45  ;;  %v5040_v49 = vsel %vm3270_vm12, %v5008_v35, %v7980_v61  ;;  %6403 = vmatpush3.bf16.msra.mxu1 %v8076_v58 }
 0x587   : > { %v8000_v52 = vunpack.i.l.bf16 %v7999_v38  ;;  %v7984_v24 = vpop.permute.xlu0 %7983  ;;  %v8001_v14 = vunpack.i.h.bf16 %v7999_v38  ;;  %6404 = vmatprep.subr.bf16.mxu1 %v13144_v23 }
 0x588   : > { %v7986_v51 = vunpack.i.h.bf16 %v7984_v24  ;;  %v7985_v10 = vunpack.i.l.bf16 %v7984_v24 }
 0x589   : > { %v4976_v62 = vsel %vm3303_vm13, %v4944_v19, %v8000_v52  ;;  %v5073_v55 = vsel %vm3303_vm13, %v5041_v8, %v8001_v14 }
 0x58a   : > { %v8004_v4 = vpop.permute.xlu1 %8003  ;;  %v5072_v22 = vsel %vm3303_vm13, %v5040_v49, %v7985_v10  ;;  %v4975_v27 = vsel %vm3303_vm13, %v4943_v47, %v7986_v51 }
 0x58b   : > { %v7989_v34 = vpop.permute.xlu0 %7988  ;;  %v5117_v13 = vpack.c.bf16 %v5072_v22, %v5071_v26  ;;  %v5116_v7 = vpack.c.bf16 %v4976_v62, %v4975_v27  ;;  %v8005_v29 = vunpack.i.l.bf16 %v8004_v4  ;;  %v8006_v1 = vunpack.i.h.bf16 %v8004_v4  ;;  %v6178_v27 = vpop.f32.mrf.mxu0 }
 0x58c   : > { %v7991_v15 = vunpack.i.h.bf16 %v7989_v34  ;;  %v7990_v2 = vunpack.i.l.bf16 %v7989_v34 }
 0x58d   : > { %5456 = vmatprep.mubr.bf16.mxu0 %v5117_v13  ;;  %v4914_v20 = vsel %vm2052_vm10, %v12054_v17, %v8005_v29  ;;  %v4915_v12 = vsel %vm2052_vm10, %v12138_v41, %v8006_v1  ;;  %v6179_v34 = vpop.f32.mrf.mxu0 }
 0x58e   : > { %v8014_v42 = vpop.permute.xlu1 %8013  ;;  %5457 = vmatmul.mubr.bf16.gmra.mxu0 %v5116_v7  ;;  %v4913_v31 = vsel %vm2052_vm10, %v12105_v59, %v7991_v15  ;;  %v5010_v56 = vsel %vm2052_vm10, %v12047_v25, %v7990_v2 }
 0x58f   : > { %v8015_v5 = vunpack.i.l.bf16 %v8014_v42  ;;  %v8009_v36 = vpop.permute.xlu0 %8008  ;;  %v8016_v48 = vunpack.i.h.bf16 %v8014_v42  ;;  %v6181_v13 = vpop.f32.mrf.mxu0 }
 0x590   : > { %v8011_v37 = vunpack.i.h.bf16 %v8009_v36  ;;  %v8010_v54 = vunpack.i.l.bf16 %v8009_v36 }
 0x591   : > { %v4946_v28 = vsel %vm3270_vm12, %v4914_v20, %v8015_v5  ;;  %v5043_v47 = vsel %vm3270_vm12, %v5011_v39, %v8016_v48  ;;  %v6182_v7 = vpop.f32.mrf.mxu0 }
 0x592   : > { %v4536_v43 = vpop.permute.xlu1 %4535  ;;  %v4945_v9 = vsel %vm3270_vm12, %v4913_v31, %v8011_v37  ;;  %v5042_v17 = vsel %vm3270_vm12, %v5010_v56, %v8010_v54  ;;  %v6372_v31 = vpop.f32.mrf.mxu1 }
 0x593   : > { %v8019_v50 = vpop.permute.xlu0 %8018  ;;  %v4978_v21 = vsel %vm3303_vm13, %v4946_v28, %v4536_v43  ;;  %v6184_v29 = vpop.f32.mrf.mxu0 }
 0x594   : > { %v8021_v11 = vunpack.i.h.bf16 %v8019_v50  ;;  %v8020_v0 = vunpack.i.l.bf16 %v8019_v50 }
 0x595   : > { %v6185_v42 = vpop.f32.mrf.mxu0 }
 0x596   : > { %v4977_v40 = vsel %vm3303_vm13, %v4945_v9, %v8021_v11  ;;  %v8024_v18 = vpop.permute.xlu1 %8023  ;;  %v5074_v59 = vsel %vm3303_vm13, %v5042_v17, %v8020_v0  ;;  %v5515_v11 = vpop.f32.mrf.mxu1  ;;  %v8077_v0 = vld [vmem:[%s12596_s8] sm:$0xff]  }
 0x597   : > { %v5119_v53 = vpack.c.bf16 %v4978_v21, %v4977_v40  ;;  %v4324_v25 = vpop.permute.xlu0 %4323  ;;  %v5120_v60 = vpack.c.bf16 %v5074_v59, %v5073_v55  ;;  %v8026_v30 = vunpack.i.h.bf16 %v8024_v18  ;;  %v8025_v45 = vunpack.i.l.bf16 %v8024_v18  ;;  %v6187_v6 = vpop.f32.mrf.mxu0  ;;  %6405 = vmatpush3.bf16.msra.mxu1 %v8077_v0  ;;  %v13316_v0 = vld [vmem:[#allocation53_spill] sm:$0xff] }
 0x598   : > { %v4916_v61 = vsel %vm2052_vm10, %v12131_v44, %v4324_v25  ;;  %v13314_v44 = vld [vmem:[#allocation80_spill] sm:$0xff]  ;;  %v6373_v9 = vpop.f32.mrf.mxu1 }
 0x599   : > { %5464 = vmatprep.mubr.bf16.mxu0 %v5120_v60  ;;  %v4947_v35 = vsel %vm3270_vm12, %v4915_v12, %v8026_v30  ;;  %v13315_v19 = vunpack.i.h.bf16 %v13314_v44  ;;  %v5044_v49 = vsel %vm3270_vm12, %v5012_v63, %v8025_v45  ;;  %v6188_v5 = vpop.f32.mrf.mxu0 }
 0x59a   : > { %v8034_v38 = vpop.permute.xlu1 %8033  ;;  %5465 = vmatmul.mubr.bf16.gmra.mxu0 %v5119_v53  ;;  %v5518_v21 = vpop.f32.mrf.mxu1 }
 0x59b   : > { %v8036_v16 = vunpack.i.h.bf16 %v8034_v38  ;;  %v8035_v52 = vunpack.i.l.bf16 %v8034_v38  ;;  %v8029_v24 = vpop.permute.xlu0 %8028  ;;  %v4948_v51 = vsel %vm3270_vm12, %v4916_v61, %v13315_v19  ;;  %v6190_v36 = vpop.f32.mrf.mxu0 }
 0x59c   : > { %v8031_v10 = vunpack.i.h.bf16 %v8029_v24  ;;  %v8030_v3 = vunpack.i.l.bf16 %v8029_v24  ;;  %v12315_v18 = vpop.f32.mrf.mxu1 }
 0x59d   : > { %v4979_v41 = vsel %vm3303_vm13, %v4947_v35, %v8035_v52  ;;  %v4980_v62 = vsel %vm3303_vm13, %v4948_v51, %v8036_v16  ;;  %v6191_v15 = vpop.f32.mrf.mxu0  ;;  %v6180_v51 = vadd.f32 %v6179_v34, %v6178_v27 }
 0x59e   : > { %v5075_v46 = vsel %vm3303_vm13, %v5043_v47, %v8030_v3  ;;  %v5076_v4 = vsel %vm3303_vm13, %v5044_v49, %v8031_v10  ;;  %v5122_v22 = vpack.c.bf16 %v4980_v62, %v4979_v41  ;;  %v5531_v59 = vpop.f32.mrf.mxu1  ;;  %v6183_v10 = vadd.f32 %v6182_v7, %v6181_v13  ;;  %v12361_v3 = vld [vmem:[%s12595_s7] ss:$0 sm:$0xff] }
 0x59f   : > { %v5123_v26 = vpack.c.bf16 %v5076_v4, %v5075_v46  ;;  %v12284_v2 = vpop.f32.mrf.mxu0  ;;  %v6186_v47 = vadd.f32 %v6185_v42, %v6184_v29  ;;  %v6189_v41 = vadd.f32 %v6188_v5, %v6187_v6  ;;  %v5358_v46 = vadd.f32 %v6180_v51, %v12361_v3 }
 0x5a0   : > { %v12321_v53 = vpop.f32.mrf.mxu1  ;;  %v5363_v4 = vadd.f32 %v6183_v10, %v12361_v3 }
 0x5a1   : > { %5472 = vmatprep.mubr.bf16.mxu0 %v5123_v26  ;;  %v6194_v37 = vpop.f32.mrf.mxu0  ;;  %v5355_v26 = vadd.f32 %v11980_v57, %v12361_v3  ;;  %v5519_v27 = vadd.f32 %v5518_v21, %v5358_v46  ;;  %v5366_v34 = vadd.f32 %v6186_v47, %v12361_v3  ;;  %v5371_v29 = vadd.f32 %v6189_v41, %v12361_v3  ;;  %v13318_v46 = vld [vmem:[#allocation11_spill] sm:$0xff] }
 0x5a2   : > { %5473 = vmatmul.mubr.bf16.gmra.mxu0 %v5122_v22  ;;  %v5534_v30 = vpop.f32.mrf.mxu1  ;;  %v6192_v22 = vadd.f32 %v6191_v15, %v6190_v36  ;;  %v6195_v6 = vadd.f32 %v6194_v37, %v12284_v2  ;;  %v5524_v5 = vadd.f32 %v6372_v31, %v5363_v4  ;;  %v13317_v15 = vld [vmem:[#allocation58_spill] sm:$0xff] }
 0x5a3   : > { %v12290_v54 = vpop.f32.mrf.mxu0  ;;  %v5516_v7 = vadd.f32 %v5515_v11, %v5355_v26  ;;  %v5643_v51 = vadd.f32 %v5519_v27, %v13316_v0  ;;  %v5527_v10 = vadd.f32 %v6373_v9, %v5366_v34  ;;  %v5532_v11 = vadd.f32 %v5531_v59, %v5371_v29  ;;  %v13319_v26 = vld [vmem:[#allocation63_spill] sm:$0xff] }
 0x5a4   : > { %v12330_v45 = vpop.f32.mrf.mxu1  ;;  %v5374_v58 = vadd.f32 %v6192_v22, %v12361_v3  ;;  %v5379_v41 = vadd.f32 %v6195_v6, %v12361_v3  ;;  %v5644_v2 = vadd.f32 %v5524_v5, %v13318_v46  ;;  %v13320_v27 = vld [vmem:[#allocation19_spill] sm:$0xff]  ;;  %v13321_v5 = vld [vmem:[#allocation16_spill] sm:$0xff] }
 0x5a5   : > { %v12292_v14 = vpop.f32.mrf.mxu0  ;;  %v5642_v21 = vadd.f32 %v5516_v7, %v13317_v15  ;;  %v5675_v4 = vmax.f32 %v5643_v51, 0.0  ;;  %v5646_v34 = vadd.f32 %v5532_v11, %v13320_v27  ;;  %v13322_v15 = vld [vmem:[#allocation67_spill] sm:$0xff] }
 0x5a6   : > { %v12334_v33 = vpop.f32.mrf.mxu1  ;;  %v6198_v57 = vadd.f32 %v12292_v14, %v12290_v54  ;;  %v5535_v9 = vadd.f32 %v5534_v30, %v5374_v58  ;;  %v5645_v54 = vadd.f32 %v5527_v10, %v13319_v26  ;;  %v5540_v29 = vadd.f32 %v12315_v18, %v5379_v41 }
 0x5a7   : > { %v12294_v43 = vpop.f32.mrf.mxu0  ;;  %v5674_v22 = vmax.f32 %v5642_v21, 0.0  ;;  %v5676_v6 = vmax.f32 %v5644_v2, 0.0 }
 0x5a8   : > { %v12338_v38 = vpop.f32.mrf.mxu1  ;;  %v5382_v14 = vadd.f32 %v6198_v57, %v12361_v3  ;;  %v5647_v58 = vadd.f32 %v5535_v9, %v13321_v5  ;;  %v5677_v0 = vmax.f32 %v5645_v54, 0.0  ;;  %v5678_v57 = vmax.f32 %v5646_v34, 0.0  ;;  %v13325_v5 = vld [vmem:[#allocation24_spill] sm:$0xff] }
 0x5a9   : > { %v12296_v20 = vpop.f32.mrf.mxu0  ;;  %v5706_v10 = vsel %vm2052_vm10, %v5674_v22, 0.0  ;;  %v5648_v21 = vadd.f32 %v5540_v29, %v13322_v15 }
 0x5aa   : > { %v12342_v63 = vpop.f32.mrf.mxu1  ;;  %v6201_v37 = vadd.f32 %v12296_v20, %v12294_v43  ;;  %v5543_v51 = vadd.f32 %v12321_v53, %v5382_v14  ;;  %v5679_v46 = vmax.f32 %v5647_v58, 0.0  ;;  %v5711_v9 = vsel %vm2052_vm10, %v5677_v0, 0.0 }
 0x5ab   : > { %v12298_v32 = vpop.f32.mrf.mxu0 }
 0x5ac   : > { %v12346_v23 = vpop.f32.mrf.mxu1  ;;  %v5387_v43 = vadd.f32 %v6201_v37, %v12361_v3 }
 0x5ad   : > { %v12300_v28 = vpop.f32.mrf.mxu0 }
 0x5ae   : > { %v12350_v24 = vpop.f32.mrf.mxu1  ;;  %v6204_v59 = vadd.f32 %v12300_v28, %v12298_v32  ;;  %v5707_v28 = vsel %vm2052_vm10, %v5675_v4, 0.0  ;;  %v5548_v11 = vadd.f32 %v12334_v33, %v5387_v43  ;;  %v13323_v4 = vld [vmem:[#allocation20_spill] sm:$0xff] }
 0x5af   : > { %v12302_v50 = vpop.f32.mrf.mxu0  ;;  %v5708_v53 = vadd.f32 %v5707_v28, %v5706_v10  ;;  %v5649_v26 = vadd.f32 %v5543_v51, %v13323_v4 }
 0x5b0   : > { %v12356_v19 = vpop.f32.mrf.mxu1  ;;  %v5390_v18 = vadd.f32 %v6204_v59, %v12361_v3  ;;  %v13324_v59 = vld [vmem:[#allocation66_spill] sm:$0xff] }
 0x5b1   : > { %v12304_v56 = vpop.f32.mrf.mxu0  ;;  %v5650_v22 = vadd.f32 %v5548_v11, %v13324_v59  ;;  %v13329_v59 = vld [vmem:[#allocation103_spill] sm:$0xff] }
 0x5b2   : > { %v12365_v62 = vpop.f32.mrf.mxu1  ;;  %v6207_v20 = vadd.f32 %v12304_v56, %v12302_v50  ;;  %v5709_v56 = vsel %vm2052_vm10, %v5676_v6, 0.0  ;;  %v5551_v54 = vadd.f32 %v12342_v63, %v5390_v18  ;;  %v5715_v63 = vsel %vm2052_vm10, %v5679_v46, 0.0  ;;  %v13326_v18 = vld [vmem:[#allocation15_spill] sm:$0xff] }
 0x5b3   : > { %v12309_v8 = vpop.f32.mrf.mxu0  ;;  %v5710_v14 = vadd.f32 %v5709_v56, %v5708_v53  ;;  %v5682_v51 = vmax.f32 %v5650_v22, 0.0  ;;  %v13327_v56 = vld [vmem:[#allocation28_spill] sm:$0xff] }
 0x5b4   : > { %v12375_v42 = vpop.f32.mrf.mxu1  ;;  %v5651_v58 = vadd.f32 %v5551_v54, %v13325_v5 }
 0x5b5   : > { %v12311_v17 = vpop.f32.mrf.mxu0  ;;  %v5712_v43 = vadd.f32 %v5711_v9, %v5710_v14  ;;  %v5721_v9 = vsel %vm2052_vm10, %v5682_v51, 0.0 }
 0x5b6   : > { %v12385_v47 = vpop.f32.mrf.mxu1  ;;  %v6210_v32 = vadd.f32 %v12311_v17, %v12309_v8  ;;  %v5395_v8 = vadd.f32 %v6207_v20, %v12361_v3 }
 0x5b7   : > { %v12313_v40 = vpop.f32.mrf.mxu0 }
 0x5b8   : > { %v12398_v7 = vpop.f32.mrf.mxu1  ;;  %v5398_v2 = vadd.f32 %v6210_v32, %v12361_v3  ;;  %v5556_v27 = vadd.f32 %v12330_v45, %v5395_v8 }
 0x5b9   : > { %v12317_v55 = vpop.f32.mrf.mxu0 }
 0x5ba   : > { %v12414_v50 = vpop.f32.mrf.mxu1  ;;  %v6213_v17 = vadd.f32 %v12317_v55, %v12313_v40  ;;  %v5713_v40 = vsel %vm2052_vm10, %v5678_v57, 0.0  ;;  %v5680_v55 = vmax.f32 %v5648_v21, 0.0  ;;  %v5559_v20 = vadd.f32 %v12338_v38, %v5398_v2 }
 0x5bb   : > { %v12319_v1 = vpop.f32.mrf.mxu0  ;;  %v5714_v0 = vadd.f32 %v5713_v40, %v5712_v43  ;;  %v5652_v38 = vadd.f32 %v5556_v27, %v13326_v18 }
 0x5bc   : > { %v12424_v37 = vpop.f32.mrf.mxu1  ;;  %v5403_v34 = vadd.f32 %v6213_v17, %v12361_v3  ;;  %v5653_v11 = vadd.f32 %v5559_v20, %v13327_v56  ;;  %v5683_v17 = vmax.f32 %v5651_v58, 0.0  ;;  %v13330_v20 = vld [vmem:[#allocation32_spill] sm:$0xff] }
 0x5bd   : > { %v12323_v25 = vpop.f32.mrf.mxu0  ;;  %v5716_v21 = vadd.f32 %v5715_v63, %v5714_v0  ;;  %v5684_v4 = vmax.f32 %v5652_v38, 0.0  ;;  %v13332_v38 = vld [vmem:[#allocation104_spill] sm:$0xff] }
 0x5be   : > { %v6216_v33 = vadd.f32 %v12323_v25, %v12319_v1  ;;  %v12439_v1 = vpop.f32.mrf.mxu1  ;;  %v5681_v25 = vmax.f32 %v5649_v26, 0.0  ;;  %v5564_v10 = vadd.f32 %v12350_v24, %v5403_v34  ;;  %v5685_v14 = vmax.f32 %v5653_v11, 0.0 }
 0x5bf   : > { %v12325_v60 = vpop.f32.mrf.mxu0  ;;  %v5725_v43 = vsel %vm2052_vm10, %v5684_v4, 0.0 }
 0x5c0   : > { %v5406_v32 = vadd.f32 %v6216_v33, %v12361_v3  ;;  %v5719_v8 = vsel %vm2052_vm10, %v5681_v25, 0.0 }
 0x5c1   : > { %v12328_v48 = vpop.f32.mrf.mxu0 }
 0x5c2   : > { %v6219_v29 = vadd.f32 %v12328_v48, %v12325_v60  ;;  %v5717_v60 = vsel %vm2052_vm10, %v5680_v55, 0.0  ;;  %v5723_v55 = vsel %vm2052_vm10, %v5683_v17, 0.0 }
 0x5c3   : > { %v12332_v61 = vpop.f32.mrf.mxu0  ;;  %v5718_v24 = vadd.f32 %v5717_v60, %v5716_v21 }
 0x5c4   : > { %v5411_v57 = vadd.f32 %v6219_v29, %v12361_v3 }
 0x5c5   : > { %v12336_v39 = vpop.f32.mrf.mxu0  ;;  %v5720_v33 = vadd.f32 %v5719_v8, %v5718_v24 }
 0x5c6   : > { %v6222_v45 = vadd.f32 %v12336_v39, %v12332_v61  ;;  %v12454_v39 = vpop.f32.mrf.mxu1  ;;  %v5572_v26 = vadd.f32 %v12346_v23, %v5411_v57 }
 0x5c7   : > { %v12340_v12 = vpop.f32.mrf.mxu0  ;;  %v5722_v34 = vadd.f32 %v5721_v9, %v5720_v33 }
 0x5c8   : > { %v5598_v40 = vpop.f32.mrf.mxu1  ;;  %v5656_v25 = vadd.f32 %v5572_v26, %v13330_v20 }
 0x5c9   : > { %v12344_v16 = vpop.f32.mrf.mxu0 }
 0x5ca   : > { %v6225_v48 = vadd.f32 %v12344_v16, %v12340_v12  ;;  %v5567_v12 = vadd.f32 %v12365_v62, %v5406_v32  ;;  %v5414_v16 = vadd.f32 %v6222_v45, %v12361_v3  ;;  %v5724_v32 = vadd.f32 %v5723_v55, %v5722_v34 }
 0x5cb   : > { %v12348_v52 = vpop.f32.mrf.mxu0  ;;  %v5688_v57 = vmax.f32 %v5656_v25, 0.0 }
 0x5cc   : > { %v5419_v46 = vadd.f32 %v6225_v48, %v12361_v3  ;;  %v5655_v22 = vadd.f32 %v5567_v12, %v13329_v59  ;;  %v5575_v27 = vadd.f32 %v12356_v19, %v5414_v16  ;;  %v5727_v19 = vsel %vm2052_vm10, %v5685_v14, 0.0 }
 0x5cd   : > { %v12352_v35 = vpop.f32.mrf.mxu0  ;;  %v5726_v18 = vadd.f32 %v5725_v43, %v5724_v32 }
 0x5ce   : > { %v6228_v61 = vadd.f32 %v12352_v35, %v12348_v52  ;;  %v13328_v52 = vld [vmem:[#allocation35_spill] sm:$0xff]  ;;  %v5580_v29 = vadd.f32 %v12385_v47, %v5419_v46  ;;  %v5687_v45 = vmax.f32 %v5655_v22, 0.0 }
 0x5cf   : > { %v12354_v44 = vpop.f32.mrf.mxu0  ;;  %v5654_v35 = vadd.f32 %v5564_v10, %v13328_v52  ;;  %v13331_v47 = vld [vmem:[#allocation31_spill] sm:$0xff]  ;;  %v5728_v11 = vadd.f32 %v5727_v19, %v5726_v18  ;;  %v13337_v19 = vld [vmem:[#allocation70_spill] sm:$0xff] }
 0x5d0   : > { %v5422_v62 = vadd.f32 %v6228_v61, %v12361_v3  ;;  %v5657_v0 = vadd.f32 %v5575_v27, %v13331_v47  ;;  %v5658_v10 = vadd.f32 %v5580_v29, %v13332_v38  ;;  %v13333_v61 = vld [vmem:[#allocation48_spill] sm:$0xff]  ;;  %v13336_v29 = vld [vmem:[#allocation62_spill] sm:$0xff] }
 0x5d1   : > { %v12363_v49 = vpop.f32.mrf.mxu0  ;;  %v5686_v63 = vmax.f32 %v5654_v35, 0.0 }
 0x5d2   : > { %v6231_v2 = vadd.f32 %v12363_v49, %v12354_v44  ;;  %v5690_v46 = vmax.f32 %v5658_v10, 0.0 }
 0x5d3   : > { %v12372_v13 = vpop.f32.mrf.mxu0 }
 0x5d4   : > { %v5427_v23 = vadd.f32 %v6231_v2, %v12361_v3  ;;  %v13334_v2 = vld [vmem:[#allocation105_spill] sm:$0xff] }
 0x5d5   : > { %v12382_v36 = vpop.f32.mrf.mxu0 }
 0x5d6   : > { %v6234_v44 = vadd.f32 %v12382_v36, %v12372_v13  ;;  %v5583_v13 = vadd.f32 %v12414_v50, %v5422_v62  ;;  %v12479_v36 = vpop.f32.mrf.mxu1  ;;  %v13335_v62 = vld [vmem:[#allocation52_spill] sm:$0xff] }
 0x5d8   : > { %v5430_v60 = vadd.f32 %v6234_v44, %v12361_v3  ;;  %v5659_v8 = vadd.f32 %v5583_v13, %v13333_v61  ;;  %v5611_v17 = vpop.f32.mrf.mxu1  ;;  %v5737_v44 = vsel %vm2052_vm10, %v5690_v46, 0.0 }
 0x5da   : > { %v5591_v16 = vadd.f32 %v12398_v7, %v5430_v60  ;;  %v5691_v26 = vmax.f32 %v5659_v8, 0.0 }
 0x5dc   : > { %v5661_v55 = vadd.f32 %v5591_v16, %v13335_v62  ;;  %v5739_v25 = vsel %vm2052_vm10, %v5691_v26, 0.0 }
 0x5de   : > { %v5693_v32 = vmax.f32 %v5661_v55, 0.0 }
 0x62c   : > { %v12391_v31 = vpop.f32.mrf.mxu0 }
 0x62e   : > { %v12404_v30 = vpop.f32.mrf.mxu0 }
 0x62f   : > { %v6237_v5 = vadd.f32 %v12404_v30, %v12391_v31  ;;  %v5588_v31 = vadd.f32 %v12375_v42, %v5427_v23  ;;  %v5729_v30 = vsel %vm2052_vm10, %v5686_v63, 0.0 }
 0x630   : > { %v12421_v41 = vpop.f32.mrf.mxu0  ;;  %v5730_v42 = vadd.f32 %v5729_v30, %v5728_v11  ;;  %v13339_v30 = vld [vmem:[#allocation110_spill] sm:$0xff] }
 0x631   : > { %v5435_v50 = vadd.f32 %v6237_v5, %v12361_v3  ;;  %v5660_v9 = vadd.f32 %v5588_v31, %v13334_v2 }
 0x632   : > { %v6239_v6 = vpop.f32.mrf.mxu0 }
 0x633   : > { %v6240_v48 = vadd.f32 %v6239_v6, %v12421_v41  ;;  %v5731_v41 = vsel %vm2052_vm10, %v5687_v45, 0.0  ;;  %v5689_v6 = vmax.f32 %v5657_v0, 0.0  ;;  %v5692_v34 = vmax.f32 %v5660_v9, 0.0  ;;  %v13341_v9 = vld [vmem:[#allocation114_spill] sm:$0xff] }
 0x635   : > { %v5438_v24 = vadd.f32 %v6240_v48, %v12361_v3  ;;  %v5735_v14 = vsel %vm2052_vm10, %v5689_v6, 0.0  ;;  %v5741_v60 = vsel %vm2052_vm10, %v5692_v34, 0.0  ;;  %v13338_v48 = vld [vmem:[#allocation61_spill] sm:$0xff] }
 0x637   : > { %v5599_v59 = vadd.f32 %v5598_v40, %v5438_v24 }
 0x639   : > { %v5663_v13 = vadd.f32 %v5599_v59, %v13337_v19 }
 0x63c   : > { %v6241_v28 = vpop.f32.mrf.mxu0 }
 0x63e   : > { %v6242_v15 = vpop.f32.mrf.mxu0 }
 0x63f   : > { %v6243_v21 = vadd.f32 %v6242_v15, %v6241_v28  ;;  %v5733_v28 = vsel %vm2052_vm10, %v5688_v57, 0.0  ;;  %v5596_v15 = vadd.f32 %v12439_v1, %v5435_v50  ;;  %v5743_v57 = vsel %vm2052_vm10, %v5693_v32, 0.0 }
 0x640   : > { %v6244_v53 = vpop.f32.mrf.mxu0  ;;  %v5695_v50 = vmax.f32 %v5663_v13, 0.0 }
 0x641   : > { %v5443_v52 = vadd.f32 %v6243_v21, %v12361_v3  ;;  %v5662_v23 = vadd.f32 %v5596_v15, %v13336_v29 }
 0x642   : > { %v6245_v54 = vpop.f32.mrf.mxu0  ;;  %v5747_v2 = vsel %vm2052_vm10, %v5695_v50, 0.0 }
 0x643   : > { %v6246_v12 = vadd.f32 %v6245_v54, %v6244_v53  ;;  %v5732_v53 = vadd.f32 %v5731_v41, %v5730_v42  ;;  %v6397_v54 = vpop.f32.mrf.mxu1  ;;  %v13340_v41 = vld [vmem:[#allocation45_spill] sm:$0xff] }
 0x645   : > { %v6247_v49 = vpop.f32.mrf.mxu0  ;;  %v5446_v33 = vadd.f32 %v6246_v12, %v12361_v3  ;;  %v5734_v27 = vadd.f32 %v5733_v28, %v5732_v53  ;;  %v5614_v5 = vpop.f32.mrf.mxu1 }
 0x647   : > { %v6248_v58 = vpop.f32.mrf.mxu0  ;;  %v5736_v20 = vadd.f32 %v5735_v14, %v5734_v27  ;;  %v6400_v31 = vpop.f32.mrf.mxu1  ;;  %v13343_v27 = vld [vmem:[#allocation115_spill] sm:$0xff] }
 0x648   : > { %v6249_v35 = vadd.f32 %v6248_v58, %v6247_v49  ;;  %v5604_v49 = vadd.f32 %v12424_v37, %v5443_v52  ;;  %v5607_v58 = vadd.f32 %v12454_v39, %v5446_v33  ;;  %v5694_v37 = vmax.f32 %v5662_v23, 0.0  ;;  %v13342_v33 = vld [vmem:[#allocation113_spill] sm:$0xff] }
 0x649   : > { %v6250_v51 = vpop.f32.mrf.mxu0  ;;  %v5738_v0 = vadd.f32 %v5737_v44, %v5736_v20  ;;  %v5627_v24 = vpop.f32.mrf.mxu1 }
 0x64a   : > { %v5451_v43 = vadd.f32 %v6249_v35, %v12361_v3  ;;  %v5665_v39 = vadd.f32 %v5607_v58, %v13339_v30  ;;  %v5745_v8 = vsel %vm2052_vm10, %v5694_v37, 0.0  ;;  %v13345_v37 = vld [vmem:[#allocation117_spill] sm:$0xff] }
 0x64b   : > { %v6251_v56 = vpop.f32.mrf.mxu0  ;;  %v5740_v10 = vadd.f32 %v5739_v25, %v5738_v0 }
 0x64c   : > { %v6252_v22 = vadd.f32 %v6251_v56, %v6250_v51  ;;  %v5664_v51 = vadd.f32 %v5604_v49, %v13338_v48  ;;  %v5612_v18 = vadd.f32 %v5611_v17, %v5451_v43  ;;  %v5697_v42 = vmax.f32 %v5665_v39, 0.0  ;;  %v13344_v43 = vld [vmem:[#allocation116_spill] sm:$0xff] }
 0x64d   : > { %v5742_v11 = vadd.f32 %v5741_v60, %v5740_v10 }
 0x64e   : > { %v6253_v4 = vpop.f32.mrf.mxu0  ;;  %v5454_v45 = vadd.f32 %v6252_v22, %v12361_v3  ;;  %v5696_v12 = vmax.f32 %v5664_v51, 0.0  ;;  %v5666_v6 = vadd.f32 %v5612_v18, %v13340_v41  ;;  %v5751_v55 = vsel %vm2052_vm10, %v5697_v42, 0.0 }
 0x64f   : > { %v5744_v16 = vadd.f32 %v5743_v57, %v5742_v11 }
 0x650   : > { %v6254_v7 = vpop.f32.mrf.mxu0  ;;  %v5615_v21 = vadd.f32 %v5614_v5, %v5454_v45  ;;  %v5749_v53 = vsel %vm2052_vm10, %v5696_v12, 0.0  ;;  %v5698_v26 = vmax.f32 %v5666_v6, 0.0 }
 0x651   : > { %v6255_v63 = vadd.f32 %v6254_v7, %v6253_v4  ;;  %v5746_v52 = vadd.f32 %v5745_v8, %v5744_v16 }
 0x652   : > { %v6256_v1 = vpop.f32.mrf.mxu0  ;;  %v5667_v4 = vadd.f32 %v5615_v21, %v13341_v9  ;;  %v5753_v23 = vsel %vm2052_vm10, %v5698_v26, 0.0 }
 0x653   : > { %v5459_v38 = vadd.f32 %v6255_v63, %v12361_v3  ;;  %v5748_v62 = vadd.f32 %v5747_v2, %v5746_v52 }
 0x654   : > { %v6257_v40 = vpop.f32.mrf.mxu0  ;;  %v5699_v22 = vmax.f32 %v5667_v4, 0.0 }
 0x655   : > { %v6258_v47 = vadd.f32 %v6257_v40, %v6256_v1  ;;  %v5620_v17 = vadd.f32 %v12479_v36, %v5459_v38  ;;  %v6401_v36 = vpop.f32.mrf.mxu1  ;;  %v5750_v1 = vadd.f32 %v5749_v53, %v5748_v62 }
 0x656   : > { %v5755_v40 = vsel %vm2052_vm10, %v5699_v22, 0.0 }
 0x657   : > { %v5462_v56 = vadd.f32 %v6258_v47, %v12361_v3  ;;  %v5668_v7 = vadd.f32 %v5620_v17, %v13342_v33  ;;  %v5630_v25 = vpop.f32.mrf.mxu1  ;;  %v5752_v5 = vadd.f32 %v5751_v55, %v5750_v1 }
 0x659   : > { %v5623_v28 = vadd.f32 %v6397_v54, %v5462_v56  ;;  %v5700_v49 = vmax.f32 %v5668_v7, 0.0  ;;  %v5754_v45 = vadd.f32 %v5753_v23, %v5752_v5  ;;  %v13346_v56 = vld [vmem:[#allocation119_spill] sm:$0xff]  ;;  %v5782_v7 = vld [vmem:[%s12597_s9] sm:$0x1] }
 0x65a   : > { %v6259_v61 = vpop.f32.mrf.mxu0 }
 0x65b   : > { %v5669_v44 = vadd.f32 %v5623_v28, %v13343_v27  ;;  %v5757_v0 = vsel %vm2052_vm10, %v5700_v49, 0.0  ;;  %v5756_v18 = vadd.f32 %v5755_v40, %v5754_v45 }
 0x65c   : > { %v6260_v46 = vpop.f32.mrf.mxu0 }
 0x65d   : > { %v6261_v15 = vadd.f32 %v6260_v46, %v6259_v61  ;;  %v5701_v32 = vmax.f32 %v5669_v44, 0.0  ;;  %v5758_v50 = vadd.f32 %v5757_v0, %v5756_v18 }
 0x65e   : > { %v6262_v35 = vpop.f32.mrf.mxu0 }
 0x65f   : > { %v5467_v14 = vadd.f32 %v6261_v15, %v12361_v3  ;;  %v5759_v10 = vsel %vm2052_vm10, %v5701_v32, 0.0 }
 0x660   : > { %v6263_v59 = vpop.f32.mrf.mxu0  ;;  %v5760_v8 = vadd.f32 %v5759_v10, %v5758_v50 }
 0x661   : > { %v5628_v34 = vadd.f32 %v5627_v24, %v5467_v14  ;;  %v6264_v54 = vadd.f32 %v6263_v59, %v6262_v35  ;;  %v13347_v24 = vld [vmem:[#allocation118_spill] sm:$0xff] }
 0x662   : > { %v6265_v29 = vpop.f32.mrf.mxu0 }
 0x663   : > { %v5670_v63 = vadd.f32 %v5628_v34, %v13344_v43  ;;  %v5470_v20 = vadd.f32 %v6264_v54, %v12361_v3 }
 0x664   : > { %v6266_v58 = vpop.f32.mrf.mxu0 }
 0x665   : > { %v5631_v19 = vadd.f32 %v5630_v25, %v5470_v20  ;;  %v6267_v13 = vadd.f32 %v6266_v58, %v6265_v29  ;;  %v5702_v60 = vmax.f32 %v5670_v63, 0.0 }
 0x666   : > { %v6268_v47 = vpop.f32.mrf.mxu0 }
 0x667   : > { %v5671_v48 = vadd.f32 %v5631_v19, %v13345_v37  ;;  %v5475_v51 = vadd.f32 %v6267_v13, %v12361_v3  ;;  %v5761_v21 = vsel %vm2052_vm10, %v5702_v60, 0.0 }
 0x668   : > { %v6269_v38 = vpop.f32.mrf.mxu0  ;;  %v5762_v17 = vadd.f32 %v5761_v21, %v5760_v8 }
 0x669   : > { %v5703_v30 = vmax.f32 %v5671_v48, 0.0  ;;  %v5636_v39 = vadd.f32 %v6400_v31, %v5475_v51  ;;  %v6270_v57 = vadd.f32 %v6269_v38, %v6268_v47 }
 0x66b   : > { %v5672_v11 = vadd.f32 %v5636_v39, %v13346_v56  ;;  %v5478_v61 = vadd.f32 %v6270_v57, %v12361_v3  ;;  %v5763_v12 = vsel %vm2052_vm10, %v5703_v30, 0.0 }
 0x66c   : > { %v5764_v31 = vadd.f32 %v5763_v12, %v5762_v17 }
 0x66d   : > { %v5704_v41 = vmax.f32 %v5672_v11, 0.0  ;;  %v5639_v6 = vadd.f32 %v6401_v36, %v5478_v61 }
 0x66f   : > { %v5765_v16 = vsel %vm2052_vm10, %v5704_v41, 0.0  ;;  %v5673_v42 = vadd.f32 %v5639_v6, %v13347_v24 }
 0x670   : > { %v5766_v2 = vadd.f32 %v5765_v16, %v5764_v31 }
 0x671   : > { %v5705_v46 = vmax.f32 %v5673_v42, 0.0 }
 0x673   : > { %v5767_v9 = vsel %vm2052_vm10, %v5705_v46, 0.0 }
 0x674   : > { %v5768_v4 = vadd.f32 %v5767_v9, %v5766_v2 }
 0x676   : > { %v5769_v28 = vrot.slane %v5768_v4, 4 }
 0x678   : > { %v5770_v3 = vadd.f32 %v5769_v28, %v5768_v4 }
 0x67a   : > { %v5771_v15 = vrot.slane %v5770_v3, 2 }
 0x67c   : > { %v5772_v52 = vadd.f32 %v5771_v15, %v5770_v3 }
 0x67e   : > { %v5773_v35 = vrot.slane %v5772_v52, 1 }
 0x680   : > { %v5774_v53 = vadd.f32 %v5773_v35, %v5772_v52 }
 0x682   : > { %v5776_v26 = vmul.f32 0.00390625, %v5774_v53 }
 0x684   : > { %v5777_v33 = vpack.c.bf16 %v5776_v26, %v5776_v26 }
 0x686   : > { %6407 = vmatmul.mubr.msk.bf16.vlgmr.msra.gmra.mxu1 %vm2052_vm10, %v5777_v33 }
 0x746   : > { %v5832_v14 = vpop.f32.mrf.mxu1 }
 0x747   : > { %v5833_v36 = vadd.f32 %v5832_v14, %v5782_v7 }
 0x748   : > { %v6408_v62 = vpop.f32.mrf.mxu1 }
 0x749   : > { %5838 = vst [vmem:[%s351_s18] sm:$0x1] %v5833_v36 }
 0x74a   : > { %v5835_v55 = vpop.f32.mrf.mxu1 }
 0x74b   : > { %8103 = shalt.err (!%p8100_p3)
}
 0x74c   : > { %s8104_s12 = scalar_lea.hbm %s12547_s28, 16  ;;  %s8108_s20 = scalar_lea.hbm %s12598_s10, 32 }
 0x74d   : > { %p8105_p4 = scmp.ne.s32.totalorder %s12547_s28, %s8104_s12  ;;  %p8109_p9 = scmp.lt.s32.totalorder %s12547_s28, %s12598_s10 }
 0x74e   : > { %p8110_p10 = scmp.lt.s32.totalorder %s8108_s20, %s8104_s12 }
 0x74f   : > { %p8106_p7 = pnand %p8105_p4, %p8260_p5 }
 0x750   : > { %p8111_p11 = por %p8110_p10, %p8109_p9 }
 0x751   : > { %p8107_p8 = pneg %p8106_p7 }
 0x753   : > { %p8112_p12 = pnand %p8111_p11, %p8107_p8 }
 0x755   : > { %8115 = shalt.err (!%p8112_p12)
}
 0x756   : > { %6415 = dma.vmem_to_hbm [thread:$0]  (%p8260_p5), %s12549_s11, 16, %s12547_s28, %s5840_s29   ;;  %v6409_v59 = vpop.f32.mrf.mxu1 }
 0x757 PF: > { %p6421_p13 = scmp.ge.s32.totalorder %s8150_s16, 2  ;;  %s5864_s21 = sand.u32 1, %s8138_s13  }
 0x758   : > { %s5865_s27 = scalar_lea.sflag [#allocation3], %s5864_s21 }
 0x759   : > { %p6418_p0 = pnand %p6421_p13, %p8264_p6 }
 0x75b   : > { %p6419_p1 = pneg %p6418_p0 }
 0x75d   : > { %8133 = dma.done.wait (%p6419_p1), %s5865_s27, 16  }
 0x75e   : > { %8135 = vsyncadd (%p6419_p1), %s5865_s27, 4294967280  ;;  %p20_p2 = scmp.ge.s32.totalorder %s8247_s19, 4   ;;  %s13348_s13 = smov %s8142_s14 }
 0x75f   : > { %s13349_s14 = smov %s8146_s15  ;;  %s13350_s15 = smov %s8258_s22 }
 0x760   : > { %s13351_s16 = smov %s8247_s19  ;;  %22 = sbr.rel (!%p20_p2) target bundleno = 3 (0x3), region = 95 }
 0x765   :  { %5869 = vsyncpa [#allocation3], 1 }
 0x766   :  { %5871 = vsyncpa [#allocation3 + $0x1], 1 }

</bundles_post_ra>
